<compile_context>
chip_gen: v7x
topology: tpu7x:2x2x1
jax: 0.10.0
libtpu: 0.0.40
codegen_flags: <defaults>
</compile_context>

<pallas_src>
import functools

import jax
import jax.numpy as jnp
from jax.experimental import pallas as pl
from jax.experimental.pallas import tpu as pltpu


def _round_up(x, m):
    return (x + m - 1) // m * m


def _pick_tile(mp, cap=128):
    """Largest multiple-of-16 tile <= cap that divides mp (mp is a mult of 16)."""
    t = min(mp, cap)
    while mp % t:
        t -= 16
    return t


_MAX_SINGLE_K = 2048  # largest K kept as a single MXU tile (covers every layer here)


# ----------------------------------------------------------------------------
# Matmul kernels: fused dot + bias + activation
# ----------------------------------------------------------------------------
def _mm_single_k_kernel(a_ref, w_ref, b_ref, o_ref, *, act):
    acc = jnp.dot(a_ref[...], w_ref[...], preferred_element_type=jnp.float32)
    acc = acc + b_ref[...]
    if act == "relu":
        acc = jnp.maximum(acc, 0.0)
    elif act == "tanh":
        acc = jnp.tanh(acc)
    o_ref[...] = acc.astype(o_ref.dtype)


def _mm_multi_k_kernel(a_ref, w_ref, b_ref, o_ref, acc_ref, *, act):
    @pl.when(pl.program_id(2) == 0)
    def _():
        acc_ref[...] = jnp.zeros_like(acc_ref)

    acc_ref[...] += jnp.dot(a_ref[...], w_ref[...],
                            preferred_element_type=jnp.float32)

    @pl.when(pl.program_id(2) == pl.num_programs(2) - 1)
    def _():
        acc = acc_ref[...] + b_ref[...]
        if act == "relu":
            acc = jnp.maximum(acc, 0.0)
        elif act == "tanh":
            acc = jnp.tanh(acc)
        o_ref[...] = acc.astype(o_ref.dtype)


def matmul_bias_act(a, w, b, act="none", out_dtype=jnp.bfloat16):
    """(M, K) @ (Kp, Np) + b with a fused activation.

    `w` (bf16) and `b` (f32, shape (1, Np)) are pre-padded / pre-laid-out at
    init time; only the activation is padded here (M up to a multiple of 16,
    K up to w.shape[0]).  The padded (Mp, Np) result is returned (lane-dense,
    unmasked stores) and stays bf16 unless it is a final model output.
    """
    M, K = a.shape
    Kp, Np = w.shape
    assert Kp % 128 == 0 and Np % 128 == 0 and K <= Kp
    Mp = _round_up(max(M, 16), 16)
    if a.dtype != jnp.bfloat16:
        a = a.astype(jnp.bfloat16)
    if (M, K) != (Mp, Kp):
        a = jnp.pad(a, ((0, Mp - M), (0, Kp - K)))

    TM = _pick_tile(Mp, 128)   # 128 tiles: fine on v5e's 4x128 MXU, keeps
    TN = 128                   # >=2 parallel N blocks on the 512-wide layers.

    if Kp <= _MAX_SINGLE_K:
        return pl.pallas_call(
            functools.partial(_mm_single_k_kernel, act=act),
            out_shape=jax.ShapeDtypeStruct((Mp, Np), out_dtype),
            grid=(Mp // TM, Np // TN),
            in_specs=[
                pl.BlockSpec((TM, Kp), lambda i, j: (i, 0)),
                pl.BlockSpec((Kp, TN), lambda i, j: (0, j)),
                pl.BlockSpec((1, TN), lambda i, j: (0, j)),
            ],
            out_specs=pl.BlockSpec((TM, TN), lambda i, j: (i, j)),
            compiler_params=pltpu.CompilerParams(
                dimension_semantics=("parallel", "parallel"),
                # Let XLA fold the im2col pad/stack/reshape producer of `a`
                # into the custom call instead of materializing it in HBM.
                allow_input_fusion=[True, False, False]),
        )(a, w, b)

    # Generic K-tiled accumulator path (not hit by this model's shapes).
    TK = 512
    KpR = _round_up(Kp, TK)
    if KpR != Kp:
        a = jnp.pad(a, ((0, 0), (0, KpR - Kp)))
        w = jnp.pad(w, ((0, KpR - Kp), (0, 0)))
    return pl.pallas_call(
        functools.partial(_mm_multi_k_kernel, act=act),
        out_shape=jax.ShapeDtypeStruct((Mp, Np), out_dtype),
        grid=(Mp // TM, Np // TN, KpR // TK),
        in_specs=[
            pl.BlockSpec((TM, TK), lambda i, j, k: (i, k)),
            pl.BlockSpec((TK, TN), lambda i, j, k: (k, j)),
            pl.BlockSpec((1, TN), lambda i, j, k: (0, j)),
        ],
        out_specs=pl.BlockSpec((TM, TN), lambda i, j, k: (i, j)),
        scratch_shapes=[pltpu.VMEM((TM, TN), jnp.float32)],
        compiler_params=pltpu.CompilerParams(
            dimension_semantics=("parallel", "parallel", "arbitrary")),
    )(a, w, b)


# ----------------------------------------------------------------------------
# Fused fc_mu + fc_logvar + reparameterization + decoder_fc
# ----------------------------------------------------------------------------
def _reparam_decfc_kernel(h_ref, wcat_ref, bcat_ref, eps_ref, y_ref,
                          wdz_ref, wdy_ref, bdec_ref,
                          mu_ref, lv_ref, hd_ref, *, half):
    acc = jnp.dot(h_ref[...], wcat_ref[...],
                  preferred_element_type=jnp.float32) + bcat_ref[...]
    mu = acc[:, :half]
    lv = acc[:, half:]
    mu_ref[...] = mu
    lv_ref[...] = lv
    z = mu + eps_ref[...] * jnp.exp(0.5 * lv)            # EUP exp
    hd = jnp.dot(z.astype(jnp.bfloat16), wdz_ref[...],
                 preferred_element_type=jnp.float32)
    hd = hd + jnp.dot(y_ref[...], wdy_ref[...],
                      preferred_element_type=jnp.float32)
    hd_ref[...] = (hd + bdec_ref[...]).astype(hd_ref.dtype)


def fused_reparam_decfc(h_comb, y1h, eps, params, latent_dim):
    """mu, logvar, z = mu + eps*exp(0.5*logvar), hd = [z, y] @ W_dec + b in one call."""
    B, Kh = h_comb.shape
    w_cat, b_cat = params["fc_cat_w"], params["fc_cat_b"]
    w_dz, w_dy, b_dec = params["dec_fc_wz"], params["dec_fc_wy"], params["dec_fc_b"]
    Kc, two_lp = w_cat.shape
    Lp = two_lp // 2
    Cp, F = w_dy.shape
    Bp = _round_up(max(B, 16), 16)

    hp = jnp.pad(h_comb.astype(jnp.bfloat16), ((0, Bp - B), (0, Kc - Kh)))
    epsp = jnp.pad(eps.astype(jnp.float32),
                   ((0, Bp - B), (0, Lp - eps.shape[1])))
    yp = jnp.pad(y1h.astype(jnp.bfloat16),
                 ((0, Bp - B), (0, Cp - y1h.shape[1])))

    full = lambda i: (0, 0)
    mu_p, lv_p, hd_p = pl.pallas_call(
        functools.partial(_reparam_decfc_kernel, half=Lp),
        out_shape=(jax.ShapeDtypeStruct((Bp, Lp), jnp.float32),
                   jax.ShapeDtypeStruct((Bp, Lp), jnp.float32),
                   jax.ShapeDtypeStruct((Bp, F), jnp.bfloat16)),
        grid=(1,),
        in_specs=[
            pl.BlockSpec((Bp, Kc), full),
            pl.BlockSpec((Kc, two_lp), full),
            pl.BlockSpec((1, two_lp), full),
            pl.BlockSpec((Bp, Lp), full),
            pl.BlockSpec((Bp, Cp), full),
            pl.BlockSpec((Lp, F), full),
            pl.BlockSpec((Cp, F), full),
            pl.BlockSpec((1, F), full),
        ],
        out_specs=(pl.BlockSpec((Bp, Lp), full),
                   pl.BlockSpec((Bp, Lp), full),
                   pl.BlockSpec((Bp, F), full)),
        compiler_params=pltpu.CompilerParams(
            dimension_semantics=("arbitrary",)),
    )(hp, w_cat, b_cat, epsp, yp, w_dz, w_dy, b_dec)

    return mu_p[:B, :latent_dim], lv_p[:B, :latent_dim], hd_p[:B]


# ----------------------------------------------------------------------------
# Conv / ConvTranspose lowering (NHWC, XLA im2col + Pallas matmul)
# ----------------------------------------------------------------------------
def _im2col_nhwc(x, kh, kw, stride, pad):
    """x: (N,H,W,C) -> (N*OH*OW, KH*KW*C); column index = (i*kw + j)*C + c."""
    N, H, W, C = x.shape
    xp = jnp.pad(x, ((0, 0), (pad, pad), (pad, pad), (0, 0)))
    Hp, Wp = H + 2 * pad, W + 2 * pad
    oh = (Hp - kh) // stride + 1
    ow = (Wp - kw) // stride + 1
    patches = []
    for i in range(kh):
        for j in range(kw):
            patches.append(
                xp[:, i:i + stride * oh:stride, j:j + stride * ow:stride, :])
    cols = jnp.stack(patches, axis=3)                 # (N, oh, ow, kh*kw, C)
    return cols.reshape(N * oh * ow, kh * kw * C), oh, ow


def conv2d_nhwc(x, wmat, bmat, k, stride, pad, act, out_dtype=jnp.bfloat16):
    """Conv2d on NHWC activations; wmat/bmat are pre-packed im2col matrices."""
    N = x.shape[0]
    cols, oh, ow = _im2col_nhwc(x, k, k, stride, pad)
    out = matmul_bias_act(cols, wmat, bmat, act, out_dtype)
    m = N * oh * ow
    if out.shape[0] != m:
        out = out[:m]
    return out.reshape(N, oh, ow, out.shape[-1])


def conv_transpose2d_nhwc(x, wmat, bmat, act, out_dtype=jnp.bfloat16):
    """ConvTranspose2d(kernel=4, stride=2, padding=1) on NHWC input, lowered
    via a sub-pixel phase decomposition: one stride-1 3x3 im2col over the
    1-padded input, a (9*Cin, 4*128) matmul (4 phase groups of 128 lanes) and
    a pixel shuffle — no zero-dilated input."""
    N, H, W, _ = x.shape
    xp = jnp.pad(x, ((0, 0), (1, 1), (1, 1), (0, 0)))
    cols, _, _ = _im2col_nhwc(xp, 3, 3, 1, 0)
    out = matmul_bias_act(cols, wmat, bmat, act, out_dtype)
    m = N * H * W
    if out.shape[0] != m:
        out = out[:m]
    gp = out.shape[-1] // 4
    out = out.reshape(N, H, W, 2, 2, gp)
    out = out.transpose(0, 1, 3, 2, 4, 5).reshape(N, 2 * H, 2 * W, gp)
    return out


# ----------------------------------------------------------------------------
# Parameters: raw (PyTorch layouts) + one-time packing for the kernels
# ----------------------------------------------------------------------------
def init_params(key, input_channels, num_classes, latent_dim, img_size):
    s = img_size // 8
    enc_flat = 128 * s * s
    comb_enc = enc_flat + num_classes
    comb_dec = latent_dim + num_classes

    def nrm(k, shape, scale=0.05):
        return scale * jax.random.normal(k, shape, jnp.float32)

    ks = jax.random.split(key, 20)
    return {
        # encoder convs (PyTorch Conv2d layout: OC, IC, KH, KW)
        "enc_w1": nrm(ks[0], (32, input_channels, 4, 4)), "enc_b1": nrm(ks[1], (32,)),
        "enc_w2": nrm(ks[2], (64, 32, 4, 4)),             "enc_b2": nrm(ks[3], (64,)),
        "enc_w3": nrm(ks[4], (128, 64, 4, 4)),            "enc_b3": nrm(ks[5], (128,)),
        # fc layers stored as (in, out)
        "fc_mu_w": nrm(ks[6], (comb_enc, latent_dim)),     "fc_mu_b": nrm(ks[7], (latent_dim,)),
        "fc_logvar_w": nrm(ks[8], (comb_enc, latent_dim)), "fc_logvar_b": nrm(ks[9], (latent_dim,)),
        "dec_fc_w": nrm(ks[10], (comb_dec, enc_flat)),     "dec_fc_b": nrm(ks[11], (enc_flat,)),
        # decoder conv-transposes (PyTorch ConvTranspose2d layout: IC, OC, KH, KW)
        "dec_w1": nrm(ks[12], (128, 64, 4, 4)),            "dec_b1": nrm(ks[13], (64,)),
        "dec_w2": nrm(ks[14], (64, 32, 4, 4)),             "dec_b2": nrm(ks[15], (32,)),
        "dec_w3": nrm(ks[16], (32, input_channels, 4, 4)), "dec_b3": nrm(ks[17], (input_channels,)),
    }


def _prep_conv_weight(w, b, cin_pad, cout_pad):
    """Conv2d weight (OC,IC,KH,KW) -> (round_up(KH*KW*cin_pad,128), cout_pad) bf16."""
    OC, IC, KH, KW = w.shape
    wk = jnp.zeros((KH, KW, cin_pad, cout_pad), jnp.float32)
    wk = wk.at[:, :, :IC, :OC].set(jnp.transpose(w, (2, 3, 1, 0)))
    wk = wk.reshape(KH * KW * cin_pad, cout_pad)
    kp = _round_up(wk.shape[0], 128)
    if kp != wk.shape[0]:
        wk = jnp.pad(wk, ((0, kp - wk.shape[0]), (0, 0)))
    bm = jnp.zeros((1, cout_pad), jnp.float32).at[0, :OC].set(b)
    return wk.astype(jnp.bfloat16), bm


def _prep_convt_weight(w, b, cin_pad, group_pad):
    """ConvTranspose2d(4,2,1) weight (IC,OC,4,4) -> sub-pixel 3x3 matmul weight
    (9*cin_pad, 4*group_pad) bf16; column group ph = 2*rh + rw holds output
    phase (rh, rw) (pixel-shuffled afterwards)."""
    IC, OC, KH, KW = w.shape
    assert (KH, KW) == (4, 4)
    wb = jnp.zeros((3, 3, cin_pad, 4 * group_pad), jnp.float32)
    for rh in (0, 1):
        for rw in (0, 1):
            ph = 2 * rh + rw
            for a in (0, 1):
                for c in (0, 1):
                    u, v = rh + a, rw + c
                    kh_i, kw_i = 3 - rh - 2 * a, 3 - rw - 2 * c
                    wb = wb.at[u, v, :IC, ph * group_pad:ph * group_pad + OC].set(
                        w[:, :, kh_i, kw_i])
    wmat = wb.reshape(9 * cin_pad, 4 * group_pad).astype(jnp.bfloat16)
    bm = jnp.zeros((1, 4 * group_pad), jnp.float32)
    for ph in range(4):
        bm = bm.at[0, ph * group_pad:ph * group_pad + OC].set(b)
    return wmat, bm


def _chw_to_hwc_perm(C, H, W):
    """perm[j_hwc] = j_chw so that x_hwc_flat = x_chw_flat[perm]."""
    j = jnp.arange(C * H * W)
    c = j % C
    hw = j // C
    h = hw // W
    w = hw % W
    return c * (H * W) + h * W + w


def prepare_params(raw, input_channels, num_classes, latent_dim, img_size):
    """One-time packing of all weights into the padded bf16 matmul layouts."""
    s = img_size // 8
    flat = 128 * s * s
    CP = 128                                   # channel padding of activations
    L = latent_dim
    Lp = _round_up(L, 128)
    Cp = _round_up(num_classes, 128)
    Kc = _round_up(flat + num_classes, 128)

    p = {}
    p["enc1_w"], p["enc1_b"] = _prep_conv_weight(raw["enc_w1"], raw["enc_b1"],
                                                 input_channels, CP)
    p["enc2_w"], p["enc2_b"] = _prep_conv_weight(raw["enc_w2"], raw["enc_b2"], CP, CP)
    p["enc3_w"], p["enc3_b"] = _prep_conv_weight(raw["enc_w3"], raw["enc_b3"], CP, CP)

    # Absorb PyTorch's NCHW flatten / view into the fc weights (CHW -> HWC).
    perm = _chw_to_hwc_perm(128, s, s)

    def permute_rows(w):
        return jnp.concatenate([w[perm], w[flat:]], axis=0)

    w_mu = permute_rows(raw["fc_mu_w"])
    w_lv = permute_rows(raw["fc_logvar_w"])
    w_cat = jnp.zeros((Kc, 2 * Lp), jnp.float32)
    w_cat = w_cat.at[:flat + num_classes, :L].set(w_mu)
    w_cat = w_cat.at[:flat + num_classes, Lp:Lp + L].set(w_lv)
    b_cat = jnp.zeros((1, 2 * Lp), jnp.float32)
    b_cat = b_cat.at[0, :L].set(raw["fc_mu_b"])
    b_cat = b_cat.at[0, Lp:Lp + L].set(raw["fc_logvar_b"])
    p["fc_cat_w"] = w_cat.astype(jnp.bfloat16)
    p["fc_cat_b"] = b_cat

    w_dec = raw["dec_fc_w"][:, perm]                       # HWC output columns
    b_dec = raw["dec_fc_b"][perm]
    p["dec_fc_wz"] = jnp.zeros((Lp, flat), jnp.float32).at[:L].set(
        w_dec[:L]).astype(jnp.bfloat16)
    p["dec_fc_wy"] = jnp.zeros((Cp, flat), jnp.float32).at[:num_classes].set(
        w_dec[L:]).astype(jnp.bfloat16)
    p["dec_fc_b"] = b_dec.reshape(1, flat)

    p["dec1_w"], p["dec1_b"] = _prep_convt_weight(raw["dec_w1"], raw["dec_b1"], CP, CP)
    p["dec2_w"], p["dec2_b"] = _prep_convt_weight(raw["dec_w2"], raw["dec_b2"], CP, CP)
    p["dec3_w"], p["dec3_b"] = _prep_convt_weight(raw["dec_w3"], raw["dec_b3"], CP, CP)
    return p


# ----------------------------------------------------------------------------
# Forward pass (7 pallas_calls; activations bf16 NHWC, 128-lane padded)
# ----------------------------------------------------------------------------
def cvae_forward(params, x, y, eps, *, num_classes, img_size, latent_dim,
                 input_channels):
    N = x.shape[0]
    s = img_size // 8
    y1h = jax.nn.one_hot(y, num_classes, dtype=jnp.float32)

    # Single NCHW -> NHWC transpose on the input; everything else stays NHWC.
    h = jnp.transpose(x, (0, 2, 3, 1)).astype(jnp.bfloat16)
    h = conv2d_nhwc(h, params["enc1_w"], params["enc1_b"], 4, 2, 1, "relu")
    h = conv2d_nhwc(h, params["enc2_w"], params["enc2_b"], 4, 2, 1, "relu")
    h = conv2d_nhwc(h, params["enc3_w"], params["enc3_b"], 4, 2, 1, "relu")

    # Flatten in HWC order (fc weights were row-permuted accordingly at init).
    h_comb = jnp.concatenate([h.reshape(N, s * s * 128),
                              y1h.astype(jnp.bfloat16)], axis=1)

    mu, logvar, hd = fused_reparam_decfc(h_comb, y1h, eps, params, latent_dim)
    hd = hd.reshape(N, s, s, 128)           # decoder_fc columns already HWC

    d = conv_transpose2d_nhwc(hd, params["dec1_w"], params["dec1_b"], "relu")
    d = conv_transpose2d_nhwc(d, params["dec2_w"], params["dec2_b"], "relu")
    xr = conv_transpose2d_nhwc(d, params["dec3_w"], params["dec3_b"], "tanh",
                               out_dtype=jnp.float32)
    # Single NHWC -> NCHW transpose on the output.
    xr = jnp.transpose(xr[..., :input_channels], (0, 3, 1, 2))
    return xr, mu, logvar


# ----------------------------------------------------------------------------
# Pure-f32 lax reference (PyTorch semantics) for correctness checking
# ----------------------------------------------------------------------------
def _ref_conv(x, w, b, stride, pad):
    out = jax.lax.conv_general_dilated(
        x, w, (stride, stride), ((pad, pad), (pad, pad)),
        dimension_numbers=("NCHW", "OIHW", "NCHW"),
        precision=jax.lax.Precision.HIGHEST)
    return out + b[None, :, None, None]


def _ref_conv_t(x, w, b):
    # PyTorch ConvTranspose2d(kernel=4, stride=2, padding=1); w: (IC, OC, 4, 4)
    w_conv = jnp.transpose(w[:, :, ::-1, ::-1], (1, 0, 2, 3))
    out = jax.lax.conv_general_dilated(
        x, w_conv, (1, 1), ((2, 2), (2, 2)), lhs_dilation=(2, 2),
        dimension_numbers=("NCHW", "OIHW", "NCHW"),
        precision=jax.lax.Precision.HIGHEST)
    return out + b[None, :, None, None]


def ref_forward(raw, x, y, eps, *, num_classes, img_size):
    N = x.shape[0]
    hi = jax.lax.Precision.HIGHEST
    y1h = jax.nn.one_hot(y, num_classes, dtype=jnp.float32)
    h = jax.nn.relu(_ref_conv(x, raw["enc_w1"], raw["enc_b1"], 2, 1))
    h = jax.nn.relu(_ref_conv(h, raw["enc_w2"], raw["enc_b2"], 2, 1))
    h = jax.nn.relu(_ref_conv(h, raw["enc_w3"], raw["enc_b3"], 2, 1))
    h_comb = jnp.concatenate([h.reshape(N, -1), y1h], axis=1)
    mu = jnp.dot(h_comb, raw["fc_mu_w"], precision=hi) + raw["fc_mu_b"]
    logvar = jnp.dot(h_comb, raw["fc_logvar_w"], precision=hi) + raw["fc_logvar_b"]
    z = mu + eps * jnp.exp(0.5 * logvar)
    zy = jnp.concatenate([z, y1h], axis=1)
    hd = jnp.dot(zy, raw["dec_fc_w"], precision=hi) + raw["dec_fc_b"]
    s = img_size // 8
    hd = hd.reshape(N, 128, s, s)
    d = jax.nn.relu(_ref_conv_t(hd, raw["dec_w1"], raw["dec_b1"]))
    d = jax.nn.relu(_ref_conv_t(d, raw["dec_w2"], raw["dec_b2"]))
    xr = jnp.tanh(_ref_conv_t(d, raw["dec_w3"], raw["dec_b3"]))
    return xr, mu, logvar


# ----------------------------------------------------------------------------
if __name__ == "__main__":
    B, C, IMG = 2, 4, 16
    NUM_CLASSES, LATENT = 10, 32

    root = jax.random.PRNGKey(0)
    k_par, k_x, k_y, k_eps = jax.random.split(root, 4)

    raw = init_params(k_par, C, NUM_CLASSES, LATENT, IMG)
    params = prepare_params(raw, C, NUM_CLASSES, LATENT, IMG)

    x = jax.random.normal(k_x, (B, C, IMG, IMG), jnp.float32)
    y = jax.random.randint(k_y, (B,), 0, NUM_CLASSES)
    eps = jax.random.normal(k_eps, (B, LATENT), jnp.float32)

    fwd = jax.jit(functools.partial(cvae_forward, num_classes=NUM_CLASSES,
                                    img_size=IMG, latent_dim=LATENT,
                                    input_channels=C))
    x_rec, mu, logvar = fwd(params, x, y, eps)
    jax.block_until_ready((x_rec, mu, logvar))

    assert x_rec.shape == (B, C, IMG, IMG)
    assert mu.shape == (B, LATENT) and logvar.shape == (B, LATENT)
    assert bool(jnp.all(jnp.isfinite(x_rec)))
    assert bool(jnp.all(jnp.isfinite(mu))) and bool(jnp.all(jnp.isfinite(logvar)))

    # Tolerance check against a pure-f32 lax reference (validates the sub-pixel
    # ConvTranspose lowering, the CHW->HWC weight permutations and the bf16 path).
    xr_ref, mu_ref, lv_ref = ref_forward(raw, x, y, eps,
                                         num_classes=NUM_CLASSES, img_size=IMG)
    for got, ref in ((x_rec, xr_ref), (mu, mu_ref), (logvar, lv_ref)):
        err = float(jnp.max(jnp.abs(got - ref)))
        assert err < 5e-2, f"max abs err {err}"

    print("KERNEL_OK")
</pallas_src>

<mosaic_0001>
module attributes {stable_mosaic.version = 11 : i64} {
  func.func @_mm_single_k_kernel(%arg0: i32, %arg1: i32, %arg2: memref<128x128xbf16, #tpu.memory_space<vmem>>, %arg3: memref<128x128xbf16, #tpu.memory_space<vmem>>, %arg4: memref<1x128xf32, #tpu.memory_space<vmem>>, %arg5: memref<128x128xbf16, #tpu.memory_space<vmem>>) attributes {dimension_semantics = [#tpu.dimension_semantics<parallel>, #tpu.dimension_semantics<parallel>], iteration_bounds = array<i64: 1, 1>, scalar_prefetch = 0 : i64, scratch_operands = 0 : i64, tpu.core_type = #tpu.core_type<tc>, window_params = [{transform_indices = @transform_0, window_bounds = array<i64: 128, 128>}, {transform_indices = @transform_1, window_bounds = array<i64: 128, 128>}, {transform_indices = @transform_2, window_bounds = array<i64: 1, 128>}, {transform_indices = @transform_3, window_bounds = array<i64: 128, 128>}]} {
    %c0 = arith.constant 0 : index
    %c0_0 = arith.constant 0 : index
    %0 = vector.load %arg2[%c0, %c0_0] : memref<128x128xbf16, #tpu.memory_space<vmem>>, vector<128x128xbf16>
    %c0_1 = arith.constant 0 : index
    %c0_2 = arith.constant 0 : index
    %1 = vector.load %arg3[%c0_1, %c0_2] : memref<128x128xbf16, #tpu.memory_space<vmem>>, vector<128x128xbf16>
    %cst = arith.constant dense<0.000000e+00> : vector<128x128xf32>
    %2 = tpu.matmul %0, %1, %cst {dimension_numbers = #tpu.dot_dimension_numbers<[1], [0], [0], [1], [0, 0, 1, 1], [], []>} : vector<128x128xbf16>, vector<128x128xbf16>, vector<128x128xf32> -> vector<128x128xf32>
    %c0_3 = arith.constant 0 : index
    %c0_4 = arith.constant 0 : index
    %3 = vector.load %arg4[%c0_3, %c0_4] : memref<1x128xf32, #tpu.memory_space<vmem>>, vector<1x128xf32>
    %4 = vector.broadcast %3 : vector<1x128xf32> to vector<128x128xf32>
    %5 = arith.addf %2, %4 : vector<128x128xf32>
    %cst_5 = arith.constant 0.000000e+00 : f32
    %6 = vector.broadcast %cst_5 : f32 to vector<128x128xf32>
    %7 = arith.maximumf %5, %6 : vector<128x128xf32>
    %8 = arith.truncf %7 : vector<128x128xf32> to vector<128x128xbf16>
    %c0_6 = arith.constant 0 : index
    %c0_7 = arith.constant 0 : index
    %9 = vector.load %arg5[%c0_6, %c0_7] : memref<128x128xbf16, #tpu.memory_space<vmem>>, vector<128x128xbf16>
    tpu.vector_store %arg5[%c0_6, %c0_7], %8 {strides = array<i32>} : memref<128x128xbf16, #tpu.memory_space<vmem>>, vector<128x128xbf16>,
    return
  }
  func.func @transform_0(%arg0: i32, %arg1: i32) -> (i32, i32) {
    %c0_i32 = arith.constant 0 : i32
    %c0_i32_0 = arith.constant 0 : i32
    return %arg0, %c0_i32 : i32, i32
  }
  func.func @transform_1(%arg0: i32, %arg1: i32) -> (i32, i32) {
    %c0_i32 = arith.constant 0 : i32
    %c0_i32_0 = arith.constant 0 : i32
    return %c0_i32, %arg1 : i32, i32
  }
  func.func @transform_2(%arg0: i32, %arg1: i32) -> (i32, i32) {
    %c0_i32 = arith.constant 0 : i32
    %c0_i32_0 = arith.constant 0 : i32
    return %c0_i32, %arg1 : i32, i32
  }
  func.func @transform_3(%arg0: i32, %arg1: i32) -> (i32, i32) {
    %c0_i32 = arith.constant 0 : i32
    return %arg0, %arg1 : i32, i32
  }
}

module attributes {stable_mosaic.version = 11 : i64} {
  func.func @_mm_single_k_kernel(%arg0: i32, %arg1: i32, %arg2: memref<32x2048xbf16, #tpu.memory_space<vmem>>, %arg3: memref<2048x128xbf16, #tpu.memory_space<vmem>>, %arg4: memref<1x128xf32, #tpu.memory_space<vmem>>, %arg5: memref<32x128xbf16, #tpu.memory_space<vmem>>) attributes {dimension_semantics = [#tpu.dimension_semantics<parallel>, #tpu.dimension_semantics<parallel>], iteration_bounds = array<i64: 1, 1>, scalar_prefetch = 0 : i64, scratch_operands = 0 : i64, tpu.core_type = #tpu.core_type<tc>, window_params = [{transform_indices = @transform_0, window_bounds = array<i64: 32, 2048>}, {transform_indices = @transform_1, window_bounds = array<i64: 2048, 128>}, {transform_indices = @transform_2, window_bounds = array<i64: 1, 128>}, {transform_indices = @transform_3, window_bounds = array<i64: 32, 128>}]} {
    %c0 = arith.constant 0 : index
    %c0_0 = arith.constant 0 : index
    %0 = vector.load %arg2[%c0, %c0_0] : memref<32x2048xbf16, #tpu.memory_space<vmem>>, vector<32x2048xbf16>
    %c0_1 = arith.constant 0 : index
    %c0_2 = arith.constant 0 : index
    %1 = vector.load %arg3[%c0_1, %c0_2] : memref<2048x128xbf16, #tpu.memory_space<vmem>>, vector<2048x128xbf16>
    %cst = arith.constant dense<0.000000e+00> : vector<32x128xf32>
    %2 = tpu.matmul %0, %1, %cst {dimension_numbers = #tpu.dot_dimension_numbers<[1], [0], [0], [1], [0, 0, 1, 1], [], []>} : vector<32x2048xbf16>, vector<2048x128xbf16>, vector<32x128xf32> -> vector<32x128xf32>
    %c0_3 = arith.constant 0 : index
    %c0_4 = arith.constant 0 : index
    %3 = vector.load %arg4[%c0_3, %c0_4] : memref<1x128xf32, #tpu.memory_space<vmem>>, vector<1x128xf32>
    %4 = vector.broadcast %3 : vector<1x128xf32> to vector<32x128xf32>
    %5 = arith.addf %2, %4 : vector<32x128xf32>
    %cst_5 = arith.constant 0.000000e+00 : f32
    %6 = vector.broadcast %cst_5 : f32 to vector<32x128xf32>
    %7 = arith.maximumf %5, %6 : vector<32x128xf32>
    %8 = arith.truncf %7 : vector<32x128xf32> to vector<32x128xbf16>
    %c0_6 = arith.constant 0 : index
    %c0_7 = arith.constant 0 : index
    %9 = vector.load %arg5[%c0_6, %c0_7] : memref<32x128xbf16, #tpu.memory_space<vmem>>, vector<32x128xbf16>
    tpu.vector_store %arg5[%c0_6, %c0_7], %8 {strides = array<i32>} : memref<32x128xbf16, #tpu.memory_space<vmem>>, vector<32x128xbf16>,
    return
  }
  func.func @transform_0(%arg0: i32, %arg1: i32) -> (i32, i32) {
    %c0_i32 = arith.constant 0 : i32
    %c0_i32_0 = arith.constant 0 : i32
    return %arg0, %c0_i32 : i32, i32
  }
  func.func @transform_1(%arg0: i32, %arg1: i32) -> (i32, i32) {
    %c0_i32 = arith.constant 0 : i32
    %c0_i32_0 = arith.constant 0 : i32
    return %c0_i32, %arg1 : i32, i32
  }
  func.func @transform_2(%arg0: i32, %arg1: i32) -> (i32, i32) {
    %c0_i32 = arith.constant 0 : i32
    %c0_i32_0 = arith.constant 0 : i32
    return %c0_i32, %arg1 : i32, i32
  }
  func.func @transform_3(%arg0: i32, %arg1: i32) -> (i32, i32) {
    %c0_i32 = arith.constant 0 : i32
    return %arg0, %arg1 : i32, i32
  }
}

module attributes {stable_mosaic.version = 11 : i64} {
  func.func @_mm_single_k_kernel(%arg0: i32, %arg1: i32, %arg2: memref<16x2048xbf16, #tpu.memory_space<vmem>>, %arg3: memref<2048x128xbf16, #tpu.memory_space<vmem>>, %arg4: memref<1x128xf32, #tpu.memory_space<vmem>>, %arg5: memref<16x128xbf16, #tpu.memory_space<vmem>>) attributes {dimension_semantics = [#tpu.dimension_semantics<parallel>, #tpu.dimension_semantics<parallel>], iteration_bounds = array<i64: 1, 1>, scalar_prefetch = 0 : i64, scratch_operands = 0 : i64, tpu.core_type = #tpu.core_type<tc>, window_params = [{transform_indices = @transform_0, window_bounds = array<i64: 16, 2048>}, {transform_indices = @transform_1, window_bounds = array<i64: 2048, 128>}, {transform_indices = @transform_2, window_bounds = array<i64: 1, 128>}, {transform_indices = @transform_3, window_bounds = array<i64: 16, 128>}]} {
    %c0 = arith.constant 0 : index
    %c0_0 = arith.constant 0 : index
    %0 = vector.load %arg2[%c0, %c0_0] : memref<16x2048xbf16, #tpu.memory_space<vmem>>, vector<16x2048xbf16>
    %c0_1 = arith.constant 0 : index
    %c0_2 = arith.constant 0 : index
    %1 = vector.load %arg3[%c0_1, %c0_2] : memref<2048x128xbf16, #tpu.memory_space<vmem>>, vector<2048x128xbf16>
    %cst = arith.constant dense<0.000000e+00> : vector<16x128xf32>
    %2 = tpu.matmul %0, %1, %cst {dimension_numbers = #tpu.dot_dimension_numbers<[1], [0], [0], [1], [0, 0, 1, 1], [], []>} : vector<16x2048xbf16>, vector<2048x128xbf16>, vector<16x128xf32> -> vector<16x128xf32>
    %c0_3 = arith.constant 0 : index
    %c0_4 = arith.constant 0 : index
    %3 = vector.load %arg4[%c0_3, %c0_4] : memref<1x128xf32, #tpu.memory_space<vmem>>, vector<1x128xf32>
    %4 = vector.broadcast %3 : vector<1x128xf32> to vector<16x128xf32>
    %5 = arith.addf %2, %4 : vector<16x128xf32>
    %cst_5 = arith.constant 0.000000e+00 : f32
    %6 = vector.broadcast %cst_5 : f32 to vector<16x128xf32>
    %7 = arith.maximumf %5, %6 : vector<16x128xf32>
    %8 = arith.truncf %7 : vector<16x128xf32> to vector<16x128xbf16>
    %c0_6 = arith.constant 0 : index
    %c0_7 = arith.constant 0 : index
    %9 = vector.load %arg5[%c0_6, %c0_7] : memref<16x128xbf16, #tpu.memory_space<vmem>>, vector<16x128xbf16>
    tpu.vector_store %arg5[%c0_6, %c0_7], %8 {strides = array<i32>} : memref<16x128xbf16, #tpu.memory_space<vmem>>, vector<16x128xbf16>,
    return
  }
  func.func @transform_0(%arg0: i32, %arg1: i32) -> (i32, i32) {
    %c0_i32 = arith.constant 0 : i32
    %c0_i32_0 = arith.constant 0 : i32
    return %arg0, %c0_i32 : i32, i32
  }
  func.func @transform_1(%arg0: i32, %arg1: i32) -> (i32, i32) {
    %c0_i32 = arith.constant 0 : i32
    %c0_i32_0 = arith.constant 0 : i32
    return %c0_i32, %arg1 : i32, i32
  }
  func.func @transform_2(%arg0: i32, %arg1: i32) -> (i32, i32) {
    %c0_i32 = arith.constant 0 : i32
    %c0_i32_0 = arith.constant 0 : i32
    return %c0_i32, %arg1 : i32, i32
  }
  func.func @transform_3(%arg0: i32, %arg1: i32) -> (i32, i32) {
    %c0_i32 = arith.constant 0 : i32
    return %arg0, %arg1 : i32, i32
  }
}

module attributes {stable_mosaic.version = 11 : i64} {
  func.func @_reparam_decfc_kernel(%arg0: i32, %arg1: memref<16x640xbf16, #tpu.memory_space<vmem>>, %arg2: memref<640x256xbf16, #tpu.memory_space<vmem>>, %arg3: memref<1x256xf32, #tpu.memory_space<vmem>>, %arg4: memref<16x128xf32, #tpu.memory_space<vmem>>, %arg5: memref<16x128xbf16, #tpu.memory_space<vmem>>, %arg6: memref<128x512xbf16, #tpu.memory_space<vmem>>, %arg7: memref<128x512xbf16, #tpu.memory_space<vmem>>, %arg8: memref<1x512xf32, #tpu.memory_space<vmem>>, %arg9: memref<16x128xf32, #tpu.memory_space<vmem>>, %arg10: memref<16x128xf32, #tpu.memory_space<vmem>>, %arg11: memref<16x512xbf16, #tpu.memory_space<vmem>>) attributes {dimension_semantics = [#tpu.dimension_semantics<arbitrary>], iteration_bounds = array<i64: 1>, scalar_prefetch = 0 : i64, scratch_operands = 0 : i64, tpu.core_type = #tpu.core_type<tc>, window_params = [{pipeline_mode = #tpu.pipeline_mode<synchronous>, transform_indices = @transform_0, window_bounds = array<i64: 16, 640>}, {pipeline_mode = #tpu.pipeline_mode<synchronous>, transform_indices = @transform_1, window_bounds = array<i64: 640, 256>}, {pipeline_mode = #tpu.pipeline_mode<synchronous>, transform_indices = @transform_2, window_bounds = array<i64: 1, 256>}, {pipeline_mode = #tpu.pipeline_mode<synchronous>, transform_indices = @transform_3, window_bounds = array<i64: 16, 128>}, {pipeline_mode = #tpu.pipeline_mode<synchronous>, transform_indices = @transform_4, window_bounds = array<i64: 16, 128>}, {pipeline_mode = #tpu.pipeline_mode<synchronous>, transform_indices = @transform_5, window_bounds = array<i64: 128, 512>}, {pipeline_mode = #tpu.pipeline_mode<synchronous>, transform_indices = @transform_6, window_bounds = array<i64: 128, 512>}, {pipeline_mode = #tpu.pipeline_mode<synchronous>, transform_indices = @transform_7, window_bounds = array<i64: 1, 512>}, {pipeline_mode = #tpu.pipeline_mode<synchronous>, transform_indices = @transform_8, window_bounds = array<i64: 16, 128>}, {pipeline_mode = #tpu.pipeline_mode<synchronous>, transform_indices = @transform_9, window_bounds = array<i64: 16, 128>}, {pipeline_mode = #tpu.pipeline_mode<synchronous>, transform_indices = @transform_10, window_bounds = array<i64: 16, 512>}]} {
    %c0 = arith.constant 0 : index
    %c0_0 = arith.constant 0 : index
    %0 = vector.load %arg1[%c0, %c0_0] : memref<16x640xbf16, #tpu.memory_space<vmem>>, vector<16x640xbf16>
    %c0_1 = arith.constant 0 : index
    %c0_2 = arith.constant 0 : index
    %1 = vector.load %arg2[%c0_1, %c0_2] : memref<640x256xbf16, #tpu.memory_space<vmem>>, vector<640x256xbf16>
    %cst = arith.constant dense<0.000000e+00> : vector<16x256xf32>
    %2 = tpu.matmul %0, %1, %cst {dimension_numbers = #tpu.dot_dimension_numbers<[1], [0], [0], [1], [0, 0, 1, 1], [], []>} : vector<16x640xbf16>, vector<640x256xbf16>, vector<16x256xf32> -> vector<16x256xf32>
    %c0_3 = arith.constant 0 : index
    %c0_4 = arith.constant 0 : index
    %3 = vector.load %arg3[%c0_3, %c0_4] : memref<1x256xf32, #tpu.memory_space<vmem>>, vector<1x256xf32>
    %4 = vector.broadcast %3 : vector<1x256xf32> to vector<16x256xf32>
    %5 = arith.addf %2, %4 : vector<16x256xf32>
    %6 = vector.extract_strided_slice %5 {offsets = [0, 0], sizes = [16, 128], strides = [1, 1]} : vector<16x256xf32> to vector<16x128xf32>
    %7 = vector.extract_strided_slice %5 {offsets = [0, 128], sizes = [16, 128], strides = [1, 1]} : vector<16x256xf32> to vector<16x128xf32>
    %c0_5 = arith.constant 0 : index
    %c0_6 = arith.constant 0 : index
    %8 = vector.load %arg9[%c0_5, %c0_6] : memref<16x128xf32, #tpu.memory_space<vmem>>, vector<16x128xf32>
    tpu.vector_store %arg9[%c0_5, %c0_6], %6 {strides = array<i32>} : memref<16x128xf32, #tpu.memory_space<vmem>>, vector<16x128xf32>,
    %c0_7 = arith.constant 0 : index
    %c0_8 = arith.constant 0 : index
    %9 = vector.load %arg10[%c0_7, %c0_8] : memref<16x128xf32, #tpu.memory_space<vmem>>, vector<16x128xf32>
    tpu.vector_store %arg10[%c0_7, %c0_8], %7 {strides = array<i32>} : memref<16x128xf32, #tpu.memory_space<vmem>>, vector<16x128xf32>,
    %c0_9 = arith.constant 0 : index
    %c0_10 = arith.constant 0 : index
    %10 = vector.load %arg4[%c0_9, %c0_10] : memref<16x128xf32, #tpu.memory_space<vmem>>, vector<16x128xf32>
    %cst_11 = arith.constant 5.000000e-01 : f32
    %11 = vector.broadcast %cst_11 : f32 to vector<16x128xf32>
    %12 = arith.mulf %11, %7 : vector<16x128xf32>
    %13 = math.exp %12 : vector<16x128xf32>
    %14 = arith.mulf %10, %13 : vector<16x128xf32>
    %15 = arith.addf %6, %14 : vector<16x128xf32>
    %16 = arith.truncf %15 : vector<16x128xf32> to vector<16x128xbf16>
    %c0_12 = arith.constant 0 : index
    %c0_13 = arith.constant 0 : index
    %17 = vector.load %arg6[%c0_12, %c0_13] : memref<128x512xbf16, #tpu.memory_space<vmem>>, vector<128x512xbf16>
    %cst_14 = arith.constant dense<0.000000e+00> : vector<16x512xf32>
    %18 = tpu.matmul %16, %17, %cst_14 {dimension_numbers = #tpu.dot_dimension_numbers<[1], [0], [0], [1], [0, 0, 1, 1], [], []>} : vector<16x128xbf16>, vector<128x512xbf16>, vector<16x512xf32> -> vector<16x512xf32>
    %c0_15 = arith.constant 0 : index
    %c0_16 = arith.constant 0 : index
    %19 = vector.load %arg5[%c0_15, %c0_16] : memref<16x128xbf16, #tpu.memory_space<vmem>>, vector<16x128xbf16>
    %c0_17 = arith.constant 0 : index
    %c0_18 = arith.constant 0 : index
    %20 = vector.load %arg7[%c0_17, %c0_18] : memref<128x512xbf16, #tpu.memory_space<vmem>>, vector<128x512xbf16>
    %cst_19 = arith.constant dense<0.000000e+00> : vector<16x512xf32>
    %21 = tpu.matmul %19, %20, %cst_19 {dimension_numbers = #tpu.dot_dimension_numbers<[1], [0], [0], [1], [0, 0, 1, 1], [], []>} : vector<16x128xbf16>, vector<128x512xbf16>, vector<16x512xf32> -> vector<16x512xf32>
    %22 = arith.addf %18, %21 : vector<16x512xf32>
    %c0_20 = arith.constant 0 : index
    %c0_21 = arith.constant 0 : index
    %23 = vector.load %arg8[%c0_20, %c0_21] : memref<1x512xf32, #tpu.memory_space<vmem>>, vector<1x512xf32>
    %24 = vector.broadcast %23 : vector<1x512xf32> to vector<16x512xf32>
    %25 = arith.addf %22, %24 : vector<16x512xf32>
    %26 = arith.truncf %25 : vector<16x512xf32> to vector<16x512xbf16>
    %c0_22 = arith.constant 0 : index
    %c0_23 = arith.constant 0 : index
    %27 = vector.load %arg11[%c0_22, %c0_23] : memref<16x512xbf16, #tpu.memory_space<vmem>>, vector<16x512xbf16>
    tpu.vector_store %arg11[%c0_22, %c0_23], %26 {strides = array<i32>} : memref<16x512xbf16, #tpu.memory_space<vmem>>, vector<16x512xbf16>,
    return
  }
  func.func @transform_0(%arg0: i32) -> (i32, i32) {
    %c0_i32 = arith.constant 0 : i32
    %c0_i32_0 = arith.constant 0 : i32
    %c0_i32_1 = arith.constant 0 : i32
    return %c0_i32, %c0_i32_0 : i32, i32
  }
  func.func @transform_1(%arg0: i32) -> (i32, i32) {
    %c0_i32 = arith.constant 0 : i32
    %c0_i32_0 = arith.constant 0 : i32
    %c0_i32_1 = arith.constant 0 : i32
    return %c0_i32, %c0_i32_0 : i32, i32
  }
  func.func @transform_2(%arg0: i32) -> (i32, i32) {
    %c0_i32 = arith.constant 0 : i32
    %c0_i32_0 = arith.constant 0 : i32
    %c0_i32_1 = arith.constant 0 : i32
    return %c0_i32, %c0_i32_0 : i32, i32
  }
  func.func @transform_3(%arg0: i32) -> (i32, i32) {
    %c0_i32 = arith.constant 0 : i32
    %c0_i32_0 = arith.constant 0 : i32
    %c0_i32_1 = arith.constant 0 : i32
    return %c0_i32, %c0_i32_0 : i32, i32
  }
  func.func @transform_4(%arg0: i32) -> (i32, i32) {
    %c0_i32 = arith.constant 0 : i32
    %c0_i32_0 = arith.constant 0 : i32
    %c0_i32_1 = arith.constant 0 : i32
    return %c0_i32, %c0_i32_0 : i32, i32
  }
  func.func @transform_5(%arg0: i32) -> (i32, i32) {
    %c0_i32 = arith.constant 0 : i32
    %c0_i32_0 = arith.constant 0 : i32
    %c0_i32_1 = arith.constant 0 : i32
    return %c0_i32, %c0_i32_0 : i32, i32
  }
  func.func @transform_6(%arg0: i32) -> (i32, i32) {
    %c0_i32 = arith.constant 0 : i32
    %c0_i32_0 = arith.constant 0 : i32
    %c0_i32_1 = arith.constant 0 : i32
    return %c0_i32, %c0_i32_0 : i32, i32
  }
  func.func @transform_7(%arg0: i32) -> (i32, i32) {
    %c0_i32 = arith.constant 0 : i32
    %c0_i32_0 = arith.constant 0 : i32
    %c0_i32_1 = arith.constant 0 : i32
    return %c0_i32, %c0_i32_0 : i32, i32
  }
  func.func @transform_8(%arg0: i32) -> (i32, i32) {
    %c0_i32 = arith.constant 0 : i32
    %c0_i32_0 = arith.constant 0 : i32
    %c0_i32_1 = arith.constant 0 : i32
    return %c0_i32, %c0_i32_0 : i32, i32
  }
  func.func @transform_9(%arg0: i32) -> (i32, i32) {
    %c0_i32 = arith.constant 0 : i32
    %c0_i32_0 = arith.constant 0 : i32
    %c0_i32_1 = arith.constant 0 : i32
    return %c0_i32, %c0_i32_0 : i32, i32
  }
  func.func @transform_10(%arg0: i32) -> (i32, i32) {
    %c0_i32 = arith.constant 0 : i32
    %c0_i32_0 = arith.constant 0 : i32
    %c0_i32_1 = arith.constant 0 : i32
    return %c0_i32, %c0_i32_0 : i32, i32
  }
}

module attributes {stable_mosaic.version = 11 : i64} {
  func.func @_mm_single_k_kernel(%arg0: i32, %arg1: i32, %arg2: memref<16x1152xbf16, #tpu.memory_space<vmem>>, %arg3: memref<1152x128xbf16, #tpu.memory_space<vmem>>, %arg4: memref<1x128xf32, #tpu.memory_space<vmem>>, %arg5: memref<16x128xbf16, #tpu.memory_space<vmem>>) attributes {dimension_semantics = [#tpu.dimension_semantics<parallel>, #tpu.dimension_semantics<parallel>], iteration_bounds = array<i64: 1, 4>, scalar_prefetch = 0 : i64, scratch_operands = 0 : i64, tpu.core_type = #tpu.core_type<tc>, window_params = [{transform_indices = @transform_0, window_bounds = array<i64: 16, 1152>}, {transform_indices = @transform_1, window_bounds = array<i64: 1152, 128>}, {transform_indices = @transform_2, window_bounds = array<i64: 1, 128>}, {transform_indices = @transform_3, window_bounds = array<i64: 16, 128>}]} {
    %c0 = arith.constant 0 : index
    %c0_0 = arith.constant 0 : index
    %0 = vector.load %arg2[%c0, %c0_0] : memref<16x1152xbf16, #tpu.memory_space<vmem>>, vector<16x1152xbf16>
    %c0_1 = arith.constant 0 : index
    %c0_2 = arith.constant 0 : index
    %1 = vector.load %arg3[%c0_1, %c0_2] : memref<1152x128xbf16, #tpu.memory_space<vmem>>, vector<1152x128xbf16>
    %cst = arith.constant dense<0.000000e+00> : vector<16x128xf32>
    %2 = tpu.matmul %0, %1, %cst {dimension_numbers = #tpu.dot_dimension_numbers<[1], [0], [0], [1], [0, 0, 1, 1], [], []>} : vector<16x1152xbf16>, vector<1152x128xbf16>, vector<16x128xf32> -> vector<16x128xf32>
    %c0_3 = arith.constant 0 : index
    %c0_4 = arith.constant 0 : index
    %3 = vector.load %arg4[%c0_3, %c0_4] : memref<1x128xf32, #tpu.memory_space<vmem>>, vector<1x128xf32>
    %4 = vector.broadcast %3 : vector<1x128xf32> to vector<16x128xf32>
    %5 = arith.addf %2, %4 : vector<16x128xf32>
    %cst_5 = arith.constant 0.000000e+00 : f32
    %6 = vector.broadcast %cst_5 : f32 to vector<16x128xf32>
    %7 = arith.maximumf %5, %6 : vector<16x128xf32>
    %8 = arith.truncf %7 : vector<16x128xf32> to vector<16x128xbf16>
    %c0_6 = arith.constant 0 : index
    %c0_7 = arith.constant 0 : index
    %9 = vector.load %arg5[%c0_6, %c0_7] : memref<16x128xbf16, #tpu.memory_space<vmem>>, vector<16x128xbf16>
    tpu.vector_store %arg5[%c0_6, %c0_7], %8 {strides = array<i32>} : memref<16x128xbf16, #tpu.memory_space<vmem>>, vector<16x128xbf16>,
    return
  }
  func.func @transform_0(%arg0: i32, %arg1: i32) -> (i32, i32) {
    %c0_i32 = arith.constant 0 : i32
    %c0_i32_0 = arith.constant 0 : i32
    return %arg0, %c0_i32 : i32, i32
  }
  func.func @transform_1(%arg0: i32, %arg1: i32) -> (i32, i32) {
    %c0_i32 = arith.constant 0 : i32
    %c0_i32_0 = arith.constant 0 : i32
    return %c0_i32, %arg1 : i32, i32
  }
  func.func @transform_2(%arg0: i32, %arg1: i32) -> (i32, i32) {
    %c0_i32 = arith.constant 0 : i32
    %c0_i32_0 = arith.constant 0 : i32
    return %c0_i32, %arg1 : i32, i32
  }
  func.func @transform_3(%arg0: i32, %arg1: i32) -> (i32, i32) {
    %c0_i32 = arith.constant 0 : i32
    return %arg0, %arg1 : i32, i32
  }
}

module attributes {stable_mosaic.version = 11 : i64} {
  func.func @_mm_single_k_kernel(%arg0: i32, %arg1: i32, %arg2: memref<32x1152xbf16, #tpu.memory_space<vmem>>, %arg3: memref<1152x128xbf16, #tpu.memory_space<vmem>>, %arg4: memref<1x128xf32, #tpu.memory_space<vmem>>, %arg5: memref<32x128xbf16, #tpu.memory_space<vmem>>) attributes {dimension_semantics = [#tpu.dimension_semantics<parallel>, #tpu.dimension_semantics<parallel>], iteration_bounds = array<i64: 1, 4>, scalar_prefetch = 0 : i64, scratch_operands = 0 : i64, tpu.core_type = #tpu.core_type<tc>, window_params = [{transform_indices = @transform_0, window_bounds = array<i64: 32, 1152>}, {transform_indices = @transform_1, window_bounds = array<i64: 1152, 128>}, {transform_indices = @transform_2, window_bounds = array<i64: 1, 128>}, {transform_indices = @transform_3, window_bounds = array<i64: 32, 128>}]} {
    %c0 = arith.constant 0 : index
    %c0_0 = arith.constant 0 : index
    %0 = vector.load %arg2[%c0, %c0_0] : memref<32x1152xbf16, #tpu.memory_space<vmem>>, vector<32x1152xbf16>
    %c0_1 = arith.constant 0 : index
    %c0_2 = arith.constant 0 : index
    %1 = vector.load %arg3[%c0_1, %c0_2] : memref<1152x128xbf16, #tpu.memory_space<vmem>>, vector<1152x128xbf16>
    %cst = arith.constant dense<0.000000e+00> : vector<32x128xf32>
    %2 = tpu.matmul %0, %1, %cst {dimension_numbers = #tpu.dot_dimension_numbers<[1], [0], [0], [1], [0, 0, 1, 1], [], []>} : vector<32x1152xbf16>, vector<1152x128xbf16>, vector<32x128xf32> -> vector<32x128xf32>
    %c0_3 = arith.constant 0 : index
    %c0_4 = arith.constant 0 : index
    %3 = vector.load %arg4[%c0_3, %c0_4] : memref<1x128xf32, #tpu.memory_space<vmem>>, vector<1x128xf32>
    %4 = vector.broadcast %3 : vector<1x128xf32> to vector<32x128xf32>
    %5 = arith.addf %2, %4 : vector<32x128xf32>
    %cst_5 = arith.constant 0.000000e+00 : f32
    %6 = vector.broadcast %cst_5 : f32 to vector<32x128xf32>
    %7 = arith.maximumf %5, %6 : vector<32x128xf32>
    %8 = arith.truncf %7 : vector<32x128xf32> to vector<32x128xbf16>
    %c0_6 = arith.constant 0 : index
    %c0_7 = arith.constant 0 : index
    %9 = vector.load %arg5[%c0_6, %c0_7] : memref<32x128xbf16, #tpu.memory_space<vmem>>, vector<32x128xbf16>
    tpu.vector_store %arg5[%c0_6, %c0_7], %8 {strides = array<i32>} : memref<32x128xbf16, #tpu.memory_space<vmem>>, vector<32x128xbf16>,
    return
  }
  func.func @transform_0(%arg0: i32, %arg1: i32) -> (i32, i32) {
    %c0_i32 = arith.constant 0 : i32
    %c0_i32_0 = arith.constant 0 : i32
    return %arg0, %c0_i32 : i32, i32
  }
  func.func @transform_1(%arg0: i32, %arg1: i32) -> (i32, i32) {
    %c0_i32 = arith.constant 0 : i32
    %c0_i32_0 = arith.constant 0 : i32
    return %c0_i32, %arg1 : i32, i32
  }
  func.func @transform_2(%arg0: i32, %arg1: i32) -> (i32, i32) {
    %c0_i32 = arith.constant 0 : i32
    %c0_i32_0 = arith.constant 0 : i32
    return %c0_i32, %arg1 : i32, i32
  }
  func.func @transform_3(%arg0: i32, %arg1: i32) -> (i32, i32) {
    %c0_i32 = arith.constant 0 : i32
    return %arg0, %arg1 : i32, i32
  }
}

module attributes {stable_mosaic.version = 11 : i64} {
  func.func @_mm_single_k_kernel(%arg0: i32, %arg1: i32, %arg2: memref<128x1152xbf16, #tpu.memory_space<vmem>>, %arg3: memref<1152x128xbf16, #tpu.memory_space<vmem>>, %arg4: memref<1x128xf32, #tpu.memory_space<vmem>>, %arg5: memref<128x128xf32, #tpu.memory_space<vmem>>) attributes {dimension_semantics = [#tpu.dimension_semantics<parallel>, #tpu.dimension_semantics<parallel>], iteration_bounds = array<i64: 1, 4>, scalar_prefetch = 0 : i64, scratch_operands = 0 : i64, tpu.core_type = #tpu.core_type<tc>, window_params = [{transform_indices = @transform_0, window_bounds = array<i64: 128, 1152>}, {transform_indices = @transform_1, window_bounds = array<i64: 1152, 128>}, {transform_indices = @transform_2, window_bounds = array<i64: 1, 128>}, {transform_indices = @transform_3, window_bounds = array<i64: 128, 128>}]} {
    %c0 = arith.constant 0 : index
    %c0_0 = arith.constant 0 : index
    %0 = vector.load %arg2[%c0, %c0_0] : memref<128x1152xbf16, #tpu.memory_space<vmem>>, vector<128x1152xbf16>
    %c0_1 = arith.constant 0 : index
    %c0_2 = arith.constant 0 : index
    %1 = vector.load %arg3[%c0_1, %c0_2] : memref<1152x128xbf16, #tpu.memory_space<vmem>>, vector<1152x128xbf16>
    %cst = arith.constant dense<0.000000e+00> : vector<128x128xf32>
    %2 = tpu.matmul %0, %1, %cst {dimension_numbers = #tpu.dot_dimension_numbers<[1], [0], [0], [1], [0, 0, 1, 1], [], []>} : vector<128x1152xbf16>, vector<1152x128xbf16>, vector<128x128xf32> -> vector<128x128xf32>
    %c0_3 = arith.constant 0 : index
    %c0_4 = arith.constant 0 : index
    %3 = vector.load %arg4[%c0_3, %c0_4] : memref<1x128xf32, #tpu.memory_space<vmem>>, vector<1x128xf32>
    %4 = vector.broadcast %3 : vector<1x128xf32> to vector<128x128xf32>
    %5 = arith.addf %2, %4 : vector<128x128xf32>
    %6 = math.tanh %5 : vector<128x128xf32>
    %c0_5 = arith.constant 0 : index
    %c0_6 = arith.constant 0 : index
    %7 = vector.load %arg5[%c0_5, %c0_6] : memref<128x128xf32, #tpu.memory_space<vmem>>, vector<128x128xf32>
    tpu.vector_store %arg5[%c0_5, %c0_6], %6 {strides = array<i32>} : memref<128x128xf32, #tpu.memory_space<vmem>>, vector<128x128xf32>,
    return
  }
  func.func @transform_0(%arg0: i32, %arg1: i32) -> (i32, i32) {
    %c0_i32 = arith.constant 0 : i32
    %c0_i32_0 = arith.constant 0 : i32
    return %arg0, %c0_i32 : i32, i32
  }
  func.func @transform_1(%arg0: i32, %arg1: i32) -> (i32, i32) {
    %c0_i32 = arith.constant 0 : i32
    %c0_i32_0 = arith.constant 0 : i32
    return %c0_i32, %arg1 : i32, i32
  }
  func.func @transform_2(%arg0: i32, %arg1: i32) -> (i32, i32) {
    %c0_i32 = arith.constant 0 : i32
    %c0_i32_0 = arith.constant 0 : i32
    return %c0_i32, %arg1 : i32, i32
  }
  func.func @transform_3(%arg0: i32, %arg1: i32) -> (i32, i32) {
    %c0_i32 = arith.constant 0 : i32
    return %arg0, %arg1 : i32, i32
  }
}

</mosaic_0001>

<bundles_post_ra>
// kernel: cvae_forward.18
= control target key start
LH: loop header
LB: loop body
LE: loop exit
PB: predicated region body
PF: predicated region fallthrough
CT: control target
= control target key end

     0   :  { %s1068_s0 = inlined_call_operand.vmem [shape: bf16[128,128], index: 0, kind: input, shape index: {}]   ;;  %s1069_s1 = inlined_call_operand.vmem [shape: f32[1,128], index: 1, kind: input, shape index: {}]   ;;  %s1070_s2 = inlined_call_operand.vmem [shape: bf16[128,64], index: 2, kind: input, shape index: {}]   ;;  %s1071_s3 = inlined_call_operand.<no memory space> [shape: bf16[], index: 3, kind: input, shape index: {}]   ;;  %s1072_s4 = inlined_call_operand.vmem [shape: bf16[128,128], index: 4, kind: output, shape index: {}]  }
   0x1   :  { %v9_v0 = vstv %s1071_s3 }
   0x2   :  { %v924_v1 = vunpack.i.l.bf16 %v9_v0 }
   0x3   :  { %v879_v2 = vld [vmem:[%s1068_s0] sm:$0xff]   ;;  %v32_v3 = vlaneseq  ;;  %v880_v4 = vld [vmem:[%s1068_s0 + $0x8] sm:$0xff]   ;;  %v881_v5 = vld [vmem:[%s1068_s0 + $0x10] sm:$0xff]   ;;  %v895_v26 = vmov 0.0  }
   0x4   :  { %830 = vmatprep.subr.bf16.mxu0 %v879_v2  ;;  %862 = vmatprep.subr.bf16.mxu1 %v879_v2  ;;  %v882_v7 = vld [vmem:[%s1068_s0 + $0x18] sm:$0xff]   ;;  %v29_v8 = vld [vmem:[%s1070_s2] sm:$0xff]   ;;  %v704_v10 = vld [vmem:[%s1070_s2 + $0x8] sm:$0xff]  }
   0x5   :  { %831 = vmatpush3.bf16.msra.mxu0 %v879_v2  ;;  %870 = vmatpush3.bf16.msra.mxu1 %v879_v2  ;;  %v935_v6 = vand.u32 127, %v32_v3  ;;  %v710_v9 = vld [vmem:[%s1070_s2 + $0x20] sm:$0xff]   ;;  %v30_v11 = vunpack.c.l.bf16 %v29_v8  ;;  %v51_v12 = vunpack.c.h.bf16 %v29_v8  ;;  %v712_v15 = vld [vmem:[%s1070_s2 + $0x28] sm:$0xff]   ;;  %v706_v16 = vld [vmem:[%s1070_s2 + $0x10] sm:$0xff]   ;;  %v73_v17 = vunpack.c.l.bf16 %v704_v10 }
   0x6   :  { %832 = vmatprep.subr.bf16.mxu0 %v880_v4  ;;  %863 = vmatprep.subr.bf16.mxu1 %v880_v4  ;;  %v205_v13 = vunpack.c.l.bf16 %v710_v9  ;;  %v227_v14 = vunpack.c.h.bf16 %v710_v9  ;;  %v95_v18 = vunpack.c.h.bf16 %v704_v10  ;;  %v249_v19 = vunpack.c.l.bf16 %v712_v15  ;;  %v883_v25 = vld [vmem:[%s1068_s0 + $0x20] sm:$0xff]   ;;  %v714_v31 = vld [vmem:[%s1070_s2 + $0x30] sm:$0xff]   ;;  %v708_v40 = vld [vmem:[%s1070_s2 + $0x18] sm:$0xff]  }
   0x7   :  { %vm35_vm0 = vcmp.lt.s32.totalorder %v935_v6, 64  ;;  %v271_v20 = vunpack.c.h.bf16 %v712_v15  ;;  %v117_v24 = vunpack.c.l.bf16 %v706_v16  ;;  %v139_v30 = vunpack.c.h.bf16 %v706_v16  ;;  %v716_v41 = vld [vmem:[%s1070_s2 + $0x38] sm:$0xff]   ;;  %v884_v46 = vld [vmem:[%s1068_s0 + $0x28] sm:$0xff]   ;;  %v885_v61 = vld [vmem:[%s1068_s0 + $0x30] sm:$0xff]  }
   0x8   :  { %v36_v21 = vsel %vm35_vm0, %v30_v11, %v924_v1  ;;  %v57_v22 = vsel %vm35_vm0, %v51_v12, %v924_v1  ;;  %v211_v23 = vsel %vm35_vm0, %v205_v13, %v924_v1  ;;  %v233_v32 = vsel %vm35_vm0, %v227_v14, %v924_v1  ;;  %v886_v8 = vld [vmem:[%s1068_s0 + $0x38] sm:$0xff]   ;;  %v718_v13 = vld [vmem:[%s1069_s1] ss:$0 sm:$0xff] }
   0x9   :  { %833 = vmatpush3.bf16.msra.mxu0 %v880_v4  ;;  %871 = vmatpush3.bf16.msra.mxu1 %v880_v4  ;;  %v37_v27 = vpack.c.bf16 %v895_v26, %v36_v21  ;;  %v59_v28 = vpack.c.bf16 %v895_v26, %v57_v22  ;;  %v213_v29 = vpack.c.bf16 %v895_v26, %v211_v23  ;;  %v293_v45 = vunpack.c.l.bf16 %v714_v31 }
   0xa   :  { %834 = vmatprep.subr.bf16.mxu0 %v881_v5  ;;  %864 = vmatprep.subr.bf16.mxu1 %v881_v5  ;;  %v79_v33 = vsel %vm35_vm0, %v73_v17, %v924_v1  ;;  %v101_v34 = vsel %vm35_vm0, %v95_v18, %v924_v1  ;;  %v255_v35 = vsel %vm35_vm0, %v249_v19, %v924_v1  ;;  %v315_v50 = vunpack.c.h.bf16 %v714_v31 }
   0xb   :  { %39 = vst [vmem:[#allocation7] sm:$0xf] %v37_v27  ;;  %61 = vst [vmem:[#allocation7 + $0x4] sm:$0xf] %v59_v28  ;;  %v235_v36 = vpack.c.bf16 %v895_v26, %v233_v32  ;;  %v81_v37 = vpack.c.bf16 %v895_v26, %v79_v33  ;;  %v103_v38 = vpack.c.bf16 %v895_v26, %v101_v34  ;;  %v161_v52 = vunpack.c.l.bf16 %v708_v40 }
   0xc   :  { %215 = vst [vmem:[#allocation7 + $0x20] sm:$0xf] %v213_v29  ;;  %v257_v39 = vpack.c.bf16 %v895_v26, %v255_v35  ;;  %v277_v42 = vsel %vm35_vm0, %v271_v20, %v924_v1  ;;  %v123_v43 = vsel %vm35_vm0, %v117_v24, %v924_v1  ;;  %v145_v44 = vsel %vm35_vm0, %v139_v30, %v924_v1 }
   0xd   :  { %835 = vmatpush3.bf16.msra.mxu0 %v881_v5  ;;  %872 = vmatpush3.bf16.msra.mxu1 %v881_v5  ;;  %237 = vst [vmem:[#allocation7 + $0x24] sm:$0xf] %v235_v36  ;;  %83 = vst [vmem:[#allocation7 + $0x8] sm:$0xf] %v81_v37  ;;  %v279_v47 = vpack.c.bf16 %v895_v26, %v277_v42  ;;  %v125_v48 = vpack.c.bf16 %v895_v26, %v123_v43  ;;  %v183_v53 = vunpack.c.h.bf16 %v708_v40 }
   0xe   :  { %836 = vmatprep.subr.bf16.mxu0 %v882_v7  ;;  %865 = vmatprep.subr.bf16.mxu1 %v882_v7  ;;  %105 = vst [vmem:[#allocation7 + $0xc] sm:$0xf] %v103_v38  ;;  %259 = vst [vmem:[#allocation7 + $0x28] sm:$0xf] %v257_v39  ;;  %v147_v49 = vpack.c.bf16 %v895_v26, %v145_v44  ;;  %v299_v51 = vsel %vm35_vm0, %v293_v45, %v924_v1  ;;  %v337_v54 = vunpack.c.l.bf16 %v716_v41 }
   0xf   :  { %281 = vst [vmem:[#allocation7 + $0x2c] sm:$0xf] %v279_v47  ;;  %127 = vst [vmem:[#allocation7 + $0x10] sm:$0xf] %v125_v48  ;;  %v301_v55 = vpack.c.bf16 %v895_v26, %v299_v51  ;;  %v321_v56 = vsel %vm35_vm0, %v315_v50, %v924_v1  ;;  %v359_v57 = vunpack.c.h.bf16 %v716_v41  ;;  %v167_v59 = vsel %vm35_vm0, %v161_v52, %v924_v1 }
  0x10   :  { %149 = vst [vmem:[#allocation7 + $0x14] sm:$0xf] %v147_v49  ;;  %v323_v58 = vpack.c.bf16 %v895_v26, %v321_v56  ;;  %v189_v60 = vsel %vm35_vm0, %v183_v53, %v924_v1  ;;  %v169_v62 = vpack.c.bf16 %v895_v26, %v167_v59  ;;  %v343_v0 = vsel %vm35_vm0, %v337_v54, %v924_v1 }
  0x11   :  { %837 = vmatpush3.bf16.msra.mxu0 %v882_v7  ;;  %873 = vmatpush3.bf16.msra.mxu1 %v882_v7  ;;  %303 = vst [vmem:[#allocation7 + $0x30] sm:$0xf] %v301_v55  ;;  %v191_v63 = vpack.c.bf16 %v895_v26, %v189_v60  ;;  %v345_v3 = vpack.c.bf16 %v895_v26, %v343_v0 }
  0x12   :  { %838 = vmatprep.subr.bf16.mxu0 %v883_v25  ;;  %866 = vmatprep.subr.bf16.mxu1 %v883_v25  ;;  %v887_v2 = vld [vmem:[#allocation7] sm:$0xff]   ;;  %325 = vst [vmem:[#allocation7 + $0x34] sm:$0xf] %v323_v58  ;;  %v365_v4 = vsel %vm35_vm0, %v359_v57, %v924_v1  ;;  %171 = vst [vmem:[#allocation7 + $0x18] sm:$0xf] %v169_v62 }
  0x13   :  { %193 = vst [vmem:[#allocation7 + $0x1c] sm:$0xf] %v191_v63  ;;  %v367_v5 = vpack.c.bf16 %v895_v26, %v365_v4  ;;  %347 = vst [vmem:[#allocation7 + $0x38] sm:$0xf] %v345_v3  ;;  %846 = vmatprep.mubr.bf16.mxu0 %v887_v2 }
  0x14   :  { %v888_v7 = vld [vmem:[#allocation7 + $0x20] sm:$0xff]  }
  0x15   :  { %839 = vmatpush3.bf16.msra.mxu0 %v883_v25  ;;  %874 = vmatpush3.bf16.msra.mxu1 %v883_v25  ;;  %369 = vst [vmem:[#allocation7 + $0x3c] sm:$0xf] %v367_v5  ;;  %v889_v1 = vld [vmem:[#allocation7 + $0x8] sm:$0xff]  }
  0x16   :  { %840 = vmatprep.subr.bf16.mxu0 %v884_v46  ;;  %867 = vmatprep.subr.bf16.mxu1 %v884_v46  ;;  %v890_v6 = vld [vmem:[#allocation7 + $0x28] sm:$0xff]  }
  0x17   :  { %854 = vmatprep.mubr.bf16.mxu1 %v888_v7  ;;  %v891_v9 = vld [vmem:[#allocation7 + $0x10] sm:$0xff]  }
  0x19   :  { %841 = vmatpush3.bf16.msra.mxu0 %v884_v46  ;;  %875 = vmatpush3.bf16.msra.mxu1 %v884_v46  ;;  %v892_v10 = vld [vmem:[#allocation7 + $0x30] sm:$0xff]  }
  0x1a   :  { %842 = vmatprep.subr.bf16.mxu0 %v885_v61  ;;  %868 = vmatprep.subr.bf16.mxu1 %v885_v61  ;;  %v893_v11 = vld [vmem:[#allocation7 + $0x18] sm:$0xff]  }
  0x1c   :  { %v894_v12 = vld [vmem:[#allocation7 + $0x38] sm:$0xff]  }
  0x1d   :  { %843 = vmatpush3.bf16.msra.mxu0 %v885_v61  ;;  %876 = vmatpush3.bf16.msra.mxu1 %v885_v61 }
  0x1e   :  { %844 = vmatprep.subr.bf16.mxu0 %v886_v8  ;;  %869 = vmatprep.subr.bf16.mxu1 %v886_v8 }
  0x21   :  { %845 = vmatpush3.bf16.msra.mxu0 %v886_v8  ;;  %877 = vmatpush3.bf16.msra.mxu1 %v886_v8 }
  0x24   :  { %847 = vmatmul.mubr.bf16.vlgmr.msra.gmra.mrb[0].mxu0 %v889_v1  ;;  %855 = vmatmul.mubr.bf16.vlgmr.msra.gmra.mrb[0].mxu1 %v890_v6 }
  0x25   :  { %850 = vmatprep.mubr.bf16.mxu0 %v891_v9  ;;  %858 = vmatprep.mubr.bf16.mxu1 %v892_v10 }
  0x2c   :  { %851 = vmatmul.mubr.bf16.gmra.mrb[4].mxu0 %v893_v11  ;;  %859 = vmatmul.mubr.bf16.gmra.mrb[4].mxu1 %v894_v12 }
  0xf7   :  { %v848_v14 = vpop.f32.mrb[0].mxu0  ;;  %v856_v15 = vpop.f32.mrb[0].mxu1 }
  0xf8   :  { %v549_v16 = vadd.f32 %v848_v14, %v718_v13  ;;  %v581_v17 = vadd.f32 %v856_v15, %v718_v13  ;;  %v540_v18 = vpop.f32.mrb[1].mxu0  ;;  %v572_v19 = vpop.f32.mrb[1].mxu1 }
  0xf9   :  { %v541_v20 = vadd.f32 %v718_v13, %v540_v18  ;;  %v573_v21 = vadd.f32 %v718_v13, %v572_v19  ;;  %v849_v22 = vpop.f32.mrb[2].mxu0  ;;  %v857_v23 = vpop.f32.mrb[2].mxu1 }
  0xfa   :  { %v552_v24 = vadd.f32 %v849_v22, %v718_v13  ;;  %v584_v25 = vadd.f32 %v857_v23, %v718_v13  ;;  %v543_v26 = vpop.f32.mrb[3].mxu0  ;;  %v575_v27 = vpop.f32.mrb[3].mxu1  ;;  %v605_v30 = vmax.f32 %v549_v16, 0.0  ;;  %v613_v31 = vmax.f32 %v581_v17, 0.0 }
  0xfb   :  { %v544_v28 = vadd.f32 %v718_v13, %v543_v26  ;;  %v576_v29 = vadd.f32 %v718_v13, %v575_v27  ;;  %v603_v34 = vmax.f32 %v541_v20, 0.0  ;;  %v611_v35 = vmax.f32 %v573_v21, 0.0 }
  0xfc   :  { %v606_v32 = vmax.f32 %v552_v24, 0.0  ;;  %v614_v33 = vmax.f32 %v584_v25, 0.0 }
  0xfd   :  { %v604_v36 = vmax.f32 %v544_v28, 0.0  ;;  %v612_v37 = vmax.f32 %v576_v29, 0.0 }
  0xfe   :  { %v775_v38 = vpack.c.bf16 %v606_v32, %v605_v30  ;;  %v795_v39 = vpack.c.bf16 %v614_v33, %v613_v31 }
  0xff   :  { %v770_v40 = vpack.c.bf16 %v604_v36, %v603_v34  ;;  %v790_v41 = vpack.c.bf16 %v612_v37, %v611_v35  ;;  %v852_v42 = vpop.f32.mrb[4].mxu0  ;;  %v860_v43 = vpop.f32.mrb[4].mxu1 }
 0x100   :  { %807 = vst [vmem:[%s1072_s4 + $0x8] sm:$0xff] %v775_v38   ;;  %811 = vst [vmem:[%s1072_s4 + $0x28] sm:$0xff] %v795_v39   ;;  %v565_v44 = vadd.f32 %v852_v42, %v718_v13  ;;  %v597_v45 = vadd.f32 %v860_v43, %v718_v13  ;;  %v556_v46 = vpop.f32.mrb[5].mxu0  ;;  %v588_v47 = vpop.f32.mrb[5].mxu1 }
 0x101   :  { %771 = vst [vmem:[%s1072_s4] sm:$0xff] %v770_v40   ;;  %810 = vst [vmem:[%s1072_s4 + $0x20] sm:$0xff] %v790_v41   ;;  %v557_v48 = vadd.f32 %v718_v13, %v556_v46  ;;  %v589_v49 = vadd.f32 %v718_v13, %v588_v47  ;;  %v853_v50 = vpop.f32.mrb[6].mxu0  ;;  %v861_v51 = vpop.f32.mrb[6].mxu1 }
 0x102   :  { %v568_v52 = vadd.f32 %v853_v50, %v718_v13  ;;  %v600_v53 = vadd.f32 %v861_v51, %v718_v13  ;;  %v559_v54 = vpop.f32.mrb[7].mxu0  ;;  %v591_v55 = vpop.f32.mrb[7].mxu1  ;;  %v609_v58 = vmax.f32 %v565_v44, 0.0  ;;  %v617_v59 = vmax.f32 %v597_v45, 0.0 }
 0x103   :  { %v560_v56 = vadd.f32 %v718_v13, %v559_v54  ;;  %v592_v57 = vadd.f32 %v718_v13, %v591_v55  ;;  %v607_v62 = vmax.f32 %v557_v48, 0.0  ;;  %v615_v63 = vmax.f32 %v589_v49, 0.0 }
 0x104   :  { %v610_v60 = vmax.f32 %v568_v52, 0.0  ;;  %v618_v61 = vmax.f32 %v600_v53, 0.0 }
 0x105   :  { %v608_v0 = vmax.f32 %v560_v56, 0.0  ;;  %v616_v2 = vmax.f32 %v592_v57, 0.0 }
 0x106   :  { %v785_v3 = vpack.c.bf16 %v610_v60, %v609_v58  ;;  %v805_v4 = vpack.c.bf16 %v618_v61, %v617_v59 }
 0x107   :  { %v780_v5 = vpack.c.bf16 %v608_v0, %v607_v62  ;;  %v800_v7 = vpack.c.bf16 %v616_v2, %v615_v63 }
 0x108   :  { %809 = vst [vmem:[%s1072_s4 + $0x18] sm:$0xff] %v785_v3   ;;  %813 = vst [vmem:[%s1072_s4 + $0x38] sm:$0xff] %v805_v4  }
 0x109   :  { %808 = vst [vmem:[%s1072_s4 + $0x10] sm:$0xff] %v780_v5   ;;  %812 = vst [vmem:[%s1072_s4 + $0x30] sm:$0xff] %v800_v7  }

// kernel: cvae_forward.14
= control target key start
LH: loop header
LB: loop body
LE: loop exit
PB: predicated region body
PF: predicated region fallthrough
CT: control target
= control target key end

     0   :  { %s3489_s0 = inlined_call_operand.vmem [shape: bf16[2048,128], index: 0, kind: input, shape index: {}]   ;;  %s3490_s1 = inlined_call_operand.vmem [shape: f32[1,128], index: 1, kind: input, shape index: {}]   ;;  %s3491_s2 = inlined_call_operand.vmem [shape: bf16[4,8,16,128], index: 2, kind: input, shape index: {}]   ;;  %s3492_s3 = inlined_call_operand.vmem [shape: bf16[32,128], index: 3, kind: output, shape index: {}]  }
   0x1   :  { %v2821_v0 = vld [vmem:[%s3489_s0 + $0x40] sm:$0xff]   ;;  %v2825_v4 = vld [vmem:[%s3489_s0 + $0x48] sm:$0xff]   ;;  %v2829_v8 = vld [vmem:[%s3489_s0 + $0x50] sm:$0xff]  }
   0x2   :  { %v2822_v1 = vld [vmem:[%s3489_s0 + $0xc0] sm:$0xff]   ;;  %2597 = vmatprep.subr.bf16.mxu0 %v2821_v0  ;;  %v2826_v5 = vld [vmem:[%s3489_s0 + $0xc8] sm:$0xff]   ;;  %v2830_v9 = vld [vmem:[%s3489_s0 + $0xd0] sm:$0xff]  }
   0x3   :  { %v2823_v2 = vld [vmem:[%s3489_s0] sm:$0xff]   ;;  %2625 = vmatprep.subr.bf16.mxu1 %v2822_v1  ;;  %v2827_v6 = vld [vmem:[%s3489_s0 + $0x8] sm:$0xff]   ;;  %v2831_v10 = vld [vmem:[%s3489_s0 + $0x10] sm:$0xff]  }
   0x4   :  { %v2824_v3 = vld [vmem:[%s3489_s0 + $0x80] sm:$0xff]   ;;  %2598 = vmatpush3.bf16.msra.mxu0 %v2823_v2  ;;  %v2828_v7 = vld [vmem:[%s3489_s0 + $0x88] sm:$0xff]   ;;  %v2832_v11 = vld [vmem:[%s3489_s0 + $0x90] sm:$0xff]  }
   0x5   :  { %2626 = vmatpush3.bf16.msra.mxu1 %v2824_v3  ;;  %2599 = vmatprep.subr.bf16.mxu0 %v2825_v4  ;;  %v2833_v12 = vld [vmem:[%s3489_s0 + $0x58] sm:$0xff]   ;;  %v2837_v16 = vld [vmem:[%s3489_s0 + $0x60] sm:$0xff]   ;;  %v2841_v20 = vld [vmem:[%s3489_s0 + $0x68] sm:$0xff]  }
   0x6   :  { %2627 = vmatprep.subr.bf16.mxu1 %v2826_v5  ;;  %v2834_v13 = vld [vmem:[%s3489_s0 + $0xd8] sm:$0xff]   ;;  %v2838_v17 = vld [vmem:[%s3489_s0 + $0xe0] sm:$0xff]   ;;  %v2842_v21 = vld [vmem:[%s3489_s0 + $0xe8] sm:$0xff]  }
   0x7   :  { %v2835_v14 = vld [vmem:[%s3489_s0 + $0x18] sm:$0xff]   ;;  %v2839_v18 = vld [vmem:[%s3489_s0 + $0x20] sm:$0xff]   ;;  %v2843_v22 = vld [vmem:[%s3489_s0 + $0x28] sm:$0xff]  }
   0x8   :  { %2600 = vmatpush3.bf16.msra.mxu0 %v2827_v6  ;;  %v2836_v15 = vld [vmem:[%s3489_s0 + $0x98] sm:$0xff]   ;;  %v2840_v19 = vld [vmem:[%s3489_s0 + $0xa0] sm:$0xff]   ;;  %v2844_v23 = vld [vmem:[%s3489_s0 + $0xa8] sm:$0xff]  }
   0x9   :  { %2628 = vmatpush3.bf16.msra.mxu1 %v2828_v7  ;;  %2601 = vmatprep.subr.bf16.mxu0 %v2829_v8  ;;  %v2845_v24 = vld [vmem:[%s3489_s0 + $0x70] sm:$0xff]   ;;  %v2849_v28 = vld [vmem:[%s3489_s0 + $0x78] sm:$0xff]   ;;  %v14_v32 = vld [vmem:[%s3491_s2] sm:$0xff]  }
   0xa   :  { %2629 = vmatprep.subr.bf16.mxu1 %v2830_v9  ;;  %v2846_v25 = vld [vmem:[%s3489_s0 + $0xf0] sm:$0xff]   ;;  %v2850_v29 = vld [vmem:[%s3489_s0 + $0xf8] sm:$0xff]   ;;  %19 = vst [vmem:[#allocation2] sm:$0xff] %v14_v32   ;;  %v2853_v33 = vld [vmem:[%s3491_s2 + $0x40] sm:$0xff]  }
   0xb   :  { %v2847_v26 = vld [vmem:[%s3489_s0 + $0x30] sm:$0xff]   ;;  %v2851_v30 = vld [vmem:[%s3489_s0 + $0x38] sm:$0xff]   ;;  %v2854_v34 = vld [vmem:[%s3491_s2 + $0x8] sm:$0xff]  }
   0xc   :  { %2602 = vmatpush3.bf16.msra.mxu0 %v2831_v10  ;;  %v2848_v27 = vld [vmem:[%s3489_s0 + $0xb0] sm:$0xff]   ;;  %v2852_v31 = vld [vmem:[%s3489_s0 + $0xb8] sm:$0xff]   ;;  %v2855_v35 = vld [vmem:[%s3491_s2 + $0x48] sm:$0xff]  }
   0xd   :  { %2630 = vmatpush3.bf16.msra.mxu1 %v2832_v11  ;;  %2603 = vmatprep.subr.bf16.mxu0 %v2833_v12  ;;  %v2856_v36 = vld [vmem:[%s3489_s0 + $0x140] sm:$0xff]   ;;  %v2234_v37 = vcombine.low %v2854_v34, %v2855_v35  ;;  %v2235_v38 = vcombine.high %v2854_v34, %v2855_v35  ;;  %v2861_v45 = vld [vmem:[%s3489_s0 + $0x1c8] sm:$0xff]   ;;  %v2865_v49 = vld [vmem:[%s3489_s0 + $0x1d0] sm:$0xff]  }
   0xe   :  { %2631 = vmatprep.subr.bf16.mxu1 %v2834_v13  ;;  %v2857_v39 = vld [vmem:[%s3489_s0 + $0x1c0] sm:$0xff]   ;;  %v2860_v46 = vld [vmem:[%s3489_s0 + $0x148] sm:$0xff]   ;;  %v2864_v50 = vld [vmem:[%s3489_s0 + $0x150] sm:$0xff]  }
   0xf   :  { %1829 = vmatprep.mubr.bf16.mxu1 %v2235_v38  ;;  %v2859_v40 = vld [vmem:[%s3489_s0 + $0x180] sm:$0xff]   ;;  %v2863_v47 = vld [vmem:[%s3489_s0 + $0x188] sm:$0xff]   ;;  %v2867_v51 = vld [vmem:[%s3489_s0 + $0x190] sm:$0xff]  }
  0x10   :  { %2604 = vmatpush3.bf16.msra.mxu0 %v2835_v14  ;;  %v2858_v42 = vld [vmem:[%s3489_s0 + $0x100] sm:$0xff]   ;;  %v2862_v48 = vld [vmem:[%s3489_s0 + $0x108] sm:$0xff]   ;;  %v2866_v52 = vld [vmem:[%s3489_s0 + $0x110] sm:$0xff]  }
  0x11   :  { %2632 = vmatpush3.bf16.msra.mxu1 %v2836_v15  ;;  %2605 = vmatprep.subr.bf16.mxu0 %v2837_v16  ;;  %v525_v41 = vld [vmem:[#allocation2] sm:$0xff]  ;;  %v2869_v53 = vld [vmem:[%s3489_s0 + $0x1d8] sm:$0xff]   ;;  %v2876_v61 = vld [vmem:[%s3489_s0 + $0x168] sm:$0xff]  }
  0x12   :  { %2633 = vmatprep.subr.bf16.mxu1 %v2838_v17  ;;  %v2232_v43 = vcombine.low %v525_v41, %v2853_v33  ;;  %v2233_v44 = vcombine.high %v525_v41, %v2853_v33  ;;  %v2868_v54 = vld [vmem:[%s3489_s0 + $0x158] sm:$0xff]   ;;  %v2873_v57 = vld [vmem:[%s3489_s0 + $0x1e0] sm:$0xff]   ;;  %v2877_v62 = vld [vmem:[%s3489_s0 + $0x1e8] sm:$0xff]  }
  0x13   :  { %v2871_v55 = vld [vmem:[%s3489_s0 + $0x198] sm:$0xff]   ;;  %v2872_v58 = vld [vmem:[%s3489_s0 + $0x160] sm:$0xff]   ;;  %v2880_v1 = vld [vmem:[%s3489_s0 + $0x128] sm:$0xff]  }
  0x14   :  { %2606 = vmatpush3.bf16.msra.mxu0 %v2839_v18  ;;  %1780 = vmatprep.mubr.bf16.mxu0 %v2233_v44  ;;  %v2870_v56 = vld [vmem:[%s3489_s0 + $0x118] sm:$0xff]   ;;  %v2874_v59 = vld [vmem:[%s3489_s0 + $0x120] sm:$0xff]   ;;  %v2881_v3 = vld [vmem:[%s3489_s0 + $0x1a8] sm:$0xff]  }
  0x15   :  { %2634 = vmatpush3.bf16.msra.mxu1 %v2840_v19  ;;  %2607 = vmatprep.subr.bf16.mxu0 %v2841_v20  ;;  %v2875_v60 = vld [vmem:[%s3489_s0 + $0x1a0] sm:$0xff]   ;;  %v2882_v5 = vld [vmem:[%s3491_s2 + $0x88] sm:$0xff]   ;;  %v2884_v7 = vld [vmem:[%s3489_s0 + $0x170] sm:$0xff]  }
  0x16   :  { %2635 = vmatprep.subr.bf16.mxu1 %v2842_v21  ;;  %v2878_v63 = vld [vmem:[%s3491_s2 + $0x80] sm:$0xff]   ;;  %v2883_v6 = vld [vmem:[%s3491_s2 + $0xc8] sm:$0xff]   ;;  %v2885_v10 = vld [vmem:[%s3489_s0 + $0x1f0] sm:$0xff]  }
  0x17   :  { %v2879_v0 = vld [vmem:[%s3491_s2 + $0xc0] sm:$0xff]   ;;  %v2251_v8 = vcombine.high %v2882_v5, %v2883_v6  ;;  %v2250_v9 = vcombine.low %v2882_v5, %v2883_v6  ;;  %v2886_v11 = vld [vmem:[%s3489_s0 + $0x130] sm:$0xff]   ;;  %v2888_v13 = vld [vmem:[%s3489_s0 + $0x178] sm:$0xff]  }
  0x18   :  { %2608 = vmatpush3.bf16.msra.mxu0 %v2843_v22  ;;  %v2249_v2 = vcombine.high %v2878_v63, %v2879_v0  ;;  %v2248_v4 = vcombine.low %v2878_v63, %v2879_v0  ;;  %v2887_v12 = vld [vmem:[%s3489_s0 + $0x1b0] sm:$0xff]   ;;  %v2889_v14 = vld [vmem:[%s3489_s0 + $0x1f8] sm:$0xff]   ;;  %v2903_v32 = vld [vmem:[%s3489_s0 + $0x288] sm:$0xff]  }
  0x19   :  { %2636 = vmatpush3.bf16.msra.mxu1 %v2844_v23  ;;  %2609 = vmatprep.subr.bf16.mxu0 %v2845_v24  ;;  %v2890_v15 = vld [vmem:[%s3489_s0 + $0x138] sm:$0xff]   ;;  %v2892_v17 = vld [vmem:[%s3491_s2 + $0x10] sm:$0xff]   ;;  %v2896_v23 = vld [vmem:[%s3489_s0 + $0x240] sm:$0xff]  }
  0x1a   :  { %2637 = vmatprep.subr.bf16.mxu1 %v2846_v25  ;;  %v2891_v16 = vld [vmem:[%s3489_s0 + $0x1b8] sm:$0xff]   ;;  %v2893_v18 = vld [vmem:[%s3491_s2 + $0x50] sm:$0xff]   ;;  %v2935_v6 = vld [vmem:[%s3491_s2 + $0x68] sm:$0xff]  }
  0x1b   :  { %v2894_v19 = vld [vmem:[%s3491_s2 + $0x18] sm:$0xff]   ;;  %v2236_v20 = vcombine.low %v2892_v17, %v2893_v18  ;;  %v2237_v21 = vcombine.high %v2892_v17, %v2893_v18  ;;  %v2904_v33 = vld [vmem:[%s3491_s2 + $0x90] sm:$0xff]   ;;  %v2944_v17 = vld [vmem:[%s3491_s2 + $0xa0] sm:$0xff]  }
  0x1c   :  { %2610 = vmatpush3.bf16.msra.mxu0 %v2847_v26  ;;  %v2895_v22 = vld [vmem:[%s3491_s2 + $0x58] sm:$0xff]   ;;  %v2897_v26 = vld [vmem:[%s3489_s0 + $0x2c0] sm:$0xff]   ;;  %v2905_v34 = vld [vmem:[%s3491_s2 + $0xd0] sm:$0xff]  }
  0x1d   :  { %2638 = vmatpush3.bf16.msra.mxu1 %v2848_v27  ;;  %2611 = vmatprep.subr.bf16.mxu0 %v2849_v28  ;;  %v2238_v24 = vcombine.low %v2894_v19, %v2895_v22  ;;  %v2239_v25 = vcombine.high %v2894_v19, %v2895_v22  ;;  %v2898_v27 = vld [vmem:[%s3489_s0 + $0x200] sm:$0xff]   ;;  %v2906_v35 = vld [vmem:[%s3489_s0 + $0x250] sm:$0xff]   ;;  %v2930_v63 = vld [vmem:[%s3489_s0 + $0x238] sm:$0xff]  }
  0x1e   :  { %2639 = vmatprep.subr.bf16.mxu1 %v2850_v29  ;;  %v2899_v28 = vld [vmem:[%s3489_s0 + $0x280] sm:$0xff]   ;;  %v2900_v29 = vld [vmem:[%s3489_s0 + $0x248] sm:$0xff]   ;;  %v2907_v38 = vld [vmem:[%s3489_s0 + $0x2d0] sm:$0xff]  }
  0x1f   :  { %v2910_v41 = vld [vmem:[%s3489_s0 + $0x210] sm:$0xff]   ;;  %v2931_v0 = vld [vmem:[%s3489_s0 + $0x2b8] sm:$0xff]   ;;  %v2945_v18 = vld [vmem:[%s3491_s2 + $0xe0] sm:$0xff]  }
  0x20   :  { %2612 = vmatpush3.bf16.msra.mxu0 %v2851_v30  ;;  %v2901_v30 = vld [vmem:[%s3489_s0 + $0x2c8] sm:$0xff]   ;;  %v2946_v19 = vld [vmem:[%s3489_s0 + $0x350] sm:$0xff]  }
  0x21   :  { %2640 = vmatpush3.bf16.msra.mxu1 %v2852_v31  ;;  %2653 = vmatprep.subr.bf16.mxu0 %v2856_v36  ;;  %v2902_v31 = vld [vmem:[%s3489_s0 + $0x208] sm:$0xff]   ;;  %v2253_v36 = vcombine.high %v2904_v33, %v2905_v34  ;;  %v2947_v22 = vld [vmem:[%s3489_s0 + $0x3d0] sm:$0xff]  }
  0x22   :  { %2681 = vmatprep.subr.bf16.mxu1 %v2857_v39  ;;  %v2908_v39 = vld [vmem:[%s3491_s2 + $0x98] sm:$0xff]  }
  0x23   :  { %1781 = vmatmul.mubr.bf16.vlgmr.msra.gmra.mrb[0].mxu0 %v2232_v43  ;;  %v2911_v43 = vld [vmem:[%s3489_s0 + $0x290] sm:$0xff]  }
  0x24   :  { %1830 = vmatmul.mubr.bf16.vlgmr.msra.gmra.mrb[0].mxu1 %v2234_v37  ;;  %2654 = vmatpush3.bf16.msra.mxu0 %v2858_v42  ;;  %v2252_v37 = vcombine.low %v2904_v33, %v2905_v34  ;;  %v2956_v33 = vld [vmem:[%s3489_s0 + $0x360] sm:$0xff]  }
  0x25   :  { %2682 = vmatpush3.bf16.msra.mxu1 %v2859_v40  ;;  %2655 = vmatprep.subr.bf16.mxu0 %v2860_v46  ;;  %v2909_v40 = vld [vmem:[%s3491_s2 + $0xd8] sm:$0xff]   ;;  %v2957_v34 = vld [vmem:[%s3489_s0 + $0x3e0] sm:$0xff]  }
  0x26   :  { %2683 = vmatprep.subr.bf16.mxu1 %v2861_v45  ;;  %1788 = vmatprep.mubr.bf16.mxu0 %v2249_v2  ;;  %v2255_v42 = vcombine.high %v2908_v39, %v2909_v40  ;;  %v2254_v44 = vcombine.low %v2908_v39, %v2909_v40  ;;  %v2912_v45 = vld [vmem:[%s3489_s0 + $0x258] sm:$0xff]   ;;  %v2933_v2 = vld [vmem:[%s3491_s2 + $0x60] sm:$0xff]   ;;  %v2962_v39 = vld [vmem:[%s3489_s0 + $0x328] sm:$0xff]  }
  0x27   :  { %1837 = vmatprep.mubr.bf16.mxu1 %v2251_v8  ;;  %v2913_v46 = vld [vmem:[%s3489_s0 + $0x2d8] sm:$0xff]   ;;  %v2963_v40 = vld [vmem:[%s3489_s0 + $0x3a8] sm:$0xff]  }
  0x28   :  { %2656 = vmatpush3.bf16.msra.mxu0 %v2862_v48  ;;  %v2915_v48 = vld [vmem:[%s3489_s0 + $0x298] sm:$0xff]  }
  0x29   :  { %2684 = vmatpush3.bf16.msra.mxu1 %v2863_v47  ;;  %2657 = vmatprep.subr.bf16.mxu0 %v2864_v50  ;;  %v2914_v47 = vld [vmem:[%s3489_s0 + $0x218] sm:$0xff]   ;;  %v2917_v50 = vld [vmem:[%s3489_s0 + $0x2e0] sm:$0xff]  }
  0x2a   :  { %2685 = vmatprep.subr.bf16.mxu1 %v2865_v49  ;;  %v2916_v49 = vld [vmem:[%s3489_s0 + $0x260] sm:$0xff]  }
  0x2b   :  { %1789 = vmatmul.mubr.bf16.gmra.mrb[4].mxu0 %v2248_v4 }
  0x2c   :  { %2658 = vmatpush3.bf16.msra.mxu0 %v2866_v52  ;;  %1838 = vmatmul.mubr.bf16.gmra.mrb[4].mxu1 %v2250_v9  ;;  %v2919_v52 = vld [vmem:[%s3489_s0 + $0x2a0] sm:$0xff]  }
  0x2d   :  { %2686 = vmatpush3.bf16.msra.mxu1 %v2867_v51  ;;  %2659 = vmatprep.subr.bf16.mxu0 %v2868_v54  ;;  %v2918_v51 = vld [vmem:[%s3489_s0 + $0x220] sm:$0xff]   ;;  %v2921_v54 = vld [vmem:[%s3489_s0 + $0x2e8] sm:$0xff]  }
  0x2e   :  { %2687 = vmatprep.subr.bf16.mxu1 %v2869_v53  ;;  %1878 = vmatprep.mubr.bf16.mxu0 %v2237_v21  ;;  %v2920_v53 = vld [vmem:[%s3489_s0 + $0x268] sm:$0xff]   ;;  %v2256_v21 = vcombine.low %v2944_v17, %v2945_v18 }
  0x2f   :  { %1927 = vmatprep.mubr.bf16.mxu1 %v2239_v25  ;;  %v2950_v25 = vld [vmem:[%s3489_s0 + $0x310] sm:$0xff]  }
  0x30   :  { %2660 = vmatpush3.bf16.msra.mxu0 %v2870_v56  ;;  %v2923_v56 = vld [vmem:[%s3489_s0 + $0x2a8] sm:$0xff]  }
  0x31   :  { %2688 = vmatpush3.bf16.msra.mxu1 %v2871_v55  ;;  %2661 = vmatprep.subr.bf16.mxu0 %v2872_v58  ;;  %v2922_v55 = vld [vmem:[%s3489_s0 + $0x228] sm:$0xff]   ;;  %v2925_v58 = vld [vmem:[%s3489_s0 + $0x2f0] sm:$0xff]  }
  0x32   :  { %2689 = vmatprep.subr.bf16.mxu1 %v2873_v57  ;;  %v2924_v57 = vld [vmem:[%s3489_s0 + $0x270] sm:$0xff]  }
  0x34   :  { %2662 = vmatpush3.bf16.msra.mxu0 %v2874_v59  ;;  %v2926_v59 = vld [vmem:[%s3489_s0 + $0x230] sm:$0xff]  }
  0x35   :  { %2690 = vmatpush3.bf16.msra.mxu1 %v2875_v60  ;;  %2663 = vmatprep.subr.bf16.mxu0 %v2876_v61  ;;  %v2927_v60 = vld [vmem:[%s3489_s0 + $0x2b0] sm:$0xff]   ;;  %v2928_v61 = vld [vmem:[%s3489_s0 + $0x278] sm:$0xff]  }
  0x36   :  { %2691 = vmatprep.subr.bf16.mxu1 %v2877_v62  ;;  %v2929_v62 = vld [vmem:[%s3489_s0 + $0x2f8] sm:$0xff]  }
  0x38   :  { %2664 = vmatpush3.bf16.msra.mxu0 %v2880_v1  ;;  %v2932_v1 = vld [vmem:[%s3491_s2 + $0x20] sm:$0xff]  }
  0x39   :  { %2692 = vmatpush3.bf16.msra.mxu1 %v2881_v3  ;;  %2665 = vmatprep.subr.bf16.mxu0 %v2884_v7  ;;  %v2934_v3 = vld [vmem:[%s3491_s2 + $0x28] sm:$0xff]   ;;  %v2240_v4 = vcombine.low %v2932_v1, %v2933_v2  ;;  %v2241_v5 = vcombine.high %v2932_v1, %v2933_v2  ;;  %v2936_v7 = vld [vmem:[%s3489_s0 + $0x340] sm:$0xff]  }
  0x3a   :  { %2693 = vmatprep.subr.bf16.mxu1 %v2885_v10  ;;  %v2242_v8 = vcombine.low %v2934_v3, %v2935_v6  ;;  %v2243_v9 = vcombine.high %v2934_v3, %v2935_v6  ;;  %v2937_v10 = vld [vmem:[%s3489_s0 + $0x3c0] sm:$0xff]  }
  0x3c   :  { %2666 = vmatpush3.bf16.msra.mxu0 %v2886_v11  ;;  %v2938_v11 = vld [vmem:[%s3489_s0 + $0x300] sm:$0xff]  }
  0x3d   :  { %2694 = vmatpush3.bf16.msra.mxu1 %v2887_v12  ;;  %2667 = vmatprep.subr.bf16.mxu0 %v2888_v13  ;;  %v2939_v12 = vld [vmem:[%s3489_s0 + $0x380] sm:$0xff]   ;;  %v2940_v13 = vld [vmem:[%s3489_s0 + $0x348] sm:$0xff]  }
  0x3e   :  { %2695 = vmatprep.subr.bf16.mxu1 %v2889_v14  ;;  %v2941_v14 = vld [vmem:[%s3489_s0 + $0x3c8] sm:$0xff]  }
  0x40   :  { %2668 = vmatpush3.bf16.msra.mxu0 %v2890_v15  ;;  %v2942_v15 = vld [vmem:[%s3489_s0 + $0x308] sm:$0xff]  }
  0x41   :  { %2696 = vmatpush3.bf16.msra.mxu1 %v2891_v16  ;;  %2709 = vmatprep.subr.bf16.mxu0 %v2896_v23  ;;  %v2943_v16 = vld [vmem:[%s3489_s0 + $0x388] sm:$0xff]  }
  0x42   :  { %2737 = vmatprep.subr.bf16.mxu1 %v2897_v26  ;;  %v2948_v23 = vld [vmem:[%s3491_s2 + $0xa8] sm:$0xff]  }
  0x43   :  { %1879 = vmatmul.mubr.bf16.vlgmr.msra.gmra.mrb[8].mxu0 %v2236_v20  ;;  %v2257_v20 = vcombine.high %v2944_v17, %v2945_v18 }
  0x44   :  { %1928 = vmatmul.mubr.bf16.vlgmr.msra.gmra.mrb[8].mxu1 %v2238_v24  ;;  %2710 = vmatpush3.bf16.msra.mxu0 %v2898_v27  ;;  %v2949_v24 = vld [vmem:[%s3491_s2 + $0xe8] sm:$0xff]   ;;  %v2951_v27 = vld [vmem:[%s3489_s0 + $0x390] sm:$0xff]  }
  0x45   :  { %2738 = vmatpush3.bf16.msra.mxu1 %v2899_v28  ;;  %2711 = vmatprep.subr.bf16.mxu0 %v2900_v29  ;;  %v2259_v26 = vcombine.high %v2948_v23, %v2949_v24  ;;  %v2258_v28 = vcombine.low %v2948_v23, %v2949_v24  ;;  %v2952_v29 = vld [vmem:[%s3489_s0 + $0x358] sm:$0xff]  }
  0x46   :  { %2739 = vmatprep.subr.bf16.mxu1 %v2901_v30  ;;  %1886 = vmatprep.mubr.bf16.mxu0 %v2253_v36  ;;  %v2953_v30 = vld [vmem:[%s3489_s0 + $0x3d8] sm:$0xff]   ;;  %v2959_v36 = vld [vmem:[%s3489_s0 + $0x3a0] sm:$0xff]  }
  0x47   :  { %1935 = vmatprep.mubr.bf16.mxu1 %v2255_v42  ;;  %v2965_v42 = vld [vmem:[%s3489_s0 + $0x3f0] sm:$0xff]  }
  0x48   :  { %2712 = vmatpush3.bf16.msra.mxu0 %v2902_v31  ;;  %v2954_v31 = vld [vmem:[%s3489_s0 + $0x318] sm:$0xff]  }
  0x49   :  { %2740 = vmatpush3.bf16.msra.mxu1 %v2903_v32  ;;  %2713 = vmatprep.subr.bf16.mxu0 %v2906_v35  ;;  %v2955_v32 = vld [vmem:[%s3489_s0 + $0x398] sm:$0xff]   ;;  %v2958_v35 = vld [vmem:[%s3489_s0 + $0x320] sm:$0xff]  }
  0x4a   :  { %2741 = vmatprep.subr.bf16.mxu1 %v2907_v38  ;;  %v2961_v38 = vld [vmem:[%s3489_s0 + $0x3e8] sm:$0xff]  }
  0x4b   :  { %1887 = vmatmul.mubr.bf16.gmra.mrb[12].mxu0 %v2252_v37  ;;  %v2960_v37 = vld [vmem:[%s3489_s0 + $0x368] sm:$0xff]  }
  0x4c   :  { %2714 = vmatpush3.bf16.msra.mxu0 %v2910_v41  ;;  %1936 = vmatmul.mubr.bf16.gmra.mrb[12].mxu1 %v2254_v44  ;;  %v2964_v41 = vld [vmem:[%s3489_s0 + $0x370] sm:$0xff]  }
  0x4d   :  { %2742 = vmatpush3.bf16.msra.mxu1 %v2911_v43  ;;  %2715 = vmatprep.subr.bf16.mxu0 %v2912_v45  ;;  %v2966_v43 = vld [vmem:[%s3489_s0 + $0x330] sm:$0xff]   ;;  %v2968_v45 = vld [vmem:[%s3489_s0 + $0x378] sm:$0xff]  }
  0x4e   :  { %2743 = vmatprep.subr.bf16.mxu1 %v2913_v46  ;;  %1976 = vmatprep.mubr.bf16.mxu0 %v2241_v5  ;;  %v2967_v44 = vld [vmem:[%s3489_s0 + $0x3b0] sm:$0xff]   ;;  %v2969_v46 = vld [vmem:[%s3489_s0 + $0x3f8] sm:$0xff]  }
  0x4f   :  { %2025 = vmatprep.mubr.bf16.mxu1 %v2243_v9 }
  0x50   :  { %2716 = vmatpush3.bf16.msra.mxu0 %v2914_v47  ;;  %v2970_v47 = vld [vmem:[%s3489_s0 + $0x338] sm:$0xff]  }
  0x51   :  { %2744 = vmatpush3.bf16.msra.mxu1 %v2915_v48  ;;  %2717 = vmatprep.subr.bf16.mxu0 %v2916_v49  ;;  %v2971_v48 = vld [vmem:[%s3489_s0 + $0x3b8] sm:$0xff]   ;;  %v2972_v49 = vld [vmem:[%s3491_s2 + $0x30] sm:$0xff]  }
  0x52   :  { %2745 = vmatprep.subr.bf16.mxu1 %v2917_v50  ;;  %v2973_v50 = vld [vmem:[%s3491_s2 + $0x70] sm:$0xff]  }
  0x54   :  { %2718 = vmatpush3.bf16.msra.mxu0 %v2918_v51  ;;  %v2974_v51 = vld [vmem:[%s3491_s2 + $0x38] sm:$0xff]  }
  0x55   :  { %2746 = vmatpush3.bf16.msra.mxu1 %v2919_v52  ;;  %2719 = vmatprep.subr.bf16.mxu0 %v2920_v53  ;;  %v2244_v52 = vcombine.low %v2972_v49, %v2973_v50  ;;  %v2245_v53 = vcombine.high %v2972_v49, %v2973_v50 }
  0x56   :  { %2747 = vmatprep.subr.bf16.mxu1 %v2921_v54  ;;  %v2975_v54 = vld [vmem:[%s3491_s2 + $0x78] sm:$0xff]  }
  0x58   :  { %2720 = vmatpush3.bf16.msra.mxu0 %v2922_v55  ;;  %v2976_v55 = vld [vmem:[%s3491_s2 + $0xb0] sm:$0xff]  }
  0x59   :  { %2748 = vmatpush3.bf16.msra.mxu1 %v2923_v56  ;;  %2721 = vmatprep.subr.bf16.mxu0 %v2924_v57  ;;  %v2246_v56 = vcombine.low %v2974_v51, %v2975_v54  ;;  %v2247_v57 = vcombine.high %v2974_v51, %v2975_v54 }
  0x5a   :  { %2749 = vmatprep.subr.bf16.mxu1 %v2925_v58  ;;  %v2977_v58 = vld [vmem:[%s3491_s2 + $0xf0] sm:$0xff]  }
  0x5c   :  { %2722 = vmatpush3.bf16.msra.mxu0 %v2926_v59  ;;  %v2978_v59 = vld [vmem:[%s3491_s2 + $0xb8] sm:$0xff]  }
  0x5d   :  { %2750 = vmatpush3.bf16.msra.mxu1 %v2927_v60  ;;  %2723 = vmatprep.subr.bf16.mxu0 %v2928_v61  ;;  %v2261_v60 = vcombine.high %v2976_v55, %v2977_v58  ;;  %v2979_v61 = vld [vmem:[%s3491_s2 + $0xf8] sm:$0xff]  }
  0x5e   :  { %2751 = vmatprep.subr.bf16.mxu1 %v2929_v62  ;;  %v2263_v62 = vcombine.high %v2978_v59, %v2979_v61 }
  0x60   :  { %2724 = vmatpush3.bf16.msra.mxu0 %v2930_v63  ;;  %v2260_v63 = vcombine.low %v2976_v55, %v2977_v58 }
  0x61   :  { %2752 = vmatpush3.bf16.msra.mxu1 %v2931_v0  ;;  %2765 = vmatprep.subr.bf16.mxu0 %v2936_v7  ;;  %v2262_v0 = vcombine.low %v2978_v59, %v2979_v61 }
  0x62   :  { %2793 = vmatprep.subr.bf16.mxu1 %v2937_v10 }
  0x63   :  { %1977 = vmatmul.mubr.bf16.vlgmr.msra.gmra.mrb[16].mxu0 %v2240_v4 }
  0x64   :  { %2026 = vmatmul.mubr.bf16.vlgmr.msra.gmra.mrb[16].mxu1 %v2242_v8  ;;  %2766 = vmatpush3.bf16.msra.mxu0 %v2938_v11  ;;  %v2231_v8 = vld [vmem:[%s3490_s1] ss:$0 sm:$0xff] }
  0x65   :  { %2794 = vmatpush3.bf16.msra.mxu1 %v2939_v12  ;;  %2767 = vmatprep.subr.bf16.mxu0 %v2940_v13 }
  0x66   :  { %2795 = vmatprep.subr.bf16.mxu1 %v2941_v14  ;;  %1984 = vmatprep.mubr.bf16.mxu0 %v2257_v20 }
  0x67   :  { %2033 = vmatprep.mubr.bf16.mxu1 %v2259_v26 }
  0x68   :  { %2768 = vmatpush3.bf16.msra.mxu0 %v2942_v15 }
  0x69   :  { %2796 = vmatpush3.bf16.msra.mxu1 %v2943_v16  ;;  %2769 = vmatprep.subr.bf16.mxu0 %v2946_v19 }
  0x6a   :  { %2797 = vmatprep.subr.bf16.mxu1 %v2947_v22 }
  0x6b   :  { %1985 = vmatmul.mubr.bf16.gmra.mrb[20].mxu0 %v2256_v21 }
  0x6c   :  { %2770 = vmatpush3.bf16.msra.mxu0 %v2950_v25  ;;  %2034 = vmatmul.mubr.bf16.gmra.mrb[20].mxu1 %v2258_v28 }
  0x6d   :  { %2798 = vmatpush3.bf16.msra.mxu1 %v2951_v27  ;;  %2771 = vmatprep.subr.bf16.mxu0 %v2952_v29 }
  0x6e   :  { %2799 = vmatprep.subr.bf16.mxu1 %v2953_v30  ;;  %2074 = vmatprep.mubr.bf16.mxu0 %v2245_v53 }
  0x6f   :  { %2123 = vmatprep.mubr.bf16.mxu1 %v2247_v57 }
  0x70   :  { %2772 = vmatpush3.bf16.msra.mxu0 %v2954_v31 }
  0x71   :  { %2800 = vmatpush3.bf16.msra.mxu1 %v2955_v32  ;;  %2773 = vmatprep.subr.bf16.mxu0 %v2956_v33 }
  0x72   :  { %2801 = vmatprep.subr.bf16.mxu1 %v2957_v34 }
  0x74   :  { %2774 = vmatpush3.bf16.msra.mxu0 %v2958_v35 }
  0x75   :  { %2802 = vmatpush3.bf16.msra.mxu1 %v2959_v36  ;;  %2775 = vmatprep.subr.bf16.mxu0 %v2960_v37 }
  0x76   :  { %2803 = vmatprep.subr.bf16.mxu1 %v2961_v38 }
  0x78   :  { %2776 = vmatpush3.bf16.msra.mxu0 %v2962_v39 }
  0x79   :  { %2804 = vmatpush3.bf16.msra.mxu1 %v2963_v40  ;;  %2777 = vmatprep.subr.bf16.mxu0 %v2964_v41 }
  0x7a   :  { %2805 = vmatprep.subr.bf16.mxu1 %v2965_v42 }
  0x7c   :  { %2778 = vmatpush3.bf16.msra.mxu0 %v2966_v43 }
  0x7d   :  { %2806 = vmatpush3.bf16.msra.mxu1 %v2967_v44  ;;  %2779 = vmatprep.subr.bf16.mxu0 %v2968_v45 }
  0x7e   :  { %2807 = vmatprep.subr.bf16.mxu1 %v2969_v46 }
  0x80   :  { %2780 = vmatpush3.bf16.msra.mxu0 %v2970_v47 }
  0x81   :  { %2808 = vmatpush3.bf16.msra.mxu1 %v2971_v48 }
  0x83   :  { %2075 = vmatmul.mubr.bf16.vlgmr.msra.gmra.mrb[24].mxu0 %v2244_v52 }
  0x84   :  { %2124 = vmatmul.mubr.bf16.vlgmr.msra.gmra.mrb[24].mxu1 %v2246_v56  ;;  %2082 = vmatprep.mubr.bf16.mxu0 %v2261_v60 }
  0x85   :  { %2131 = vmatprep.mubr.bf16.mxu1 %v2263_v62 }
  0x8b   :  { %2083 = vmatmul.mubr.bf16.gmra.mrb[28].mxu0 %v2260_v63 }
  0x8c   :  { %2132 = vmatmul.mubr.bf16.gmra.mrb[28].mxu1 %v2262_v0 }
  0xf6   :  { %v2613_v6 = vpop.f32.mrb[0].mxu0 }
  0xf7   :  { %v2641_v1 = vpop.f32.mrb[0].mxu1  ;;  %v2614_v9 = vpop.f32.mrb[1].mxu0 }
  0xf8   :  { %v2642_v2 = vpop.f32.mrb[1].mxu1  ;;  %v2615_v10 = vadd.f32 %v2614_v9, %v2613_v6  ;;  %v2616_v11 = vpop.f32.mrb[2].mxu0 }
  0xf9   :  { %v2643_v3 = vadd.f32 %v2642_v2, %v2641_v1  ;;  %v2644_v4 = vpop.f32.mrb[2].mxu1  ;;  %v2617_v12 = vpop.f32.mrb[3].mxu0 }
  0xfa   :  { %v2645_v5 = vpop.f32.mrb[3].mxu1  ;;  %v1783_v13 = vadd.f32 %v2615_v10, %v2231_v8  ;;  %v2618_v14 = vadd.f32 %v2617_v12, %v2616_v11 }
  0xfb   :  { %v2646_v7 = vadd.f32 %v2645_v5, %v2644_v4 }
  0xfc   :  { %v1832_v15 = vadd.f32 %v2643_v3, %v1783_v13  ;;  %v1786_v16 = vadd.f32 %v2618_v14, %v2231_v8 }
  0xfe   :  { %v1835_v17 = vadd.f32 %v2646_v7, %v1786_v16  ;;  %v2619_v18 = vpop.f32.mrb[4].mxu0 }
  0xff   :  { %v2620_v19 = vpop.f32.mrb[5].mxu0  ;;  %v2647_v24 = vpop.f32.mrb[4].mxu1 }
 0x100   :  { %v2621_v20 = vadd.f32 %v2620_v19, %v2619_v18  ;;  %v2622_v21 = vpop.f32.mrb[6].mxu0  ;;  %v2648_v26 = vpop.f32.mrb[5].mxu1 }
 0x101   :  { %v2623_v22 = vpop.f32.mrb[7].mxu0  ;;  %v2649_v28 = vadd.f32 %v2648_v26, %v2647_v24  ;;  %v2650_v29 = vpop.f32.mrb[6].mxu1 }
 0x102   :  { %v1791_v23 = vadd.f32 %v2621_v20, %v2231_v8  ;;  %v2624_v25 = vadd.f32 %v2623_v22, %v2622_v21  ;;  %v2651_v30 = vpop.f32.mrb[7].mxu1 }
 0x103   :  { %v2652_v32 = vadd.f32 %v2651_v30, %v2650_v29 }
 0x104   :  { %v1794_v27 = vadd.f32 %v2624_v25, %v2231_v8  ;;  %v1840_v31 = vadd.f32 %v2649_v28, %v1791_v23 }
 0x106   :  { %v1843_v33 = vadd.f32 %v2652_v32, %v1794_v27 }
 0x116   :  { %v2669_v34 = vpop.f32.mrb[8].mxu0 }
 0x117   :  { %v2670_v35 = vpop.f32.mrb[9].mxu0  ;;  %v2697_v36 = vpop.f32.mrb[8].mxu1 }
 0x118   :  { %v2671_v37 = vadd.f32 %v2670_v35, %v2669_v34  ;;  %v2672_v38 = vpop.f32.mrb[10].mxu0  ;;  %v2698_v39 = vpop.f32.mrb[9].mxu1 }
 0x119   :  { %v2673_v40 = vpop.f32.mrb[11].mxu0  ;;  %v2699_v42 = vadd.f32 %v2698_v39, %v2697_v36  ;;  %v2700_v43 = vpop.f32.mrb[10].mxu1 }
 0x11a   :  { %v1881_v41 = vadd.f32 %v2671_v37, %v1832_v15  ;;  %v2674_v44 = vadd.f32 %v2673_v40, %v2672_v38  ;;  %v2701_v45 = vpop.f32.mrb[11].mxu1 }
 0x11b   :  { %v2702_v48 = vadd.f32 %v2701_v45, %v2700_v43 }
 0x11c   :  { %v1930_v46 = vadd.f32 %v2699_v42, %v1881_v41  ;;  %v1884_v47 = vadd.f32 %v2674_v44, %v1835_v17 }
 0x11e   :  { %v1933_v49 = vadd.f32 %v2702_v48, %v1884_v47  ;;  %v2675_v50 = vpop.f32.mrb[12].mxu0 }
 0x11f   :  { %v2676_v51 = vpop.f32.mrb[13].mxu0  ;;  %v2703_v56 = vpop.f32.mrb[12].mxu1 }
 0x120   :  { %v2677_v52 = vadd.f32 %v2676_v51, %v2675_v50  ;;  %v2678_v53 = vpop.f32.mrb[14].mxu0  ;;  %v2704_v58 = vpop.f32.mrb[13].mxu1 }
 0x121   :  { %v2679_v54 = vpop.f32.mrb[15].mxu0  ;;  %v2705_v60 = vadd.f32 %v2704_v58, %v2703_v56  ;;  %v2706_v61 = vpop.f32.mrb[14].mxu1 }
 0x122   :  { %v1889_v55 = vadd.f32 %v2677_v52, %v1840_v31  ;;  %v2680_v57 = vadd.f32 %v2679_v54, %v2678_v53  ;;  %v2707_v62 = vpop.f32.mrb[15].mxu1 }
 0x123   :  { %v2708_v0 = vadd.f32 %v2707_v62, %v2706_v61 }
 0x124   :  { %v1892_v59 = vadd.f32 %v2680_v57, %v1843_v33  ;;  %v1938_v63 = vadd.f32 %v2705_v60, %v1889_v55 }
 0x126   :  { %v1941_v1 = vadd.f32 %v2708_v0, %v1892_v59 }
 0x136   :  { %v2725_v2 = vpop.f32.mrb[16].mxu0 }
 0x137   :  { %v2726_v3 = vpop.f32.mrb[17].mxu0  ;;  %v2753_v4 = vpop.f32.mrb[16].mxu1 }
 0x138   :  { %v2727_v5 = vadd.f32 %v2726_v3, %v2725_v2  ;;  %v2728_v6 = vpop.f32.mrb[18].mxu0  ;;  %v2754_v7 = vpop.f32.mrb[17].mxu1 }
 0x139   :  { %v2729_v8 = vpop.f32.mrb[19].mxu0  ;;  %v2755_v10 = vadd.f32 %v2754_v7, %v2753_v4  ;;  %v2756_v11 = vpop.f32.mrb[18].mxu1 }
 0x13a   :  { %v1979_v9 = vadd.f32 %v2727_v5, %v1930_v46  ;;  %v2730_v12 = vadd.f32 %v2729_v8, %v2728_v6  ;;  %v2757_v13 = vpop.f32.mrb[19].mxu1 }
 0x13b   :  { %v2758_v16 = vadd.f32 %v2757_v13, %v2756_v11 }
 0x13c   :  { %v2028_v14 = vadd.f32 %v2755_v10, %v1979_v9  ;;  %v1982_v15 = vadd.f32 %v2730_v12, %v1933_v49 }
 0x13e   :  { %v2031_v17 = vadd.f32 %v2758_v16, %v1982_v15  ;;  %v2731_v18 = vpop.f32.mrb[20].mxu0 }
 0x13f   :  { %v2732_v19 = vpop.f32.mrb[21].mxu0  ;;  %v2759_v24 = vpop.f32.mrb[20].mxu1 }
 0x140   :  { %v2733_v20 = vadd.f32 %v2732_v19, %v2731_v18  ;;  %v2734_v21 = vpop.f32.mrb[22].mxu0  ;;  %v2760_v26 = vpop.f32.mrb[21].mxu1 }
 0x141   :  { %v2735_v22 = vpop.f32.mrb[23].mxu0  ;;  %v2761_v28 = vadd.f32 %v2760_v26, %v2759_v24  ;;  %v2762_v29 = vpop.f32.mrb[22].mxu1 }
 0x142   :  { %v1987_v23 = vadd.f32 %v2733_v20, %v1938_v63  ;;  %v2736_v25 = vadd.f32 %v2735_v22, %v2734_v21  ;;  %v2763_v30 = vpop.f32.mrb[23].mxu1 }
 0x143   :  { %v2764_v32 = vadd.f32 %v2763_v30, %v2762_v29 }
 0x144   :  { %v1990_v27 = vadd.f32 %v2736_v25, %v1941_v1  ;;  %v2036_v31 = vadd.f32 %v2761_v28, %v1987_v23 }
 0x146   :  { %v2039_v33 = vadd.f32 %v2764_v32, %v1990_v27 }
 0x156   :  { %v2781_v34 = vpop.f32.mrb[24].mxu0 }
 0x157   :  { %v2782_v35 = vpop.f32.mrb[25].mxu0  ;;  %v2809_v36 = vpop.f32.mrb[24].mxu1 }
 0x158   :  { %v2783_v37 = vadd.f32 %v2782_v35, %v2781_v34  ;;  %v2784_v38 = vpop.f32.mrb[26].mxu0  ;;  %v2810_v39 = vpop.f32.mrb[25].mxu1 }
 0x159   :  { %v2785_v40 = vpop.f32.mrb[27].mxu0  ;;  %v2811_v42 = vadd.f32 %v2810_v39, %v2809_v36  ;;  %v2812_v43 = vpop.f32.mrb[26].mxu1 }
 0x15a   :  { %v2077_v41 = vadd.f32 %v2783_v37, %v2028_v14  ;;  %v2786_v44 = vadd.f32 %v2785_v40, %v2784_v38  ;;  %v2813_v45 = vpop.f32.mrb[27].mxu1 }
 0x15b   :  { %v2814_v48 = vadd.f32 %v2813_v45, %v2812_v43 }
 0x15c   :  { %v2126_v46 = vadd.f32 %v2811_v42, %v2077_v41  ;;  %v2080_v47 = vadd.f32 %v2786_v44, %v2031_v17 }
 0x15e   :  { %v2129_v49 = vadd.f32 %v2814_v48, %v2080_v47  ;;  %v2787_v50 = vpop.f32.mrb[28].mxu0  ;;  %v2140_v52 = vmax.f32 %v2126_v46, 0.0 }
 0x15f   :  { %v2788_v51 = vpop.f32.mrb[29].mxu0  ;;  %v2815_v54 = vpop.f32.mrb[28].mxu1 }
 0x160   :  { %v2141_v53 = vmax.f32 %v2129_v49, 0.0  ;;  %v2789_v55 = vadd.f32 %v2788_v51, %v2787_v50  ;;  %v2790_v56 = vpop.f32.mrb[30].mxu0  ;;  %v2816_v57 = vpop.f32.mrb[29].mxu1 }
 0x161   :  { %v2791_v58 = vpop.f32.mrb[31].mxu0  ;;  %v2817_v61 = vadd.f32 %v2816_v57, %v2815_v54  ;;  %v2818_v62 = vpop.f32.mrb[30].mxu1 }
 0x162   :  { %v2558_v59 = vpack.c.bf16 %v2141_v53, %v2140_v52  ;;  %v2085_v60 = vadd.f32 %v2789_v55, %v2036_v31  ;;  %v2792_v63 = vadd.f32 %v2791_v58, %v2790_v56  ;;  %v2819_v0 = vpop.f32.mrb[31].mxu1 }
 0x163   :  { %v2820_v3 = vadd.f32 %v2819_v0, %v2818_v62 }
 0x164   :  { %2559 = vst [vmem:[%s3492_s3] sm:$0xff] %v2558_v59   ;;  %v2134_v1 = vadd.f32 %v2817_v61, %v2085_v60  ;;  %v2088_v2 = vadd.f32 %v2792_v63, %v2039_v33 }
 0x166   :  { %v2137_v4 = vadd.f32 %v2820_v3, %v2088_v2  ;;  %v2142_v5 = vmax.f32 %v2134_v1, 0.0 }
 0x168   :  { %v2143_v6 = vmax.f32 %v2137_v4, 0.0 }
 0x16a   :  { %v2563_v7 = vpack.c.bf16 %v2143_v6, %v2142_v5 }
 0x16c   :  { %2596 = vst [vmem:[%s3492_s3 + $0x8] sm:$0xff] %v2563_v7  }

// kernel: cvae_forward.16
= control target key start
LH: loop header
LB: loop body
LE: loop exit
PB: predicated region body
PF: predicated region fallthrough
CT: control target
= control target key end

     0   :  { %s2846_s0 = inlined_call_operand.vmem [shape: bf16[2048,128], index: 0, kind: input, shape index: {}]   ;;  %s2847_s1 = inlined_call_operand.vmem [shape: f32[1,128], index: 1, kind: input, shape index: {}]   ;;  %s2848_s2 = inlined_call_operand.vmem [shape: bf16[8,2048], index: 2, kind: input, shape index: {}]   ;;  %s2849_s3 = inlined_call_operand.<no memory space> [shape: bf16[], index: 3, kind: input, shape index: {}]   ;;  %s2850_s4 = inlined_call_operand.vmem [shape: bf16[16,128], index: 4, kind: output, shape index: {}]  }
   0x1   :  { %v9_v0 = vstv %s2849_s3 }
   0x2   :  { %v10_v1 = vunpack.i.l.bf16 %v9_v0 }
   0x3   :  { %v2253_v2 = vld [vmem:[%s2846_s0 + $0x40] sm:$0xff]   ;;  %v2257_v7 = vld [vmem:[%s2846_s0 + $0x48] sm:$0xff]   ;;  %v2261_v11 = vld [vmem:[%s2846_s0 + $0x50] sm:$0xff]  }
   0x4   :  { %v2420_v3 = vpack.c.bf16 %v10_v1, %v10_v1  ;;  %v2254_v4 = vld [vmem:[%s2846_s0 + $0xc0] sm:$0xff]   ;;  %2077 = vmatprep.subr.bf16.mxu0 %v2253_v2  ;;  %v2258_v8 = vld [vmem:[%s2846_s0 + $0xc8] sm:$0xff]   ;;  %v2262_v12 = vld [vmem:[%s2846_s0 + $0xd0] sm:$0xff]  }
   0x5   :  { %v2255_v5 = vld [vmem:[%s2846_s0] sm:$0xff]   ;;  %2099 = vmatprep.subr.bf16.mxu1 %v2254_v4  ;;  %v2259_v9 = vld [vmem:[%s2846_s0 + $0x8] sm:$0xff]   ;;  %v2263_v13 = vld [vmem:[%s2846_s0 + $0x10] sm:$0xff]  }
   0x6   :  { %2029 = vst [vmem:[#allocation7 + $0x40] sm:$0xff] %v2420_v3   ;;  %v2256_v6 = vld [vmem:[%s2846_s0 + $0x80] sm:$0xff]   ;;  %2078 = vmatpush3.bf16.msra.mxu0 %v2255_v5  ;;  %v2260_v10 = vld [vmem:[%s2846_s0 + $0x88] sm:$0xff]   ;;  %v2264_v14 = vld [vmem:[%s2846_s0 + $0x90] sm:$0xff]  }
   0x7   :  { %2100 = vmatpush3.bf16.msra.mxu1 %v2256_v6  ;;  %2079 = vmatprep.subr.bf16.mxu0 %v2257_v7  ;;  %v2265_v15 = vld [vmem:[%s2846_s0 + $0x58] sm:$0xff]   ;;  %v2269_v19 = vld [vmem:[%s2846_s0 + $0x60] sm:$0xff]   ;;  %v2273_v23 = vld [vmem:[%s2846_s0 + $0x68] sm:$0xff]  }
   0x8   :  { %2101 = vmatprep.subr.bf16.mxu1 %v2258_v8  ;;  %v2266_v16 = vld [vmem:[%s2846_s0 + $0xd8] sm:$0xff]   ;;  %v2270_v20 = vld [vmem:[%s2846_s0 + $0xe0] sm:$0xff]   ;;  %v2274_v24 = vld [vmem:[%s2846_s0 + $0xe8] sm:$0xff]  }
   0x9   :  { %v2267_v17 = vld [vmem:[%s2846_s0 + $0x18] sm:$0xff]   ;;  %v2271_v21 = vld [vmem:[%s2846_s0 + $0x20] sm:$0xff]   ;;  %v2275_v25 = vld [vmem:[%s2846_s0 + $0x28] sm:$0xff]  }
   0xa   :  { %2080 = vmatpush3.bf16.msra.mxu0 %v2259_v9  ;;  %v2268_v18 = vld [vmem:[%s2846_s0 + $0x98] sm:$0xff]   ;;  %v2272_v22 = vld [vmem:[%s2846_s0 + $0xa0] sm:$0xff]   ;;  %v2276_v26 = vld [vmem:[%s2846_s0 + $0xa8] sm:$0xff]  }
   0xb   :  { %2102 = vmatpush3.bf16.msra.mxu1 %v2260_v10  ;;  %2081 = vmatprep.subr.bf16.mxu0 %v2261_v11  ;;  %v2277_v27 = vld [vmem:[%s2846_s0 + $0x70] sm:$0xff]   ;;  %v2281_v31 = vld [vmem:[%s2846_s0 + $0x78] sm:$0xff]   ;;  %v29_v35 = vld [vmem:[%s2848_s2] sm:$0xff]  }
   0xc   :  { %2103 = vmatprep.subr.bf16.mxu1 %v2262_v12  ;;  %v2278_v28 = vld [vmem:[%s2846_s0 + $0xf0] sm:$0xff]   ;;  %v2282_v32 = vld [vmem:[%s2846_s0 + $0xf8] sm:$0xff]   ;;  %34 = vst [vmem:[#allocation7] sm:$0xff] %v29_v35   ;;  %v2285_v36 = vld [vmem:[%s2848_s2 + $0x8] sm:$0xff]  }
   0xd   :  { %v2279_v29 = vld [vmem:[%s2846_s0 + $0x30] sm:$0xff]   ;;  %v2283_v33 = vld [vmem:[%s2846_s0 + $0x38] sm:$0xff]   ;;  %v2286_v37 = vld [vmem:[%s2846_s0 + $0x140] sm:$0xff]   ;;  %v1844_v38 = vcombine.low %v2285_v36, %v2420_v3  ;;  %v1845_v39 = vcombine.high %v2285_v36, %v2420_v3 }
   0xe   :  { %2082 = vmatpush3.bf16.msra.mxu0 %v2263_v13  ;;  %v2280_v30 = vld [vmem:[%s2846_s0 + $0xb0] sm:$0xff]   ;;  %v2284_v34 = vld [vmem:[%s2846_s0 + $0xb8] sm:$0xff]   ;;  %v2287_v40 = vld [vmem:[%s2846_s0 + $0x1c0] sm:$0xff]  }
   0xf   :  { %2104 = vmatpush3.bf16.msra.mxu1 %v2264_v14  ;;  %2083 = vmatprep.subr.bf16.mxu0 %v2265_v15  ;;  %v2289_v41 = vld [vmem:[%s2846_s0 + $0x180] sm:$0xff]   ;;  %v2291_v42 = vld [vmem:[%s2846_s0 + $0x1c8] sm:$0xff]   ;;  %v2295_v49 = vld [vmem:[%s2846_s0 + $0x1d0] sm:$0xff]  }
  0x10   :  { %2105 = vmatprep.subr.bf16.mxu1 %v2266_v16  ;;  %1555 = vmatprep.mubr.bf16.mxu1 %v1845_v39  ;;  %v2288_v44 = vld [vmem:[%s2846_s0 + $0x100] sm:$0xff]   ;;  %v2293_v47 = vld [vmem:[%s2846_s0 + $0x188] sm:$0xff]   ;;  %v2297_v51 = vld [vmem:[%s2846_s0 + $0x190] sm:$0xff]  }
  0x11   :  { %v2290_v48 = vld [vmem:[%s2846_s0 + $0x148] sm:$0xff]   ;;  %v2294_v52 = vld [vmem:[%s2846_s0 + $0x150] sm:$0xff]   ;;  %v2299_v53 = vld [vmem:[%s2846_s0 + $0x1d8] sm:$0xff]  }
  0x12   :  { %2084 = vmatpush3.bf16.msra.mxu0 %v2267_v17  ;;  %v2292_v50 = vld [vmem:[%s2846_s0 + $0x108] sm:$0xff]   ;;  %v2296_v54 = vld [vmem:[%s2846_s0 + $0x110] sm:$0xff]   ;;  %v2301_v55 = vld [vmem:[%s2846_s0 + $0x198] sm:$0xff]  }
  0x13   :  { %2106 = vmatpush3.bf16.msra.mxu1 %v2268_v18  ;;  %2085 = vmatprep.subr.bf16.mxu0 %v2269_v19  ;;  %v355_v43 = vld [vmem:[#allocation7] sm:$0xff]  ;;  %v2298_v56 = vld [vmem:[%s2846_s0 + $0x158] sm:$0xff]   ;;  %v2307_v61 = vld [vmem:[%s2846_s0 + $0x1e8] sm:$0xff]  }
  0x14   :  { %2107 = vmatprep.subr.bf16.mxu1 %v2270_v20  ;;  %v1842_v45 = vcombine.low %v355_v43, %v2420_v3  ;;  %v1843_v46 = vcombine.high %v355_v43, %v2420_v3  ;;  %v2303_v57 = vld [vmem:[%s2846_s0 + $0x1e0] sm:$0xff]   ;;  %v2300_v58 = vld [vmem:[%s2846_s0 + $0x118] sm:$0xff]   ;;  %v2309_v63 = vld [vmem:[%s2846_s0 + $0x1a8] sm:$0xff]  }
  0x15   :  { %v2305_v59 = vld [vmem:[%s2846_s0 + $0x1a0] sm:$0xff]   ;;  %v2306_v0 = vld [vmem:[%s2846_s0 + $0x168] sm:$0xff]   ;;  %v2311_v1 = vld [vmem:[%s2846_s0 + $0x1f0] sm:$0xff]  }
  0x16   :  { %2086 = vmatpush3.bf16.msra.mxu0 %v2271_v21  ;;  %1514 = vmatprep.mubr.bf16.mxu0 %v1843_v46  ;;  %v2302_v60 = vld [vmem:[%s2846_s0 + $0x160] sm:$0xff]   ;;  %v2308_v2 = vld [vmem:[%s2846_s0 + $0x128] sm:$0xff]   ;;  %v2313_v4 = vld [vmem:[%s2846_s0 + $0x1b0] sm:$0xff]  }
  0x17   :  { %2108 = vmatpush3.bf16.msra.mxu1 %v2272_v22  ;;  %2087 = vmatprep.subr.bf16.mxu0 %v2273_v23  ;;  %v2304_v62 = vld [vmem:[%s2846_s0 + $0x120] sm:$0xff]   ;;  %v2310_v5 = vld [vmem:[%s2846_s0 + $0x170] sm:$0xff]   ;;  %v2315_v7 = vld [vmem:[%s2846_s0 + $0x1f8] sm:$0xff]  }
  0x18   :  { %2109 = vmatprep.subr.bf16.mxu1 %v2274_v24  ;;  %v2312_v6 = vld [vmem:[%s2846_s0 + $0x130] sm:$0xff]   ;;  %v2314_v8 = vld [vmem:[%s2846_s0 + $0x178] sm:$0xff]   ;;  %v2321_v16 = vld [vmem:[%s2846_s0 + $0x2c0] sm:$0xff]  }
  0x19   :  { %v2317_v9 = vld [vmem:[%s2846_s0 + $0x1b8] sm:$0xff]   ;;  %v2318_v10 = vld [vmem:[%s2848_s2 + $0x10] sm:$0xff]   ;;  %v2320_v17 = vld [vmem:[%s2846_s0 + $0x240] sm:$0xff]  }
  0x1a   :  { %2088 = vmatpush3.bf16.msra.mxu0 %v2275_v25  ;;  %v2319_v11 = vld [vmem:[%s2848_s2 + $0x18] sm:$0xff]   ;;  %v1847_v13 = vcombine.high %v2318_v10, %v2420_v3  ;;  %v2323_v18 = vld [vmem:[%s2846_s0 + $0x280] sm:$0xff]   ;;  %v1846_v19 = vcombine.low %v2318_v10, %v2420_v3  ;;  %v2325_v21 = vld [vmem:[%s2846_s0 + $0x2c8] sm:$0xff]  }
  0x1b   :  { %2110 = vmatpush3.bf16.msra.mxu1 %v2276_v26  ;;  %2089 = vmatprep.subr.bf16.mxu0 %v2277_v27  ;;  %v2316_v12 = vld [vmem:[%s2846_s0 + $0x138] sm:$0xff]   ;;  %v1848_v14 = vcombine.low %v2319_v11, %v2420_v3  ;;  %v1849_v15 = vcombine.high %v2319_v11, %v2420_v3  ;;  %v2322_v20 = vld [vmem:[%s2846_s0 + $0x200] sm:$0xff]   ;;  %v2324_v22 = vld [vmem:[%s2846_s0 + $0x248] sm:$0xff]  }
  0x1c   :  { %2111 = vmatprep.subr.bf16.mxu1 %v2278_v28  ;;  %v2327_v23 = vld [vmem:[%s2846_s0 + $0x288] sm:$0xff]   ;;  %v2329_v25 = vld [vmem:[%s2846_s0 + $0x2d0] sm:$0xff]   ;;  %v2339_v35 = vld [vmem:[%s2846_s0 + $0x2a0] sm:$0xff]  }
  0x1d   :  { %v2326_v24 = vld [vmem:[%s2846_s0 + $0x208] sm:$0xff]   ;;  %v2328_v26 = vld [vmem:[%s2846_s0 + $0x250] sm:$0xff]   ;;  %v2338_v36 = vld [vmem:[%s2846_s0 + $0x220] sm:$0xff]  }
  0x1e   :  { %2090 = vmatpush3.bf16.msra.mxu0 %v2279_v29  ;;  %v2331_v27 = vld [vmem:[%s2846_s0 + $0x290] sm:$0xff]   ;;  %v2333_v29 = vld [vmem:[%s2846_s0 + $0x2d8] sm:$0xff]   ;;  %v2343_v39 = vld [vmem:[%s2846_s0 + $0x2a8] sm:$0xff]  }
  0x1f   :  { %2112 = vmatpush3.bf16.msra.mxu1 %v2280_v30  ;;  %2091 = vmatprep.subr.bf16.mxu0 %v2281_v31  ;;  %v2330_v28 = vld [vmem:[%s2846_s0 + $0x210] sm:$0xff]   ;;  %v2332_v30 = vld [vmem:[%s2846_s0 + $0x258] sm:$0xff]   ;;  %v2373_v10 = vld [vmem:[%s2846_s0 + $0x3a0] sm:$0xff]  }
  0x20   :  { %2113 = vmatprep.subr.bf16.mxu1 %v2282_v32  ;;  %v2335_v31 = vld [vmem:[%s2846_s0 + $0x298] sm:$0xff]   ;;  %v2347_v43 = vld [vmem:[%s2846_s0 + $0x2b0] sm:$0xff]   ;;  %v2374_v11 = vld [vmem:[%s2846_s0 + $0x368] sm:$0xff]  }
  0x21   :  { %v2334_v32 = vld [vmem:[%s2846_s0 + $0x218] sm:$0xff]  }
  0x22   :  { %2092 = vmatpush3.bf16.msra.mxu0 %v2283_v33  ;;  %v2337_v33 = vld [vmem:[%s2846_s0 + $0x2e0] sm:$0xff]   ;;  %v2348_v46 = vld [vmem:[%s2846_s0 + $0x278] sm:$0xff]  }
  0x23   :  { %2114 = vmatpush3.bf16.msra.mxu1 %v2284_v34  ;;  %2121 = vmatprep.subr.bf16.mxu0 %v2286_v37  ;;  %v2336_v34 = vld [vmem:[%s2846_s0 + $0x260] sm:$0xff]   ;;  %v2341_v37 = vld [vmem:[%s2846_s0 + $0x2e8] sm:$0xff]  }
  0x24   :  { %2143 = vmatprep.subr.bf16.mxu1 %v2287_v40  ;;  %v2342_v40 = vld [vmem:[%s2846_s0 + $0x228] sm:$0xff]  }
  0x25   :  { %1515 = vmatmul.mubr.bf16.vlgmr.msra.gmra.mrb[0].mxu0 %v1842_v45  ;;  %v2349_v45 = vld [vmem:[%s2846_s0 + $0x2f8] sm:$0xff]  }
  0x26   :  { %1556 = vmatmul.mubr.bf16.vlgmr.msra.gmra.mrb[0].mxu1 %v1844_v38  ;;  %2122 = vmatpush3.bf16.msra.mxu0 %v2288_v44  ;;  %v2340_v38 = vld [vmem:[%s2846_s0 + $0x268] sm:$0xff]   ;;  %v2346_v44 = vld [vmem:[%s2846_s0 + $0x230] sm:$0xff]  }
  0x27   :  { %2144 = vmatpush3.bf16.msra.mxu1 %v2289_v41  ;;  %2123 = vmatprep.subr.bf16.mxu0 %v2290_v48  ;;  %v2345_v41 = vld [vmem:[%s2846_s0 + $0x2f0] sm:$0xff]   ;;  %v2351_v48 = vld [vmem:[%s2846_s0 + $0x2b8] sm:$0xff]  }
  0x28   :  { %2145 = vmatprep.subr.bf16.mxu1 %v2291_v42  ;;  %1596 = vmatprep.mubr.bf16.mxu0 %v1847_v13  ;;  %v2344_v42 = vld [vmem:[%s2846_s0 + $0x270] sm:$0xff]   ;;  %v2376_v13 = vld [vmem:[%s2846_s0 + $0x328] sm:$0xff]  }
  0x29   :  { %1637 = vmatprep.mubr.bf16.mxu1 %v1849_v15  ;;  %v2378_v15 = vld [vmem:[%s2846_s0 + $0x370] sm:$0xff]  }
  0x2a   :  { %2124 = vmatpush3.bf16.msra.mxu0 %v2292_v50  ;;  %v2353_v50 = vld [vmem:[%s2848_s2 + $0x28] sm:$0xff]  }
  0x2b   :  { %2146 = vmatpush3.bf16.msra.mxu1 %v2293_v47  ;;  %2125 = vmatprep.subr.bf16.mxu0 %v2294_v52  ;;  %v2350_v47 = vld [vmem:[%s2846_s0 + $0x238] sm:$0xff]   ;;  %v2354_v52 = vld [vmem:[%s2846_s0 + $0x340] sm:$0xff]  }
  0x2c   :  { %2147 = vmatprep.subr.bf16.mxu1 %v2295_v49  ;;  %v2352_v49 = vld [vmem:[%s2848_s2 + $0x20] sm:$0xff]  }
  0x2e   :  { %2126 = vmatpush3.bf16.msra.mxu0 %v2296_v54  ;;  %v1853_v54 = vcombine.high %v2353_v50, %v2420_v3 }
  0x2f   :  { %2148 = vmatpush3.bf16.msra.mxu1 %v2297_v51  ;;  %2127 = vmatprep.subr.bf16.mxu0 %v2298_v56  ;;  %v1851_v51 = vcombine.high %v2352_v49, %v2420_v3  ;;  %v1850_v56 = vcombine.low %v2352_v49, %v2420_v3 }
  0x30   :  { %2149 = vmatprep.subr.bf16.mxu1 %v2299_v53  ;;  %v1852_v53 = vcombine.low %v2353_v50, %v2420_v3  ;;  %v2359_v3 = vld [vmem:[%s2846_s0 + $0x3c8] sm:$0xff]  }
  0x32   :  { %2128 = vmatpush3.bf16.msra.mxu0 %v2300_v58  ;;  %v2357_v58 = vld [vmem:[%s2846_s0 + $0x380] sm:$0xff]  }
  0x33   :  { %2150 = vmatpush3.bf16.msra.mxu1 %v2301_v55  ;;  %2129 = vmatprep.subr.bf16.mxu0 %v2302_v60  ;;  %v2355_v55 = vld [vmem:[%s2846_s0 + $0x3c0] sm:$0xff]   ;;  %v2360_v60 = vld [vmem:[%s2846_s0 + $0x308] sm:$0xff]  }
  0x34   :  { %2151 = vmatprep.subr.bf16.mxu1 %v2303_v57  ;;  %v2356_v57 = vld [vmem:[%s2846_s0 + $0x300] sm:$0xff]  }
  0x36   :  { %2130 = vmatpush3.bf16.msra.mxu0 %v2304_v62  ;;  %v2362_v62 = vld [vmem:[%s2846_s0 + $0x350] sm:$0xff]  }
  0x37   :  { %2152 = vmatpush3.bf16.msra.mxu1 %v2305_v59  ;;  %2131 = vmatprep.subr.bf16.mxu0 %v2306_v0  ;;  %v2358_v59 = vld [vmem:[%s2846_s0 + $0x348] sm:$0xff]   ;;  %v2364_v0 = vld [vmem:[%s2846_s0 + $0x310] sm:$0xff]  }
  0x38   :  { %2153 = vmatprep.subr.bf16.mxu1 %v2307_v61  ;;  %v2361_v61 = vld [vmem:[%s2846_s0 + $0x388] sm:$0xff]  }
  0x3a   :  { %2132 = vmatpush3.bf16.msra.mxu0 %v2308_v2  ;;  %v2366_v2 = vld [vmem:[%s2846_s0 + $0x358] sm:$0xff]  }
  0x3b   :  { %2154 = vmatpush3.bf16.msra.mxu1 %v2309_v63  ;;  %2133 = vmatprep.subr.bf16.mxu0 %v2310_v5  ;;  %v2363_v63 = vld [vmem:[%s2846_s0 + $0x3d0] sm:$0xff]   ;;  %v2368_v5 = vld [vmem:[%s2846_s0 + $0x318] sm:$0xff]  }
  0x3c   :  { %2155 = vmatprep.subr.bf16.mxu1 %v2311_v1  ;;  %v2365_v1 = vld [vmem:[%s2846_s0 + $0x390] sm:$0xff]  }
  0x3e   :  { %2134 = vmatpush3.bf16.msra.mxu0 %v2312_v6  ;;  %v2369_v6 = vld [vmem:[%s2846_s0 + $0x398] sm:$0xff]  }
  0x3f   :  { %2156 = vmatpush3.bf16.msra.mxu1 %v2313_v4  ;;  %2135 = vmatprep.subr.bf16.mxu0 %v2314_v8  ;;  %v2367_v4 = vld [vmem:[%s2846_s0 + $0x3d8] sm:$0xff]   ;;  %v2371_v8 = vld [vmem:[%s2846_s0 + $0x3e0] sm:$0xff]  }
  0x40   :  { %2157 = vmatprep.subr.bf16.mxu1 %v2315_v7  ;;  %v2370_v7 = vld [vmem:[%s2846_s0 + $0x360] sm:$0xff]  }
  0x42   :  { %2136 = vmatpush3.bf16.msra.mxu0 %v2316_v12  ;;  %v2375_v12 = vld [vmem:[%s2846_s0 + $0x3e8] sm:$0xff]  }
  0x43   :  { %2158 = vmatpush3.bf16.msra.mxu1 %v2317_v9  ;;  %2165 = vmatprep.subr.bf16.mxu0 %v2320_v17  ;;  %v2372_v9 = vld [vmem:[%s2846_s0 + $0x320] sm:$0xff]   ;;  %v2380_v17 = vld [vmem:[%s2846_s0 + $0x330] sm:$0xff]  }
  0x44   :  { %2187 = vmatprep.subr.bf16.mxu1 %v2321_v16  ;;  %v2379_v16 = vld [vmem:[%s2846_s0 + $0x3f0] sm:$0xff]  }
  0x45   :  { %1597 = vmatmul.mubr.bf16.vlgmr.msra.gmra.mrb[4].mxu0 %v1846_v19  ;;  %v2382_v19 = vld [vmem:[%s2846_s0 + $0x378] sm:$0xff]  }
  0x46   :  { %1638 = vmatmul.mubr.bf16.vlgmr.msra.gmra.mrb[4].mxu1 %v1848_v14  ;;  %2166 = vmatpush3.bf16.msra.mxu0 %v2322_v20  ;;  %v2377_v14 = vld [vmem:[%s2846_s0 + $0x3a8] sm:$0xff]   ;;  %v2383_v20 = vld [vmem:[%s2846_s0 + $0x3f8] sm:$0xff]  }
  0x47   :  { %2188 = vmatpush3.bf16.msra.mxu1 %v2323_v18  ;;  %2167 = vmatprep.subr.bf16.mxu0 %v2324_v22  ;;  %v2381_v18 = vld [vmem:[%s2846_s0 + $0x3b0] sm:$0xff]   ;;  %v2385_v22 = vld [vmem:[%s2846_s0 + $0x3b8] sm:$0xff]  }
  0x48   :  { %2189 = vmatprep.subr.bf16.mxu1 %v2325_v21  ;;  %1678 = vmatprep.mubr.bf16.mxu0 %v1851_v51  ;;  %v2384_v21 = vld [vmem:[%s2846_s0 + $0x338] sm:$0xff]  }
  0x49   :  { %1719 = vmatprep.mubr.bf16.mxu1 %v1853_v54 }
  0x4a   :  { %2168 = vmatpush3.bf16.msra.mxu0 %v2326_v24  ;;  %v2387_v24 = vld [vmem:[%s2848_s2 + $0x38] sm:$0xff]  }
  0x4b   :  { %2190 = vmatpush3.bf16.msra.mxu1 %v2327_v23  ;;  %2169 = vmatprep.subr.bf16.mxu0 %v2328_v26  ;;  %v2386_v23 = vld [vmem:[%s2848_s2 + $0x30] sm:$0xff]  }
  0x4c   :  { %2191 = vmatprep.subr.bf16.mxu1 %v2329_v25  ;;  %v2388_v25 = vld [vmem:[#allocation7 + $0x40] sm:$0xff] }
  0x4d   :  { %v1854_v26 = vcombine.low %v2386_v23, %v2388_v25 }
  0x4e   :  { %2170 = vmatpush3.bf16.msra.mxu0 %v2330_v28  ;;  %v1856_v28 = vcombine.low %v2387_v24, %v2388_v25 }
  0x4f   :  { %2192 = vmatpush3.bf16.msra.mxu1 %v2331_v27  ;;  %2171 = vmatprep.subr.bf16.mxu0 %v2332_v30  ;;  %v1855_v27 = vcombine.high %v2386_v23, %v2388_v25 }
  0x50   :  { %2193 = vmatprep.subr.bf16.mxu1 %v2333_v29  ;;  %v1857_v29 = vcombine.high %v2387_v24, %v2388_v25 }
  0x52   :  { %2172 = vmatpush3.bf16.msra.mxu0 %v2334_v32 }
  0x53   :  { %2194 = vmatpush3.bf16.msra.mxu1 %v2335_v31  ;;  %2173 = vmatprep.subr.bf16.mxu0 %v2336_v34 }
  0x54   :  { %2195 = vmatprep.subr.bf16.mxu1 %v2337_v33 }
  0x56   :  { %2174 = vmatpush3.bf16.msra.mxu0 %v2338_v36 }
  0x57   :  { %2196 = vmatpush3.bf16.msra.mxu1 %v2339_v35  ;;  %2175 = vmatprep.subr.bf16.mxu0 %v2340_v38 }
  0x58   :  { %2197 = vmatprep.subr.bf16.mxu1 %v2341_v37  ;;  %v1841_v37 = vld [vmem:[%s2847_s1] ss:$0 sm:$0xff] }
  0x5a   :  { %2176 = vmatpush3.bf16.msra.mxu0 %v2342_v40 }
  0x5b   :  { %2198 = vmatpush3.bf16.msra.mxu1 %v2343_v39  ;;  %2177 = vmatprep.subr.bf16.mxu0 %v2344_v42 }
  0x5c   :  { %2199 = vmatprep.subr.bf16.mxu1 %v2345_v41 }
  0x5e   :  { %2178 = vmatpush3.bf16.msra.mxu0 %v2346_v44 }
  0x5f   :  { %2200 = vmatpush3.bf16.msra.mxu1 %v2347_v43  ;;  %2179 = vmatprep.subr.bf16.mxu0 %v2348_v46 }
  0x60   :  { %2201 = vmatprep.subr.bf16.mxu1 %v2349_v45 }
  0x62   :  { %2180 = vmatpush3.bf16.msra.mxu0 %v2350_v47 }
  0x63   :  { %2202 = vmatpush3.bf16.msra.mxu1 %v2351_v48  ;;  %2209 = vmatprep.subr.bf16.mxu0 %v2354_v52 }
  0x64   :  { %2231 = vmatprep.subr.bf16.mxu1 %v2355_v55 }
  0x65   :  { %1679 = vmatmul.mubr.bf16.vlgmr.msra.gmra.mrb[8].mxu0 %v1850_v56 }
  0x66   :  { %1720 = vmatmul.mubr.bf16.vlgmr.msra.gmra.mrb[8].mxu1 %v1852_v53  ;;  %2210 = vmatpush3.bf16.msra.mxu0 %v2356_v57 }
  0x67   :  { %2232 = vmatpush3.bf16.msra.mxu1 %v2357_v58  ;;  %2211 = vmatprep.subr.bf16.mxu0 %v2358_v59 }
  0x68   :  { %2233 = vmatprep.subr.bf16.mxu1 %v2359_v3  ;;  %1760 = vmatprep.mubr.bf16.mxu0 %v1855_v27 }
  0x69   :  { %1801 = vmatprep.mubr.bf16.mxu1 %v1857_v29 }
  0x6a   :  { %2212 = vmatpush3.bf16.msra.mxu0 %v2360_v60 }
  0x6b   :  { %2234 = vmatpush3.bf16.msra.mxu1 %v2361_v61  ;;  %2213 = vmatprep.subr.bf16.mxu0 %v2362_v62 }
  0x6c   :  { %2235 = vmatprep.subr.bf16.mxu1 %v2363_v63 }
  0x6e   :  { %2214 = vmatpush3.bf16.msra.mxu0 %v2364_v0 }
  0x6f   :  { %2236 = vmatpush3.bf16.msra.mxu1 %v2365_v1  ;;  %2215 = vmatprep.subr.bf16.mxu0 %v2366_v2 }
  0x70   :  { %2237 = vmatprep.subr.bf16.mxu1 %v2367_v4 }
  0x72   :  { %2216 = vmatpush3.bf16.msra.mxu0 %v2368_v5 }
  0x73   :  { %2238 = vmatpush3.bf16.msra.mxu1 %v2369_v6  ;;  %2217 = vmatprep.subr.bf16.mxu0 %v2370_v7 }
  0x74   :  { %2239 = vmatprep.subr.bf16.mxu1 %v2371_v8 }
  0x76   :  { %2218 = vmatpush3.bf16.msra.mxu0 %v2372_v9 }
  0x77   :  { %2240 = vmatpush3.bf16.msra.mxu1 %v2373_v10  ;;  %2219 = vmatprep.subr.bf16.mxu0 %v2374_v11 }
  0x78   :  { %2241 = vmatprep.subr.bf16.mxu1 %v2375_v12 }
  0x7a   :  { %2220 = vmatpush3.bf16.msra.mxu0 %v2376_v13 }
  0x7b   :  { %2242 = vmatpush3.bf16.msra.mxu1 %v2377_v14  ;;  %2221 = vmatprep.subr.bf16.mxu0 %v2378_v15 }
  0x7c   :  { %2243 = vmatprep.subr.bf16.mxu1 %v2379_v16 }
  0x7e   :  { %2222 = vmatpush3.bf16.msra.mxu0 %v2380_v17 }
  0x7f   :  { %2244 = vmatpush3.bf16.msra.mxu1 %v2381_v18  ;;  %2223 = vmatprep.subr.bf16.mxu0 %v2382_v19 }
  0x80   :  { %2245 = vmatprep.subr.bf16.mxu1 %v2383_v20 }
  0x82   :  { %2224 = vmatpush3.bf16.msra.mxu0 %v2384_v21 }
  0x83   :  { %2246 = vmatpush3.bf16.msra.mxu1 %v2385_v22 }
  0x85   :  { %1761 = vmatmul.mubr.bf16.vlgmr.msra.gmra.mrb[12].mxu0 %v1854_v26 }
  0x86   :  { %1802 = vmatmul.mubr.bf16.vlgmr.msra.gmra.mrb[12].mxu1 %v1856_v28 }
  0xf8   :  { %v2093_v36 = vpop.f32.mrb[0].mxu0 }
  0xf9   :  { %v2115_v30 = vpop.f32.mrb[0].mxu1  ;;  %v2094_v38 = vpop.f32.mrb[1].mxu0 }
  0xfa   :  { %v2116_v31 = vpop.f32.mrb[1].mxu1  ;;  %v2095_v39 = vadd.f32 %v2094_v38, %v2093_v36  ;;  %v2096_v40 = vpop.f32.mrb[2].mxu0 }
  0xfb   :  { %v2117_v32 = vadd.f32 %v2116_v31, %v2115_v30  ;;  %v2118_v33 = vpop.f32.mrb[2].mxu1  ;;  %v2097_v41 = vpop.f32.mrb[3].mxu0 }
  0xfc   :  { %v2119_v34 = vpop.f32.mrb[3].mxu1  ;;  %v1517_v42 = vadd.f32 %v2095_v39, %v1841_v37  ;;  %v2098_v43 = vadd.f32 %v2097_v41, %v2096_v40 }
  0xfd   :  { %v2120_v35 = vadd.f32 %v2119_v34, %v2118_v33 }
  0xfe   :  { %v1558_v44 = vadd.f32 %v2117_v32, %v1517_v42  ;;  %v1520_v45 = vadd.f32 %v2098_v43, %v1841_v37 }
 0x100   :  { %v1561_v46 = vadd.f32 %v2120_v35, %v1520_v45 }
 0x118   :  { %v2137_v52 = vpop.f32.mrb[4].mxu0 }
 0x119   :  { %v2159_v47 = vpop.f32.mrb[4].mxu1  ;;  %v2138_v54 = vpop.f32.mrb[5].mxu0 }
 0x11a   :  { %v2160_v48 = vpop.f32.mrb[5].mxu1  ;;  %v2139_v55 = vadd.f32 %v2138_v54, %v2137_v52  ;;  %v2140_v56 = vpop.f32.mrb[6].mxu0 }
 0x11b   :  { %v2161_v49 = vadd.f32 %v2160_v48, %v2159_v47  ;;  %v2162_v50 = vpop.f32.mrb[6].mxu1  ;;  %v2141_v57 = vpop.f32.mrb[7].mxu0 }
 0x11c   :  { %v2163_v51 = vpop.f32.mrb[7].mxu1  ;;  %v1599_v58 = vadd.f32 %v2139_v55, %v1558_v44  ;;  %v2142_v59 = vadd.f32 %v2141_v57, %v2140_v56 }
 0x11d   :  { %v2164_v53 = vadd.f32 %v2163_v51, %v2162_v50 }
 0x11e   :  { %v1640_v3 = vadd.f32 %v2161_v49, %v1599_v58  ;;  %v1602_v60 = vadd.f32 %v2142_v59, %v1561_v46 }
 0x120   :  { %v1643_v61 = vadd.f32 %v2164_v53, %v1602_v60 }
 0x138   :  { %v2181_v0 = vpop.f32.mrb[8].mxu0 }
 0x139   :  { %v2203_v62 = vpop.f32.mrb[8].mxu1  ;;  %v2182_v4 = vpop.f32.mrb[9].mxu0 }
 0x13a   :  { %v2204_v63 = vpop.f32.mrb[9].mxu1  ;;  %v2183_v6 = vadd.f32 %v2182_v4, %v2181_v0  ;;  %v2184_v7 = vpop.f32.mrb[10].mxu0 }
 0x13b   :  { %v2205_v1 = vadd.f32 %v2204_v63, %v2203_v62  ;;  %v2206_v2 = vpop.f32.mrb[10].mxu1  ;;  %v2185_v9 = vpop.f32.mrb[11].mxu0 }
 0x13c   :  { %v2207_v5 = vpop.f32.mrb[11].mxu1  ;;  %v1681_v10 = vadd.f32 %v2183_v6, %v1640_v3  ;;  %v2186_v11 = vadd.f32 %v2185_v9, %v2184_v7 }
 0x13d   :  { %v2208_v8 = vadd.f32 %v2207_v5, %v2206_v2 }
 0x13e   :  { %v1722_v12 = vadd.f32 %v2205_v1, %v1681_v10  ;;  %v1684_v13 = vadd.f32 %v2186_v11, %v1643_v61 }
 0x140   :  { %v1725_v14 = vadd.f32 %v2208_v8, %v1684_v13 }
 0x158   :  { %v2225_v15 = vpop.f32.mrb[12].mxu0 }
 0x159   :  { %v2247_v16 = vpop.f32.mrb[12].mxu1  ;;  %v2226_v17 = vpop.f32.mrb[13].mxu0 }
 0x15a   :  { %v2248_v18 = vpop.f32.mrb[13].mxu1  ;;  %v2227_v19 = vadd.f32 %v2226_v17, %v2225_v15  ;;  %v2228_v21 = vpop.f32.mrb[14].mxu0 }
 0x15b   :  { %v2249_v20 = vadd.f32 %v2248_v18, %v2247_v16  ;;  %v2250_v22 = vpop.f32.mrb[14].mxu1  ;;  %v2229_v23 = vpop.f32.mrb[15].mxu0 }
 0x15c   :  { %v2251_v24 = vpop.f32.mrb[15].mxu1  ;;  %v1763_v25 = vadd.f32 %v2227_v19, %v1722_v12  ;;  %v2230_v26 = vadd.f32 %v2229_v23, %v2228_v21 }
 0x15d   :  { %v2252_v27 = vadd.f32 %v2251_v24, %v2250_v22 }
 0x15e   :  { %v1804_v28 = vadd.f32 %v2249_v20, %v1763_v25  ;;  %v1766_v29 = vadd.f32 %v2230_v26, %v1725_v14 }
 0x160   :  { %v1807_v30 = vadd.f32 %v2252_v27, %v1766_v29  ;;  %v1810_v31 = vmax.f32 %v1804_v28, 0.0 }
 0x162   :  { %v1811_v32 = vmax.f32 %v1807_v30, 0.0 }
 0x164   :  { %v2068_v33 = vpack.c.bf16 %v1811_v32, %v1810_v31 }
 0x166   :  { %2069 = vst [vmem:[%s2850_s4] sm:$0xff] %v2068_v33  }

// kernel: cvae_forward.12
= control target key start
LH: loop header
LB: loop body
LE: loop exit
PB: predicated region body
PF: predicated region fallthrough
CT: control target
= control target key end

     0   :  { %v1744_v20 = vmov 0   ;;  %s2309_s1 = inlined_call_operand.vmem [shape: bf16[640,256], index: 1, kind: input, shape index: {}]   ;;  %s2310_s0 = inlined_call_operand.vmem [shape: bf16[16,640], index: 0, kind: input, shape index: {}]   ;;  %s2311_s6 = inlined_call_operand.vmem [shape: bf16[128,512], index: 6, kind: input, shape index: {}]   ;;  %s2312_s4 = inlined_call_operand.vmem [shape: bf16[16,128], index: 4, kind: input, shape index: {}]   ;;  %s2313_s5 = inlined_call_operand.vmem [shape: bf16[128,512], index: 5, kind: input, shape index: {}]   ;;  %s2314_s2 = inlined_call_operand.vmem [shape: f32[1,256], index: 2, kind: input, shape index: {}]   ;;  %s2315_s8 = inlined_call_operand.vmem [shape: f32[16,128], index: 8, kind: output, shape index: {0}]   ;;  %s2316_s9 = inlined_call_operand.vmem [shape: f32[16,128], index: 9, kind: output, shape index: {1}]   ;;  %s2317_s3 = inlined_call_operand.vmem [shape: f32[16,128], index: 3, kind: input, shape index: {}]   ;;  %s2318_s7 = inlined_call_operand.vmem [shape: f32[1,512], index: 7, kind: input, shape index: {}]   ;;  %s2319_s10 = inlined_call_operand.vmem [shape: bf16[16,512], index: 10, kind: output, shape index: {2}]  }
   0x1   :  { %v1516_v0 = vld [vmem:[%s2309_s1 + $0x4] ss:$8 sps:$4 sm:$0xff]   ;;  %v1518_v1 = vld [vmem:[%s2309_s1] ss:$8 sps:$4 sm:$0xff]   ;;  %v1519_v2 = vld [vmem:[%s2309_s1 + $0x14] ss:$8 sps:$4 sm:$0xff]   ;;  %967 = vmatprep.mubr.bf16.mxu1 %v1744_v20 }
   0x2   :  { %557 = vmatprep.subr.bf16.mxu0 %v1516_v0  ;;  %v1521_v3 = vld [vmem:[%s2309_s1 + $0x10] ss:$8 sps:$4 sm:$0xff]   ;;  %v1522_v4 = vld [vmem:[%s2309_s1 + $0x24] ss:$8 sps:$4 sm:$0xff]   ;;  %v1524_v5 = vld [vmem:[%s2309_s1 + $0x20] ss:$8 sps:$4 sm:$0xff]  }
   0x3   :  { %558 = vmatpush1.bf16.msra.mxu0 %v1518_v1  ;;  %v1525_v6 = vld [vmem:[%s2309_s1 + $0x34] ss:$8 sps:$4 sm:$0xff]   ;;  %v1527_v7 = vld [vmem:[%s2309_s1 + $0x30] ss:$8 sps:$4 sm:$0xff]   ;;  %v1528_v8 = vld [vmem:[%s2309_s1 + $0x44] ss:$8 sps:$4 sm:$0xff]  }
   0x4   :  { %559 = vmatprep.subr.bf16.mxu0 %v1519_v2  ;;  %v1530_v9 = vld [vmem:[%s2309_s1 + $0x40] ss:$8 sps:$4 sm:$0xff]   ;;  %v1531_v10 = vld [vmem:[%s2309_s1 + $0x54] ss:$8 sps:$4 sm:$0xff]   ;;  %v1533_v11 = vld [vmem:[%s2309_s1 + $0x50] ss:$8 sps:$4 sm:$0xff]  }
   0x5   :  { %v1534_v12 = vld [vmem:[%s2309_s1 + $0x64] ss:$8 sps:$4 sm:$0xff]   ;;  %v1536_v14 = vld [vmem:[%s2309_s1 + $0x60] ss:$8 sps:$4 sm:$0xff]   ;;  %v1537_v15 = vld [vmem:[%s2309_s1 + $0x74] ss:$8 sps:$4 sm:$0xff]  }
   0x6   :  { %v1566_v13 = vld [vmem:[%s2310_s0 + $0x4] ss:$20 sps:$4 sm:$0xff]   ;;  %v1542_v18 = vld [vmem:[%s2309_s1 + $0x80] ss:$8 sps:$4 sm:$0xff]   ;;  %v1543_v19 = vld [vmem:[%s2309_s1 + $0x94] ss:$8 sps:$4 sm:$0xff]  }
   0x7   :  { %560 = vmatpush1.bf16.msra.mxu0 %v1521_v3  ;;  %589 = vmatprep.mubr.bf16.mxu0 %v1566_v13  ;;  %v1539_v16 = vld [vmem:[%s2309_s1 + $0x70] ss:$8 sps:$4 sm:$0xff]   ;;  %v1540_v17 = vld [vmem:[%s2309_s1 + $0x84] ss:$8 sps:$4 sm:$0xff]   ;;  %v1548_v23 = vld [vmem:[%s2309_s1 + $0xa0] ss:$8 sps:$4 sm:$0xff]  }
   0x8   :  { %561 = vmatprep.subr.bf16.mxu0 %v1522_v4  ;;  %v1545_v21 = vld [vmem:[%s2309_s1 + $0x90] ss:$8 sps:$4 sm:$0xff]   ;;  %v1546_v22 = vld [vmem:[%s2309_s1 + $0xa4] ss:$8 sps:$4 sm:$0xff]   ;;  %v1549_v24 = vld [vmem:[%s2309_s1 + $0xb4] ss:$8 sps:$4 sm:$0xff]  }
   0x9   :  { %v1551_v25 = vld [vmem:[%s2309_s1 + $0xb0] ss:$8 sps:$4 sm:$0xff]   ;;  %v1552_v26 = vld [vmem:[%s2309_s1 + $0xc4] ss:$8 sps:$4 sm:$0xff]   ;;  %v1554_v27 = vld [vmem:[%s2309_s1 + $0xc0] ss:$8 sps:$4 sm:$0xff]  }
   0xa   :  { %v1555_v28 = vld [vmem:[%s2309_s1 + $0xd4] ss:$8 sps:$4 sm:$0xff]   ;;  %v1557_v29 = vld [vmem:[%s2309_s1 + $0xd0] ss:$8 sps:$4 sm:$0xff]   ;;  %v1558_v30 = vld [vmem:[%s2309_s1 + $0xe4] ss:$8 sps:$4 sm:$0xff]  }
   0xb   :  { %562 = vmatpush1.bf16.msra.mxu0 %v1524_v5  ;;  %v1560_v31 = vld [vmem:[%s2309_s1 + $0xe0] ss:$8 sps:$4 sm:$0xff]   ;;  %v1561_v32 = vld [vmem:[%s2309_s1 + $0xf4] ss:$8 sps:$4 sm:$0xff]   ;;  %v1563_v35 = vld [vmem:[%s2309_s1 + $0xf0] ss:$8 sps:$4 sm:$0xff]  }
   0xc   :  { %563 = vmatprep.subr.bf16.mxu0 %v1525_v6  ;;  %v1643_v33 = vld [vmem:[%s2311_s6 + $0x4] ss:$16 sps:$4 sm:$0xff]   ;;  %v1645_v34 = vld [vmem:[%s2311_s6] ss:$16 sps:$4 sm:$0xff]   ;;  %v1669_v1 = vld [vmem:[%s2311_s6 + $0xc] ss:$16 sps:$4 sm:$0xff]  }
   0xd   :  { %935 = vmatprep.subr.bf16.mxu1 %v1643_v33  ;;  %v1646_v36 = vld [vmem:[%s2311_s6 + $0x24] ss:$16 sps:$4 sm:$0xff]   ;;  %v1648_v38 = vld [vmem:[%s2311_s6 + $0x20] ss:$16 sps:$4 sm:$0xff]   ;;  %v1667_v5 = vld [vmem:[%s2311_s6 + $0x8] ss:$16 sps:$4 sm:$0xff]  }
   0xe   :  { %v1569_v37 = vld [vmem:[%s2309_s1 + $0x104] ss:$8 sps:$4 sm:$0xff]   ;;  %936 = vmatpush1.bf16.msra.mxu1 %v1645_v34  ;;  %v1564_v40 = vld [vmem:[%s2310_s0] ss:$20 sps:$4 sm:$0xff]   ;;  %v1570_v46 = vld [vmem:[%s2309_s1 + $0x110] ss:$8 sps:$4 sm:$0xff]  }
   0xf   :  { %564 = vmatpush1.bf16.msra.mxu0 %v1527_v7  ;;  %937 = vmatprep.subr.bf16.mxu1 %v1646_v36  ;;  %v1649_v39 = vld [vmem:[%s2311_s6 + $0x44] ss:$16 sps:$4 sm:$0xff]   ;;  %v1567_v41 = vld [vmem:[%s2309_s1 + $0x100] ss:$8 sps:$4 sm:$0xff]   ;;  %v1576_v54 = vld [vmem:[%s2309_s1 + $0x130] ss:$8 sps:$4 sm:$0xff]  }
  0x10   :  { %565 = vmatprep.subr.bf16.mxu0 %v1528_v8  ;;  %v1617_v42 = vld [vmem:[%s2310_s0 + $0xc] ss:$20 sps:$4 sm:$0xff]   ;;  %v1572_v43 = vld [vmem:[%s2309_s1 + $0x114] ss:$8 sps:$4 sm:$0xff]   ;;  %v1582_v61 = vld [vmem:[%s2309_s1 + $0x150] ss:$8 sps:$4 sm:$0xff]  }
  0x11   :  { %v1651_v44 = vld [vmem:[%s2311_s6 + $0x40] ss:$16 sps:$4 sm:$0xff]   ;;  %v1652_v45 = vld [vmem:[%s2311_s6 + $0x64] ss:$16 sps:$4 sm:$0xff]   ;;  %v1673_v6 = vld [vmem:[%s2311_s6 + $0x2c] ss:$16 sps:$4 sm:$0xff]  }
  0x12   :  { %938 = vmatpush1.bf16.msra.mxu1 %v1648_v38  ;;  %v1575_v47 = vld [vmem:[%s2309_s1 + $0x124] ss:$8 sps:$4 sm:$0xff]   ;;  %v1654_v48 = vld [vmem:[%s2311_s6 + $0x60] ss:$16 sps:$4 sm:$0xff]   ;;  %v1578_v51 = vld [vmem:[%s2309_s1 + $0x134] ss:$8 sps:$4 sm:$0xff]  }
  0x13   :  { %566 = vmatpush1.bf16.msra.mxu0 %v1530_v9  ;;  %939 = vmatprep.subr.bf16.mxu1 %v1649_v39  ;;  %v1655_v49 = vld [vmem:[%s2311_s6 + $0x84] ss:$16 sps:$4 sm:$0xff]   ;;  %v1573_v50 = vld [vmem:[%s2309_s1 + $0x120] ss:$8 sps:$4 sm:$0xff]   ;;  %v1588_v7 = vld [vmem:[%s2309_s1 + $0x170] ss:$8 sps:$4 sm:$0xff]  }
  0x14   :  { %567 = vmatprep.subr.bf16.mxu0 %v1531_v10  ;;  %v1657_v52 = vld [vmem:[%s2311_s6 + $0x80] ss:$16 sps:$4 sm:$0xff]   ;;  %v1658_v53 = vld [vmem:[%s2311_s6 + $0xa4] ss:$16 sps:$4 sm:$0xff]   ;;  %v1671_v9 = vld [vmem:[%s2311_s6 + $0x28] ss:$16 sps:$4 sm:$0xff]  }
  0x15   :  { %v1581_v55 = vld [vmem:[%s2309_s1 + $0x144] ss:$8 sps:$4 sm:$0xff]   ;;  %v1660_v56 = vld [vmem:[%s2311_s6 + $0xa0] ss:$16 sps:$4 sm:$0xff]   ;;  %v1584_v59 = vld [vmem:[%s2309_s1 + $0x154] ss:$8 sps:$4 sm:$0xff]  }
  0x16   :  { %940 = vmatpush1.bf16.msra.mxu1 %v1651_v44  ;;  %v1661_v57 = vld [vmem:[%s2311_s6 + $0xc4] ss:$16 sps:$4 sm:$0xff]   ;;  %v1579_v58 = vld [vmem:[%s2309_s1 + $0x140] ss:$8 sps:$4 sm:$0xff]   ;;  %v1676_v10 = vld [vmem:[%s2311_s6 + $0x4c] ss:$16 sps:$4 sm:$0xff]  }
  0x17   :  { %568 = vmatpush1.bf16.msra.mxu0 %v1533_v11  ;;  %941 = vmatprep.subr.bf16.mxu1 %v1652_v45  ;;  %v1663_v60 = vld [vmem:[%s2311_s6 + $0xc0] ss:$16 sps:$4 sm:$0xff]   ;;  %v1664_v62 = vld [vmem:[%s2311_s6 + $0xe4] ss:$16 sps:$4 sm:$0xff]   ;;  %v1674_v13 = vld [vmem:[%s2311_s6 + $0x48] ss:$16 sps:$4 sm:$0xff]  }
  0x18   :  { %569 = vmatprep.subr.bf16.mxu0 %v1534_v12  ;;  %v1587_v63 = vld [vmem:[%s2309_s1 + $0x164] ss:$8 sps:$4 sm:$0xff]   ;;  %v1666_v0 = vld [vmem:[%s2311_s6 + $0xe0] ss:$16 sps:$4 sm:$0xff]   ;;  %v1590_v4 = vld [vmem:[%s2309_s1 + $0x174] ss:$8 sps:$4 sm:$0xff]  }
  0x19   :  { %v1585_v2 = vld [vmem:[%s2309_s1 + $0x160] ss:$8 sps:$4 sm:$0xff]   ;;  %v1593_v8 = vld [vmem:[%s2309_s1 + $0x184] ss:$8 sps:$4 sm:$0xff]   ;;  %v1596_v12 = vld [vmem:[%s2309_s1 + $0x194] ss:$8 sps:$4 sm:$0xff]  }
  0x1a   :  { %942 = vmatpush1.bf16.msra.mxu1 %v1654_v48  ;;  %v2002_v3 = vld [vmem:[%s2312_s4] sm:$0xff]   ;;  %v1689_v34 = vld [vmem:[%s2311_s6 + $0xe8] ss:$16 sps:$4 sm:$0xff]   ;;  %v1623_v45 = vld [vmem:[%s2309_s1 + $0x214] ss:$8 sps:$4 sm:$0xff]  }
  0x1b   :  { %570 = vmatpush1.bf16.msra.mxu0 %v1536_v14  ;;  %943 = vmatprep.subr.bf16.mxu1 %v1655_v49  ;;  %v1591_v11 = vld [vmem:[%s2309_s1 + $0x180] ss:$8 sps:$4 sm:$0xff]   ;;  %v1679_v14 = vld [vmem:[%s2311_s6 + $0x6c] ss:$16 sps:$4 sm:$0xff]   ;;  %v1697_v39 = vld [vmem:[%s2313_s5 + $0x24] ss:$16 sps:$4 sm:$0xff]  }
  0x1c   :  { %571 = vmatprep.subr.bf16.mxu0 %v1537_v15  ;;  %v1594_v15 = vld [vmem:[%s2309_s1 + $0x190] ss:$8 sps:$4 sm:$0xff]   ;;  %v1611_v33 = vld [vmem:[%s2309_s1 + $0x1e4] ss:$8 sps:$4 sm:$0xff]   ;;  %v1609_v36 = vld [vmem:[%s2309_s1 + $0x1e0] ss:$8 sps:$4 sm:$0xff]  }
  0x1d   :  { %v1692_v38 = vld [vmem:[%s2313_s5] ss:$16 sps:$4 sm:$0xff]   ;;  %v1629_v49 = vld [vmem:[%s2309_s1 + $0x234] ss:$8 sps:$4 sm:$0xff]  }
  0x1e   :  { %944 = vmatpush1.bf16.msra.mxu1 %v1657_v52  ;;  %v1618_v44 = vld [vmem:[%s2309_s1 + $0x200] ss:$8 sps:$4 sm:$0xff]  }
  0x1f   :  { %572 = vmatpush1.bf16.msra.mxu0 %v1539_v16  ;;  %945 = vmatprep.subr.bf16.mxu1 %v1658_v53  ;;  %v1599_v16 = vld [vmem:[%s2309_s1 + $0x1a4] ss:$8 sps:$4 sm:$0xff]   ;;  %v1624_v48 = vld [vmem:[%s2309_s1 + $0x220] ss:$8 sps:$4 sm:$0xff]   ;;  %v1635_v53 = vld [vmem:[%s2309_s1 + $0x254] ss:$8 sps:$4 sm:$0xff]  }
  0x20   :  { %573 = vmatprep.subr.bf16.mxu0 %v1540_v17  ;;  %v1677_v17 = vld [vmem:[%s2311_s6 + $0x68] ss:$16 sps:$4 sm:$0xff]  }
  0x21   :  { %v1630_v52 = vld [vmem:[%s2309_s1 + $0x240] ss:$8 sps:$4 sm:$0xff]  }
  0x22   :  { %946 = vmatpush1.bf16.msra.mxu1 %v1660_v56  ;;  %v1636_v56 = vld [vmem:[%s2309_s1 + $0x260] ss:$8 sps:$4 sm:$0xff]  }
  0x23   :  { %574 = vmatpush1.bf16.msra.mxu0 %v1542_v18  ;;  %947 = vmatprep.subr.bf16.mxu1 %v1661_v57  ;;  %v1682_v18 = vld [vmem:[%s2311_s6 + $0x8c] ss:$16 sps:$4 sm:$0xff]  }
  0x24   :  { %575 = vmatprep.subr.bf16.mxu0 %v1543_v19  ;;  %v1597_v19 = vld [vmem:[%s2309_s1 + $0x1a0] ss:$8 sps:$4 sm:$0xff]   ;;  %v1641_v57 = vld [vmem:[%s2309_s1 + $0x274] ss:$8 sps:$4 sm:$0xff]  }
  0x26   :  { %948 = vmatpush1.bf16.msra.mxu1 %v1663_v60  ;;  %v1700_v60 = vld [vmem:[%s2313_s5 + $0x44] ss:$16 sps:$4 sm:$0xff]  }
  0x27   :  { %576 = vmatpush1.bf16.msra.mxu0 %v1545_v21  ;;  %949 = vmatprep.subr.bf16.mxu1 %v1664_v62  ;;  %v1602_v21 = vld [vmem:[%s2309_s1 + $0x1b4] ss:$8 sps:$4 sm:$0xff]  }
  0x28   :  { %577 = vmatprep.subr.bf16.mxu0 %v1546_v22  ;;  %v1680_v22 = vld [vmem:[%s2311_s6 + $0x88] ss:$16 sps:$4 sm:$0xff]   ;;  %v1703_v62 = vld [vmem:[%s2313_s5 + $0x64] ss:$16 sps:$4 sm:$0xff]  }
  0x2a   :  { %950 = vmatpush1.bf16.msra.mxu1 %v1666_v0  ;;  %v1706_v0 = vld [vmem:[%s2313_s5 + $0x84] ss:$16 sps:$4 sm:$0xff]  }
  0x2b   :  { %578 = vmatpush1.bf16.msra.mxu0 %v1548_v23  ;;  %978 = vmatprep.subr.bf16.mxu1 %v1669_v1  ;;  %v1685_v23 = vld [vmem:[%s2311_s6 + $0xac] ss:$16 sps:$4 sm:$0xff]   ;;  %v1704_v1 = vld [vmem:[%s2313_s5 + $0x80] ss:$16 sps:$4 sm:$0xff]  }
  0x2c   :  { %579 = vmatprep.subr.bf16.mxu0 %v1549_v24  ;;  %v1600_v24 = vld [vmem:[%s2309_s1 + $0x1b0] ss:$8 sps:$4 sm:$0xff]  }
  0x2d   :  { %968 = vmatmul.mubr.bf16.vlgmr.msra.gmra.mrb[0].mxu1 %v2002_v3 }
  0x2e   :  { %979 = vmatpush1.bf16.msra.mxu1 %v1667_v5  ;;  %1010 = vmatprep.mubr.bf16.mxu1 %v1744_v20  ;;  %v1710_v5 = vld [vmem:[%s2313_s5 + $0xc0] ss:$16 sps:$4 sm:$0xff]  }
  0x2f   :  { %580 = vmatpush1.bf16.msra.mxu0 %v1551_v25  ;;  %980 = vmatprep.subr.bf16.mxu1 %v1673_v6  ;;  %v1605_v25 = vld [vmem:[%s2309_s1 + $0x1c4] ss:$8 sps:$4 sm:$0xff]  }
  0x30   :  { %581 = vmatprep.subr.bf16.mxu0 %v1552_v26  ;;  %v1683_v26 = vld [vmem:[%s2311_s6 + $0xa8] ss:$16 sps:$4 sm:$0xff]   ;;  %v1715_v6 = vld [vmem:[%s2313_s5 + $0xe4] ss:$16 sps:$4 sm:$0xff]  }
  0x32   :  { %981 = vmatpush1.bf16.msra.mxu1 %v1671_v9  ;;  %v121_v9 = vlaneseq }
  0x33   :  { %582 = vmatpush1.bf16.msra.mxu0 %v1554_v27  ;;  %982 = vmatprep.subr.bf16.mxu1 %v1676_v10  ;;  %v1688_v27 = vld [vmem:[%s2311_s6 + $0xcc] ss:$16 sps:$4 sm:$0xff]  }
  0x34   :  { %583 = vmatprep.subr.bf16.mxu0 %v1555_v28  ;;  %v1603_v28 = vld [vmem:[%s2309_s1 + $0x1c0] ss:$8 sps:$4 sm:$0xff]   ;;  %v2213_v10 = vshrl.u32 %v121_v9, 7 }
  0x36   :  { %983 = vmatpush1.bf16.msra.mxu1 %v1674_v13  ;;  %v127_v13 = vsub.s32 1, %v2213_v10 }
  0x37   :  { %584 = vmatpush1.bf16.msra.mxu0 %v1557_v29  ;;  %984 = vmatprep.subr.bf16.mxu1 %v1679_v14  ;;  %v1608_v29 = vld [vmem:[%s2309_s1 + $0x1d4] ss:$8 sps:$4 sm:$0xff]  }
  0x38   :  { %585 = vmatprep.subr.bf16.mxu0 %v1558_v30  ;;  %v1686_v30 = vld [vmem:[%s2311_s6 + $0xc8] ss:$16 sps:$4 sm:$0xff]  }
  0x3a   :  { %985 = vmatpush1.bf16.msra.mxu1 %v1677_v17 }
  0x3b   :  { %586 = vmatpush1.bf16.msra.mxu0 %v1560_v31  ;;  %986 = vmatprep.subr.bf16.mxu1 %v1682_v18  ;;  %v1691_v31 = vld [vmem:[%s2311_s6 + $0xec] ss:$16 sps:$4 sm:$0xff]  }
  0x3c   :  { %587 = vmatprep.subr.bf16.mxu0 %v1561_v32  ;;  %v1606_v32 = vld [vmem:[%s2309_s1 + $0x1d0] ss:$8 sps:$4 sm:$0xff]  }
  0x3e   :  { %987 = vmatpush1.bf16.msra.mxu1 %v1680_v22 }
  0x3f   :  { %588 = vmatpush1.bf16.msra.mxu0 %v1563_v35  ;;  %988 = vmatprep.subr.bf16.mxu1 %v1685_v23  ;;  %v1694_v35 = vld [vmem:[%s2313_s5 + $0x4] ss:$16 sps:$4 sm:$0xff]  }
  0x40   :  { %600 = vmatprep.subr.bf16.mxu0 %v1569_v37  ;;  %v1614_v37 = vld [vmem:[%s2309_s1 + $0x1f4] ss:$8 sps:$4 sm:$0xff]  }
  0x42   :  { %590 = vmatmul.mubr.bf16.vlgmr.msra.gmra.mrb[0].mxu0 %v1564_v40  ;;  %989 = vmatpush1.bf16.msra.mxu1 %v1683_v26  ;;  %v1612_v40 = vld [vmem:[%s2309_s1 + $0x1f0] ss:$8 sps:$4 sm:$0xff]  }
  0x43   :  { %601 = vmatpush1.bf16.msra.mxu0 %v1567_v41  ;;  %632 = vmatprep.mubr.bf16.mxu0 %v1617_v42  ;;  %v1620_v41 = vld [vmem:[%s2309_s1 + $0x204] ss:$8 sps:$4 sm:$0xff]   ;;  %v1695_v42 = vld [vmem:[%s2313_s5 + $0x20] ss:$16 sps:$4 sm:$0xff]  }
  0x44   :  { %602 = vmatprep.subr.bf16.mxu0 %v1572_v43  ;;  %990 = vmatprep.subr.bf16.mxu1 %v1688_v27  ;;  %v1615_v43 = vld [vmem:[%s2310_s0 + $0x8] ss:$20 sps:$4 sm:$0xff]  }
  0x46   :  { %991 = vmatpush1.bf16.msra.mxu1 %v1686_v30 }
  0x47   :  { %603 = vmatpush1.bf16.msra.mxu0 %v1570_v46  ;;  %992 = vmatprep.subr.bf16.mxu1 %v1691_v31  ;;  %v1621_v46 = vld [vmem:[%s2309_s1 + $0x210] ss:$8 sps:$4 sm:$0xff]   ;;  %v691_v31 = vld [vmem:[%s2317_s3 + $0x8] sm:$0xff] }
  0x48   :  { %604 = vmatprep.subr.bf16.mxu0 %v1575_v47  ;;  %v1626_v47 = vld [vmem:[%s2309_s1 + $0x224] ss:$8 sps:$4 sm:$0xff]  }
  0x4a   :  { %993 = vmatpush1.bf16.msra.mxu1 %v1689_v34 }
  0x4b   :  { %605 = vmatpush1.bf16.msra.mxu0 %v1573_v50  ;;  %1181 = vmatprep.subr.bf16.mxu1 %v1694_v35  ;;  %v1627_v50 = vld [vmem:[%s2309_s1 + $0x230] ss:$8 sps:$4 sm:$0xff]  }
  0x4c   :  { %606 = vmatprep.subr.bf16.mxu0 %v1578_v51  ;;  %v1632_v51 = vld [vmem:[%s2309_s1 + $0x244] ss:$8 sps:$4 sm:$0xff]  }
  0x4d   :  { %1011 = vmatmul.mubr.bf16.vlgmr.msra.gmra.mrb[4].mxu1 %v2002_v3  ;;  %v1707_v3 = vld [vmem:[%s2313_s5 + $0xa0] ss:$16 sps:$4 sm:$0xff]  }
  0x4e   :  { %1182 = vmatpush1.bf16.msra.mxu1 %v1692_v38  ;;  %1213 = vmatprep.mubr.bf16.mxu1 %v1744_v20 }
  0x4f   :  { %607 = vmatpush1.bf16.msra.mxu0 %v1576_v54  ;;  %1183 = vmatprep.subr.bf16.mxu1 %v1697_v39  ;;  %v1633_v54 = vld [vmem:[%s2309_s1 + $0x250] ss:$8 sps:$4 sm:$0xff]   ;;  %v1721_v39 = vld [vmem:[%s2313_s5 + $0x2c] ss:$16 sps:$4 sm:$0xff]  }
  0x50   :  { %608 = vmatprep.subr.bf16.mxu0 %v1581_v55  ;;  %v1638_v55 = vld [vmem:[%s2309_s1 + $0x264] ss:$8 sps:$4 sm:$0xff]  }
  0x52   :  { %1184 = vmatpush1.bf16.msra.mxu1 %v1695_v42  ;;  %v1722_v42 = vld [vmem:[%s2313_s5 + $0x48] ss:$16 sps:$4 sm:$0xff]  }
  0x53   :  { %609 = vmatpush1.bf16.msra.mxu0 %v1579_v58  ;;  %v1639_v58 = vld [vmem:[%s2309_s1 + $0x270] ss:$8 sps:$4 sm:$0xff]   ;;  %1185 = vmatprep.subr.bf16.mxu1 %v1700_v60 }
  0x54   :  { %610 = vmatprep.subr.bf16.mxu0 %v1584_v59  ;;  %v1642_v59 = vld [vmem:[%s2310_s0 + $0x10] ss:$20 sps:$4 sm:$0xff]  }
  0x57   :  { %611 = vmatpush1.bf16.msra.mxu0 %v1582_v61  ;;  %v1698_v61 = vld [vmem:[%s2313_s5 + $0x40] ss:$16 sps:$4 sm:$0xff]  }
  0x58   :  { %612 = vmatprep.subr.bf16.mxu0 %v1587_v63  ;;  %1186 = vmatpush1.bf16.msra.mxu1 %v1698_v61  ;;  %v1701_v63 = vld [vmem:[%s2313_s5 + $0x60] ss:$16 sps:$4 sm:$0xff]  }
  0x59   :  { %1187 = vmatprep.subr.bf16.mxu1 %v1703_v62 }
  0x5b   :  { %613 = vmatpush1.bf16.msra.mxu0 %v1585_v2  ;;  %v1709_v2 = vld [vmem:[%s2313_s5 + $0xa4] ss:$16 sps:$4 sm:$0xff]  }
  0x5c   :  { %614 = vmatprep.subr.bf16.mxu0 %v1590_v4  ;;  %1188 = vmatpush1.bf16.msra.mxu1 %v1701_v63  ;;  %v1712_v4 = vld [vmem:[%s2313_s5 + $0xc4] ss:$16 sps:$4 sm:$0xff]  }
  0x5d   :  { %1189 = vmatprep.subr.bf16.mxu1 %v1706_v0 }
  0x5f   :  { %615 = vmatpush1.bf16.msra.mxu0 %v1588_v7  ;;  %v1713_v7 = vld [vmem:[%s2313_s5 + $0xe0] ss:$16 sps:$4 sm:$0xff]  }
  0x60   :  { %616 = vmatprep.subr.bf16.mxu0 %v1593_v8  ;;  %1190 = vmatpush1.bf16.msra.mxu1 %v1704_v1  ;;  %v1718_v8 = vld [vmem:[%s2313_s5 + $0xc] ss:$16 sps:$4 sm:$0xff]   ;;  %v1279_v1 = vsub.s32 2, %v2213_v10 }
  0x61   :  { %1191 = vmatprep.subr.bf16.mxu1 %v1709_v2  ;;  %v1283_v2 = vsub.s32 3, %v2213_v10 }
  0x63   :  { %617 = vmatpush1.bf16.msra.mxu0 %v1591_v11  ;;  %v123_v11 = vsub.s32 0, %v2213_v10 }
  0x64   :  { %618 = vmatprep.subr.bf16.mxu0 %v1596_v12  ;;  %1192 = vmatpush1.bf16.msra.mxu1 %v1707_v3  ;;  %v119_v12 = vld [vmem:[%s2314_s2] sm:$0x3] }
  0x65   :  { %1193 = vmatprep.subr.bf16.mxu1 %v1712_v4  ;;  %v124_v14 = vrot.slane %v119_v12, %v123_v11 }
  0x67   :  { %619 = vmatpush1.bf16.msra.mxu0 %v1594_v15  ;;  %v128_v15 = vrot.slane %v119_v12, %v127_v13 }
  0x68   :  { %620 = vmatprep.subr.bf16.mxu0 %v1599_v16  ;;  %1194 = vmatpush1.bf16.msra.mxu1 %v1710_v5 }
  0x69   :  { %1195 = vmatprep.subr.bf16.mxu1 %v1715_v6 }
  0x6b   :  { %621 = vmatpush1.bf16.msra.mxu0 %v1597_v19 }
  0x6c   :  { %622 = vmatprep.subr.bf16.mxu0 %v1602_v21  ;;  %1196 = vmatpush1.bf16.msra.mxu1 %v1713_v7 }
  0x6d   :  { %1224 = vmatprep.subr.bf16.mxu1 %v1718_v8 }
  0x6f   :  { %623 = vmatpush1.bf16.msra.mxu0 %v1600_v24 }
  0x70   :  { %624 = vmatprep.subr.bf16.mxu0 %v1605_v25 }
  0x73   :  { %625 = vmatpush1.bf16.msra.mxu0 %v1603_v28 }
  0x74   :  { %626 = vmatprep.subr.bf16.mxu0 %v1608_v29  ;;  %v690_v29 = vld [vmem:[%s2317_s3] sm:$0xff] }
  0x77   :  { %627 = vmatpush1.bf16.msra.mxu0 %v1606_v32 }
  0x78   :  { %628 = vmatprep.subr.bf16.mxu0 %v1611_v33 }
  0x7b   :  { %629 = vmatpush1.bf16.msra.mxu0 %v1609_v36 }
  0x7c   :  { %630 = vmatprep.subr.bf16.mxu0 %v1614_v37  ;;  %v1716_v37 = vld [vmem:[%s2313_s5 + $0x8] ss:$16 sps:$4 sm:$0xff]  }
  0x7f   :  { %631 = vmatpush1.bf16.msra.mxu0 %v1612_v40  ;;  %v1719_v40 = vld [vmem:[%s2313_s5 + $0x28] ss:$16 sps:$4 sm:$0xff]  }
  0x80   :  { %643 = vmatprep.subr.bf16.mxu0 %v1620_v41  ;;  %v1724_v41 = vld [vmem:[%s2313_s5 + $0x4c] ss:$16 sps:$4 sm:$0xff]  }
  0x82   :  { %633 = vmatmul.mubr.bf16.vlgmr.msra.gmra.mrb[0].mxu0 %v1615_v43  ;;  %v1727_v43 = vld [vmem:[%s2313_s5 + $0x6c] ss:$16 sps:$4 sm:$0xff]  }
  0x83   :  { %644 = vmatpush1.bf16.msra.mxu0 %v1618_v44  ;;  %675 = vmatprep.mubr.bf16.mxu0 %v1744_v20  ;;  %v1730_v44 = vld [vmem:[%s2313_s5 + $0x8c] ss:$16 sps:$4 sm:$0xff]  }
  0x84   :  { %645 = vmatprep.subr.bf16.mxu0 %v1623_v45  ;;  %v1728_v45 = vld [vmem:[%s2313_s5 + $0x88] ss:$16 sps:$4 sm:$0xff]  }
  0x87   :  { %646 = vmatpush1.bf16.msra.mxu0 %v1621_v46  ;;  %v1733_v46 = vld [vmem:[%s2313_s5 + $0xac] ss:$16 sps:$4 sm:$0xff]  }
  0x88   :  { %647 = vmatprep.subr.bf16.mxu0 %v1626_v47  ;;  %v1731_v47 = vld [vmem:[%s2313_s5 + $0xa8] ss:$16 sps:$4 sm:$0xff]  }
  0x8b   :  { %648 = vmatpush1.bf16.msra.mxu0 %v1624_v48  ;;  %v1736_v48 = vld [vmem:[%s2313_s5 + $0xcc] ss:$16 sps:$4 sm:$0xff]  }
  0x8c   :  { %649 = vmatprep.subr.bf16.mxu0 %v1629_v49  ;;  %v1734_v49 = vld [vmem:[%s2313_s5 + $0xc8] ss:$16 sps:$4 sm:$0xff]  }
  0x8f   :  { %650 = vmatpush1.bf16.msra.mxu0 %v1627_v50  ;;  %v1739_v50 = vld [vmem:[%s2313_s5 + $0xec] ss:$16 sps:$4 sm:$0xff]  }
  0x90   :  { %651 = vmatprep.subr.bf16.mxu0 %v1632_v51  ;;  %v1737_v51 = vld [vmem:[%s2313_s5 + $0xe8] ss:$16 sps:$4 sm:$0xff]  }
  0x93   :  { %652 = vmatpush1.bf16.msra.mxu0 %v1630_v52  ;;  %v1267_v52 = vld [vmem:[%s2318_s7] sm:$0xf] }
  0x94   :  { %653 = vmatprep.subr.bf16.mxu0 %v1635_v53  ;;  %v1272_v53 = vrot.slane %v1267_v52, %v123_v11  ;;  %v1280_v3 = vrot.slane %v1267_v52, %v1279_v1  ;;  %v1284_v4 = vrot.slane %v1267_v52, %v1283_v2 }
  0x97   :  { %654 = vmatpush1.bf16.msra.mxu0 %v1633_v54  ;;  %v1276_v54 = vrot.slane %v1267_v52, %v127_v13 }
  0x98   :  { %655 = vmatprep.subr.bf16.mxu0 %v1638_v55 }
  0x9b   :  { %656 = vmatpush1.bf16.msra.mxu0 %v1636_v56 }
  0x9c   :  { %657 = vmatprep.subr.bf16.mxu0 %v1641_v57 }
  0x9f   :  { %658 = vmatpush1.bf16.msra.mxu0 %v1639_v58 }
  0xa2   :  { %676 = vmatmul.mubr.bf16.vlgmr.msra.gmra.mrb[0].mxu0 %v1642_v59 }
 0x175   :  { %v677_v16 = vpop.f32.mrb[0].mxu0 }
 0x176   :  { %v1495_v17 = vadd.f32 %v677_v16, %v124_v14  ;;  %v679_v18 = vpop.f32.mrb[1].mxu0 }
 0x177   :  { %v1496_v19 = vadd.f32 %v679_v18, %v128_v15  ;;  %v681_v21 = vpop.f32.mrb[2].mxu0 }
 0x178   :  { %686 = vst [vmem:[%s2315_s8] sm:$0xff] %v1495_v17  ;;  %v1497_v22 = vadd.f32 %v681_v21, %v124_v14  ;;  %v683_v23 = vpop.f32.mrb[3].mxu0 }
 0x179   :  { %688 = vst [vmem:[%s2316_s9] sm:$0xff] %v1496_v19  ;;  %v692_v24 = vmul.f32 0.5, %v1496_v19  ;;  %v1498_v25 = vadd.f32 %v683_v23, %v128_v15 }
 0x17a   :  { %687 = vst [vmem:[%s2315_s8 + $0x8] sm:$0xff] %v1497_v22 }
 0x17b   :  { %v694_v26 = vmul.f32 1.442695, %v692_v24  ;;  %689 = vst [vmem:[%s2316_s9 + $0x8] sm:$0xff] %v1498_v25  ;;  %v693_v27 = vmul.f32 0.5, %v1498_v25 }
 0x17d   :  { %1740 = vpow2.f32 %v694_v26  ;;  %v696_v28 = vmul.f32 1.442695, %v693_v27 }
 0x17f   :  { %1742 = vpow2.f32 %v696_v28 }
 0x187   :  { %v1741_v30 = vpop.eup %1740 }
 0x188   :  { %v698_v32 = vmul.f32 %v1741_v30, %v690_v29 }
 0x189   :  { %v1743_v33 = vpop.eup %1742 }
 0x18a   :  { %v699_v34 = vmul.f32 %v1743_v33, %v691_v31  ;;  %v700_v35 = vadd.f32 %v1495_v17, %v698_v32 }
 0x18c   :  { %v701_v36 = vadd.f32 %v1497_v22, %v699_v34 }
 0x18e   :  { %v702_v38 = vpack.c.bf16 %v701_v36, %v700_v35 }
 0x190   :  { %1214 = vmatmul.mubr.bf16.vlgmr.msra.gmra.mrb[0].mxu1 %v702_v38 }
 0x191   :  { %1225 = vmatpush1.bf16.msra.mxu1 %v1716_v37  ;;  %1256 = vmatprep.mubr.bf16.mxu1 %v1744_v20  ;;  %v1725_v20 = vld [vmem:[%s2313_s5 + $0x68] ss:$16 sps:$4 sm:$0xff]  }
 0x192   :  { %1226 = vmatprep.subr.bf16.mxu1 %v1721_v39 }
 0x195   :  { %1227 = vmatpush1.bf16.msra.mxu1 %v1719_v40 }
 0x196   :  { %1228 = vmatprep.subr.bf16.mxu1 %v1724_v41 }
 0x199   :  { %1229 = vmatpush1.bf16.msra.mxu1 %v1722_v42 }
 0x19a   :  { %1230 = vmatprep.subr.bf16.mxu1 %v1727_v43 }
 0x19d   :  { %1231 = vmatpush1.bf16.msra.mxu1 %v1725_v20 }
 0x19e   :  { %1232 = vmatprep.subr.bf16.mxu1 %v1730_v44 }
 0x1a1   :  { %1233 = vmatpush1.bf16.msra.mxu1 %v1728_v45 }
 0x1a2   :  { %1234 = vmatprep.subr.bf16.mxu1 %v1733_v46 }
 0x1a5   :  { %1235 = vmatpush1.bf16.msra.mxu1 %v1731_v47 }
 0x1a6   :  { %1236 = vmatprep.subr.bf16.mxu1 %v1736_v48 }
 0x1a9   :  { %1237 = vmatpush1.bf16.msra.mxu1 %v1734_v49 }
 0x1aa   :  { %1238 = vmatprep.subr.bf16.mxu1 %v1739_v50 }
 0x1ad   :  { %1239 = vmatpush1.bf16.msra.mxu1 %v1737_v51 }
 0x1b0   :  { %1257 = vmatmul.mubr.bf16.vlgmr.msra.gmra.mrb[4].mxu1 %v702_v38 }
 0x263   :  { %v1215_v55 = vpop.f32.mrb[0].mxu1 }
 0x264   :  { %v1289_v56 = vadd.f32 %v1272_v53, %v1215_v55  ;;  %v1217_v57 = vpop.f32.mrb[1].mxu1 }
 0x265   :  { %v1290_v58 = vadd.f32 %v1276_v54, %v1217_v57  ;;  %v1219_v59 = vpop.f32.mrb[2].mxu1 }
 0x266   :  { %v1293_v60 = vadd.f32 %v1272_v53, %v1219_v59  ;;  %v1221_v61 = vpop.f32.mrb[3].mxu1 }
 0x267   :  { %v1491_v62 = vpack.c.bf16 %v1290_v58, %v1289_v56  ;;  %v1294_v63 = vadd.f32 %v1276_v54, %v1221_v61 }
 0x269   :  { %1321 = vst [vmem:[%s2319_s10] sm:$0xff] %v1491_v62  ;;  %v1493_v0 = vpack.c.bf16 %v1294_v63, %v1293_v60 }
 0x26b   :  { %1323 = vst [vmem:[%s2319_s10 + $0x10] sm:$0xff] %v1493_v0 }
 0x283   :  { %v1258_v5 = vpop.f32.mrb[4].mxu1 }
 0x284   :  { %v1291_v6 = vadd.f32 %v1280_v3, %v1258_v5  ;;  %v1260_v7 = vpop.f32.mrb[5].mxu1 }
 0x285   :  { %v1292_v8 = vadd.f32 %v1284_v4, %v1260_v7  ;;  %v1262_v9 = vpop.f32.mrb[6].mxu1 }
 0x286   :  { %v1295_v11 = vadd.f32 %v1280_v3, %v1262_v9  ;;  %v1264_v12 = vpop.f32.mrb[7].mxu1 }
 0x287   :  { %v1492_v13 = vpack.c.bf16 %v1292_v8, %v1291_v6  ;;  %v1296_v14 = vadd.f32 %v1284_v4, %v1264_v12 }
 0x289   :  { %1322 = vst [vmem:[%s2319_s10 + $0x8] sm:$0xff] %v1492_v13  ;;  %v1494_v15 = vpack.c.bf16 %v1296_v14, %v1295_v11 }
 0x28b   :  { %1324 = vst [vmem:[%s2319_s10 + $0x18] sm:$0xff] %v1494_v15 }

// kernel: cvae_forward.17
= control target key start
LH: loop header
LB: loop body
LE: loop exit
PB: predicated region body
PF: predicated region fallthrough
CT: control target
= control target key end

     0   :  { %s3049_s0 = inlined_call_operand.vmem [shape: bf16[1152,512], index: 0, kind: input, shape index: {}]   ;;  %s3050_s1 = inlined_call_operand.vmem [shape: f32[1,512], index: 1, kind: input, shape index: {}]   ;;  %s3051_s2 = inlined_call_operand.vmem [shape: bf16[8,1152], index: 2, kind: input, shape index: {}]   ;;  %s3052_s3 = inlined_call_operand.<no memory space> [shape: bf16[], index: 3, kind: input, shape index: {}]   ;;  %s3053_s4 = inlined_call_operand.vmem [shape: bf16[16,512], index: 4, kind: output, shape index: {}]  }
   0x1   :  { %v9_v0 = vstv %s3052_s3 }
   0x2   :  { %v2570_v1 = vunpack.i.l.bf16 %v9_v0 }
   0x3   :  { %s2572_s17 = smov 0   ;;  %s2574_s18 = smov 0  }
   0x4   :  { %s2576_s19 = smov 0   ;;  %s2578_s20 = smov 0  }
   0x5   :  { %s2580_s21 = smov 0  }
   0x6 LB: > { %s28_s3 = sadd.s32 1, %s2534_s20  ;;  %s2106_s22 = sadd.s32 4294967295, %s2538_s21   ;;  %s2538_s21 = sphi %s2580_s21, %s19_s21   ;;  %s2534_s20 = sphi %s2578_s20, %s3058_s20   ;;  %s2530_s19 = sphi %s2576_s19, %s3057_s19   ;;  %s2526_s18 = sphi %s2574_s18, %s3056_s18   ;;  %s2522_s17 = sphi %s2572_s17, %s3055_s17  }
   0x7   : > { %p29_p0 = scmp.ge.s32.totalorder %s28_s3, 4  ;;  %p71_p1 = scmp.ne.s32.totalorder %s2526_s18, %s2522_s17 }
   0x8   : > { %p72_p2 = scmp.eq.s32.totalorder %s2538_s21, 0  ;;  %p129_p4 = scmp.eq.s32.totalorder %s2106_s22, 3 }
   0x9   : > { %s3060_s3 = smov (%p29_p0, %s28_s3), 0  ;;  %s64_s24 = sadd.s32 1, %s2526_s18 }
   0xa   : > { %p73_p3 = por %p72_p2, %p71_p1  ;;  %s61_s23 = ssub.s32 %s2534_s20, %s3060_s3 }
   0xb   : > { %p62_p5 = scmp.eq.s32.totalorder %s61_s23, 0  ;;  %p2607_p6 = por %p129_p4, %p71_p1 }
   0xc   : > { %p2110_p7 = scmp.ge.s32.totalorder %s2538_s21, 4 }
   0xd   : > { %s2612_s26 = scalar_select %p62_p5, %s2526_s18, %s64_s24  }
   0xe   : > { %167 = sbr.rel (%p2110_p7) target bundleno = 121 (0x79), region = 20 }
  0x15   : > { %170 = sbr.rel (!%p73_p3) target bundleno = 121 (0x79), region = 24  ;;  %s172_s27 = sand.u32 (%p73_p3), 1, %s2526_s18  }
  0x16   : > { %s2111_s28 = sshll.u32 (%p73_p3), %s2534_s20, 2  ;;  %s2377_s29 = smul.u32 (%p73_p3), 576, %s172_s27 }
  0x17   : > { %s2620_s6 = scalar_lea.vmem (%p73_p3), %s3049_s0, %s2111_s28 }
  0x18   : > { %v192_v2 = vld [vmem:[%s2620_s6] sm:$0xf] (%p73_p3)  ;;  %v194_v3 = vld [vmem:[%s2620_s6 + $0x10] sm:$0xf] (%p73_p3)  ;;  %s2627_s7 = scalar_lea.vmem (%p73_p3), [#allocation7], %s2377_s29 }
  0x19   : > { %v196_v4 = vld [vmem:[%s2620_s6 + $0x20] sm:$0xf] (%p73_p3)  ;;  %v198_v5 = vld [vmem:[%s2620_s6 + $0x30] sm:$0xf] (%p73_p3)  ;;  %193 = vst [vmem:[%s2627_s7] sm:$0xf] (%p73_p3), %v192_v2 }
  0x1a   : > { %v200_v6 = vld [vmem:[%s2620_s6 + $0x40] sm:$0xf] (%p73_p3)  ;;  %195 = vst [vmem:[%s2627_s7 + $0x4] sm:$0xf] (%p73_p3), %v194_v3  ;;  %197 = vst [vmem:[%s2627_s7 + $0x8] sm:$0xf] (%p73_p3), %v196_v4 }
  0x1b   : > { %199 = vst [vmem:[%s2627_s7 + $0xc] sm:$0xf] (%p73_p3), %v198_v5  ;;  %201 = vst [vmem:[%s2627_s7 + $0x10] sm:$0xf] (%p73_p3), %v200_v6  ;;  %v202_v7 = vld [vmem:[%s2620_s6 + $0x50] sm:$0xf] (%p73_p3) }
  0x1c   : > { %v204_v8 = vld [vmem:[%s2620_s6 + $0x60] sm:$0xf]  ;;  %v206_v9 = vld [vmem:[%s2620_s6 + $0x70] sm:$0xf]  ;;  %203 = vst [vmem:[%s2627_s7 + $0x14] sm:$0xf] %v202_v7 }
  0x1d   : > { %205 = vst [vmem:[%s2627_s7 + $0x18] sm:$0xf] %v204_v8  ;;  %207 = vst [vmem:[%s2627_s7 + $0x1c] sm:$0xf] %v206_v9  ;;  %v208_v10 = vld [vmem:[%s2620_s6 + $0x80] sm:$0xf] }
  0x1e   : > { %v210_v11 = vld [vmem:[%s2620_s6 + $0x90] sm:$0xf]  ;;  %v212_v12 = vld [vmem:[%s2620_s6 + $0xa0] sm:$0xf]  ;;  %209 = vst [vmem:[%s2627_s7 + $0x20] sm:$0xf] %v208_v10 }
  0x1f   : > { %211 = vst [vmem:[%s2627_s7 + $0x24] sm:$0xf] %v210_v11  ;;  %213 = vst [vmem:[%s2627_s7 + $0x28] sm:$0xf] %v212_v12  ;;  %v214_v13 = vld [vmem:[%s2620_s6 + $0xb0] sm:$0xf] }
  0x20   : > { %v216_v14 = vld [vmem:[%s2620_s6 + $0xc0] sm:$0xf]  ;;  %v218_v15 = vld [vmem:[%s2620_s6 + $0xd0] sm:$0xf]  ;;  %215 = vst [vmem:[%s2627_s7 + $0x2c] sm:$0xf] %v214_v13 }
  0x21   : > { %217 = vst [vmem:[%s2627_s7 + $0x30] sm:$0xf] %v216_v14  ;;  %219 = vst [vmem:[%s2627_s7 + $0x34] sm:$0xf] %v218_v15  ;;  %v220_v16 = vld [vmem:[%s2620_s6 + $0xe0] sm:$0xf] }
  0x22   : > { %v222_v17 = vld [vmem:[%s2620_s6 + $0xf0] sm:$0xf]  ;;  %v224_v18 = vld [vmem:[%s2620_s6 + $0x100] sm:$0xf]  ;;  %221 = vst [vmem:[%s2627_s7 + $0x38] sm:$0xf] %v220_v16 }
  0x23   : > { %223 = vst [vmem:[%s2627_s7 + $0x3c] sm:$0xf] %v222_v17  ;;  %225 = vst [vmem:[%s2627_s7 + $0x40] sm:$0xf] %v224_v18  ;;  %v226_v19 = vld [vmem:[%s2620_s6 + $0x110] sm:$0xf] }
  0x24   : > { %v228_v20 = vld [vmem:[%s2620_s6 + $0x120] sm:$0xf]  ;;  %v230_v21 = vld [vmem:[%s2620_s6 + $0x130] sm:$0xf]  ;;  %227 = vst [vmem:[%s2627_s7 + $0x44] sm:$0xf] %v226_v19 }
  0x25   : > { %229 = vst [vmem:[%s2627_s7 + $0x48] sm:$0xf] %v228_v20  ;;  %231 = vst [vmem:[%s2627_s7 + $0x4c] sm:$0xf] %v230_v21  ;;  %v232_v22 = vld [vmem:[%s2620_s6 + $0x140] sm:$0xf] }
  0x26   : > { %v234_v23 = vld [vmem:[%s2620_s6 + $0x150] sm:$0xf]  ;;  %v236_v24 = vld [vmem:[%s2620_s6 + $0x160] sm:$0xf]  ;;  %233 = vst [vmem:[%s2627_s7 + $0x50] sm:$0xf] %v232_v22 }
  0x27   : > { %235 = vst [vmem:[%s2627_s7 + $0x54] sm:$0xf] %v234_v23  ;;  %237 = vst [vmem:[%s2627_s7 + $0x58] sm:$0xf] %v236_v24  ;;  %v238_v25 = vld [vmem:[%s2620_s6 + $0x170] sm:$0xf] }
  0x28   : > { %v240_v26 = vld [vmem:[%s2620_s6 + $0x180] sm:$0xf]  ;;  %v242_v27 = vld [vmem:[%s2620_s6 + $0x190] sm:$0xf]  ;;  %239 = vst [vmem:[%s2627_s7 + $0x5c] sm:$0xf] %v238_v25 }
  0x29   : > { %241 = vst [vmem:[%s2627_s7 + $0x60] sm:$0xf] %v240_v26  ;;  %243 = vst [vmem:[%s2627_s7 + $0x64] sm:$0xf] %v242_v27  ;;  %v244_v28 = vld [vmem:[%s2620_s6 + $0x1a0] sm:$0xf] }
  0x2a   : > { %v246_v29 = vld [vmem:[%s2620_s6 + $0x1b0] sm:$0xf]  ;;  %v248_v30 = vld [vmem:[%s2620_s6 + $0x1c0] sm:$0xf]  ;;  %245 = vst [vmem:[%s2627_s7 + $0x68] sm:$0xf] %v244_v28 }
  0x2b   : > { %247 = vst [vmem:[%s2627_s7 + $0x6c] sm:$0xf] %v246_v29  ;;  %249 = vst [vmem:[%s2627_s7 + $0x70] sm:$0xf] %v248_v30  ;;  %v250_v31 = vld [vmem:[%s2620_s6 + $0x1d0] sm:$0xf] }
  0x2c   : > { %v252_v32 = vld [vmem:[%s2620_s6 + $0x1e0] sm:$0xf]  ;;  %v254_v33 = vld [vmem:[%s2620_s6 + $0x1f0] sm:$0xf]  ;;  %251 = vst [vmem:[%s2627_s7 + $0x74] sm:$0xf] %v250_v31 }
  0x2d   : > { %253 = vst [vmem:[%s2627_s7 + $0x78] sm:$0xf] %v252_v32  ;;  %255 = vst [vmem:[%s2627_s7 + $0x7c] sm:$0xf] %v254_v33  ;;  %v256_v34 = vld [vmem:[%s2620_s6 + $0x200] sm:$0xf] }
  0x2e   : > { %v258_v35 = vld [vmem:[%s2620_s6 + $0x210] sm:$0xf]  ;;  %v260_v36 = vld [vmem:[%s2620_s6 + $0x220] sm:$0xf]  ;;  %257 = vst [vmem:[%s2627_s7 + $0x80] sm:$0xf] %v256_v34 }
  0x2f   : > { %259 = vst [vmem:[%s2627_s7 + $0x84] sm:$0xf] %v258_v35  ;;  %261 = vst [vmem:[%s2627_s7 + $0x88] sm:$0xf] %v260_v36  ;;  %v262_v37 = vld [vmem:[%s2620_s6 + $0x230] sm:$0xf] }
  0x30   : > { %v264_v38 = vld [vmem:[%s2620_s6 + $0x240] sm:$0xf]  ;;  %v266_v39 = vld [vmem:[%s2620_s6 + $0x250] sm:$0xf]  ;;  %263 = vst [vmem:[%s2627_s7 + $0x8c] sm:$0xf] %v262_v37 }
  0x31   : > { %265 = vst [vmem:[%s2627_s7 + $0x90] sm:$0xf] %v264_v38  ;;  %267 = vst [vmem:[%s2627_s7 + $0x94] sm:$0xf] %v266_v39  ;;  %v268_v40 = vld [vmem:[%s2620_s6 + $0x260] sm:$0xf] }
  0x32   : > { %v270_v41 = vld [vmem:[%s2620_s6 + $0x270] sm:$0xf]  ;;  %v272_v42 = vld [vmem:[%s2620_s6 + $0x280] sm:$0xf]  ;;  %269 = vst [vmem:[%s2627_s7 + $0x98] sm:$0xf] %v268_v40 }
  0x33   : > { %271 = vst [vmem:[%s2627_s7 + $0x9c] sm:$0xf] %v270_v41  ;;  %273 = vst [vmem:[%s2627_s7 + $0xa0] sm:$0xf] %v272_v42  ;;  %v274_v43 = vld [vmem:[%s2620_s6 + $0x290] sm:$0xf] }
  0x34   : > { %v276_v44 = vld [vmem:[%s2620_s6 + $0x2a0] sm:$0xf]  ;;  %v278_v45 = vld [vmem:[%s2620_s6 + $0x2b0] sm:$0xf]  ;;  %275 = vst [vmem:[%s2627_s7 + $0xa4] sm:$0xf] %v274_v43 }
  0x35   : > { %277 = vst [vmem:[%s2627_s7 + $0xa8] sm:$0xf] %v276_v44  ;;  %279 = vst [vmem:[%s2627_s7 + $0xac] sm:$0xf] %v278_v45  ;;  %v280_v46 = vld [vmem:[%s2620_s6 + $0x2c0] sm:$0xf] }
  0x36   : > { %v282_v47 = vld [vmem:[%s2620_s6 + $0x2d0] sm:$0xf]  ;;  %v284_v48 = vld [vmem:[%s2620_s6 + $0x2e0] sm:$0xf]  ;;  %281 = vst [vmem:[%s2627_s7 + $0xb0] sm:$0xf] %v280_v46 }
  0x37   : > { %283 = vst [vmem:[%s2627_s7 + $0xb4] sm:$0xf] %v282_v47  ;;  %285 = vst [vmem:[%s2627_s7 + $0xb8] sm:$0xf] %v284_v48  ;;  %v286_v49 = vld [vmem:[%s2620_s6 + $0x2f0] sm:$0xf] }
  0x38   : > { %v288_v50 = vld [vmem:[%s2620_s6 + $0x300] sm:$0xf]  ;;  %v290_v51 = vld [vmem:[%s2620_s6 + $0x310] sm:$0xf]  ;;  %287 = vst [vmem:[%s2627_s7 + $0xbc] sm:$0xf] %v286_v49 }
  0x39   : > { %289 = vst [vmem:[%s2627_s7 + $0xc0] sm:$0xf] %v288_v50  ;;  %291 = vst [vmem:[%s2627_s7 + $0xc4] sm:$0xf] %v290_v51  ;;  %v292_v52 = vld [vmem:[%s2620_s6 + $0x320] sm:$0xf] }
  0x3a   : > { %v294_v53 = vld [vmem:[%s2620_s6 + $0x330] sm:$0xf]  ;;  %v296_v54 = vld [vmem:[%s2620_s6 + $0x340] sm:$0xf]  ;;  %293 = vst [vmem:[%s2627_s7 + $0xc8] sm:$0xf] %v292_v52 }
  0x3b   : > { %295 = vst [vmem:[%s2627_s7 + $0xcc] sm:$0xf] %v294_v53  ;;  %297 = vst [vmem:[%s2627_s7 + $0xd0] sm:$0xf] %v296_v54  ;;  %v298_v55 = vld [vmem:[%s2620_s6 + $0x350] sm:$0xf] }
  0x3c   : > { %v300_v56 = vld [vmem:[%s2620_s6 + $0x360] sm:$0xf]  ;;  %v302_v57 = vld [vmem:[%s2620_s6 + $0x370] sm:$0xf]  ;;  %299 = vst [vmem:[%s2627_s7 + $0xd4] sm:$0xf] %v298_v55 }
  0x3d   : > { %301 = vst [vmem:[%s2627_s7 + $0xd8] sm:$0xf] %v300_v56  ;;  %303 = vst [vmem:[%s2627_s7 + $0xdc] sm:$0xf] %v302_v57  ;;  %v304_v58 = vld [vmem:[%s2620_s6 + $0x380] sm:$0xf] }
  0x3e   : > { %v306_v59 = vld [vmem:[%s2620_s6 + $0x390] sm:$0xf]  ;;  %v308_v60 = vld [vmem:[%s2620_s6 + $0x3a0] sm:$0xf]  ;;  %305 = vst [vmem:[%s2627_s7 + $0xe0] sm:$0xf] %v304_v58 }
  0x3f   : > { %307 = vst [vmem:[%s2627_s7 + $0xe4] sm:$0xf] %v306_v59  ;;  %309 = vst [vmem:[%s2627_s7 + $0xe8] sm:$0xf] %v308_v60  ;;  %v310_v61 = vld [vmem:[%s2620_s6 + $0x3b0] sm:$0xf] }
  0x40   : > { %v312_v62 = vld [vmem:[%s2620_s6 + $0x3c0] sm:$0xf]  ;;  %v314_v63 = vld [vmem:[%s2620_s6 + $0x3d0] sm:$0xf]  ;;  %311 = vst [vmem:[%s2627_s7 + $0xec] sm:$0xf] %v310_v61 }
  0x41   : > { %313 = vst [vmem:[%s2627_s7 + $0xf0] sm:$0xf] %v312_v62  ;;  %315 = vst [vmem:[%s2627_s7 + $0xf4] sm:$0xf] %v314_v63  ;;  %v316_v0 = vld [vmem:[%s2620_s6 + $0x3e0] sm:$0xf] }
  0x42   : > { %v318_v2 = vld [vmem:[%s2620_s6 + $0x3f0] sm:$0xf]  ;;  %v320_v3 = vld [vmem:[%s2620_s6 + $0x400] sm:$0xf]  ;;  %317 = vst [vmem:[%s2627_s7 + $0xf8] sm:$0xf] %v316_v0 }
  0x43   : > { %319 = vst [vmem:[%s2627_s7 + $0xfc] sm:$0xf] %v318_v2  ;;  %321 = vst [vmem:[%s2627_s7 + $0x100] sm:$0xf] %v320_v3  ;;  %v322_v4 = vld [vmem:[%s2620_s6 + $0x410] sm:$0xf] }
  0x44   : > { %v324_v5 = vld [vmem:[%s2620_s6 + $0x420] sm:$0xf]  ;;  %v326_v6 = vld [vmem:[%s2620_s6 + $0x430] sm:$0xf]  ;;  %323 = vst [vmem:[%s2627_s7 + $0x104] sm:$0xf] %v322_v4 }
  0x45   : > { %325 = vst [vmem:[%s2627_s7 + $0x108] sm:$0xf] %v324_v5  ;;  %327 = vst [vmem:[%s2627_s7 + $0x10c] sm:$0xf] %v326_v6  ;;  %v328_v7 = vld [vmem:[%s2620_s6 + $0x440] sm:$0xf] }
  0x46   : > { %v330_v8 = vld [vmem:[%s2620_s6 + $0x450] sm:$0xf]  ;;  %v332_v9 = vld [vmem:[%s2620_s6 + $0x460] sm:$0xf]  ;;  %329 = vst [vmem:[%s2627_s7 + $0x110] sm:$0xf] %v328_v7 }
  0x47   : > { %331 = vst [vmem:[%s2627_s7 + $0x114] sm:$0xf] %v330_v8  ;;  %333 = vst [vmem:[%s2627_s7 + $0x118] sm:$0xf] %v332_v9  ;;  %v334_v10 = vld [vmem:[%s2620_s6 + $0x470] sm:$0xf] }
  0x48   : > { %v336_v11 = vld [vmem:[%s2620_s6 + $0x480] sm:$0xf]  ;;  %v338_v12 = vld [vmem:[%s2620_s6 + $0x490] sm:$0xf]  ;;  %335 = vst [vmem:[%s2627_s7 + $0x11c] sm:$0xf] %v334_v10 }
  0x49   : > { %337 = vst [vmem:[%s2627_s7 + $0x120] sm:$0xf] %v336_v11  ;;  %339 = vst [vmem:[%s2627_s7 + $0x124] sm:$0xf] %v338_v12  ;;  %v340_v13 = vld [vmem:[%s2620_s6 + $0x4a0] sm:$0xf] }
  0x4a   : > { %v342_v14 = vld [vmem:[%s2620_s6 + $0x4b0] sm:$0xf]  ;;  %v344_v15 = vld [vmem:[%s2620_s6 + $0x4c0] sm:$0xf]  ;;  %341 = vst [vmem:[%s2627_s7 + $0x128] sm:$0xf] %v340_v13 }
  0x4b   : > { %343 = vst [vmem:[%s2627_s7 + $0x12c] sm:$0xf] %v342_v14  ;;  %345 = vst [vmem:[%s2627_s7 + $0x130] sm:$0xf] %v344_v15  ;;  %v346_v16 = vld [vmem:[%s2620_s6 + $0x4d0] sm:$0xf] }
  0x4c   : > { %v348_v17 = vld [vmem:[%s2620_s6 + $0x4e0] sm:$0xf]  ;;  %v350_v18 = vld [vmem:[%s2620_s6 + $0x4f0] sm:$0xf]  ;;  %347 = vst [vmem:[%s2627_s7 + $0x134] sm:$0xf] %v346_v16 }
  0x4d   : > { %349 = vst [vmem:[%s2627_s7 + $0x138] sm:$0xf] %v348_v17  ;;  %351 = vst [vmem:[%s2627_s7 + $0x13c] sm:$0xf] %v350_v18  ;;  %v352_v19 = vld [vmem:[%s2620_s6 + $0x500] sm:$0xf] }
  0x4e   : > { %v354_v20 = vld [vmem:[%s2620_s6 + $0x510] sm:$0xf]  ;;  %v356_v21 = vld [vmem:[%s2620_s6 + $0x520] sm:$0xf]  ;;  %353 = vst [vmem:[%s2627_s7 + $0x140] sm:$0xf] %v352_v19 }
  0x4f   : > { %355 = vst [vmem:[%s2627_s7 + $0x144] sm:$0xf] %v354_v20  ;;  %357 = vst [vmem:[%s2627_s7 + $0x148] sm:$0xf] %v356_v21  ;;  %v358_v22 = vld [vmem:[%s2620_s6 + $0x530] sm:$0xf] }
  0x50   : > { %v360_v23 = vld [vmem:[%s2620_s6 + $0x540] sm:$0xf]  ;;  %v362_v24 = vld [vmem:[%s2620_s6 + $0x550] sm:$0xf]  ;;  %359 = vst [vmem:[%s2627_s7 + $0x14c] sm:$0xf] %v358_v22 }
  0x51   : > { %361 = vst [vmem:[%s2627_s7 + $0x150] sm:$0xf] %v360_v23  ;;  %363 = vst [vmem:[%s2627_s7 + $0x154] sm:$0xf] %v362_v24  ;;  %v364_v25 = vld [vmem:[%s2620_s6 + $0x560] sm:$0xf] }
  0x52   : > { %v366_v26 = vld [vmem:[%s2620_s6 + $0x570] sm:$0xf]  ;;  %v368_v27 = vld [vmem:[%s2620_s6 + $0x580] sm:$0xf]  ;;  %365 = vst [vmem:[%s2627_s7 + $0x158] sm:$0xf] %v364_v25 }
  0x53   : > { %367 = vst [vmem:[%s2627_s7 + $0x15c] sm:$0xf] %v366_v26  ;;  %369 = vst [vmem:[%s2627_s7 + $0x160] sm:$0xf] %v368_v27  ;;  %v370_v28 = vld [vmem:[%s2620_s6 + $0x590] sm:$0xf] }
  0x54   : > { %v372_v29 = vld [vmem:[%s2620_s6 + $0x5a0] sm:$0xf]  ;;  %v374_v30 = vld [vmem:[%s2620_s6 + $0x5b0] sm:$0xf]  ;;  %371 = vst [vmem:[%s2627_s7 + $0x164] sm:$0xf] %v370_v28 }
  0x55   : > { %373 = vst [vmem:[%s2627_s7 + $0x168] sm:$0xf] %v372_v29  ;;  %375 = vst [vmem:[%s2627_s7 + $0x16c] sm:$0xf] %v374_v30  ;;  %v376_v31 = vld [vmem:[%s2620_s6 + $0x5c0] sm:$0xf] }
  0x56   : > { %v378_v32 = vld [vmem:[%s2620_s6 + $0x5d0] sm:$0xf]  ;;  %v380_v33 = vld [vmem:[%s2620_s6 + $0x5e0] sm:$0xf]  ;;  %377 = vst [vmem:[%s2627_s7 + $0x170] sm:$0xf] %v376_v31 }
  0x57   : > { %379 = vst [vmem:[%s2627_s7 + $0x174] sm:$0xf] %v378_v32  ;;  %381 = vst [vmem:[%s2627_s7 + $0x178] sm:$0xf] %v380_v33  ;;  %v382_v34 = vld [vmem:[%s2620_s6 + $0x5f0] sm:$0xf] }
  0x58   : > { %v384_v35 = vld [vmem:[%s2620_s6 + $0x600] sm:$0xf]  ;;  %v386_v36 = vld [vmem:[%s2620_s6 + $0x610] sm:$0xf]  ;;  %383 = vst [vmem:[%s2627_s7 + $0x17c] sm:$0xf] %v382_v34 }
  0x59   : > { %385 = vst [vmem:[%s2627_s7 + $0x180] sm:$0xf] %v384_v35  ;;  %387 = vst [vmem:[%s2627_s7 + $0x184] sm:$0xf] %v386_v36  ;;  %v388_v37 = vld [vmem:[%s2620_s6 + $0x620] sm:$0xf] }
  0x5a   : > { %v390_v38 = vld [vmem:[%s2620_s6 + $0x630] sm:$0xf]  ;;  %v392_v39 = vld [vmem:[%s2620_s6 + $0x640] sm:$0xf]  ;;  %389 = vst [vmem:[%s2627_s7 + $0x188] sm:$0xf] %v388_v37 }
  0x5b   : > { %391 = vst [vmem:[%s2627_s7 + $0x18c] sm:$0xf] %v390_v38  ;;  %393 = vst [vmem:[%s2627_s7 + $0x190] sm:$0xf] %v392_v39  ;;  %v394_v40 = vld [vmem:[%s2620_s6 + $0x650] sm:$0xf] }
  0x5c   : > { %v396_v41 = vld [vmem:[%s2620_s6 + $0x660] sm:$0xf]  ;;  %v398_v42 = vld [vmem:[%s2620_s6 + $0x670] sm:$0xf]  ;;  %395 = vst [vmem:[%s2627_s7 + $0x194] sm:$0xf] %v394_v40 }
  0x5d   : > { %397 = vst [vmem:[%s2627_s7 + $0x198] sm:$0xf] %v396_v41  ;;  %399 = vst [vmem:[%s2627_s7 + $0x19c] sm:$0xf] %v398_v42  ;;  %v400_v43 = vld [vmem:[%s2620_s6 + $0x680] sm:$0xf] }
  0x5e   : > { %v402_v44 = vld [vmem:[%s2620_s6 + $0x690] sm:$0xf]  ;;  %v404_v45 = vld [vmem:[%s2620_s6 + $0x6a0] sm:$0xf]  ;;  %401 = vst [vmem:[%s2627_s7 + $0x1a0] sm:$0xf] %v400_v43 }
  0x5f   : > { %403 = vst [vmem:[%s2627_s7 + $0x1a4] sm:$0xf] %v402_v44  ;;  %405 = vst [vmem:[%s2627_s7 + $0x1a8] sm:$0xf] %v404_v45  ;;  %v406_v46 = vld [vmem:[%s2620_s6 + $0x6b0] sm:$0xf] }
  0x60   : > { %v408_v47 = vld [vmem:[%s2620_s6 + $0x6c0] sm:$0xf]  ;;  %v410_v48 = vld [vmem:[%s2620_s6 + $0x6d0] sm:$0xf]  ;;  %407 = vst [vmem:[%s2627_s7 + $0x1ac] sm:$0xf] %v406_v46 }
  0x61   : > { %409 = vst [vmem:[%s2627_s7 + $0x1b0] sm:$0xf] %v408_v47  ;;  %411 = vst [vmem:[%s2627_s7 + $0x1b4] sm:$0xf] %v410_v48  ;;  %v412_v49 = vld [vmem:[%s2620_s6 + $0x6e0] sm:$0xf] }
  0x62   : > { %v414_v50 = vld [vmem:[%s2620_s6 + $0x6f0] sm:$0xf]  ;;  %v416_v51 = vld [vmem:[%s2620_s6 + $0x700] sm:$0xf]  ;;  %413 = vst [vmem:[%s2627_s7 + $0x1b8] sm:$0xf] %v412_v49 }
  0x63   : > { %415 = vst [vmem:[%s2627_s7 + $0x1bc] sm:$0xf] %v414_v50  ;;  %417 = vst [vmem:[%s2627_s7 + $0x1c0] sm:$0xf] %v416_v51  ;;  %v418_v52 = vld [vmem:[%s2620_s6 + $0x710] sm:$0xf] }
  0x64   : > { %v420_v53 = vld [vmem:[%s2620_s6 + $0x720] sm:$0xf]  ;;  %v422_v54 = vld [vmem:[%s2620_s6 + $0x730] sm:$0xf]  ;;  %419 = vst [vmem:[%s2627_s7 + $0x1c4] sm:$0xf] %v418_v52 }
  0x65   : > { %421 = vst [vmem:[%s2627_s7 + $0x1c8] sm:$0xf] %v420_v53  ;;  %423 = vst [vmem:[%s2627_s7 + $0x1cc] sm:$0xf] %v422_v54  ;;  %v424_v55 = vld [vmem:[%s2620_s6 + $0x740] sm:$0xf] }
  0x66   : > { %v426_v56 = vld [vmem:[%s2620_s6 + $0x750] sm:$0xf]  ;;  %v428_v57 = vld [vmem:[%s2620_s6 + $0x760] sm:$0xf]  ;;  %425 = vst [vmem:[%s2627_s7 + $0x1d0] sm:$0xf] %v424_v55 }
  0x67   : > { %427 = vst [vmem:[%s2627_s7 + $0x1d4] sm:$0xf] %v426_v56  ;;  %429 = vst [vmem:[%s2627_s7 + $0x1d8] sm:$0xf] %v428_v57  ;;  %v430_v58 = vld [vmem:[%s2620_s6 + $0x770] sm:$0xf] }
  0x68   : > { %v432_v59 = vld [vmem:[%s2620_s6 + $0x780] sm:$0xf]  ;;  %v434_v60 = vld [vmem:[%s2620_s6 + $0x790] sm:$0xf]  ;;  %431 = vst [vmem:[%s2627_s7 + $0x1dc] sm:$0xf] %v430_v58 }
  0x69   : > { %433 = vst [vmem:[%s2627_s7 + $0x1e0] sm:$0xf] %v432_v59  ;;  %435 = vst [vmem:[%s2627_s7 + $0x1e4] sm:$0xf] %v434_v60  ;;  %v436_v61 = vld [vmem:[%s2620_s6 + $0x7a0] sm:$0xf] }
  0x6a   : > { %v438_v62 = vld [vmem:[%s2620_s6 + $0x7b0] sm:$0xf]  ;;  %v440_v63 = vld [vmem:[%s2620_s6 + $0x7c0] sm:$0xf]  ;;  %437 = vst [vmem:[%s2627_s7 + $0x1e8] sm:$0xf] %v436_v61 }
  0x6b   : > { %439 = vst [vmem:[%s2627_s7 + $0x1ec] sm:$0xf] %v438_v62  ;;  %441 = vst [vmem:[%s2627_s7 + $0x1f0] sm:$0xf] %v440_v63  ;;  %v442_v0 = vld [vmem:[%s2620_s6 + $0x7d0] sm:$0xf] }
  0x6c   : > { %v444_v2 = vld [vmem:[%s2620_s6 + $0x7e0] sm:$0xf]  ;;  %v446_v3 = vld [vmem:[%s2620_s6 + $0x7f0] sm:$0xf]  ;;  %443 = vst [vmem:[%s2627_s7 + $0x1f4] sm:$0xf] %v442_v0 }
  0x6d   : > { %445 = vst [vmem:[%s2627_s7 + $0x1f8] sm:$0xf] %v444_v2  ;;  %447 = vst [vmem:[%s2627_s7 + $0x1fc] sm:$0xf] %v446_v3  ;;  %v448_v4 = vld [vmem:[%s2620_s6 + $0x800] sm:$0xf] }
  0x6e   : > { %v450_v5 = vld [vmem:[%s2620_s6 + $0x810] sm:$0xf]  ;;  %v452_v6 = vld [vmem:[%s2620_s6 + $0x820] sm:$0xf]  ;;  %449 = vst [vmem:[%s2627_s7 + $0x200] sm:$0xf] %v448_v4 }
  0x6f   : > { %451 = vst [vmem:[%s2627_s7 + $0x204] sm:$0xf] %v450_v5  ;;  %453 = vst [vmem:[%s2627_s7 + $0x208] sm:$0xf] %v452_v6  ;;  %v454_v7 = vld [vmem:[%s2620_s6 + $0x830] sm:$0xf] }
  0x70   : > { %v456_v8 = vld [vmem:[%s2620_s6 + $0x840] sm:$0xf]  ;;  %v458_v9 = vld [vmem:[%s2620_s6 + $0x850] sm:$0xf]  ;;  %455 = vst [vmem:[%s2627_s7 + $0x20c] sm:$0xf] %v454_v7 }
  0x71   : > { %457 = vst [vmem:[%s2627_s7 + $0x210] sm:$0xf] %v456_v8  ;;  %459 = vst [vmem:[%s2627_s7 + $0x214] sm:$0xf] %v458_v9  ;;  %v460_v10 = vld [vmem:[%s2620_s6 + $0x860] sm:$0xf] }
  0x72   : > { %v462_v11 = vld [vmem:[%s2620_s6 + $0x870] sm:$0xf]  ;;  %v464_v12 = vld [vmem:[%s2620_s6 + $0x880] sm:$0xf]  ;;  %461 = vst [vmem:[%s2627_s7 + $0x218] sm:$0xf] %v460_v10 }
  0x73   : > { %463 = vst [vmem:[%s2627_s7 + $0x21c] sm:$0xf] %v462_v11  ;;  %465 = vst [vmem:[%s2627_s7 + $0x220] sm:$0xf] %v464_v12  ;;  %v466_v13 = vld [vmem:[%s2620_s6 + $0x890] sm:$0xf] }
  0x74   : > { %v468_v14 = vld [vmem:[%s2620_s6 + $0x8a0] sm:$0xf]  ;;  %v470_v15 = vld [vmem:[%s2620_s6 + $0x8b0] sm:$0xf]  ;;  %467 = vst [vmem:[%s2627_s7 + $0x224] sm:$0xf] %v466_v13 }
  0x75   : > { %469 = vst [vmem:[%s2627_s7 + $0x228] sm:$0xf] %v468_v14  ;;  %471 = vst [vmem:[%s2627_s7 + $0x22c] sm:$0xf] %v470_v15  ;;  %v472_v16 = vld [vmem:[%s2620_s6 + $0x8c0] sm:$0xf] }
  0x76   : > { %v474_v17 = vld [vmem:[%s2620_s6 + $0x8d0] sm:$0xf]  ;;  %v476_v18 = vld [vmem:[%s2620_s6 + $0x8e0] sm:$0xf]  ;;  %473 = vst [vmem:[%s2627_s7 + $0x230] sm:$0xf] %v472_v16 }
  0x77   : > { %475 = vst [vmem:[%s2627_s7 + $0x234] sm:$0xf] %v474_v17  ;;  %477 = vst [vmem:[%s2627_s7 + $0x238] sm:$0xf] %v476_v18  ;;  %v478_v19 = vld [vmem:[%s2620_s6 + $0x8f0] sm:$0xf] }
  0x78   : > { %479 = vst [vmem:[%s2627_s7 + $0x23c] sm:$0xf] %v478_v19 }
  0x79 PF: > { %p2112_p8 = scmp.ge.s32.totalorder %s2538_s21, 1  ;;  %p795_p9 = scmp.lt.s32.totalorder %s2538_s21, 5 }
  0x7b   : > { %p796_p10 = pnand %p2112_p8, %p795_p9 }
  0x7d   : > { %799 = sbr.rel (%p796_p10) target bundleno = 462 (0x1ce), region = 69 }
  0x84   : > { %s802_s8 = sand.u32 1, %s2522_s17   ;;  %v865_v20 = vld [vmem:[%s3051_s2] sm:$0xff]   ;;  %v2235_v22 = vpack.c.bf16 %v2570_v1, %v2570_v1  ;;  %v2928_v24 = vld [vmem:[%s3051_s2 + $0x8] sm:$0xff]   ;;  %v2933_v25 = vld [vmem:[%s3051_s2 + $0x10] sm:$0xff]   ;;  %vm2541_vm0 = vmmov 0   ;;  %p849_p11 = scmp.lt.s32.totalorder %s2530_s19, 3 }
  0x85   : > { %v2121_v21 = vld [vmem:[%s3051_s2 + $0x20] sm:$0xf]  ;;  %s2378_s13 = smul.u32 576, %s802_s8  ;;  %874 = vst [vmem:[#allocation9] sm:$0xff] %v865_v20   ;;  %v2939_v27 = vld [vmem:[%s3051_s2 + $0x18] sm:$0xff]   ;;  %s2113_s6 = sshll.u32 %s802_s8, 3 }
  0x86   : > { %v2228_v23 = vunpack.c.l.bf16 %v2121_v21  ;;  %2236 = vst [vmem:[#allocation9 + $0x28] sm:$0xff] %v2235_v22   ;;  %2241 = vst [vmem:[#allocation9 + $0x30] sm:$0xff] %v2235_v22   ;;  %s850_s28 = scalar_select %p849_p11, %s2530_s19, 3 }
  0x87   : > { %2246 = vst [vmem:[#allocation9 + $0x38] sm:$0xff] %v2235_v22   ;;  %2251 = vst [vmem:[#allocation9 + $0x40] sm:$0xff] %v2235_v22   ;;  %s2941_s27 = scalar_lea.vmem [#allocation7], %s2378_s13  ;;  %s835_s7 = scalar_lea.vmem [#allocation8], %s2113_s6 }
  0x88   : > { %v2230_v26 = vpack.c.bf16 %v2570_v1, %v2228_v23  ;;  %v2421_v28 = vld [vmem:[%s2941_s27 + $0x40] sm:$0xff]   ;;  %v2425_v32 = vld [vmem:[%s2941_s27 + $0x48] sm:$0xff]   ;;  %v2429_v36 = vld [vmem:[%s2941_s27 + $0x50] sm:$0xff]   ;;  %s851_s5 = scalar_lea.vmem %s3050_s1, %s850_s28  ;;  %s2207_s9 = sshll.u32 (%p2607_p6), %s2530_s19, 2 }
  0x89   : > { %v2422_v29 = vld [vmem:[%s2941_s27] sm:$0xff]   ;;  %2260 = vmatprep.subr.bf16.mxu0 %v2421_v28  ;;  %v2426_v33 = vld [vmem:[%s2941_s27 + $0x8] sm:$0xff]   ;;  %v2430_v37 = vld [vmem:[%s2941_s27 + $0x10] sm:$0xff]   ;;  %s1971_s12 = scalar_lea.vmem (%p2607_p6), %s3053_s4, %s2207_s9 }
  0x8a   : > { %2231 = vst [vmem:[#allocation9 + $0x20] sm:$0xff] %v2230_v26   ;;  %v2423_v30 = vld [vmem:[%s2941_s27 + $0xc0] sm:$0xff]   ;;  %2261 = vmatpush3.bf16.msra.mxu0 %v2422_v29  ;;  %v2427_v34 = vld [vmem:[%s2941_s27 + $0xc8] sm:$0xff]   ;;  %v2431_v38 = vld [vmem:[%s2941_s27 + $0xd0] sm:$0xff]  }
  0x8b   : > { %v2424_v31 = vld [vmem:[%s2941_s27 + $0x80] sm:$0xff]   ;;  %2282 = vmatprep.subr.bf16.mxu1 %v2423_v30  ;;  %2262 = vmatprep.subr.bf16.mxu0 %v2425_v32  ;;  %v2428_v35 = vld [vmem:[%s2941_s27 + $0x88] sm:$0xff]   ;;  %v2432_v39 = vld [vmem:[%s2941_s27 + $0x90] sm:$0xff]  }
  0x8c   : > { %2283 = vmatpush3.bf16.msra.mxu1 %v2424_v31  ;;  %v2433_v40 = vld [vmem:[%s2941_s27 + $0x58] sm:$0xff]   ;;  %v2437_v44 = vld [vmem:[%s2941_s27 + $0x60] sm:$0xff]   ;;  %v2441_v48 = vld [vmem:[%s2941_s27 + $0x68] sm:$0xff]  }
  0x8d   : > { %2284 = vmatprep.subr.bf16.mxu1 %v2427_v34  ;;  %v2434_v41 = vld [vmem:[%s2941_s27 + $0x18] sm:$0xff]   ;;  %v2438_v45 = vld [vmem:[%s2941_s27 + $0x20] sm:$0xff]   ;;  %v2442_v49 = vld [vmem:[%s2941_s27 + $0x28] sm:$0xff]  }
  0x8e   : > { %2263 = vmatpush3.bf16.msra.mxu0 %v2426_v33  ;;  %v2435_v42 = vld [vmem:[%s2941_s27 + $0xd8] sm:$0xff]   ;;  %v2439_v46 = vld [vmem:[%s2941_s27 + $0xe0] sm:$0xff]   ;;  %v2443_v50 = vld [vmem:[%s2941_s27 + $0xe8] sm:$0xff]  }
  0x8f   : > { %2264 = vmatprep.subr.bf16.mxu0 %v2429_v36  ;;  %v2436_v43 = vld [vmem:[%s2941_s27 + $0x98] sm:$0xff]   ;;  %v2440_v47 = vld [vmem:[%s2941_s27 + $0xa0] sm:$0xff]   ;;  %v2444_v51 = vld [vmem:[%s2941_s27 + $0xa8] sm:$0xff]  }
  0x90   : > { %2285 = vmatpush3.bf16.msra.mxu1 %v2428_v35  ;;  %v2445_v52 = vld [vmem:[%s2941_s27 + $0x70] sm:$0xff]   ;;  %v2449_v56 = vld [vmem:[%s2941_s27 + $0x78] sm:$0xff]   ;;  %v2456_v62 = vld [vmem:[%s2941_s27 + $0x140] sm:$0xff]  }
  0x91   : > { %2286 = vmatprep.subr.bf16.mxu1 %v2431_v38  ;;  %v2446_v53 = vld [vmem:[%s2941_s27 + $0x30] sm:$0xff]   ;;  %v2450_v57 = vld [vmem:[%s2941_s27 + $0x38] sm:$0xff]   ;;  %v2458_v3 = vld [vmem:[%s2941_s27 + $0x100] sm:$0xff]  }
  0x92   : > { %2265 = vmatpush3.bf16.msra.mxu0 %v2430_v37  ;;  %v2447_v54 = vld [vmem:[%s2941_s27 + $0xf0] sm:$0xff]   ;;  %v2451_v58 = vld [vmem:[%s2941_s27 + $0xf8] sm:$0xff]   ;;  %v2459_v4 = vld [vmem:[%s2941_s27 + $0x1c0] sm:$0xff]  }
  0x93   : > { %2266 = vmatprep.subr.bf16.mxu0 %v2433_v40  ;;  %v2448_v55 = vld [vmem:[%s2941_s27 + $0xb0] sm:$0xff]   ;;  %v2455_v61 = vld [vmem:[%s2941_s27 + $0xb8] sm:$0xff]   ;;  %v2460_v5 = vld [vmem:[%s2941_s27 + $0x180] sm:$0xff]  }
  0x94   : > { %2287 = vmatpush3.bf16.msra.mxu1 %v2432_v39  ;;  %v2452_v59 = vld [vmem:[#allocation9] ss:$36 sps:$4 sm:$0xff]   ;;  %v1110_v63 = vld [vmem:[#allocation9 + $0x2c] sm:$0xff]  ;;  %v2461_v6 = vld [vmem:[%s2941_s27 + $0x148] sm:$0xff]   ;;  %v2540_v39 = vmov 0.0  }
  0x95   : > { %2288 = vmatprep.subr.bf16.mxu1 %v2435_v42  ;;  %v2454_v60 = vld [vmem:[#allocation9 + $0x4] ss:$36 sps:$4 sm:$0xff]   ;;  %v2125_v0 = vcombine.low %v2928_v24, %v1110_v63  ;;  %v2126_v2 = vcombine.high %v2928_v24, %v1110_v63  ;;  %v2462_v7 = vld [vmem:[%s2941_s27 + $0x108] sm:$0xff]   ;;  %v2473_v18 = vld [vmem:[%s2941_s27 + $0x160] sm:$0xff]  }
  0x96   : > { %2267 = vmatpush3.bf16.msra.mxu0 %v2434_v41  ;;  %1775 = vmatprep.mubr.bf16.mxu0 %v2454_v60  ;;  %v2463_v8 = vld [vmem:[%s2941_s27 + $0x1c8] sm:$0xff]   ;;  %v2465_v10 = vld [vmem:[%s2941_s27 + $0x150] sm:$0xff]   ;;  %v2469_v14 = vld [vmem:[%s2941_s27 + $0x158] sm:$0xff]  }
  0x97   : > { %2268 = vmatprep.subr.bf16.mxu0 %v2437_v44  ;;  %1816 = vmatprep.mubr.bf16.mxu1 %v2126_v2  ;;  %v2464_v9 = vld [vmem:[%s2941_s27 + $0x188] sm:$0xff]   ;;  %v2466_v11 = vld [vmem:[%s2941_s27 + $0x110] sm:$0xff]   ;;  %v2470_v15 = vld [vmem:[%s2941_s27 + $0x118] sm:$0xff]  }
  0x98   : > { %2289 = vmatpush3.bf16.msra.mxu1 %v2436_v43  ;;  %v2467_v12 = vld [vmem:[%s2941_s27 + $0x1d0] sm:$0xff]   ;;  %v2471_v16 = vld [vmem:[%s2941_s27 + $0x1d8] sm:$0xff]   ;;  %v2474_v19 = vld [vmem:[%s2941_s27 + $0x120] sm:$0xff]  }
  0x99   : > { %2290 = vmatprep.subr.bf16.mxu1 %v2439_v46  ;;  %v2468_v13 = vld [vmem:[%s2941_s27 + $0x190] sm:$0xff]   ;;  %v2472_v17 = vld [vmem:[%s2941_s27 + $0x198] sm:$0xff]   ;;  %v2475_v20 = vld [vmem:[%s2941_s27 + $0x1e0] sm:$0xff]  }
  0x9a   : > { %2269 = vmatpush3.bf16.msra.mxu0 %v2438_v45  ;;  %v2476_v21 = vld [vmem:[%s2941_s27 + $0x1a0] sm:$0xff]   ;;  %v2477_v22 = vld [vmem:[%s2941_s27 + $0x168] sm:$0xff]   ;;  %v2481_v28 = vld [vmem:[%s2941_s27 + $0x170] sm:$0xff]  }
  0x9b   : > { %2270 = vmatprep.subr.bf16.mxu0 %v2441_v48  ;;  %v2478_v23 = vld [vmem:[%s2941_s27 + $0x128] sm:$0xff]   ;;  %v2482_v29 = vld [vmem:[%s2941_s27 + $0x130] sm:$0xff]   ;;  %v2485_v32 = vld [vmem:[%s2941_s27 + $0x178] sm:$0xff]  }
  0x9c   : > { %2291 = vmatpush3.bf16.msra.mxu1 %v2440_v47  ;;  %v2479_v24 = vld [vmem:[%s2941_s27 + $0x1e8] sm:$0xff]   ;;  %v2483_v30 = vld [vmem:[%s2941_s27 + $0x1f0] sm:$0xff]   ;;  %v2486_v33 = vld [vmem:[%s2941_s27 + $0x138] sm:$0xff]  }
  0x9d   : > { %2292 = vmatprep.subr.bf16.mxu1 %v2443_v50  ;;  %v2480_v26 = vld [vmem:[%s2941_s27 + $0x1a8] sm:$0xff]   ;;  %v2484_v31 = vld [vmem:[%s2941_s27 + $0x1b0] sm:$0xff]   ;;  %v2487_v34 = vld [vmem:[%s2941_s27 + $0x1f8] sm:$0xff]  }
  0x9e   : > { %2271 = vmatpush3.bf16.msra.mxu0 %v2442_v49  ;;  %v1111_v35 = vld [vmem:[#allocation9 + $0x34] sm:$0xff]  ;;  %v2489_v38 = vld [vmem:[%s2941_s27 + $0x1b8] sm:$0xff]   ;;  %v1112_v40 = vld [vmem:[#allocation9 + $0x3c] sm:$0xff] }
  0x9f   : > { %2272 = vmatprep.subr.bf16.mxu0 %v2445_v52  ;;  %v2127_v36 = vcombine.low %v2933_v25, %v1111_v35  ;;  %v2128_v37 = vcombine.high %v2933_v25, %v1111_v35  ;;  %v2129_v41 = vcombine.low %v2939_v27, %v1112_v40  ;;  %v2130_v42 = vcombine.high %v2939_v27, %v1112_v40  ;;  %v2491_v43 = vld [vmem:[%s2941_s27 + $0x200] sm:$0xff]   ;;  %v2492_v25 = vld [vmem:[%s2941_s27 + $0x208] sm:$0xff]   ;;  %v2493_v44 = vld [vmem:[%s2941_s27 + $0x210] sm:$0xff]  }
  0xa0   : > { %2293 = vmatpush3.bf16.msra.mxu1 %v2444_v51  ;;  %v2494_v45 = vld [vmem:[%s2941_s27 + $0x218] sm:$0xff]   ;;  %v2495_v27 = vld [vmem:[%s2941_s27 + $0x220] sm:$0xff]   ;;  %v2496_v46 = vld [vmem:[%s2941_s27 + $0x228] sm:$0xff]  }
  0xa1   : > { %2294 = vmatprep.subr.bf16.mxu1 %v2447_v54  ;;  %v2497_v47 = vld [vmem:[%s2941_s27 + $0x230] sm:$0xff]   ;;  %v2498_v48 = vld [vmem:[%s2941_s27 + $0x238] sm:$0xff]   ;;  %v2122_v51 = vld [vmem:[%s851_s5] ss:$0 sm:$0xff] }
  0xa2   : > { %2273 = vmatpush3.bf16.msra.mxu0 %v2446_v53  ;;  %v2499_v49 = vld [vmem:[#allocation9 + $0x20] ss:$36 sps:$4 sm:$0xff]  }
  0xa3   : > { %2274 = vmatprep.subr.bf16.mxu0 %v2449_v56 }
  0xa4   : > { %2295 = vmatpush3.bf16.msra.mxu1 %v2448_v55 }
  0xa5   : > { %2296 = vmatprep.subr.bf16.mxu1 %v2451_v58 }
  0xa6   : > { %2275 = vmatpush3.bf16.msra.mxu0 %v2450_v57 }
  0xa7   : > { %2304 = vmatprep.subr.bf16.mxu0 %v2456_v62 }
  0xa8   : > { %2297 = vmatpush3.bf16.msra.mxu1 %v2455_v61 }
  0xa9   : > { %1776 = vmatmul.mubr.bf16.vlgmr.msra.gmra.mrb[0].mxu0 %v2452_v59  ;;  %2326 = vmatprep.subr.bf16.mxu1 %v2459_v4 }
  0xaa   : > { %2305 = vmatpush3.bf16.msra.mxu0 %v2458_v3  ;;  %1857 = vmatprep.mubr.bf16.mxu0 %v2128_v37 }
  0xab   : > { %1817 = vmatmul.mubr.bf16.vlgmr.msra.gmra.mrb[0].mxu1 %v2125_v0  ;;  %2306 = vmatprep.subr.bf16.mxu0 %v2461_v6 }
  0xac   : > { %2327 = vmatpush3.bf16.msra.mxu1 %v2460_v5  ;;  %1898 = vmatprep.mubr.bf16.mxu1 %v2130_v42 }
  0xad   : > { %2328 = vmatprep.subr.bf16.mxu1 %v2463_v8 }
  0xae   : > { %2307 = vmatpush3.bf16.msra.mxu0 %v2462_v7 }
  0xaf   : > { %2308 = vmatprep.subr.bf16.mxu0 %v2465_v10 }
  0xb0   : > { %2329 = vmatpush3.bf16.msra.mxu1 %v2464_v9 }
  0xb1   : > { %2330 = vmatprep.subr.bf16.mxu1 %v2467_v12 }
  0xb2   : > { %2309 = vmatpush3.bf16.msra.mxu0 %v2466_v11 }
  0xb3   : > { %2310 = vmatprep.subr.bf16.mxu0 %v2469_v14 }
  0xb4   : > { %2331 = vmatpush3.bf16.msra.mxu1 %v2468_v13 }
  0xb5   : > { %2332 = vmatprep.subr.bf16.mxu1 %v2471_v16 }
  0xb6   : > { %2311 = vmatpush3.bf16.msra.mxu0 %v2470_v15 }
  0xb7   : > { %2312 = vmatprep.subr.bf16.mxu0 %v2473_v18 }
  0xb8   : > { %2333 = vmatpush3.bf16.msra.mxu1 %v2472_v17 }
  0xb9   : > { %2334 = vmatprep.subr.bf16.mxu1 %v2475_v20 }
  0xba   : > { %2313 = vmatpush3.bf16.msra.mxu0 %v2474_v19 }
  0xbb   : > { %2314 = vmatprep.subr.bf16.mxu0 %v2477_v22 }
  0xbc   : > { %2335 = vmatpush3.bf16.msra.mxu1 %v2476_v21 }
  0xbd   : > { %2336 = vmatprep.subr.bf16.mxu1 %v2479_v24 }
  0xbe   : > { %2315 = vmatpush3.bf16.msra.mxu0 %v2478_v23 }
  0xbf   : > { %2316 = vmatprep.subr.bf16.mxu0 %v2481_v28 }
  0xc0   : > { %2337 = vmatpush3.bf16.msra.mxu1 %v2480_v26 }
  0xc1   : > { %2338 = vmatprep.subr.bf16.mxu1 %v2483_v30 }
  0xc2   : > { %2317 = vmatpush3.bf16.msra.mxu0 %v2482_v29 }
  0xc3   : > { %2318 = vmatprep.subr.bf16.mxu0 %v2485_v32 }
  0xc4   : > { %2339 = vmatpush3.bf16.msra.mxu1 %v2484_v31 }
  0xc5   : > { %2340 = vmatprep.subr.bf16.mxu1 %v2487_v34 }
  0xc6   : > { %2319 = vmatpush3.bf16.msra.mxu0 %v2486_v33 }
  0xc7   : > { %2357 = vmatprep.subr.bf16.mxu0 %v2540_v39 }
  0xc8   : > { %2341 = vmatpush3.bf16.msra.mxu1 %v2489_v38 }
  0xc9   : > { %1858 = vmatmul.mubr.bf16.vlgmr.msra.gmra.mrb[4].mxu0 %v2127_v36 }
  0xca   : > { %2358 = vmatpush3.bf16.msra.mxu0 %v2491_v43  ;;  %2373 = vmatprep.mubr.msk.bf16.mxu0 %vm2541_vm0, %v2540_v39 }
  0xcb   : > { %1899 = vmatmul.mubr.bf16.vlgmr.msra.gmra.mrb[4].mxu1 %v2129_v41  ;;  %2359 = vmatprep.subr.bf16.mxu0 %v2540_v39 }
  0xce   : > { %2360 = vmatpush3.bf16.msra.mxu0 %v2492_v25 }
  0xcf   : > { %2361 = vmatprep.subr.bf16.mxu0 %v2540_v39 }
  0xd2   : > { %2362 = vmatpush3.bf16.msra.mxu0 %v2493_v44 }
  0xd3   : > { %2363 = vmatprep.subr.bf16.mxu0 %v2540_v39 }
  0xd6   : > { %2364 = vmatpush3.bf16.msra.mxu0 %v2494_v45 }
  0xd7   : > { %2365 = vmatprep.subr.bf16.mxu0 %v2540_v39 }
  0xda   : > { %2366 = vmatpush3.bf16.msra.mxu0 %v2495_v27 }
  0xdb   : > { %2367 = vmatprep.subr.bf16.mxu0 %v2540_v39 }
  0xde   : > { %2368 = vmatpush3.bf16.msra.mxu0 %v2496_v46 }
  0xdf   : > { %2369 = vmatprep.subr.bf16.mxu0 %v2540_v39 }
  0xe2   : > { %2370 = vmatpush3.bf16.msra.mxu0 %v2497_v47 }
  0xe3   : > { %2371 = vmatprep.subr.bf16.mxu0 %v2540_v39 }
  0xe6   : > { %2372 = vmatpush3.bf16.msra.mxu0 %v2498_v48 }
  0xe9   : > { %2374 = vmatmul.mubr.bf16.vlgmr.msra.gmra.mrb[8].mxu0 %v2499_v49 }
 0x17c   : > { %v2276_v50 = vpop.f32.mrb[0].mxu0 }
 0x17d   : > { %v2277_v52 = vpop.f32.mrb[1].mxu0 }
 0x17e   : > { %v2278_v53 = vadd.f32 %v2277_v52, %v2276_v50  ;;  %v2279_v54 = vpop.f32.mrb[2].mxu0  ;;  %v2298_v55 = vpop.f32.mrb[0].mxu1 }
 0x17f   : > { %v2280_v56 = vpop.f32.mrb[3].mxu0  ;;  %v2299_v59 = vpop.f32.mrb[1].mxu1 }
 0x180   : > { %v1778_v57 = vadd.f32 %v2278_v53, %v2122_v51  ;;  %v2281_v58 = vadd.f32 %v2280_v56, %v2279_v54  ;;  %v2300_v60 = vadd.f32 %v2299_v59, %v2298_v55  ;;  %v2301_v61 = vpop.f32.mrb[2].mxu1 }
 0x181   : > { %v2302_v63 = vpop.f32.mrb[3].mxu1 }
 0x182   : > { %v1781_v62 = vadd.f32 %v2281_v58, %v2122_v51  ;;  %v1819_v0 = vadd.f32 %v2300_v60, %v1778_v57  ;;  %v2303_v2 = vadd.f32 %v2302_v63, %v2301_v61 }
 0x184   : > { %v1822_v3 = vadd.f32 %v2303_v2, %v1781_v62 }
 0x19c   : > { %v2320_v4 = vpop.f32.mrb[4].mxu0 }
 0x19d   : > { %v2321_v5 = vpop.f32.mrb[5].mxu0 }
 0x19e   : > { %v2322_v6 = vadd.f32 %v2321_v5, %v2320_v4  ;;  %v2323_v7 = vpop.f32.mrb[6].mxu0  ;;  %v2342_v8 = vpop.f32.mrb[4].mxu1 }
 0x19f   : > { %v2324_v9 = vpop.f32.mrb[7].mxu0  ;;  %v2343_v10 = vpop.f32.mrb[5].mxu1 }
 0x1a0   : > { %v1860_v11 = vadd.f32 %v2322_v6, %v1819_v0  ;;  %v2325_v12 = vadd.f32 %v2324_v9, %v2323_v7  ;;  %v2344_v13 = vadd.f32 %v2343_v10, %v2342_v8  ;;  %v2345_v14 = vpop.f32.mrb[6].mxu1 }
 0x1a1   : > { %v2346_v15 = vpop.f32.mrb[7].mxu1 }
 0x1a2   : > { %v1863_v16 = vadd.f32 %v2325_v12, %v1822_v3  ;;  %v2347_v17 = vadd.f32 %v2346_v15, %v2345_v14  ;;  %v1901_v18 = vadd.f32 %v2344_v13, %v1860_v11 }
 0x1a4   : > { %v1904_v19 = vadd.f32 %v2347_v17, %v1863_v16 }
 0x1bc   : > { %v1941_v20 = vpop.f32.mrb[8].mxu0 }
 0x1bd   : > { %v1942_v21 = vadd.f32 %v1941_v20, %v1901_v18  ;;  %v2375_v22 = vpop.f32.mrb[9].mxu0 }
 0x1be   : > { %v1944_v23 = vpop.f32.mrb[10].mxu0 }
 0x1bf   : > { %v1945_v24 = vadd.f32 %v1944_v23, %v1904_v19  ;;  %v2376_v26 = vpop.f32.mrb[11].mxu0  ;;  %v1948_v28 = vmax.f32 %v1942_v21, 0.0  ;;  %1966 = sbr.rel (!%p2607_p6) target bundleno = 462 (0x1ce), region = 77 }
 0x1c1   : > { %v1949_v29 = vmax.f32 %v1945_v24, 0.0 }
 0x1c3   : > { %v2255_v30 = vpack.c.bf16 %v1949_v29, %v1948_v28 }
 0x1c5   : > { %2256 = vst [vmem:[%s835_s7] sm:$0xff] %v2255_v30  }
 0x1cc   : > { %v1987_v31 = vld [vmem:[%s835_s7] sm:$0xf]  ;;  %v1989_v32 = vld [vmem:[%s835_s7 + $0x4] sm:$0xf] }
 0x1cd   : > { %1988 = vst [vmem:[%s1971_s12] sm:$0xf] %v1987_v31  ;;  %1990 = vst [vmem:[%s1971_s12 + $0x10] sm:$0xf] %v1989_v32 }
 0x1ce PF: > { %s19_s21 = sadd.s32 1, %s2538_s21   ;;  %s3055_s17 = smov %s2526_s18 }
 0x1cf   : > { %p16_p12 = scmp.ge.s32.totalorder %s19_s21, 6   ;;  %s3056_s18 = smov %s2612_s26 }
 0x1d0   : > { %s3057_s19 = smov %s2534_s20  ;;  %s3058_s20 = smov %s3060_s3 }
 0x1d1   :  { %18 = sbr.rel (!%p16_p12) target bundleno = 6 (0x6), region = 180 }

// kernel: cvae_forward.15
= control target key start
LH: loop header
LB: loop body
LE: loop exit
PB: predicated region body
PF: predicated region fallthrough
CT: control target
= control target key end

     0   :  { %s2834_s12 = smov 0   ;;  %s2836_s13 = smov 0   ;;  %s3339_s0 = inlined_call_operand.vmem [shape: bf16[1152,512], index: 0, kind: input, shape index: {}]   ;;  %s3340_s1 = inlined_call_operand.vmem [shape: f32[1,512], index: 1, kind: input, shape index: {}]   ;;  %s3341_s2 = inlined_call_operand.vmem [shape: bf16[4,8,9,128], index: 2, kind: input, shape index: {}]   ;;  %s3342_s3 = inlined_call_operand.vmem [shape: bf16[32,512], index: 3, kind: output, shape index: {}]  }
   0x1   :  { %s2838_s14 = smov 0   ;;  %s2840_s15 = smov 0  }
   0x2   :  { %s2842_s16 = smov 0  }
   0x3 LB: > { %s22_s17 = sadd.s32 1, %s2808_s15  ;;  %s2237_s18 = sadd.s32 4294967295, %s2812_s16   ;;  %s2812_s16 = sphi %s2842_s16, %s13_s16   ;;  %s2808_s15 = sphi %s2840_s15, %s3347_s15   ;;  %s2804_s14 = sphi %s2838_s14, %s3346_s14   ;;  %s2800_s13 = sphi %s2836_s13, %s3345_s13   ;;  %s2796_s12 = sphi %s2834_s12, %s3344_s12  }
   0x4   : > { %p23_p0 = scmp.ge.s32.totalorder %s22_s17, 4  ;;  %p65_p1 = scmp.ne.s32.totalorder %s2800_s13, %s2796_s12 }
   0x5   : > { %p66_p2 = scmp.eq.s32.totalorder %s2812_s16, 0  ;;  %p123_p4 = scmp.eq.s32.totalorder %s2237_s18, 3 }
   0x6   : > { %s3349_s17 = smov (%p23_p0, %s22_s17), 0  ;;  %s58_s20 = sadd.s32 1, %s2800_s13 }
   0x7   : > { %p67_p3 = por %p66_p2, %p65_p1  ;;  %s55_s19 = ssub.s32 %s2808_s15, %s3349_s17 }
   0x8   : > { %p56_p5 = scmp.eq.s32.totalorder %s55_s19, 0  ;;  %p2869_p6 = por %p123_p4, %p65_p1 }
   0x9   : > { %p2241_p7 = scmp.ge.s32.totalorder %s2812_s16, 4 }
   0xa   : > { %s2874_s22 = scalar_select %p56_p5, %s2800_s13, %s58_s20  }
   0xb   : > { %155 = sbr.rel (%p2241_p7) target bundleno = 118 (0x76), region = 20 }
  0x12   : > { %158 = sbr.rel (!%p67_p3) target bundleno = 118 (0x76), region = 24  ;;  %s160_s23 = sand.u32 (%p67_p3), 1, %s2800_s13  }
  0x13   : > { %s2242_s24 = sshll.u32 (%p67_p3), %s2808_s15, 2  ;;  %s2638_s25 = smul.u32 (%p67_p3), 576, %s160_s23 }
  0x14   : > { %s2882_s28 = scalar_lea.vmem (%p67_p3), %s3339_s0, %s2242_s24 }
  0x15   : > { %v180_v0 = vld [vmem:[%s2882_s28] sm:$0xf] (%p67_p3)  ;;  %v182_v1 = vld [vmem:[%s2882_s28 + $0x10] sm:$0xf] (%p67_p3)  ;;  %s2889_s29 = scalar_lea.vmem (%p67_p3), [#allocation2], %s2638_s25 }
  0x16   : > { %v184_v2 = vld [vmem:[%s2882_s28 + $0x20] sm:$0xf] (%p67_p3)  ;;  %v186_v3 = vld [vmem:[%s2882_s28 + $0x30] sm:$0xf] (%p67_p3)  ;;  %181 = vst [vmem:[%s2889_s29] sm:$0xf] (%p67_p3), %v180_v0 }
  0x17   : > { %v188_v4 = vld [vmem:[%s2882_s28 + $0x40] sm:$0xf] (%p67_p3)  ;;  %183 = vst [vmem:[%s2889_s29 + $0x4] sm:$0xf] (%p67_p3), %v182_v1  ;;  %185 = vst [vmem:[%s2889_s29 + $0x8] sm:$0xf] (%p67_p3), %v184_v2 }
  0x18   : > { %187 = vst [vmem:[%s2889_s29 + $0xc] sm:$0xf] (%p67_p3), %v186_v3  ;;  %189 = vst [vmem:[%s2889_s29 + $0x10] sm:$0xf] (%p67_p3), %v188_v4  ;;  %v190_v5 = vld [vmem:[%s2882_s28 + $0x50] sm:$0xf] (%p67_p3) }
  0x19   : > { %v192_v6 = vld [vmem:[%s2882_s28 + $0x60] sm:$0xf]  ;;  %v194_v7 = vld [vmem:[%s2882_s28 + $0x70] sm:$0xf]  ;;  %191 = vst [vmem:[%s2889_s29 + $0x14] sm:$0xf] %v190_v5 }
  0x1a   : > { %193 = vst [vmem:[%s2889_s29 + $0x18] sm:$0xf] %v192_v6  ;;  %195 = vst [vmem:[%s2889_s29 + $0x1c] sm:$0xf] %v194_v7  ;;  %v196_v8 = vld [vmem:[%s2882_s28 + $0x80] sm:$0xf] }
  0x1b   : > { %v198_v9 = vld [vmem:[%s2882_s28 + $0x90] sm:$0xf]  ;;  %v200_v10 = vld [vmem:[%s2882_s28 + $0xa0] sm:$0xf]  ;;  %197 = vst [vmem:[%s2889_s29 + $0x20] sm:$0xf] %v196_v8 }
  0x1c   : > { %199 = vst [vmem:[%s2889_s29 + $0x24] sm:$0xf] %v198_v9  ;;  %201 = vst [vmem:[%s2889_s29 + $0x28] sm:$0xf] %v200_v10  ;;  %v202_v11 = vld [vmem:[%s2882_s28 + $0xb0] sm:$0xf] }
  0x1d   : > { %v204_v12 = vld [vmem:[%s2882_s28 + $0xc0] sm:$0xf]  ;;  %v206_v13 = vld [vmem:[%s2882_s28 + $0xd0] sm:$0xf]  ;;  %203 = vst [vmem:[%s2889_s29 + $0x2c] sm:$0xf] %v202_v11 }
  0x1e   : > { %205 = vst [vmem:[%s2889_s29 + $0x30] sm:$0xf] %v204_v12  ;;  %207 = vst [vmem:[%s2889_s29 + $0x34] sm:$0xf] %v206_v13  ;;  %v208_v14 = vld [vmem:[%s2882_s28 + $0xe0] sm:$0xf] }
  0x1f   : > { %v210_v15 = vld [vmem:[%s2882_s28 + $0xf0] sm:$0xf]  ;;  %v212_v16 = vld [vmem:[%s2882_s28 + $0x100] sm:$0xf]  ;;  %209 = vst [vmem:[%s2889_s29 + $0x38] sm:$0xf] %v208_v14 }
  0x20   : > { %211 = vst [vmem:[%s2889_s29 + $0x3c] sm:$0xf] %v210_v15  ;;  %213 = vst [vmem:[%s2889_s29 + $0x40] sm:$0xf] %v212_v16  ;;  %v214_v17 = vld [vmem:[%s2882_s28 + $0x110] sm:$0xf] }
  0x21   : > { %v216_v18 = vld [vmem:[%s2882_s28 + $0x120] sm:$0xf]  ;;  %v218_v19 = vld [vmem:[%s2882_s28 + $0x130] sm:$0xf]  ;;  %215 = vst [vmem:[%s2889_s29 + $0x44] sm:$0xf] %v214_v17 }
  0x22   : > { %217 = vst [vmem:[%s2889_s29 + $0x48] sm:$0xf] %v216_v18  ;;  %219 = vst [vmem:[%s2889_s29 + $0x4c] sm:$0xf] %v218_v19  ;;  %v220_v20 = vld [vmem:[%s2882_s28 + $0x140] sm:$0xf] }
  0x23   : > { %v222_v21 = vld [vmem:[%s2882_s28 + $0x150] sm:$0xf]  ;;  %v224_v22 = vld [vmem:[%s2882_s28 + $0x160] sm:$0xf]  ;;  %221 = vst [vmem:[%s2889_s29 + $0x50] sm:$0xf] %v220_v20 }
  0x24   : > { %223 = vst [vmem:[%s2889_s29 + $0x54] sm:$0xf] %v222_v21  ;;  %225 = vst [vmem:[%s2889_s29 + $0x58] sm:$0xf] %v224_v22  ;;  %v226_v23 = vld [vmem:[%s2882_s28 + $0x170] sm:$0xf] }
  0x25   : > { %v228_v24 = vld [vmem:[%s2882_s28 + $0x180] sm:$0xf]  ;;  %v230_v25 = vld [vmem:[%s2882_s28 + $0x190] sm:$0xf]  ;;  %227 = vst [vmem:[%s2889_s29 + $0x5c] sm:$0xf] %v226_v23 }
  0x26   : > { %229 = vst [vmem:[%s2889_s29 + $0x60] sm:$0xf] %v228_v24  ;;  %231 = vst [vmem:[%s2889_s29 + $0x64] sm:$0xf] %v230_v25  ;;  %v232_v26 = vld [vmem:[%s2882_s28 + $0x1a0] sm:$0xf] }
  0x27   : > { %v234_v27 = vld [vmem:[%s2882_s28 + $0x1b0] sm:$0xf]  ;;  %v236_v28 = vld [vmem:[%s2882_s28 + $0x1c0] sm:$0xf]  ;;  %233 = vst [vmem:[%s2889_s29 + $0x68] sm:$0xf] %v232_v26 }
  0x28   : > { %235 = vst [vmem:[%s2889_s29 + $0x6c] sm:$0xf] %v234_v27  ;;  %237 = vst [vmem:[%s2889_s29 + $0x70] sm:$0xf] %v236_v28  ;;  %v238_v29 = vld [vmem:[%s2882_s28 + $0x1d0] sm:$0xf] }
  0x29   : > { %v240_v30 = vld [vmem:[%s2882_s28 + $0x1e0] sm:$0xf]  ;;  %v242_v31 = vld [vmem:[%s2882_s28 + $0x1f0] sm:$0xf]  ;;  %239 = vst [vmem:[%s2889_s29 + $0x74] sm:$0xf] %v238_v29 }
  0x2a   : > { %241 = vst [vmem:[%s2889_s29 + $0x78] sm:$0xf] %v240_v30  ;;  %243 = vst [vmem:[%s2889_s29 + $0x7c] sm:$0xf] %v242_v31  ;;  %v244_v32 = vld [vmem:[%s2882_s28 + $0x200] sm:$0xf] }
  0x2b   : > { %v246_v33 = vld [vmem:[%s2882_s28 + $0x210] sm:$0xf]  ;;  %v248_v34 = vld [vmem:[%s2882_s28 + $0x220] sm:$0xf]  ;;  %245 = vst [vmem:[%s2889_s29 + $0x80] sm:$0xf] %v244_v32 }
  0x2c   : > { %247 = vst [vmem:[%s2889_s29 + $0x84] sm:$0xf] %v246_v33  ;;  %249 = vst [vmem:[%s2889_s29 + $0x88] sm:$0xf] %v248_v34  ;;  %v250_v35 = vld [vmem:[%s2882_s28 + $0x230] sm:$0xf] }
  0x2d   : > { %v252_v36 = vld [vmem:[%s2882_s28 + $0x240] sm:$0xf]  ;;  %v254_v37 = vld [vmem:[%s2882_s28 + $0x250] sm:$0xf]  ;;  %251 = vst [vmem:[%s2889_s29 + $0x8c] sm:$0xf] %v250_v35 }
  0x2e   : > { %253 = vst [vmem:[%s2889_s29 + $0x90] sm:$0xf] %v252_v36  ;;  %255 = vst [vmem:[%s2889_s29 + $0x94] sm:$0xf] %v254_v37  ;;  %v256_v38 = vld [vmem:[%s2882_s28 + $0x260] sm:$0xf] }
  0x2f   : > { %v258_v39 = vld [vmem:[%s2882_s28 + $0x270] sm:$0xf]  ;;  %v260_v40 = vld [vmem:[%s2882_s28 + $0x280] sm:$0xf]  ;;  %257 = vst [vmem:[%s2889_s29 + $0x98] sm:$0xf] %v256_v38 }
  0x30   : > { %259 = vst [vmem:[%s2889_s29 + $0x9c] sm:$0xf] %v258_v39  ;;  %261 = vst [vmem:[%s2889_s29 + $0xa0] sm:$0xf] %v260_v40  ;;  %v262_v41 = vld [vmem:[%s2882_s28 + $0x290] sm:$0xf] }
  0x31   : > { %v264_v42 = vld [vmem:[%s2882_s28 + $0x2a0] sm:$0xf]  ;;  %v266_v43 = vld [vmem:[%s2882_s28 + $0x2b0] sm:$0xf]  ;;  %263 = vst [vmem:[%s2889_s29 + $0xa4] sm:$0xf] %v262_v41 }
  0x32   : > { %265 = vst [vmem:[%s2889_s29 + $0xa8] sm:$0xf] %v264_v42  ;;  %267 = vst [vmem:[%s2889_s29 + $0xac] sm:$0xf] %v266_v43  ;;  %v268_v44 = vld [vmem:[%s2882_s28 + $0x2c0] sm:$0xf] }
  0x33   : > { %v270_v45 = vld [vmem:[%s2882_s28 + $0x2d0] sm:$0xf]  ;;  %v272_v46 = vld [vmem:[%s2882_s28 + $0x2e0] sm:$0xf]  ;;  %269 = vst [vmem:[%s2889_s29 + $0xb0] sm:$0xf] %v268_v44 }
  0x34   : > { %271 = vst [vmem:[%s2889_s29 + $0xb4] sm:$0xf] %v270_v45  ;;  %273 = vst [vmem:[%s2889_s29 + $0xb8] sm:$0xf] %v272_v46  ;;  %v274_v47 = vld [vmem:[%s2882_s28 + $0x2f0] sm:$0xf] }
  0x35   : > { %v276_v48 = vld [vmem:[%s2882_s28 + $0x300] sm:$0xf]  ;;  %v278_v49 = vld [vmem:[%s2882_s28 + $0x310] sm:$0xf]  ;;  %275 = vst [vmem:[%s2889_s29 + $0xbc] sm:$0xf] %v274_v47 }
  0x36   : > { %277 = vst [vmem:[%s2889_s29 + $0xc0] sm:$0xf] %v276_v48  ;;  %279 = vst [vmem:[%s2889_s29 + $0xc4] sm:$0xf] %v278_v49  ;;  %v280_v50 = vld [vmem:[%s2882_s28 + $0x320] sm:$0xf] }
  0x37   : > { %v282_v51 = vld [vmem:[%s2882_s28 + $0x330] sm:$0xf]  ;;  %v284_v52 = vld [vmem:[%s2882_s28 + $0x340] sm:$0xf]  ;;  %281 = vst [vmem:[%s2889_s29 + $0xc8] sm:$0xf] %v280_v50 }
  0x38   : > { %283 = vst [vmem:[%s2889_s29 + $0xcc] sm:$0xf] %v282_v51  ;;  %285 = vst [vmem:[%s2889_s29 + $0xd0] sm:$0xf] %v284_v52  ;;  %v286_v53 = vld [vmem:[%s2882_s28 + $0x350] sm:$0xf] }
  0x39   : > { %v288_v54 = vld [vmem:[%s2882_s28 + $0x360] sm:$0xf]  ;;  %v290_v55 = vld [vmem:[%s2882_s28 + $0x370] sm:$0xf]  ;;  %287 = vst [vmem:[%s2889_s29 + $0xd4] sm:$0xf] %v286_v53 }
  0x3a   : > { %289 = vst [vmem:[%s2889_s29 + $0xd8] sm:$0xf] %v288_v54  ;;  %291 = vst [vmem:[%s2889_s29 + $0xdc] sm:$0xf] %v290_v55  ;;  %v292_v56 = vld [vmem:[%s2882_s28 + $0x380] sm:$0xf] }
  0x3b   : > { %v294_v57 = vld [vmem:[%s2882_s28 + $0x390] sm:$0xf]  ;;  %v296_v58 = vld [vmem:[%s2882_s28 + $0x3a0] sm:$0xf]  ;;  %293 = vst [vmem:[%s2889_s29 + $0xe0] sm:$0xf] %v292_v56 }
  0x3c   : > { %295 = vst [vmem:[%s2889_s29 + $0xe4] sm:$0xf] %v294_v57  ;;  %297 = vst [vmem:[%s2889_s29 + $0xe8] sm:$0xf] %v296_v58  ;;  %v298_v59 = vld [vmem:[%s2882_s28 + $0x3b0] sm:$0xf] }
  0x3d   : > { %v300_v60 = vld [vmem:[%s2882_s28 + $0x3c0] sm:$0xf]  ;;  %v302_v61 = vld [vmem:[%s2882_s28 + $0x3d0] sm:$0xf]  ;;  %299 = vst [vmem:[%s2889_s29 + $0xec] sm:$0xf] %v298_v59 }
  0x3e   : > { %301 = vst [vmem:[%s2889_s29 + $0xf0] sm:$0xf] %v300_v60  ;;  %303 = vst [vmem:[%s2889_s29 + $0xf4] sm:$0xf] %v302_v61  ;;  %v304_v62 = vld [vmem:[%s2882_s28 + $0x3e0] sm:$0xf] }
  0x3f   : > { %v306_v63 = vld [vmem:[%s2882_s28 + $0x3f0] sm:$0xf]  ;;  %v308_v0 = vld [vmem:[%s2882_s28 + $0x400] sm:$0xf]  ;;  %305 = vst [vmem:[%s2889_s29 + $0xf8] sm:$0xf] %v304_v62 }
  0x40   : > { %307 = vst [vmem:[%s2889_s29 + $0xfc] sm:$0xf] %v306_v63  ;;  %309 = vst [vmem:[%s2889_s29 + $0x100] sm:$0xf] %v308_v0  ;;  %v310_v1 = vld [vmem:[%s2882_s28 + $0x410] sm:$0xf] }
  0x41   : > { %v312_v2 = vld [vmem:[%s2882_s28 + $0x420] sm:$0xf]  ;;  %v314_v3 = vld [vmem:[%s2882_s28 + $0x430] sm:$0xf]  ;;  %311 = vst [vmem:[%s2889_s29 + $0x104] sm:$0xf] %v310_v1 }
  0x42   : > { %313 = vst [vmem:[%s2889_s29 + $0x108] sm:$0xf] %v312_v2  ;;  %315 = vst [vmem:[%s2889_s29 + $0x10c] sm:$0xf] %v314_v3  ;;  %v316_v4 = vld [vmem:[%s2882_s28 + $0x440] sm:$0xf] }
  0x43   : > { %v318_v5 = vld [vmem:[%s2882_s28 + $0x450] sm:$0xf]  ;;  %v320_v6 = vld [vmem:[%s2882_s28 + $0x460] sm:$0xf]  ;;  %317 = vst [vmem:[%s2889_s29 + $0x110] sm:$0xf] %v316_v4 }
  0x44   : > { %319 = vst [vmem:[%s2889_s29 + $0x114] sm:$0xf] %v318_v5  ;;  %321 = vst [vmem:[%s2889_s29 + $0x118] sm:$0xf] %v320_v6  ;;  %v322_v7 = vld [vmem:[%s2882_s28 + $0x470] sm:$0xf] }
  0x45   : > { %v324_v8 = vld [vmem:[%s2882_s28 + $0x480] sm:$0xf]  ;;  %v326_v9 = vld [vmem:[%s2882_s28 + $0x490] sm:$0xf]  ;;  %323 = vst [vmem:[%s2889_s29 + $0x11c] sm:$0xf] %v322_v7 }
  0x46   : > { %325 = vst [vmem:[%s2889_s29 + $0x120] sm:$0xf] %v324_v8  ;;  %327 = vst [vmem:[%s2889_s29 + $0x124] sm:$0xf] %v326_v9  ;;  %v328_v10 = vld [vmem:[%s2882_s28 + $0x4a0] sm:$0xf] }
  0x47   : > { %v330_v11 = vld [vmem:[%s2882_s28 + $0x4b0] sm:$0xf]  ;;  %v332_v12 = vld [vmem:[%s2882_s28 + $0x4c0] sm:$0xf]  ;;  %329 = vst [vmem:[%s2889_s29 + $0x128] sm:$0xf] %v328_v10 }
  0x48   : > { %331 = vst [vmem:[%s2889_s29 + $0x12c] sm:$0xf] %v330_v11  ;;  %333 = vst [vmem:[%s2889_s29 + $0x130] sm:$0xf] %v332_v12  ;;  %v334_v13 = vld [vmem:[%s2882_s28 + $0x4d0] sm:$0xf] }
  0x49   : > { %v336_v14 = vld [vmem:[%s2882_s28 + $0x4e0] sm:$0xf]  ;;  %v338_v15 = vld [vmem:[%s2882_s28 + $0x4f0] sm:$0xf]  ;;  %335 = vst [vmem:[%s2889_s29 + $0x134] sm:$0xf] %v334_v13 }
  0x4a   : > { %337 = vst [vmem:[%s2889_s29 + $0x138] sm:$0xf] %v336_v14  ;;  %339 = vst [vmem:[%s2889_s29 + $0x13c] sm:$0xf] %v338_v15  ;;  %v340_v16 = vld [vmem:[%s2882_s28 + $0x500] sm:$0xf] }
  0x4b   : > { %v342_v17 = vld [vmem:[%s2882_s28 + $0x510] sm:$0xf]  ;;  %v344_v18 = vld [vmem:[%s2882_s28 + $0x520] sm:$0xf]  ;;  %341 = vst [vmem:[%s2889_s29 + $0x140] sm:$0xf] %v340_v16 }
  0x4c   : > { %343 = vst [vmem:[%s2889_s29 + $0x144] sm:$0xf] %v342_v17  ;;  %345 = vst [vmem:[%s2889_s29 + $0x148] sm:$0xf] %v344_v18  ;;  %v346_v19 = vld [vmem:[%s2882_s28 + $0x530] sm:$0xf] }
  0x4d   : > { %v348_v20 = vld [vmem:[%s2882_s28 + $0x540] sm:$0xf]  ;;  %v350_v21 = vld [vmem:[%s2882_s28 + $0x550] sm:$0xf]  ;;  %347 = vst [vmem:[%s2889_s29 + $0x14c] sm:$0xf] %v346_v19 }
  0x4e   : > { %349 = vst [vmem:[%s2889_s29 + $0x150] sm:$0xf] %v348_v20  ;;  %351 = vst [vmem:[%s2889_s29 + $0x154] sm:$0xf] %v350_v21  ;;  %v352_v22 = vld [vmem:[%s2882_s28 + $0x560] sm:$0xf] }
  0x4f   : > { %v354_v23 = vld [vmem:[%s2882_s28 + $0x570] sm:$0xf]  ;;  %v356_v24 = vld [vmem:[%s2882_s28 + $0x580] sm:$0xf]  ;;  %353 = vst [vmem:[%s2889_s29 + $0x158] sm:$0xf] %v352_v22 }
  0x50   : > { %355 = vst [vmem:[%s2889_s29 + $0x15c] sm:$0xf] %v354_v23  ;;  %357 = vst [vmem:[%s2889_s29 + $0x160] sm:$0xf] %v356_v24  ;;  %v358_v25 = vld [vmem:[%s2882_s28 + $0x590] sm:$0xf] }
  0x51   : > { %v360_v26 = vld [vmem:[%s2882_s28 + $0x5a0] sm:$0xf]  ;;  %v362_v27 = vld [vmem:[%s2882_s28 + $0x5b0] sm:$0xf]  ;;  %359 = vst [vmem:[%s2889_s29 + $0x164] sm:$0xf] %v358_v25 }
  0x52   : > { %361 = vst [vmem:[%s2889_s29 + $0x168] sm:$0xf] %v360_v26  ;;  %363 = vst [vmem:[%s2889_s29 + $0x16c] sm:$0xf] %v362_v27  ;;  %v364_v28 = vld [vmem:[%s2882_s28 + $0x5c0] sm:$0xf] }
  0x53   : > { %v366_v29 = vld [vmem:[%s2882_s28 + $0x5d0] sm:$0xf]  ;;  %v368_v30 = vld [vmem:[%s2882_s28 + $0x5e0] sm:$0xf]  ;;  %365 = vst [vmem:[%s2889_s29 + $0x170] sm:$0xf] %v364_v28 }
  0x54   : > { %367 = vst [vmem:[%s2889_s29 + $0x174] sm:$0xf] %v366_v29  ;;  %369 = vst [vmem:[%s2889_s29 + $0x178] sm:$0xf] %v368_v30  ;;  %v370_v31 = vld [vmem:[%s2882_s28 + $0x5f0] sm:$0xf] }
  0x55   : > { %v372_v32 = vld [vmem:[%s2882_s28 + $0x600] sm:$0xf]  ;;  %v374_v33 = vld [vmem:[%s2882_s28 + $0x610] sm:$0xf]  ;;  %371 = vst [vmem:[%s2889_s29 + $0x17c] sm:$0xf] %v370_v31 }
  0x56   : > { %373 = vst [vmem:[%s2889_s29 + $0x180] sm:$0xf] %v372_v32  ;;  %375 = vst [vmem:[%s2889_s29 + $0x184] sm:$0xf] %v374_v33  ;;  %v376_v34 = vld [vmem:[%s2882_s28 + $0x620] sm:$0xf] }
  0x57   : > { %v378_v35 = vld [vmem:[%s2882_s28 + $0x630] sm:$0xf]  ;;  %v380_v36 = vld [vmem:[%s2882_s28 + $0x640] sm:$0xf]  ;;  %377 = vst [vmem:[%s2889_s29 + $0x188] sm:$0xf] %v376_v34 }
  0x58   : > { %379 = vst [vmem:[%s2889_s29 + $0x18c] sm:$0xf] %v378_v35  ;;  %381 = vst [vmem:[%s2889_s29 + $0x190] sm:$0xf] %v380_v36  ;;  %v382_v37 = vld [vmem:[%s2882_s28 + $0x650] sm:$0xf] }
  0x59   : > { %v384_v38 = vld [vmem:[%s2882_s28 + $0x660] sm:$0xf]  ;;  %v386_v39 = vld [vmem:[%s2882_s28 + $0x670] sm:$0xf]  ;;  %383 = vst [vmem:[%s2889_s29 + $0x194] sm:$0xf] %v382_v37 }
  0x5a   : > { %385 = vst [vmem:[%s2889_s29 + $0x198] sm:$0xf] %v384_v38  ;;  %387 = vst [vmem:[%s2889_s29 + $0x19c] sm:$0xf] %v386_v39  ;;  %v388_v40 = vld [vmem:[%s2882_s28 + $0x680] sm:$0xf] }
  0x5b   : > { %v390_v41 = vld [vmem:[%s2882_s28 + $0x690] sm:$0xf]  ;;  %v392_v42 = vld [vmem:[%s2882_s28 + $0x6a0] sm:$0xf]  ;;  %389 = vst [vmem:[%s2889_s29 + $0x1a0] sm:$0xf] %v388_v40 }
  0x5c   : > { %391 = vst [vmem:[%s2889_s29 + $0x1a4] sm:$0xf] %v390_v41  ;;  %393 = vst [vmem:[%s2889_s29 + $0x1a8] sm:$0xf] %v392_v42  ;;  %v394_v43 = vld [vmem:[%s2882_s28 + $0x6b0] sm:$0xf] }
  0x5d   : > { %v396_v44 = vld [vmem:[%s2882_s28 + $0x6c0] sm:$0xf]  ;;  %v398_v45 = vld [vmem:[%s2882_s28 + $0x6d0] sm:$0xf]  ;;  %395 = vst [vmem:[%s2889_s29 + $0x1ac] sm:$0xf] %v394_v43 }
  0x5e   : > { %397 = vst [vmem:[%s2889_s29 + $0x1b0] sm:$0xf] %v396_v44  ;;  %399 = vst [vmem:[%s2889_s29 + $0x1b4] sm:$0xf] %v398_v45  ;;  %v400_v46 = vld [vmem:[%s2882_s28 + $0x6e0] sm:$0xf] }
  0x5f   : > { %v402_v47 = vld [vmem:[%s2882_s28 + $0x6f0] sm:$0xf]  ;;  %v404_v48 = vld [vmem:[%s2882_s28 + $0x700] sm:$0xf]  ;;  %401 = vst [vmem:[%s2889_s29 + $0x1b8] sm:$0xf] %v400_v46 }
  0x60   : > { %403 = vst [vmem:[%s2889_s29 + $0x1bc] sm:$0xf] %v402_v47  ;;  %405 = vst [vmem:[%s2889_s29 + $0x1c0] sm:$0xf] %v404_v48  ;;  %v406_v49 = vld [vmem:[%s2882_s28 + $0x710] sm:$0xf] }
  0x61   : > { %v408_v50 = vld [vmem:[%s2882_s28 + $0x720] sm:$0xf]  ;;  %v410_v51 = vld [vmem:[%s2882_s28 + $0x730] sm:$0xf]  ;;  %407 = vst [vmem:[%s2889_s29 + $0x1c4] sm:$0xf] %v406_v49 }
  0x62   : > { %409 = vst [vmem:[%s2889_s29 + $0x1c8] sm:$0xf] %v408_v50  ;;  %411 = vst [vmem:[%s2889_s29 + $0x1cc] sm:$0xf] %v410_v51  ;;  %v412_v52 = vld [vmem:[%s2882_s28 + $0x740] sm:$0xf] }
  0x63   : > { %v414_v53 = vld [vmem:[%s2882_s28 + $0x750] sm:$0xf]  ;;  %v416_v54 = vld [vmem:[%s2882_s28 + $0x760] sm:$0xf]  ;;  %413 = vst [vmem:[%s2889_s29 + $0x1d0] sm:$0xf] %v412_v52 }
  0x64   : > { %415 = vst [vmem:[%s2889_s29 + $0x1d4] sm:$0xf] %v414_v53  ;;  %417 = vst [vmem:[%s2889_s29 + $0x1d8] sm:$0xf] %v416_v54  ;;  %v418_v55 = vld [vmem:[%s2882_s28 + $0x770] sm:$0xf] }
  0x65   : > { %v420_v56 = vld [vmem:[%s2882_s28 + $0x780] sm:$0xf]  ;;  %v422_v57 = vld [vmem:[%s2882_s28 + $0x790] sm:$0xf]  ;;  %419 = vst [vmem:[%s2889_s29 + $0x1dc] sm:$0xf] %v418_v55 }
  0x66   : > { %421 = vst [vmem:[%s2889_s29 + $0x1e0] sm:$0xf] %v420_v56  ;;  %423 = vst [vmem:[%s2889_s29 + $0x1e4] sm:$0xf] %v422_v57  ;;  %v424_v58 = vld [vmem:[%s2882_s28 + $0x7a0] sm:$0xf] }
  0x67   : > { %v426_v59 = vld [vmem:[%s2882_s28 + $0x7b0] sm:$0xf]  ;;  %v428_v60 = vld [vmem:[%s2882_s28 + $0x7c0] sm:$0xf]  ;;  %425 = vst [vmem:[%s2889_s29 + $0x1e8] sm:$0xf] %v424_v58 }
  0x68   : > { %427 = vst [vmem:[%s2889_s29 + $0x1ec] sm:$0xf] %v426_v59  ;;  %429 = vst [vmem:[%s2889_s29 + $0x1f0] sm:$0xf] %v428_v60  ;;  %v430_v61 = vld [vmem:[%s2882_s28 + $0x7d0] sm:$0xf] }
  0x69   : > { %v432_v62 = vld [vmem:[%s2882_s28 + $0x7e0] sm:$0xf]  ;;  %v434_v63 = vld [vmem:[%s2882_s28 + $0x7f0] sm:$0xf]  ;;  %431 = vst [vmem:[%s2889_s29 + $0x1f4] sm:$0xf] %v430_v61 }
  0x6a   : > { %433 = vst [vmem:[%s2889_s29 + $0x1f8] sm:$0xf] %v432_v62  ;;  %435 = vst [vmem:[%s2889_s29 + $0x1fc] sm:$0xf] %v434_v63  ;;  %v436_v0 = vld [vmem:[%s2882_s28 + $0x800] sm:$0xf] }
  0x6b   : > { %v438_v1 = vld [vmem:[%s2882_s28 + $0x810] sm:$0xf]  ;;  %v440_v2 = vld [vmem:[%s2882_s28 + $0x820] sm:$0xf]  ;;  %437 = vst [vmem:[%s2889_s29 + $0x200] sm:$0xf] %v436_v0 }
  0x6c   : > { %439 = vst [vmem:[%s2889_s29 + $0x204] sm:$0xf] %v438_v1  ;;  %441 = vst [vmem:[%s2889_s29 + $0x208] sm:$0xf] %v440_v2  ;;  %v442_v3 = vld [vmem:[%s2882_s28 + $0x830] sm:$0xf] }
  0x6d   : > { %v444_v4 = vld [vmem:[%s2882_s28 + $0x840] sm:$0xf]  ;;  %v446_v5 = vld [vmem:[%s2882_s28 + $0x850] sm:$0xf]  ;;  %443 = vst [vmem:[%s2889_s29 + $0x20c] sm:$0xf] %v442_v3 }
  0x6e   : > { %445 = vst [vmem:[%s2889_s29 + $0x210] sm:$0xf] %v444_v4  ;;  %447 = vst [vmem:[%s2889_s29 + $0x214] sm:$0xf] %v446_v5  ;;  %v448_v6 = vld [vmem:[%s2882_s28 + $0x860] sm:$0xf] }
  0x6f   : > { %v450_v7 = vld [vmem:[%s2882_s28 + $0x870] sm:$0xf]  ;;  %v452_v8 = vld [vmem:[%s2882_s28 + $0x880] sm:$0xf]  ;;  %449 = vst [vmem:[%s2889_s29 + $0x218] sm:$0xf] %v448_v6 }
  0x70   : > { %451 = vst [vmem:[%s2889_s29 + $0x21c] sm:$0xf] %v450_v7  ;;  %453 = vst [vmem:[%s2889_s29 + $0x220] sm:$0xf] %v452_v8  ;;  %v454_v9 = vld [vmem:[%s2882_s28 + $0x890] sm:$0xf] }
  0x71   : > { %v456_v10 = vld [vmem:[%s2882_s28 + $0x8a0] sm:$0xf]  ;;  %v458_v11 = vld [vmem:[%s2882_s28 + $0x8b0] sm:$0xf]  ;;  %455 = vst [vmem:[%s2889_s29 + $0x224] sm:$0xf] %v454_v9 }
  0x72   : > { %457 = vst [vmem:[%s2889_s29 + $0x228] sm:$0xf] %v456_v10  ;;  %459 = vst [vmem:[%s2889_s29 + $0x22c] sm:$0xf] %v458_v11  ;;  %v460_v12 = vld [vmem:[%s2882_s28 + $0x8c0] sm:$0xf] }
  0x73   : > { %v462_v13 = vld [vmem:[%s2882_s28 + $0x8d0] sm:$0xf]  ;;  %v464_v14 = vld [vmem:[%s2882_s28 + $0x8e0] sm:$0xf]  ;;  %461 = vst [vmem:[%s2889_s29 + $0x230] sm:$0xf] %v460_v12 }
  0x74   : > { %463 = vst [vmem:[%s2889_s29 + $0x234] sm:$0xf] %v462_v13  ;;  %465 = vst [vmem:[%s2889_s29 + $0x238] sm:$0xf] %v464_v14  ;;  %v466_v15 = vld [vmem:[%s2882_s28 + $0x8f0] sm:$0xf] }
  0x75   : > { %467 = vst [vmem:[%s2889_s29 + $0x23c] sm:$0xf] %v466_v15 }
  0x76 PF: > { %p2243_p8 = scmp.ge.s32.totalorder %s2812_s16, 1  ;;  %p783_p9 = scmp.lt.s32.totalorder %s2812_s16, 5 }
  0x78   : > { %p784_p10 = pnand %p2243_p8, %p783_p9 }
  0x7a   : > { %787 = sbr.rel (%p784_p10) target bundleno = 461 (0x1cd), region = 69 }
  0x81   : > { %s790_s30 = sand.u32 1, %s2796_s12   ;;  %v832_v16 = vld [vmem:[%s3341_s2] sm:$0xff]   ;;  %v2712_v18 = vld [vmem:[%s3341_s2 + $0x28] sm:$0xff]   ;;  %v2719_v55 = vld [vmem:[%s3341_s2 + $0x30] sm:$0xff]   ;;  %p828_p11 = scmp.lt.s32.totalorder %s2804_s14, 3 }
  0x82   : > { %s2639_s6 = smul.u32 576, %s790_s30  ;;  %837 = vst [vmem:[#allocation4] sm:$0xff] %v832_v16   ;;  %v2711_v17 = vld [vmem:[%s3341_s2 + $0x20] sm:$0xff]   ;;  %v3191_v19 = vld [vmem:[%s3341_s2 + $0x8] sm:$0xff]   ;;  %2407 = vst [vmem:[#allocation4 + $0x28] sm:$0xff] %v2712_v18   ;;  %s2376_s18 = sshll.u32 (%p2869_p6), %s2804_s14, 2 }
  0x83   : > { %2402 = vst [vmem:[#allocation4 + $0x20] sm:$0xff] %v2711_v17   ;;  %2412 = vst [vmem:[#allocation4 + $0x30] sm:$0xff] %v2719_v55   ;;  %v2740_v14 = vld [vmem:[%s3341_s2 + $0x48] sm:$0xff]   ;;  %v2742_v16 = vld [vmem:[%s3341_s2 + $0x70] sm:$0xff]   ;;  %s829_s7 = scalar_select %p828_p11, %s2804_s14, 3 }
  0x84   : > { %s3193_s19 = scalar_lea.vmem [#allocation2], %s2639_s6  ;;  %v2741_v15 = vld [vmem:[%s3341_s2 + $0x68] sm:$0xff]   ;;  %2452 = vst [vmem:[#allocation4 + $0x70] sm:$0xff] %v2742_v16   ;;  %s2094_s20 = scalar_lea.vmem (%p2869_p6), %s3342_s3, %s2376_s18 }
  0x85   : > { %v2680_v20 = vld [vmem:[%s3193_s19 + $0x40] sm:$0xff]   ;;  %v2684_v24 = vld [vmem:[%s3193_s19 + $0x48] sm:$0xff]   ;;  %v2688_v28 = vld [vmem:[%s3193_s19 + $0x50] sm:$0xff]   ;;  %2447 = vst [vmem:[#allocation4 + $0x68] sm:$0xff] %v2741_v15   ;;  %s830_s10 = scalar_lea.vmem %s3340_s1, %s829_s7 }
  0x86   : > { %v2681_v21 = vld [vmem:[%s3193_s19] sm:$0xff]   ;;  %2496 = vmatprep.subr.bf16.mxu0 %v2680_v20  ;;  %v2685_v25 = vld [vmem:[%s3193_s19 + $0x8] sm:$0xff]   ;;  %v2689_v29 = vld [vmem:[%s3193_s19 + $0x10] sm:$0xff]  }
  0x87   : > { %v2682_v22 = vld [vmem:[%s3193_s19 + $0xc0] sm:$0xff]   ;;  %2497 = vmatpush3.bf16.msra.mxu0 %v2681_v21  ;;  %v2686_v26 = vld [vmem:[%s3193_s19 + $0xc8] sm:$0xff]   ;;  %v2690_v30 = vld [vmem:[%s3193_s19 + $0xd0] sm:$0xff]  }
  0x88   : > { %v2683_v23 = vld [vmem:[%s3193_s19 + $0x80] sm:$0xff]   ;;  %2524 = vmatprep.subr.bf16.mxu1 %v2682_v22  ;;  %2498 = vmatprep.subr.bf16.mxu0 %v2684_v24  ;;  %v2687_v27 = vld [vmem:[%s3193_s19 + $0x88] sm:$0xff]   ;;  %v2691_v31 = vld [vmem:[%s3193_s19 + $0x90] sm:$0xff]  }
  0x89   : > { %2525 = vmatpush3.bf16.msra.mxu1 %v2683_v23  ;;  %v2692_v32 = vld [vmem:[%s3193_s19 + $0x58] sm:$0xff]   ;;  %v2696_v36 = vld [vmem:[%s3193_s19 + $0x60] sm:$0xff]   ;;  %v2700_v40 = vld [vmem:[%s3193_s19 + $0x68] sm:$0xff]  }
  0x8a   : > { %2526 = vmatprep.subr.bf16.mxu1 %v2686_v26  ;;  %v2693_v33 = vld [vmem:[%s3193_s19 + $0x18] sm:$0xff]   ;;  %v2697_v37 = vld [vmem:[%s3193_s19 + $0x20] sm:$0xff]   ;;  %v2701_v41 = vld [vmem:[%s3193_s19 + $0x28] sm:$0xff]  }
  0x8b   : > { %2499 = vmatpush3.bf16.msra.mxu0 %v2685_v25  ;;  %v2694_v34 = vld [vmem:[%s3193_s19 + $0xd8] sm:$0xff]   ;;  %v2698_v38 = vld [vmem:[%s3193_s19 + $0xe0] sm:$0xff]   ;;  %v2702_v42 = vld [vmem:[%s3193_s19 + $0xe8] sm:$0xff]  }
  0x8c   : > { %2500 = vmatprep.subr.bf16.mxu0 %v2688_v28  ;;  %v2695_v35 = vld [vmem:[%s3193_s19 + $0x98] sm:$0xff]   ;;  %v2699_v39 = vld [vmem:[%s3193_s19 + $0xa0] sm:$0xff]   ;;  %v2703_v43 = vld [vmem:[%s3193_s19 + $0xa8] sm:$0xff]  }
  0x8d   : > { %2527 = vmatpush3.bf16.msra.mxu1 %v2687_v27  ;;  %v2704_v44 = vld [vmem:[%s3193_s19 + $0x70] sm:$0xff]   ;;  %v2708_v48 = vld [vmem:[%s3193_s19 + $0x78] sm:$0xff]   ;;  %v2713_v51 = vld [vmem:[#allocation4] ss:$36 sps:$4 sm:$0xff]  }
  0x8e   : > { %2528 = vmatprep.subr.bf16.mxu1 %v2690_v30  ;;  %v2705_v45 = vld [vmem:[%s3193_s19 + $0x30] sm:$0xff]   ;;  %v2709_v49 = vld [vmem:[%s3193_s19 + $0x38] sm:$0xff]   ;;  %v2715_v52 = vld [vmem:[#allocation4 + $0x4] ss:$36 sps:$4 sm:$0xff]  }
  0x8f   : > { %2501 = vmatpush3.bf16.msra.mxu0 %v2689_v29  ;;  %v2706_v46 = vld [vmem:[%s3193_s19 + $0xf0] sm:$0xff]   ;;  %v2710_v50 = vld [vmem:[%s3193_s19 + $0xf8] sm:$0xff]   ;;  %1846 = vmatprep.mubr.bf16.mxu0 %v2715_v52  ;;  %v2717_v54 = vld [vmem:[%s3193_s19 + $0x140] sm:$0xff]  }
  0x90   : > { %2502 = vmatprep.subr.bf16.mxu0 %v2692_v32  ;;  %v2707_v47 = vld [vmem:[%s3193_s19 + $0xb0] sm:$0xff]   ;;  %v2716_v53 = vld [vmem:[%s3193_s19 + $0xb8] sm:$0xff]   ;;  %v2720_v56 = vld [vmem:[%s3193_s19 + $0x100] sm:$0xff]  }
  0x91   : > { %2529 = vmatpush3.bf16.msra.mxu1 %v2691_v31  ;;  %v2721_v57 = vld [vmem:[%s3193_s19 + $0x1c0] sm:$0xff]   ;;  %v2723_v58 = vld [vmem:[%s3193_s19 + $0x148] sm:$0xff]   ;;  %v2727_v60 = vld [vmem:[%s3193_s19 + $0x150] sm:$0xff]  }
  0x92   : > { %2530 = vmatprep.subr.bf16.mxu1 %v2694_v34  ;;  %v2724_v59 = vld [vmem:[%s3193_s19 + $0x108] sm:$0xff]   ;;  %v2728_v62 = vld [vmem:[%s3193_s19 + $0x110] sm:$0xff]   ;;  %v2722_v1 = vld [vmem:[%s3193_s19 + $0x180] sm:$0xff]  }
  0x93   : > { %2503 = vmatpush3.bf16.msra.mxu0 %v2693_v33  ;;  %v1125_v61 = vld [vmem:[#allocation4 + $0x2c] sm:$0xff]  ;;  %v2731_v3 = vld [vmem:[%s3193_s19 + $0x158] sm:$0xff]   ;;  %v2735_v7 = vld [vmem:[%s3193_s19 + $0x160] sm:$0xff]  }
  0x94   : > { %2504 = vmatprep.subr.bf16.mxu0 %v2696_v36  ;;  %v2283_v63 = vcombine.low %v3191_v19, %v1125_v61  ;;  %v2284_v0 = vcombine.high %v3191_v19, %v1125_v61  ;;  %v2725_v2 = vld [vmem:[%s3193_s19 + $0x1c8] sm:$0xff]   ;;  %v2732_v4 = vld [vmem:[%s3193_s19 + $0x118] sm:$0xff]   ;;  %v2729_v6 = vld [vmem:[%s3193_s19 + $0x1d0] sm:$0xff]  }
  0x95   : > { %2531 = vmatpush3.bf16.msra.mxu1 %v2695_v35  ;;  %v2726_v5 = vld [vmem:[%s3193_s19 + $0x188] sm:$0xff]   ;;  %v2736_v8 = vld [vmem:[%s3193_s19 + $0x120] sm:$0xff]   ;;  %v2730_v9 = vld [vmem:[%s3193_s19 + $0x190] sm:$0xff]  }
  0x96   : > { %2532 = vmatprep.subr.bf16.mxu1 %v2698_v38  ;;  %1895 = vmatprep.mubr.bf16.mxu1 %v2284_v0  ;;  %v2733_v10 = vld [vmem:[%s3193_s19 + $0x1d8] sm:$0xff]   ;;  %v2739_v12 = vld [vmem:[%s3193_s19 + $0x168] sm:$0xff]   ;;  %v2737_v13 = vld [vmem:[%s3193_s19 + $0x1e0] sm:$0xff]  }
  0x97   : > { %2505 = vmatpush3.bf16.msra.mxu0 %v2697_v37  ;;  %v2734_v11 = vld [vmem:[%s3193_s19 + $0x198] sm:$0xff]   ;;  %v2738_v17 = vld [vmem:[%s3193_s19 + $0x1a0] sm:$0xff]   ;;  %v2743_v18 = vld [vmem:[%s3193_s19 + $0x128] sm:$0xff]  }
  0x98   : > { %2506 = vmatprep.subr.bf16.mxu0 %v2700_v40  ;;  %v2744_v19 = vld [vmem:[%s3193_s19 + $0x1e8] sm:$0xff]   ;;  %v2745_v20 = vld [vmem:[%s3341_s2 + $0x50] sm:$0xff]   ;;  %v2746_v21 = vld [vmem:[%s3341_s2 + $0x78] sm:$0xff]  }
  0x99   : > { %2533 = vmatpush3.bf16.msra.mxu1 %v2699_v39  ;;  %v2747_v22 = vld [vmem:[%s3193_s19 + $0x1a8] sm:$0xff]   ;;  %2457 = vst [vmem:[#allocation4 + $0x78] sm:$0xff] %v2746_v21   ;;  %v2748_v23 = vld [vmem:[%s3193_s19 + $0x170] sm:$0xff]   ;;  %v2752_v30 = vld [vmem:[%s3193_s19 + $0x178] sm:$0xff]  }
  0x9a   : > { %2534 = vmatprep.subr.bf16.mxu1 %v2702_v42  ;;  %v2749_v24 = vld [vmem:[%s3193_s19 + $0x130] sm:$0xff]   ;;  %v2753_v31 = vld [vmem:[%s3193_s19 + $0x138] sm:$0xff]   ;;  %v2758_v39 = vld [vmem:[%s3193_s19 + $0x200] sm:$0xff]  }
  0x9b   : > { %2507 = vmatpush3.bf16.msra.mxu0 %v2701_v41  ;;  %v2750_v25 = vld [vmem:[%s3193_s19 + $0x1f0] sm:$0xff]   ;;  %v2754_v33 = vld [vmem:[%s3193_s19 + $0x1f8] sm:$0xff]   ;;  %v2760_v41 = vld [vmem:[%s3341_s2 + $0x40] sm:$0xff]  }
  0x9c   : > { %2508 = vmatprep.subr.bf16.mxu0 %v2704_v44  ;;  %v1134_v26 = vld [vmem:[#allocation4 + $0x6c] sm:$0xff]  ;;  %v2756_v37 = vld [vmem:[%s3341_s2 + $0x38] sm:$0xff]   ;;  %2422 = vst [vmem:[#allocation4 + $0x40] sm:$0xff] %v2760_v41  }
  0x9d   : > { %2535 = vmatpush3.bf16.msra.mxu1 %v2703_v43  ;;  %v2291_v27 = vcombine.high %v2740_v14, %v1134_v26  ;;  %v2290_v28 = vcombine.low %v2740_v14, %v1134_v26  ;;  %v2751_v29 = vld [vmem:[%s3193_s19 + $0x1b0] sm:$0xff]   ;;  %v2757_v38 = vld [vmem:[%s3193_s19 + $0x1b8] sm:$0xff]   ;;  %2417 = vst [vmem:[#allocation4 + $0x38] sm:$0xff] %v2756_v37   ;;  %v2763_v43 = vld [vmem:[%s3341_s2 + $0x80] sm:$0xff]  }
  0x9e   : > { %2536 = vmatprep.subr.bf16.mxu1 %v2706_v46  ;;  %v2755_v36 = vld [vmem:[%s3341_s2 + $0x10] sm:$0xff]   ;;  %v2759_v40 = vld [vmem:[%s3341_s2 + $0x18] sm:$0xff]   ;;  %2462 = vst [vmem:[#allocation4 + $0x80] sm:$0xff] %v2763_v43  }
  0x9f   : > { %2509 = vmatpush3.bf16.msra.mxu0 %v2705_v45  ;;  %v2762_v42 = vld [vmem:[%s3341_s2 + $0x58] sm:$0xff]   ;;  %v2765_v45 = vld [vmem:[%s3341_s2 + $0x60] sm:$0xff]   ;;  %v2770_v0 = vld [vmem:[%s3193_s19 + $0x230] sm:$0xff]  }
  0xa0   : > { %2510 = vmatprep.subr.bf16.mxu0 %v2708_v48  ;;  %v1135_v32 = vld [vmem:[#allocation4 + $0x74] sm:$0xff]  ;;  %v2766_v48 = vld [vmem:[%s3341_s2 + $0x88] sm:$0xff]  }
  0xa1   : > { %2537 = vmatpush3.bf16.msra.mxu1 %v2707_v47  ;;  %v2293_v34 = vcombine.high %v2745_v20, %v1135_v32  ;;  %v2292_v35 = vcombine.low %v2745_v20, %v1135_v32  ;;  %2467 = vst [vmem:[#allocation4 + $0x88] sm:$0xff] %v2766_v48  }
  0xa2   : > { %2538 = vmatprep.subr.bf16.mxu1 %v2710_v50 }
  0xa3   : > { %2511 = vmatpush3.bf16.msra.mxu0 %v2709_v49  ;;  %v2761_v49 = vld [vmem:[%s3193_s19 + $0x208] sm:$0xff]  }
  0xa4   : > { %2552 = vmatprep.subr.bf16.mxu0 %v2717_v54  ;;  %v1126_v44 = vld [vmem:[#allocation4 + $0x34] sm:$0xff]  ;;  %v1127_v50 = vld [vmem:[#allocation4 + $0x3c] sm:$0xff] }
  0xa5   : > { %2539 = vmatpush3.bf16.msra.mxu1 %v2716_v53  ;;  %v2285_v46 = vcombine.low %v2755_v36, %v1126_v44  ;;  %v2286_v47 = vcombine.high %v2755_v36, %v1126_v44  ;;  %v2288_v52 = vcombine.high %v2759_v40, %v1127_v50  ;;  %v2764_v53 = vld [vmem:[%s3193_s19 + $0x210] sm:$0xff]   ;;  %v1136_v54 = vld [vmem:[#allocation4 + $0x7c] sm:$0xff] }
  0xa6   : > { %1847 = vmatmul.mubr.bf16.vlgmr.msra.gmra.mrb[0].mxu0 %v2713_v51  ;;  %2580 = vmatprep.subr.bf16.mxu1 %v2721_v57  ;;  %v2287_v51 = vcombine.low %v2759_v40, %v1127_v50  ;;  %v2295_v55 = vcombine.high %v2762_v42, %v1136_v54  ;;  %v2767_v57 = vld [vmem:[%s3193_s19 + $0x218] sm:$0xff]  }
  0xa7   : > { %2553 = vmatpush3.bf16.msra.mxu0 %v2720_v56  ;;  %1854 = vmatprep.mubr.bf16.mxu0 %v2291_v27  ;;  %v2294_v56 = vcombine.low %v2762_v42, %v1136_v54 }
  0xa8   : > { %2554 = vmatprep.subr.bf16.mxu0 %v2723_v58  ;;  %1896 = vmatmul.mubr.bf16.vlgmr.msra.gmra.mrb[0].mxu1 %v2283_v63  ;;  %v1137_v58 = vld [vmem:[#allocation4 + $0x84] sm:$0xff] }
  0xa9   : > { %2581 = vmatpush3.bf16.msra.mxu1 %v2722_v1  ;;  %1903 = vmatprep.mubr.bf16.mxu1 %v2293_v34  ;;  %v2296_v61 = vcombine.low %v2765_v45, %v1137_v58  ;;  %v2769_v63 = vld [vmem:[%s3193_s19 + $0x228] sm:$0xff]   ;;  %v2771_v1 = vld [vmem:[%s3193_s19 + $0x238] sm:$0xff]  }
  0xaa   : > { %2582 = vmatprep.subr.bf16.mxu1 %v2725_v2  ;;  %v2773_v2 = vld [vmem:[#allocation4 + $0x68] ss:$36 sps:$4 sm:$0xff]  }
  0xab   : > { %2555 = vmatpush3.bf16.msra.mxu0 %v2724_v59  ;;  %v2772_v59 = vld [vmem:[#allocation4 + $0x20] ss:$36 sps:$4 sm:$0xff]  }
  0xac   : > { %2556 = vmatprep.subr.bf16.mxu0 %v2727_v60  ;;  %v2297_v60 = vcombine.high %v2765_v45, %v1137_v58 }
  0xad   : > { %2583 = vmatpush3.bf16.msra.mxu1 %v2726_v5 }
  0xae   : > { %2584 = vmatprep.subr.bf16.mxu1 %v2729_v6  ;;  %1855 = vmatmul.mubr.bf16.gmra.mrb[4].mxu0 %v2290_v28 }
  0xaf   : > { %2557 = vmatpush3.bf16.msra.mxu0 %v2728_v62  ;;  %1944 = vmatprep.mubr.bf16.mxu0 %v2286_v47  ;;  %v2768_v62 = vld [vmem:[%s3193_s19 + $0x220] sm:$0xff]   ;;  %s2244_s19 = sshll.u32 %s790_s30, 4 }
  0xb0   : > { %2558 = vmatprep.subr.bf16.mxu0 %v2731_v3  ;;  %1904 = vmatmul.mubr.bf16.gmra.mrb[4].mxu1 %v2292_v35  ;;  %s820_s11 = scalar_lea.vmem [#allocation3], %s2244_s19 }
  0xb1   : > { %2585 = vmatpush3.bf16.msra.mxu1 %v2730_v9  ;;  %1993 = vmatprep.mubr.bf16.mxu1 %v2288_v52  ;;  %v2280_v9 = vld [vmem:[%s830_s10] ss:$0 sm:$0xff] }
  0xb2   : > { %2586 = vmatprep.subr.bf16.mxu1 %v2733_v10 }
  0xb3   : > { %2559 = vmatpush3.bf16.msra.mxu0 %v2732_v4 }
  0xb4   : > { %2560 = vmatprep.subr.bf16.mxu0 %v2735_v7 }
  0xb5   : > { %2587 = vmatpush3.bf16.msra.mxu1 %v2734_v11 }
  0xb6   : > { %2588 = vmatprep.subr.bf16.mxu1 %v2737_v13 }
  0xb7   : > { %2561 = vmatpush3.bf16.msra.mxu0 %v2736_v8 }
  0xb8   : > { %2562 = vmatprep.subr.bf16.mxu0 %v2739_v12 }
  0xb9   : > { %2589 = vmatpush3.bf16.msra.mxu1 %v2738_v17 }
  0xba   : > { %2590 = vmatprep.subr.bf16.mxu1 %v2744_v19 }
  0xbb   : > { %2563 = vmatpush3.bf16.msra.mxu0 %v2743_v18 }
  0xbc   : > { %2564 = vmatprep.subr.bf16.mxu0 %v2748_v23 }
  0xbd   : > { %2591 = vmatpush3.bf16.msra.mxu1 %v2747_v22 }
  0xbe   : > { %2592 = vmatprep.subr.bf16.mxu1 %v2750_v25 }
  0xbf   : > { %2565 = vmatpush3.bf16.msra.mxu0 %v2749_v24 }
  0xc0   : > { %2566 = vmatprep.subr.bf16.mxu0 %v2752_v30 }
  0xc1   : > { %2593 = vmatpush3.bf16.msra.mxu1 %v2751_v29 }
  0xc2   : > { %2594 = vmatprep.subr.bf16.mxu1 %v2754_v33 }
  0xc3   : > { %2567 = vmatpush3.bf16.msra.mxu0 %v2753_v31 }
  0xc4   : > { %2618 = vmatprep.subr.bf16.mxu0 %v2758_v39 }
  0xc5   : > { %2595 = vmatpush3.bf16.msra.mxu1 %v2757_v38 }
  0xc6   : > { %1945 = vmatmul.mubr.bf16.vlgmr.msra.gmra.mrb[8].mxu0 %v2285_v46 }
  0xc7   : > { %2619 = vmatpush3.bf16.msra.mxu0 %v2758_v39  ;;  %1952 = vmatprep.mubr.bf16.mxu0 %v2295_v55 }
  0xc8   : > { %2620 = vmatprep.subr.bf16.mxu0 %v2761_v49  ;;  %1994 = vmatmul.mubr.bf16.vlgmr.msra.gmra.mrb[8].mxu1 %v2287_v51 }
  0xc9   : > { %2001 = vmatprep.mubr.bf16.mxu1 %v2297_v60 }
  0xcb   : > { %2621 = vmatpush3.bf16.msra.mxu0 %v2761_v49 }
  0xcc   : > { %2622 = vmatprep.subr.bf16.mxu0 %v2764_v53 }
  0xce   : > { %1953 = vmatmul.mubr.bf16.gmra.mrb[12].mxu0 %v2294_v56 }
  0xcf   : > { %2623 = vmatpush3.bf16.msra.mxu0 %v2764_v53  ;;  %2634 = vmatprep.mubr.bf16.mxu0 %v2772_v59 }
  0xd0   : > { %2624 = vmatprep.subr.bf16.mxu0 %v2767_v57  ;;  %2002 = vmatmul.mubr.bf16.gmra.mrb[12].mxu1 %v2296_v61 }
  0xd3   : > { %2625 = vmatpush3.bf16.msra.mxu0 %v2767_v57 }
  0xd4   : > { %2626 = vmatprep.subr.bf16.mxu0 %v2768_v62 }
  0xd7   : > { %2627 = vmatpush3.bf16.msra.mxu0 %v2768_v62 }
  0xd8   : > { %2628 = vmatprep.subr.bf16.mxu0 %v2769_v63 }
  0xdb   : > { %2629 = vmatpush3.bf16.msra.mxu0 %v2769_v63 }
  0xdc   : > { %2630 = vmatprep.subr.bf16.mxu0 %v2770_v0 }
  0xdf   : > { %2631 = vmatpush3.bf16.msra.mxu0 %v2770_v0 }
  0xe0   : > { %2632 = vmatprep.subr.bf16.mxu0 %v2771_v1 }
  0xe3   : > { %2633 = vmatpush3.bf16.msra.mxu0 %v2771_v1 }
  0xe6   : > { %2635 = vmatmul.mubr.bf16.vlgmr.msra.gmra.mrb[16].mxu0 %v2773_v2 }
 0x179   : > { %v2512_v3 = vpop.f32.mrb[0].mxu0 }
 0x17a   : > { %v2513_v4 = vpop.f32.mrb[1].mxu0 }
 0x17b   : > { %v2514_v5 = vadd.f32 %v2513_v4, %v2512_v3  ;;  %v2515_v6 = vpop.f32.mrb[2].mxu0  ;;  %v2540_v11 = vpop.f32.mrb[0].mxu1 }
 0x17c   : > { %v2516_v7 = vpop.f32.mrb[3].mxu0  ;;  %v2541_v12 = vpop.f32.mrb[1].mxu1 }
 0x17d   : > { %v2517_v8 = vadd.f32 %v2516_v7, %v2515_v6  ;;  %v1849_v10 = vadd.f32 %v2514_v5, %v2280_v9  ;;  %v2542_v14 = vadd.f32 %v2541_v12, %v2540_v11  ;;  %v2543_v15 = vpop.f32.mrb[2].mxu1 }
 0x17e   : > { %v2544_v16 = vpop.f32.mrb[3].mxu1 }
 0x17f   : > { %v1852_v13 = vadd.f32 %v2517_v8, %v2280_v9  ;;  %v1898_v17 = vadd.f32 %v2542_v14, %v1849_v10  ;;  %v2545_v18 = vadd.f32 %v2544_v16, %v2543_v15 }
 0x181   : > { %v1901_v19 = vadd.f32 %v2545_v18, %v1852_v13  ;;  %v2518_v20 = vpop.f32.mrb[4].mxu0 }
 0x182   : > { %v2519_v21 = vpop.f32.mrb[5].mxu0 }
 0x183   : > { %v2520_v22 = vadd.f32 %v2519_v21, %v2518_v20  ;;  %v2521_v23 = vpop.f32.mrb[6].mxu0  ;;  %v2546_v26 = vpop.f32.mrb[4].mxu1 }
 0x184   : > { %v2522_v24 = vpop.f32.mrb[7].mxu0  ;;  %v2547_v28 = vpop.f32.mrb[5].mxu1 }
 0x185   : > { %v1857_v25 = vadd.f32 %v2520_v22, %v2280_v9  ;;  %v2523_v27 = vadd.f32 %v2522_v24, %v2521_v23  ;;  %v2548_v30 = vadd.f32 %v2547_v28, %v2546_v26  ;;  %v2549_v31 = vpop.f32.mrb[6].mxu1 }
 0x186   : > { %v2550_v32 = vpop.f32.mrb[7].mxu1 }
 0x187   : > { %v1860_v29 = vadd.f32 %v2523_v27, %v2280_v9  ;;  %v1906_v33 = vadd.f32 %v2548_v30, %v1857_v25  ;;  %v2551_v34 = vadd.f32 %v2550_v32, %v2549_v31 }
 0x189   : > { %v1909_v35 = vadd.f32 %v2551_v34, %v1860_v29 }
 0x199   : > { %v2568_v36 = vpop.f32.mrb[8].mxu0 }
 0x19a   : > { %v2569_v37 = vpop.f32.mrb[9].mxu0 }
 0x19b   : > { %v2570_v38 = vadd.f32 %v2569_v37, %v2568_v36  ;;  %v2571_v39 = vpop.f32.mrb[10].mxu0  ;;  %v2596_v42 = vpop.f32.mrb[8].mxu1 }
 0x19c   : > { %v2572_v40 = vpop.f32.mrb[11].mxu0  ;;  %v2597_v44 = vpop.f32.mrb[9].mxu1 }
 0x19d   : > { %v1947_v41 = vadd.f32 %v2570_v38, %v1898_v17  ;;  %v2573_v43 = vadd.f32 %v2572_v40, %v2571_v39  ;;  %v2598_v46 = vadd.f32 %v2597_v44, %v2596_v42  ;;  %v2599_v47 = vpop.f32.mrb[10].mxu1 }
 0x19e   : > { %v2600_v48 = vpop.f32.mrb[11].mxu1 }
 0x19f   : > { %v1950_v45 = vadd.f32 %v2573_v43, %v1901_v19  ;;  %v2601_v49 = vadd.f32 %v2600_v48, %v2599_v47  ;;  %v1996_v51 = vadd.f32 %v2598_v46, %v1947_v41 }
 0x1a1   : > { %v2574_v50 = vpop.f32.mrb[12].mxu0  ;;  %v1999_v55 = vadd.f32 %v2601_v49, %v1950_v45 }
 0x1a2   : > { %v2575_v52 = vpop.f32.mrb[13].mxu0 }
 0x1a3   : > { %v2576_v53 = vadd.f32 %v2575_v52, %v2574_v50  ;;  %v2577_v54 = vpop.f32.mrb[14].mxu0  ;;  %v2602_v58 = vpop.f32.mrb[12].mxu1 }
 0x1a4   : > { %v2578_v56 = vpop.f32.mrb[15].mxu0  ;;  %v2603_v60 = vpop.f32.mrb[13].mxu1 }
 0x1a5   : > { %v1955_v57 = vadd.f32 %v2576_v53, %v1906_v33  ;;  %v2579_v59 = vadd.f32 %v2578_v56, %v2577_v54  ;;  %v2604_v62 = vadd.f32 %v2603_v60, %v2602_v58  ;;  %v2605_v63 = vpop.f32.mrb[14].mxu1 }
 0x1a6   : > { %v2606_v0 = vpop.f32.mrb[15].mxu1 }
 0x1a7   : > { %v1958_v61 = vadd.f32 %v2579_v59, %v1909_v35  ;;  %v2607_v1 = vadd.f32 %v2606_v0, %v2605_v63  ;;  %v2004_v2 = vadd.f32 %v2604_v62, %v1955_v57 }
 0x1a9   : > { %v2007_v3 = vadd.f32 %v2607_v1, %v1958_v61 }
 0x1b9   : > { %v2636_v4 = vpop.f32.mrb[16].mxu0 }
 0x1ba   : > { %v2053_v5 = vadd.f32 %v2636_v4, %v2004_v2  ;;  %v2044_v6 = vpop.f32.mrb[17].mxu0 }
 0x1bb   : > { %v2045_v7 = vadd.f32 %v2044_v6, %v1996_v51  ;;  %v2637_v8 = vpop.f32.mrb[18].mxu0 }
 0x1bc   : > { %v2056_v9 = vadd.f32 %v2637_v8, %v2007_v3  ;;  %v2047_v10 = vpop.f32.mrb[19].mxu0  ;;  %v2061_v12 = vmax.f32 %v2053_v5, 0.0 }
 0x1bd   : > { %v2048_v11 = vadd.f32 %v2047_v10, %v1999_v55  ;;  %v2059_v14 = vmax.f32 %v2045_v7, 0.0  ;;  %2089 = sbr.rel (!%p2869_p6) target bundleno = 461 (0x1cd), region = 77 }
 0x1be   : > { %v2062_v13 = vmax.f32 %v2056_v9, 0.0 }
 0x1bf   : > { %v2060_v15 = vmax.f32 %v2048_v11, 0.0 }
 0x1c0   : > { %v2476_v16 = vpack.c.bf16 %v2062_v13, %v2061_v12 }
 0x1c1   : > { %v2471_v17 = vpack.c.bf16 %v2060_v15, %v2059_v14 }
 0x1c2   : > { %2495 = vst [vmem:[%s820_s11 + $0x8] sm:$0xff] %v2476_v16  }
 0x1c3   : > { %2472 = vst [vmem:[%s820_s11] sm:$0xff] %v2471_v17  }
 0x1c9   : > { %v2114_v20 = vld [vmem:[%s820_s11 + $0x8] sm:$0xf]  ;;  %v2116_v21 = vld [vmem:[%s820_s11 + $0xc] sm:$0xf] }
 0x1ca   : > { %v2110_v18 = vld [vmem:[%s820_s11] sm:$0xf]  ;;  %v2112_v19 = vld [vmem:[%s820_s11 + $0x4] sm:$0xf]  ;;  %2115 = vst [vmem:[%s2094_s20 + $0x20] sm:$0xf] %v2114_v20 }
 0x1cb   : > { %2111 = vst [vmem:[%s2094_s20] sm:$0xf] %v2110_v18  ;;  %2113 = vst [vmem:[%s2094_s20 + $0x10] sm:$0xf] %v2112_v19 }
 0x1cc   : > { %2117 = vst [vmem:[%s2094_s20 + $0x30] sm:$0xf] %v2116_v21 }
 0x1cd PF: > { %s13_s16 = sadd.s32 1, %s2812_s16   ;;  %s3344_s12 = smov %s2800_s13 }
 0x1ce   : > { %p10_p12 = scmp.ge.s32.totalorder %s13_s16, 6   ;;  %s3345_s13 = smov %s2874_s22 }
 0x1cf   : > { %s3346_s14 = smov %s2808_s15  ;;  %s3347_s15 = smov %s3349_s17 }
 0x1d0   :  { %12 = sbr.rel (!%p10_p12) target bundleno = 3 (0x3), region = 225 }

// kernel: cvae_forward.13
= control target key start
LH: loop header
LB: loop body
LE: loop exit
PB: predicated region body
PF: predicated region fallthrough
CT: control target
= control target key end

     0   :  { %s3363_s12 = smov 0   ;;  %s3365_s13 = smov 0   ;;  %s4153_s0 = inlined_call_operand.vmem [shape: bf16[128,1152], index: 0, kind: input, shape index: {}]   ;;  %s4154_s1 = inlined_call_operand.vmem [shape: bf16[1152,512], index: 1, kind: input, shape index: {}]   ;;  %s4155_s2 = inlined_call_operand.vmem [shape: f32[1,512], index: 2, kind: input, shape index: {}]   ;;  %s4156_s3 = inlined_call_operand.vmem [shape: f32[128,512], index: 3, kind: output, shape index: {}]  }
   0x1   :  { %s3367_s14 = smov 0   ;;  %s3369_s15 = smov 0  }
   0x2   :  { %s3371_s16 = smov 0  }
   0x3 LB: > { %s22_s17 = sadd.s32 1, %s3337_s15  ;;  %s2576_s18 = sadd.s32 4294967295, %s3341_s16   ;;  %s3341_s16 = sphi %s3371_s16, %s13_s16   ;;  %s3337_s15 = sphi %s3369_s15, %s4161_s15   ;;  %s3333_s14 = sphi %s3367_s14, %s4160_s14   ;;  %s3329_s13 = sphi %s3365_s13, %s4159_s13   ;;  %s3325_s12 = sphi %s3363_s12, %s4158_s12  }
   0x4   : > { %p23_p0 = scmp.ge.s32.totalorder %s22_s17, 4  ;;  %p65_p1 = scmp.ne.s32.totalorder %s3329_s13, %s3325_s12 }
   0x5   : > { %p66_p2 = scmp.eq.s32.totalorder %s3341_s16, 0  ;;  %p123_p4 = scmp.eq.s32.totalorder %s2576_s18, 3 }
   0x6   : > { %s4163_s17 = smov (%p23_p0, %s22_s17), 0  ;;  %s58_s20 = sadd.s32 1, %s3329_s13 }
   0x7   : > { %p67_p3 = por %p66_p2, %p65_p1  ;;  %s55_s19 = ssub.s32 %s3337_s15, %s4163_s17 }
   0x8   : > { %p56_p5 = scmp.eq.s32.totalorder %s55_s19, 0  ;;  %p3398_p6 = por %p123_p4, %p65_p1 }
   0x9   : > { %p2580_p7 = scmp.ge.s32.totalorder %s3341_s16, 4 }
   0xa   : > { %s3403_s22 = scalar_select %p56_p5, %s3329_s13, %s58_s20  }
   0xb   : > { %155 = sbr.rel (%p2580_p7) target bundleno = 118 (0x76), region = 20 }
  0x12   : > { %158 = sbr.rel (!%p67_p3) target bundleno = 118 (0x76), region = 24  ;;  %s160_s23 = sand.u32 (%p67_p3), 1, %s3329_s13  }
  0x13   : > { %s2581_s24 = sshll.u32 (%p67_p3), %s3337_s15, 2  ;;  %s3053_s25 = smul.u32 (%p67_p3), 576, %s160_s23 }
  0x14   : > { %s3411_s28 = scalar_lea.vmem (%p67_p3), %s4154_s1, %s2581_s24 }
  0x15   : > { %v180_v0 = vld [vmem:[%s3411_s28] sm:$0xf] (%p67_p3)  ;;  %v182_v1 = vld [vmem:[%s3411_s28 + $0x10] sm:$0xf] (%p67_p3)  ;;  %s3418_s29 = scalar_lea.vmem (%p67_p3), [#allocation2], %s3053_s25 }
  0x16   : > { %v184_v2 = vld [vmem:[%s3411_s28 + $0x20] sm:$0xf] (%p67_p3)  ;;  %v186_v3 = vld [vmem:[%s3411_s28 + $0x30] sm:$0xf] (%p67_p3)  ;;  %181 = vst [vmem:[%s3418_s29] sm:$0xf] (%p67_p3), %v180_v0 }
  0x17   : > { %v188_v4 = vld [vmem:[%s3411_s28 + $0x40] sm:$0xf] (%p67_p3)  ;;  %183 = vst [vmem:[%s3418_s29 + $0x4] sm:$0xf] (%p67_p3), %v182_v1  ;;  %185 = vst [vmem:[%s3418_s29 + $0x8] sm:$0xf] (%p67_p3), %v184_v2 }
  0x18   : > { %187 = vst [vmem:[%s3418_s29 + $0xc] sm:$0xf] (%p67_p3), %v186_v3  ;;  %189 = vst [vmem:[%s3418_s29 + $0x10] sm:$0xf] (%p67_p3), %v188_v4  ;;  %v190_v5 = vld [vmem:[%s3411_s28 + $0x50] sm:$0xf] (%p67_p3) }
  0x19   : > { %v192_v6 = vld [vmem:[%s3411_s28 + $0x60] sm:$0xf]  ;;  %v194_v7 = vld [vmem:[%s3411_s28 + $0x70] sm:$0xf]  ;;  %191 = vst [vmem:[%s3418_s29 + $0x14] sm:$0xf] %v190_v5 }
  0x1a   : > { %193 = vst [vmem:[%s3418_s29 + $0x18] sm:$0xf] %v192_v6  ;;  %195 = vst [vmem:[%s3418_s29 + $0x1c] sm:$0xf] %v194_v7  ;;  %v196_v8 = vld [vmem:[%s3411_s28 + $0x80] sm:$0xf] }
  0x1b   : > { %v198_v9 = vld [vmem:[%s3411_s28 + $0x90] sm:$0xf]  ;;  %v200_v10 = vld [vmem:[%s3411_s28 + $0xa0] sm:$0xf]  ;;  %197 = vst [vmem:[%s3418_s29 + $0x20] sm:$0xf] %v196_v8 }
  0x1c   : > { %199 = vst [vmem:[%s3418_s29 + $0x24] sm:$0xf] %v198_v9  ;;  %201 = vst [vmem:[%s3418_s29 + $0x28] sm:$0xf] %v200_v10  ;;  %v202_v11 = vld [vmem:[%s3411_s28 + $0xb0] sm:$0xf] }
  0x1d   : > { %v204_v12 = vld [vmem:[%s3411_s28 + $0xc0] sm:$0xf]  ;;  %v206_v13 = vld [vmem:[%s3411_s28 + $0xd0] sm:$0xf]  ;;  %203 = vst [vmem:[%s3418_s29 + $0x2c] sm:$0xf] %v202_v11 }
  0x1e   : > { %205 = vst [vmem:[%s3418_s29 + $0x30] sm:$0xf] %v204_v12  ;;  %207 = vst [vmem:[%s3418_s29 + $0x34] sm:$0xf] %v206_v13  ;;  %v208_v14 = vld [vmem:[%s3411_s28 + $0xe0] sm:$0xf] }
  0x1f   : > { %v210_v15 = vld [vmem:[%s3411_s28 + $0xf0] sm:$0xf]  ;;  %v212_v16 = vld [vmem:[%s3411_s28 + $0x100] sm:$0xf]  ;;  %209 = vst [vmem:[%s3418_s29 + $0x38] sm:$0xf] %v208_v14 }
  0x20   : > { %211 = vst [vmem:[%s3418_s29 + $0x3c] sm:$0xf] %v210_v15  ;;  %213 = vst [vmem:[%s3418_s29 + $0x40] sm:$0xf] %v212_v16  ;;  %v214_v17 = vld [vmem:[%s3411_s28 + $0x110] sm:$0xf] }
  0x21   : > { %v216_v18 = vld [vmem:[%s3411_s28 + $0x120] sm:$0xf]  ;;  %v218_v19 = vld [vmem:[%s3411_s28 + $0x130] sm:$0xf]  ;;  %215 = vst [vmem:[%s3418_s29 + $0x44] sm:$0xf] %v214_v17 }
  0x22   : > { %217 = vst [vmem:[%s3418_s29 + $0x48] sm:$0xf] %v216_v18  ;;  %219 = vst [vmem:[%s3418_s29 + $0x4c] sm:$0xf] %v218_v19  ;;  %v220_v20 = vld [vmem:[%s3411_s28 + $0x140] sm:$0xf] }
  0x23   : > { %v222_v21 = vld [vmem:[%s3411_s28 + $0x150] sm:$0xf]  ;;  %v224_v22 = vld [vmem:[%s3411_s28 + $0x160] sm:$0xf]  ;;  %221 = vst [vmem:[%s3418_s29 + $0x50] sm:$0xf] %v220_v20 }
  0x24   : > { %223 = vst [vmem:[%s3418_s29 + $0x54] sm:$0xf] %v222_v21  ;;  %225 = vst [vmem:[%s3418_s29 + $0x58] sm:$0xf] %v224_v22  ;;  %v226_v23 = vld [vmem:[%s3411_s28 + $0x170] sm:$0xf] }
  0x25   : > { %v228_v24 = vld [vmem:[%s3411_s28 + $0x180] sm:$0xf]  ;;  %v230_v25 = vld [vmem:[%s3411_s28 + $0x190] sm:$0xf]  ;;  %227 = vst [vmem:[%s3418_s29 + $0x5c] sm:$0xf] %v226_v23 }
  0x26   : > { %229 = vst [vmem:[%s3418_s29 + $0x60] sm:$0xf] %v228_v24  ;;  %231 = vst [vmem:[%s3418_s29 + $0x64] sm:$0xf] %v230_v25  ;;  %v232_v26 = vld [vmem:[%s3411_s28 + $0x1a0] sm:$0xf] }
  0x27   : > { %v234_v27 = vld [vmem:[%s3411_s28 + $0x1b0] sm:$0xf]  ;;  %v236_v28 = vld [vmem:[%s3411_s28 + $0x1c0] sm:$0xf]  ;;  %233 = vst [vmem:[%s3418_s29 + $0x68] sm:$0xf] %v232_v26 }
  0x28   : > { %235 = vst [vmem:[%s3418_s29 + $0x6c] sm:$0xf] %v234_v27  ;;  %237 = vst [vmem:[%s3418_s29 + $0x70] sm:$0xf] %v236_v28  ;;  %v238_v29 = vld [vmem:[%s3411_s28 + $0x1d0] sm:$0xf] }
  0x29   : > { %v240_v30 = vld [vmem:[%s3411_s28 + $0x1e0] sm:$0xf]  ;;  %v242_v31 = vld [vmem:[%s3411_s28 + $0x1f0] sm:$0xf]  ;;  %239 = vst [vmem:[%s3418_s29 + $0x74] sm:$0xf] %v238_v29 }
  0x2a   : > { %241 = vst [vmem:[%s3418_s29 + $0x78] sm:$0xf] %v240_v30  ;;  %243 = vst [vmem:[%s3418_s29 + $0x7c] sm:$0xf] %v242_v31  ;;  %v244_v32 = vld [vmem:[%s3411_s28 + $0x200] sm:$0xf] }
  0x2b   : > { %v246_v33 = vld [vmem:[%s3411_s28 + $0x210] sm:$0xf]  ;;  %v248_v34 = vld [vmem:[%s3411_s28 + $0x220] sm:$0xf]  ;;  %245 = vst [vmem:[%s3418_s29 + $0x80] sm:$0xf] %v244_v32 }
  0x2c   : > { %247 = vst [vmem:[%s3418_s29 + $0x84] sm:$0xf] %v246_v33  ;;  %249 = vst [vmem:[%s3418_s29 + $0x88] sm:$0xf] %v248_v34  ;;  %v250_v35 = vld [vmem:[%s3411_s28 + $0x230] sm:$0xf] }
  0x2d   : > { %v252_v36 = vld [vmem:[%s3411_s28 + $0x240] sm:$0xf]  ;;  %v254_v37 = vld [vmem:[%s3411_s28 + $0x250] sm:$0xf]  ;;  %251 = vst [vmem:[%s3418_s29 + $0x8c] sm:$0xf] %v250_v35 }
  0x2e   : > { %253 = vst [vmem:[%s3418_s29 + $0x90] sm:$0xf] %v252_v36  ;;  %255 = vst [vmem:[%s3418_s29 + $0x94] sm:$0xf] %v254_v37  ;;  %v256_v38 = vld [vmem:[%s3411_s28 + $0x260] sm:$0xf] }
  0x2f   : > { %v258_v39 = vld [vmem:[%s3411_s28 + $0x270] sm:$0xf]  ;;  %v260_v40 = vld [vmem:[%s3411_s28 + $0x280] sm:$0xf]  ;;  %257 = vst [vmem:[%s3418_s29 + $0x98] sm:$0xf] %v256_v38 }
  0x30   : > { %259 = vst [vmem:[%s3418_s29 + $0x9c] sm:$0xf] %v258_v39  ;;  %261 = vst [vmem:[%s3418_s29 + $0xa0] sm:$0xf] %v260_v40  ;;  %v262_v41 = vld [vmem:[%s3411_s28 + $0x290] sm:$0xf] }
  0x31   : > { %v264_v42 = vld [vmem:[%s3411_s28 + $0x2a0] sm:$0xf]  ;;  %v266_v43 = vld [vmem:[%s3411_s28 + $0x2b0] sm:$0xf]  ;;  %263 = vst [vmem:[%s3418_s29 + $0xa4] sm:$0xf] %v262_v41 }
  0x32   : > { %265 = vst [vmem:[%s3418_s29 + $0xa8] sm:$0xf] %v264_v42  ;;  %267 = vst [vmem:[%s3418_s29 + $0xac] sm:$0xf] %v266_v43  ;;  %v268_v44 = vld [vmem:[%s3411_s28 + $0x2c0] sm:$0xf] }
  0x33   : > { %v270_v45 = vld [vmem:[%s3411_s28 + $0x2d0] sm:$0xf]  ;;  %v272_v46 = vld [vmem:[%s3411_s28 + $0x2e0] sm:$0xf]  ;;  %269 = vst [vmem:[%s3418_s29 + $0xb0] sm:$0xf] %v268_v44 }
  0x34   : > { %271 = vst [vmem:[%s3418_s29 + $0xb4] sm:$0xf] %v270_v45  ;;  %273 = vst [vmem:[%s3418_s29 + $0xb8] sm:$0xf] %v272_v46  ;;  %v274_v47 = vld [vmem:[%s3411_s28 + $0x2f0] sm:$0xf] }
  0x35   : > { %v276_v48 = vld [vmem:[%s3411_s28 + $0x300] sm:$0xf]  ;;  %v278_v49 = vld [vmem:[%s3411_s28 + $0x310] sm:$0xf]  ;;  %275 = vst [vmem:[%s3418_s29 + $0xbc] sm:$0xf] %v274_v47 }
  0x36   : > { %277 = vst [vmem:[%s3418_s29 + $0xc0] sm:$0xf] %v276_v48  ;;  %279 = vst [vmem:[%s3418_s29 + $0xc4] sm:$0xf] %v278_v49  ;;  %v280_v50 = vld [vmem:[%s3411_s28 + $0x320] sm:$0xf] }
  0x37   : > { %v282_v51 = vld [vmem:[%s3411_s28 + $0x330] sm:$0xf]  ;;  %v284_v52 = vld [vmem:[%s3411_s28 + $0x340] sm:$0xf]  ;;  %281 = vst [vmem:[%s3418_s29 + $0xc8] sm:$0xf] %v280_v50 }
  0x38   : > { %283 = vst [vmem:[%s3418_s29 + $0xcc] sm:$0xf] %v282_v51  ;;  %285 = vst [vmem:[%s3418_s29 + $0xd0] sm:$0xf] %v284_v52  ;;  %v286_v53 = vld [vmem:[%s3411_s28 + $0x350] sm:$0xf] }
  0x39   : > { %v288_v54 = vld [vmem:[%s3411_s28 + $0x360] sm:$0xf]  ;;  %v290_v55 = vld [vmem:[%s3411_s28 + $0x370] sm:$0xf]  ;;  %287 = vst [vmem:[%s3418_s29 + $0xd4] sm:$0xf] %v286_v53 }
  0x3a   : > { %289 = vst [vmem:[%s3418_s29 + $0xd8] sm:$0xf] %v288_v54  ;;  %291 = vst [vmem:[%s3418_s29 + $0xdc] sm:$0xf] %v290_v55  ;;  %v292_v56 = vld [vmem:[%s3411_s28 + $0x380] sm:$0xf] }
  0x3b   : > { %v294_v57 = vld [vmem:[%s3411_s28 + $0x390] sm:$0xf]  ;;  %v296_v58 = vld [vmem:[%s3411_s28 + $0x3a0] sm:$0xf]  ;;  %293 = vst [vmem:[%s3418_s29 + $0xe0] sm:$0xf] %v292_v56 }
  0x3c   : > { %295 = vst [vmem:[%s3418_s29 + $0xe4] sm:$0xf] %v294_v57  ;;  %297 = vst [vmem:[%s3418_s29 + $0xe8] sm:$0xf] %v296_v58  ;;  %v298_v59 = vld [vmem:[%s3411_s28 + $0x3b0] sm:$0xf] }
  0x3d   : > { %v300_v60 = vld [vmem:[%s3411_s28 + $0x3c0] sm:$0xf]  ;;  %v302_v61 = vld [vmem:[%s3411_s28 + $0x3d0] sm:$0xf]  ;;  %299 = vst [vmem:[%s3418_s29 + $0xec] sm:$0xf] %v298_v59 }
  0x3e   : > { %301 = vst [vmem:[%s3418_s29 + $0xf0] sm:$0xf] %v300_v60  ;;  %303 = vst [vmem:[%s3418_s29 + $0xf4] sm:$0xf] %v302_v61  ;;  %v304_v62 = vld [vmem:[%s3411_s28 + $0x3e0] sm:$0xf] }
  0x3f   : > { %v306_v63 = vld [vmem:[%s3411_s28 + $0x3f0] sm:$0xf]  ;;  %v308_v0 = vld [vmem:[%s3411_s28 + $0x400] sm:$0xf]  ;;  %305 = vst [vmem:[%s3418_s29 + $0xf8] sm:$0xf] %v304_v62 }
  0x40   : > { %307 = vst [vmem:[%s3418_s29 + $0xfc] sm:$0xf] %v306_v63  ;;  %309 = vst [vmem:[%s3418_s29 + $0x100] sm:$0xf] %v308_v0  ;;  %v310_v1 = vld [vmem:[%s3411_s28 + $0x410] sm:$0xf] }
  0x41   : > { %v312_v2 = vld [vmem:[%s3411_s28 + $0x420] sm:$0xf]  ;;  %v314_v3 = vld [vmem:[%s3411_s28 + $0x430] sm:$0xf]  ;;  %311 = vst [vmem:[%s3418_s29 + $0x104] sm:$0xf] %v310_v1 }
  0x42   : > { %313 = vst [vmem:[%s3418_s29 + $0x108] sm:$0xf] %v312_v2  ;;  %315 = vst [vmem:[%s3418_s29 + $0x10c] sm:$0xf] %v314_v3  ;;  %v316_v4 = vld [vmem:[%s3411_s28 + $0x440] sm:$0xf] }
  0x43   : > { %v318_v5 = vld [vmem:[%s3411_s28 + $0x450] sm:$0xf]  ;;  %v320_v6 = vld [vmem:[%s3411_s28 + $0x460] sm:$0xf]  ;;  %317 = vst [vmem:[%s3418_s29 + $0x110] sm:$0xf] %v316_v4 }
  0x44   : > { %319 = vst [vmem:[%s3418_s29 + $0x114] sm:$0xf] %v318_v5  ;;  %321 = vst [vmem:[%s3418_s29 + $0x118] sm:$0xf] %v320_v6  ;;  %v322_v7 = vld [vmem:[%s3411_s28 + $0x470] sm:$0xf] }
  0x45   : > { %v324_v8 = vld [vmem:[%s3411_s28 + $0x480] sm:$0xf]  ;;  %v326_v9 = vld [vmem:[%s3411_s28 + $0x490] sm:$0xf]  ;;  %323 = vst [vmem:[%s3418_s29 + $0x11c] sm:$0xf] %v322_v7 }
  0x46   : > { %325 = vst [vmem:[%s3418_s29 + $0x120] sm:$0xf] %v324_v8  ;;  %327 = vst [vmem:[%s3418_s29 + $0x124] sm:$0xf] %v326_v9  ;;  %v328_v10 = vld [vmem:[%s3411_s28 + $0x4a0] sm:$0xf] }
  0x47   : > { %v330_v11 = vld [vmem:[%s3411_s28 + $0x4b0] sm:$0xf]  ;;  %v332_v12 = vld [vmem:[%s3411_s28 + $0x4c0] sm:$0xf]  ;;  %329 = vst [vmem:[%s3418_s29 + $0x128] sm:$0xf] %v328_v10 }
  0x48   : > { %331 = vst [vmem:[%s3418_s29 + $0x12c] sm:$0xf] %v330_v11  ;;  %333 = vst [vmem:[%s3418_s29 + $0x130] sm:$0xf] %v332_v12  ;;  %v334_v13 = vld [vmem:[%s3411_s28 + $0x4d0] sm:$0xf] }
  0x49   : > { %v336_v14 = vld [vmem:[%s3411_s28 + $0x4e0] sm:$0xf]  ;;  %v338_v15 = vld [vmem:[%s3411_s28 + $0x4f0] sm:$0xf]  ;;  %335 = vst [vmem:[%s3418_s29 + $0x134] sm:$0xf] %v334_v13 }
  0x4a   : > { %337 = vst [vmem:[%s3418_s29 + $0x138] sm:$0xf] %v336_v14  ;;  %339 = vst [vmem:[%s3418_s29 + $0x13c] sm:$0xf] %v338_v15  ;;  %v340_v16 = vld [vmem:[%s3411_s28 + $0x500] sm:$0xf] }
  0x4b   : > { %v342_v17 = vld [vmem:[%s3411_s28 + $0x510] sm:$0xf]  ;;  %v344_v18 = vld [vmem:[%s3411_s28 + $0x520] sm:$0xf]  ;;  %341 = vst [vmem:[%s3418_s29 + $0x140] sm:$0xf] %v340_v16 }
  0x4c   : > { %343 = vst [vmem:[%s3418_s29 + $0x144] sm:$0xf] %v342_v17  ;;  %345 = vst [vmem:[%s3418_s29 + $0x148] sm:$0xf] %v344_v18  ;;  %v346_v19 = vld [vmem:[%s3411_s28 + $0x530] sm:$0xf] }
  0x4d   : > { %v348_v20 = vld [vmem:[%s3411_s28 + $0x540] sm:$0xf]  ;;  %v350_v21 = vld [vmem:[%s3411_s28 + $0x550] sm:$0xf]  ;;  %347 = vst [vmem:[%s3418_s29 + $0x14c] sm:$0xf] %v346_v19 }
  0x4e   : > { %349 = vst [vmem:[%s3418_s29 + $0x150] sm:$0xf] %v348_v20  ;;  %351 = vst [vmem:[%s3418_s29 + $0x154] sm:$0xf] %v350_v21  ;;  %v352_v22 = vld [vmem:[%s3411_s28 + $0x560] sm:$0xf] }
  0x4f   : > { %v354_v23 = vld [vmem:[%s3411_s28 + $0x570] sm:$0xf]  ;;  %v356_v24 = vld [vmem:[%s3411_s28 + $0x580] sm:$0xf]  ;;  %353 = vst [vmem:[%s3418_s29 + $0x158] sm:$0xf] %v352_v22 }
  0x50   : > { %355 = vst [vmem:[%s3418_s29 + $0x15c] sm:$0xf] %v354_v23  ;;  %357 = vst [vmem:[%s3418_s29 + $0x160] sm:$0xf] %v356_v24  ;;  %v358_v25 = vld [vmem:[%s3411_s28 + $0x590] sm:$0xf] }
  0x51   : > { %v360_v26 = vld [vmem:[%s3411_s28 + $0x5a0] sm:$0xf]  ;;  %v362_v27 = vld [vmem:[%s3411_s28 + $0x5b0] sm:$0xf]  ;;  %359 = vst [vmem:[%s3418_s29 + $0x164] sm:$0xf] %v358_v25 }
  0x52   : > { %361 = vst [vmem:[%s3418_s29 + $0x168] sm:$0xf] %v360_v26  ;;  %363 = vst [vmem:[%s3418_s29 + $0x16c] sm:$0xf] %v362_v27  ;;  %v364_v28 = vld [vmem:[%s3411_s28 + $0x5c0] sm:$0xf] }
  0x53   : > { %v366_v29 = vld [vmem:[%s3411_s28 + $0x5d0] sm:$0xf]  ;;  %v368_v30 = vld [vmem:[%s3411_s28 + $0x5e0] sm:$0xf]  ;;  %365 = vst [vmem:[%s3418_s29 + $0x170] sm:$0xf] %v364_v28 }
  0x54   : > { %367 = vst [vmem:[%s3418_s29 + $0x174] sm:$0xf] %v366_v29  ;;  %369 = vst [vmem:[%s3418_s29 + $0x178] sm:$0xf] %v368_v30  ;;  %v370_v31 = vld [vmem:[%s3411_s28 + $0x5f0] sm:$0xf] }
  0x55   : > { %v372_v32 = vld [vmem:[%s3411_s28 + $0x600] sm:$0xf]  ;;  %v374_v33 = vld [vmem:[%s3411_s28 + $0x610] sm:$0xf]  ;;  %371 = vst [vmem:[%s3418_s29 + $0x17c] sm:$0xf] %v370_v31 }
  0x56   : > { %373 = vst [vmem:[%s3418_s29 + $0x180] sm:$0xf] %v372_v32  ;;  %375 = vst [vmem:[%s3418_s29 + $0x184] sm:$0xf] %v374_v33  ;;  %v376_v34 = vld [vmem:[%s3411_s28 + $0x620] sm:$0xf] }
  0x57   : > { %v378_v35 = vld [vmem:[%s3411_s28 + $0x630] sm:$0xf]  ;;  %v380_v36 = vld [vmem:[%s3411_s28 + $0x640] sm:$0xf]  ;;  %377 = vst [vmem:[%s3418_s29 + $0x188] sm:$0xf] %v376_v34 }
  0x58   : > { %379 = vst [vmem:[%s3418_s29 + $0x18c] sm:$0xf] %v378_v35  ;;  %381 = vst [vmem:[%s3418_s29 + $0x190] sm:$0xf] %v380_v36  ;;  %v382_v37 = vld [vmem:[%s3411_s28 + $0x650] sm:$0xf] }
  0x59   : > { %v384_v38 = vld [vmem:[%s3411_s28 + $0x660] sm:$0xf]  ;;  %v386_v39 = vld [vmem:[%s3411_s28 + $0x670] sm:$0xf]  ;;  %383 = vst [vmem:[%s3418_s29 + $0x194] sm:$0xf] %v382_v37 }
  0x5a   : > { %385 = vst [vmem:[%s3418_s29 + $0x198] sm:$0xf] %v384_v38  ;;  %387 = vst [vmem:[%s3418_s29 + $0x19c] sm:$0xf] %v386_v39  ;;  %v388_v40 = vld [vmem:[%s3411_s28 + $0x680] sm:$0xf] }
  0x5b   : > { %v390_v41 = vld [vmem:[%s3411_s28 + $0x690] sm:$0xf]  ;;  %v392_v42 = vld [vmem:[%s3411_s28 + $0x6a0] sm:$0xf]  ;;  %389 = vst [vmem:[%s3418_s29 + $0x1a0] sm:$0xf] %v388_v40 }
  0x5c   : > { %391 = vst [vmem:[%s3418_s29 + $0x1a4] sm:$0xf] %v390_v41  ;;  %393 = vst [vmem:[%s3418_s29 + $0x1a8] sm:$0xf] %v392_v42  ;;  %v394_v43 = vld [vmem:[%s3411_s28 + $0x6b0] sm:$0xf] }
  0x5d   : > { %v396_v44 = vld [vmem:[%s3411_s28 + $0x6c0] sm:$0xf]  ;;  %v398_v45 = vld [vmem:[%s3411_s28 + $0x6d0] sm:$0xf]  ;;  %395 = vst [vmem:[%s3418_s29 + $0x1ac] sm:$0xf] %v394_v43 }
  0x5e   : > { %397 = vst [vmem:[%s3418_s29 + $0x1b0] sm:$0xf] %v396_v44  ;;  %399 = vst [vmem:[%s3418_s29 + $0x1b4] sm:$0xf] %v398_v45  ;;  %v400_v46 = vld [vmem:[%s3411_s28 + $0x6e0] sm:$0xf] }
  0x5f   : > { %v402_v47 = vld [vmem:[%s3411_s28 + $0x6f0] sm:$0xf]  ;;  %v404_v48 = vld [vmem:[%s3411_s28 + $0x700] sm:$0xf]  ;;  %401 = vst [vmem:[%s3418_s29 + $0x1b8] sm:$0xf] %v400_v46 }
  0x60   : > { %403 = vst [vmem:[%s3418_s29 + $0x1bc] sm:$0xf] %v402_v47  ;;  %405 = vst [vmem:[%s3418_s29 + $0x1c0] sm:$0xf] %v404_v48  ;;  %v406_v49 = vld [vmem:[%s3411_s28 + $0x710] sm:$0xf] }
  0x61   : > { %v408_v50 = vld [vmem:[%s3411_s28 + $0x720] sm:$0xf]  ;;  %v410_v51 = vld [vmem:[%s3411_s28 + $0x730] sm:$0xf]  ;;  %407 = vst [vmem:[%s3418_s29 + $0x1c4] sm:$0xf] %v406_v49 }
  0x62   : > { %409 = vst [vmem:[%s3418_s29 + $0x1c8] sm:$0xf] %v408_v50  ;;  %411 = vst [vmem:[%s3418_s29 + $0x1cc] sm:$0xf] %v410_v51  ;;  %v412_v52 = vld [vmem:[%s3411_s28 + $0x740] sm:$0xf] }
  0x63   : > { %v414_v53 = vld [vmem:[%s3411_s28 + $0x750] sm:$0xf]  ;;  %v416_v54 = vld [vmem:[%s3411_s28 + $0x760] sm:$0xf]  ;;  %413 = vst [vmem:[%s3418_s29 + $0x1d0] sm:$0xf] %v412_v52 }
  0x64   : > { %415 = vst [vmem:[%s3418_s29 + $0x1d4] sm:$0xf] %v414_v53  ;;  %417 = vst [vmem:[%s3418_s29 + $0x1d8] sm:$0xf] %v416_v54  ;;  %v418_v55 = vld [vmem:[%s3411_s28 + $0x770] sm:$0xf] }
  0x65   : > { %v420_v56 = vld [vmem:[%s3411_s28 + $0x780] sm:$0xf]  ;;  %v422_v57 = vld [vmem:[%s3411_s28 + $0x790] sm:$0xf]  ;;  %419 = vst [vmem:[%s3418_s29 + $0x1dc] sm:$0xf] %v418_v55 }
  0x66   : > { %421 = vst [vmem:[%s3418_s29 + $0x1e0] sm:$0xf] %v420_v56  ;;  %423 = vst [vmem:[%s3418_s29 + $0x1e4] sm:$0xf] %v422_v57  ;;  %v424_v58 = vld [vmem:[%s3411_s28 + $0x7a0] sm:$0xf] }
  0x67   : > { %v426_v59 = vld [vmem:[%s3411_s28 + $0x7b0] sm:$0xf]  ;;  %v428_v60 = vld [vmem:[%s3411_s28 + $0x7c0] sm:$0xf]  ;;  %425 = vst [vmem:[%s3418_s29 + $0x1e8] sm:$0xf] %v424_v58 }
  0x68   : > { %427 = vst [vmem:[%s3418_s29 + $0x1ec] sm:$0xf] %v426_v59  ;;  %429 = vst [vmem:[%s3418_s29 + $0x1f0] sm:$0xf] %v428_v60  ;;  %v430_v61 = vld [vmem:[%s3411_s28 + $0x7d0] sm:$0xf] }
  0x69   : > { %v432_v62 = vld [vmem:[%s3411_s28 + $0x7e0] sm:$0xf]  ;;  %v434_v63 = vld [vmem:[%s3411_s28 + $0x7f0] sm:$0xf]  ;;  %431 = vst [vmem:[%s3418_s29 + $0x1f4] sm:$0xf] %v430_v61 }
  0x6a   : > { %433 = vst [vmem:[%s3418_s29 + $0x1f8] sm:$0xf] %v432_v62  ;;  %435 = vst [vmem:[%s3418_s29 + $0x1fc] sm:$0xf] %v434_v63  ;;  %v436_v0 = vld [vmem:[%s3411_s28 + $0x800] sm:$0xf] }
  0x6b   : > { %v438_v1 = vld [vmem:[%s3411_s28 + $0x810] sm:$0xf]  ;;  %v440_v2 = vld [vmem:[%s3411_s28 + $0x820] sm:$0xf]  ;;  %437 = vst [vmem:[%s3418_s29 + $0x200] sm:$0xf] %v436_v0 }
  0x6c   : > { %439 = vst [vmem:[%s3418_s29 + $0x204] sm:$0xf] %v438_v1  ;;  %441 = vst [vmem:[%s3418_s29 + $0x208] sm:$0xf] %v440_v2  ;;  %v442_v3 = vld [vmem:[%s3411_s28 + $0x830] sm:$0xf] }
  0x6d   : > { %v444_v4 = vld [vmem:[%s3411_s28 + $0x840] sm:$0xf]  ;;  %v446_v5 = vld [vmem:[%s3411_s28 + $0x850] sm:$0xf]  ;;  %443 = vst [vmem:[%s3418_s29 + $0x20c] sm:$0xf] %v442_v3 }
  0x6e   : > { %445 = vst [vmem:[%s3418_s29 + $0x210] sm:$0xf] %v444_v4  ;;  %447 = vst [vmem:[%s3418_s29 + $0x214] sm:$0xf] %v446_v5  ;;  %v448_v6 = vld [vmem:[%s3411_s28 + $0x860] sm:$0xf] }
  0x6f   : > { %v450_v7 = vld [vmem:[%s3411_s28 + $0x870] sm:$0xf]  ;;  %v452_v8 = vld [vmem:[%s3411_s28 + $0x880] sm:$0xf]  ;;  %449 = vst [vmem:[%s3418_s29 + $0x218] sm:$0xf] %v448_v6 }
  0x70   : > { %451 = vst [vmem:[%s3418_s29 + $0x21c] sm:$0xf] %v450_v7  ;;  %453 = vst [vmem:[%s3418_s29 + $0x220] sm:$0xf] %v452_v8  ;;  %v454_v9 = vld [vmem:[%s3411_s28 + $0x890] sm:$0xf] }
  0x71   : > { %v456_v10 = vld [vmem:[%s3411_s28 + $0x8a0] sm:$0xf]  ;;  %v458_v11 = vld [vmem:[%s3411_s28 + $0x8b0] sm:$0xf]  ;;  %455 = vst [vmem:[%s3418_s29 + $0x224] sm:$0xf] %v454_v9 }
  0x72   : > { %457 = vst [vmem:[%s3418_s29 + $0x228] sm:$0xf] %v456_v10  ;;  %459 = vst [vmem:[%s3418_s29 + $0x22c] sm:$0xf] %v458_v11  ;;  %v460_v12 = vld [vmem:[%s3411_s28 + $0x8c0] sm:$0xf] }
  0x73   : > { %v462_v13 = vld [vmem:[%s3411_s28 + $0x8d0] sm:$0xf]  ;;  %v464_v14 = vld [vmem:[%s3411_s28 + $0x8e0] sm:$0xf]  ;;  %461 = vst [vmem:[%s3418_s29 + $0x230] sm:$0xf] %v460_v12 }
  0x74   : > { %463 = vst [vmem:[%s3418_s29 + $0x234] sm:$0xf] %v462_v13  ;;  %465 = vst [vmem:[%s3418_s29 + $0x238] sm:$0xf] %v464_v14  ;;  %v466_v15 = vld [vmem:[%s3411_s28 + $0x8f0] sm:$0xf] }
  0x75   : > { %467 = vst [vmem:[%s3418_s29 + $0x23c] sm:$0xf] %v466_v15 }
  0x76 PF: > { %p2582_p8 = scmp.ge.s32.totalorder %s3341_s16, 1  ;;  %p783_p9 = scmp.lt.s32.totalorder %s3341_s16, 5 }
  0x78   : > { %p784_p10 = pnand %p2582_p8, %p783_p9 }
  0x79   : > { %s790_s30 = sand.u32 (!%p784_p10), 1, %s3325_s12   ;;  %v3129_v16 = vld [vmem:[%s4153_s0 + $0x4] ss:$36 sps:$4 sm:$0xff] (!%p784_p10)   ;;  %v3132_v17 = vld [vmem:[%s4153_s0 + $0xc] ss:$36 sps:$4 sm:$0xff] (!%p784_p10)   ;;  %p828_p11 = scmp.lt.s32.totalorder (!%p784_p10), %s3333_s14, 3 }
  0x7a   : > { %787 = sbr.rel (%p784_p10) target bundleno = 537 (0x219), region = 69  ;;  %1896 = vmatprep.mubr.bf16.mxu0 (!%p784_p10), %v3129_v16  ;;  %1993 = vmatprep.mubr.bf16.mxu1 (!%p784_p10), %v3132_v17  ;;  %v3127_v48 = vld [vmem:[%s4153_s0] ss:$36 sps:$4 sm:$0xff] (!%p784_p10)   ;;  %v3130_v50 = vld [vmem:[%s4153_s0 + $0x8] ss:$36 sps:$4 sm:$0xff] (!%p784_p10)   ;;  %s2583_s23 = sshll.u32 (!%p784_p10), %s790_s30, 7 }
  0x7b   : > { %s3054_s4 = smul.u32 (!%p784_p10), 576, %s790_s30  ;;  %v3137_v52 = vld [vmem:[%s4153_s0 + $0x4c] ss:$36 sps:$4 sm:$0xff] (!%p784_p10)   ;;  %v3139_v57 = vld [vmem:[%s4153_s0 + $0x54] ss:$36 sps:$4 sm:$0xff] (!%p784_p10)   ;;  %s4098_s12 = scalar_lea.vmem (!%p784_p10), [#allocation3], %s2583_s23 }
  0x7c   : > { %v3141_v58 = vld [vmem:[%s4153_s0 + $0x48] ss:$36 sps:$4 sm:$0xff] (!%p784_p10)   ;;  %v3142_v59 = vld [vmem:[%s4153_s0 + $0x50] ss:$36 sps:$4 sm:$0xff] (!%p784_p10)   ;;  %v3149_v1 = vld [vmem:[%s4153_s0 + $0x9c] ss:$36 sps:$4 sm:$0xff] (!%p784_p10)  }
  0x7d   : > { %s3714_s9 = scalar_lea.vmem (!%p784_p10), [#allocation2], %s3054_s4  ;;  %v3147_v0 = vld [vmem:[%s4153_s0 + $0x94] ss:$36 sps:$4 sm:$0xff] (!%p784_p10)   ;;  %v3157_v8 = vld [vmem:[%s4153_s0 + $0xdc] ss:$36 sps:$4 sm:$0xff] (!%p784_p10)  }
  0x7e   : > { %v3095_v18 = vld [vmem:[%s3714_s9 + $0x40] sm:$0xff] (!%p784_p10)   ;;  %v3099_v22 = vld [vmem:[%s3714_s9 + $0x48] sm:$0xff] (!%p784_p10)   ;;  %v3103_v26 = vld [vmem:[%s3714_s9 + $0x50] sm:$0xff] (!%p784_p10)  }
  0x7f   : > { %v3096_v19 = vld [vmem:[%s3714_s9 + $0xc0] sm:$0xff] (!%p784_p10)   ;;  %2733 = vmatprep.subr.bf16.mxu0 (!%p784_p10), %v3095_v18  ;;  %v3100_v23 = vld [vmem:[%s3714_s9 + $0xc8] sm:$0xff] (!%p784_p10)   ;;  %v3104_v27 = vld [vmem:[%s3714_s9 + $0xd0] sm:$0xff] (!%p784_p10)  }
  0x80   : > { %v3097_v20 = vld [vmem:[%s3714_s9] sm:$0xff] (!%p784_p10)   ;;  %2797 = vmatprep.subr.bf16.mxu1 (!%p784_p10), %v3096_v19  ;;  %v3101_v24 = vld [vmem:[%s3714_s9 + $0x8] sm:$0xff] (!%p784_p10)   ;;  %v3105_v28 = vld [vmem:[%s3714_s9 + $0x10] sm:$0xff] (!%p784_p10)  }
  0x81   : > { %v3098_v21 = vld [vmem:[%s3714_s9 + $0x80] sm:$0xff]   ;;  %2734 = vmatpush3.bf16.msra.mxu0 %v3097_v20  ;;  %v3102_v25 = vld [vmem:[%s3714_s9 + $0x88] sm:$0xff]   ;;  %v3106_v29 = vld [vmem:[%s3714_s9 + $0x90] sm:$0xff]   ;;  %s829_s11 = scalar_select %p828_p11, %s3333_s14, 3 }
  0x82   : > { %2798 = vmatpush3.bf16.msra.mxu1 %v3098_v21  ;;  %2735 = vmatprep.subr.bf16.mxu0 %v3099_v22  ;;  %v3107_v30 = vld [vmem:[%s3714_s9 + $0x58] sm:$0xff]   ;;  %v3111_v34 = vld [vmem:[%s3714_s9 + $0x60] sm:$0xff]   ;;  %v3115_v38 = vld [vmem:[%s3714_s9 + $0x68] sm:$0xff]   ;;  %s2730_s30 = sshll.u32 (%p3398_p6), %s3333_s14, 3 }
  0x83   : > { %2799 = vmatprep.subr.bf16.mxu1 %v3100_v23  ;;  %v3108_v31 = vld [vmem:[%s3714_s9 + $0xd8] sm:$0xff]   ;;  %v3112_v35 = vld [vmem:[%s3714_s9 + $0xe0] sm:$0xff]   ;;  %v3116_v39 = vld [vmem:[%s3714_s9 + $0xe8] sm:$0xff]   ;;  %s830_s20 = scalar_lea.vmem %s4155_s2, %s829_s11  ;;  %s2392_s26 = scalar_lea.vmem (%p3398_p6), %s4156_s3, %s2730_s30 }
  0x84   : > { %v3109_v32 = vld [vmem:[%s3714_s9 + $0x18] sm:$0xff]   ;;  %v3113_v36 = vld [vmem:[%s3714_s9 + $0x20] sm:$0xff]   ;;  %v3117_v40 = vld [vmem:[%s3714_s9 + $0x28] sm:$0xff]  }
  0x85   : > { %2736 = vmatpush3.bf16.msra.mxu0 %v3101_v24  ;;  %v3110_v33 = vld [vmem:[%s3714_s9 + $0x98] sm:$0xff]   ;;  %v3114_v37 = vld [vmem:[%s3714_s9 + $0xa0] sm:$0xff]   ;;  %v3118_v41 = vld [vmem:[%s3714_s9 + $0xa8] sm:$0xff]  }
  0x86   : > { %2800 = vmatpush3.bf16.msra.mxu1 %v3102_v25  ;;  %2737 = vmatprep.subr.bf16.mxu0 %v3103_v26  ;;  %v3119_v42 = vld [vmem:[%s3714_s9 + $0x70] sm:$0xff]   ;;  %v3123_v46 = vld [vmem:[%s3714_s9 + $0x78] sm:$0xff]   ;;  %v3133_v53 = vld [vmem:[%s3714_s9 + $0x140] sm:$0xff]  }
  0x87   : > { %2801 = vmatprep.subr.bf16.mxu1 %v3104_v27  ;;  %v3120_v43 = vld [vmem:[%s3714_s9 + $0xf0] sm:$0xff]   ;;  %v3124_v47 = vld [vmem:[%s3714_s9 + $0xf8] sm:$0xff]   ;;  %v3134_v54 = vld [vmem:[%s3714_s9 + $0x1c0] sm:$0xff]  }
  0x88   : > { %v3121_v44 = vld [vmem:[%s3714_s9 + $0x30] sm:$0xff]   ;;  %v3125_v49 = vld [vmem:[%s3714_s9 + $0x38] sm:$0xff]   ;;  %v3135_v55 = vld [vmem:[%s3714_s9 + $0x100] sm:$0xff]  }
  0x89   : > { %2738 = vmatpush3.bf16.msra.mxu0 %v3105_v28  ;;  %v3122_v45 = vld [vmem:[%s3714_s9 + $0xb0] sm:$0xff]   ;;  %v3126_v51 = vld [vmem:[%s3714_s9 + $0xb8] sm:$0xff]   ;;  %v3136_v56 = vld [vmem:[%s3714_s9 + $0x180] sm:$0xff]  }
  0x8a   : > { %2802 = vmatpush3.bf16.msra.mxu1 %v3106_v29  ;;  %2739 = vmatprep.subr.bf16.mxu0 %v3107_v30  ;;  %v3143_v60 = vld [vmem:[%s3714_s9 + $0x148] sm:$0xff]   ;;  %v3153_v2 = vld [vmem:[%s3714_s9 + $0x150] sm:$0xff]   ;;  %v3152_v5 = vld [vmem:[%s4153_s0 + $0x98] ss:$36 sps:$4 sm:$0xff]  }
  0x8b   : > { %2803 = vmatprep.subr.bf16.mxu1 %v3108_v31  ;;  %v3144_v61 = vld [vmem:[%s3714_s9 + $0x1c8] sm:$0xff]   ;;  %v3151_v3 = vld [vmem:[%s4153_s0 + $0x90] ss:$36 sps:$4 sm:$0xff]   ;;  %v3163_v10 = vld [vmem:[%s3714_s9 + $0x158] sm:$0xff]  }
  0x8c   : > { %v3145_v62 = vld [vmem:[%s3714_s9 + $0x108] sm:$0xff]   ;;  %v3154_v4 = vld [vmem:[%s3714_s9 + $0x1d0] sm:$0xff]   ;;  %v3164_v11 = vld [vmem:[%s3714_s9 + $0x1d8] sm:$0xff]  }
  0x8d   : > { %2740 = vmatpush3.bf16.msra.mxu0 %v3109_v32  ;;  %v3146_v63 = vld [vmem:[%s3714_s9 + $0x188] sm:$0xff]   ;;  %v3155_v6 = vld [vmem:[%s3714_s9 + $0x110] sm:$0xff]   ;;  %v3165_v12 = vld [vmem:[%s3714_s9 + $0x118] sm:$0xff]  }
  0x8e   : > { %2804 = vmatpush3.bf16.msra.mxu1 %v3110_v33  ;;  %2741 = vmatprep.subr.bf16.mxu0 %v3111_v34  ;;  %v3156_v7 = vld [vmem:[%s3714_s9 + $0x190] sm:$0xff]   ;;  %v3159_v9 = vld [vmem:[%s4153_s0 + $0xe4] ss:$36 sps:$4 sm:$0xff]   ;;  %v3166_v13 = vld [vmem:[%s3714_s9 + $0x198] sm:$0xff]  }
  0x8f   : > { %2805 = vmatprep.subr.bf16.mxu1 %v3112_v35  ;;  %v3161_v14 = vld [vmem:[%s4153_s0 + $0xd8] ss:$36 sps:$4 sm:$0xff]   ;;  %v3162_v15 = vld [vmem:[%s4153_s0 + $0xe0] ss:$36 sps:$4 sm:$0xff]   ;;  %v3169_v17 = vld [vmem:[%s4153_s0 + $0x12c] ss:$36 sps:$4 sm:$0xff]  }
  0x90   : > { %v3167_v16 = vld [vmem:[%s4153_s0 + $0x124] ss:$36 sps:$4 sm:$0xff]   ;;  %v3177_v24 = vld [vmem:[%s4153_s0 + $0x16c] ss:$36 sps:$4 sm:$0xff]   ;;  %v3179_v25 = vld [vmem:[%s4153_s0 + $0x174] ss:$36 sps:$4 sm:$0xff]  }
  0x91   : > { %2742 = vmatpush3.bf16.msra.mxu0 %v3113_v36  ;;  %v3173_v18 = vld [vmem:[%s3714_s9 + $0x160] sm:$0xff]   ;;  %v3172_v23 = vld [vmem:[%s4153_s0 + $0x128] ss:$36 sps:$4 sm:$0xff]   ;;  %v3182_v31 = vld [vmem:[%s4153_s0 + $0x170] ss:$36 sps:$4 sm:$0xff]  }
  0x92   : > { %2806 = vmatpush3.bf16.msra.mxu1 %v3114_v37  ;;  %2743 = vmatprep.subr.bf16.mxu0 %v3115_v38  ;;  %v3174_v19 = vld [vmem:[%s3714_s9 + $0x1e0] sm:$0xff]   ;;  %v3183_v26 = vld [vmem:[%s3714_s9 + $0x168] sm:$0xff]   ;;  %v3187_v32 = vld [vmem:[%s4153_s0 + $0x1b4] ss:$36 sps:$4 sm:$0xff]  }
  0x93   : > { %2807 = vmatprep.subr.bf16.mxu1 %v3116_v39  ;;  %v3175_v20 = vld [vmem:[%s3714_s9 + $0x120] sm:$0xff]   ;;  %v3184_v27 = vld [vmem:[%s3714_s9 + $0x1e8] sm:$0xff]   ;;  %v3193_v34 = vld [vmem:[%s3714_s9 + $0x170] sm:$0xff]  }
  0x94   : > { %v3176_v21 = vld [vmem:[%s3714_s9 + $0x1a0] sm:$0xff]   ;;  %v3185_v28 = vld [vmem:[%s3714_s9 + $0x128] sm:$0xff]   ;;  %v3194_v35 = vld [vmem:[%s3714_s9 + $0x1f0] sm:$0xff]  }
  0x95   : > { %2744 = vmatpush3.bf16.msra.mxu0 %v3117_v40  ;;  %v3171_v22 = vld [vmem:[%s4153_s0 + $0x120] ss:$36 sps:$4 sm:$0xff]   ;;  %v3186_v29 = vld [vmem:[%s3714_s9 + $0x1a8] sm:$0xff]   ;;  %v3195_v36 = vld [vmem:[%s3714_s9 + $0x130] sm:$0xff]  }
  0x96   : > { %2808 = vmatpush3.bf16.msra.mxu1 %v3118_v41  ;;  %2745 = vmatprep.subr.bf16.mxu0 %v3119_v42  ;;  %v3181_v30 = vld [vmem:[%s4153_s0 + $0x168] ss:$36 sps:$4 sm:$0xff]   ;;  %v3189_v33 = vld [vmem:[%s4153_s0 + $0x1bc] ss:$36 sps:$4 sm:$0xff]   ;;  %v3196_v37 = vld [vmem:[%s3714_s9 + $0x1b0] sm:$0xff]  }
  0x97   : > { %2809 = vmatprep.subr.bf16.mxu1 %v3120_v43  ;;  %v3191_v38 = vld [vmem:[%s4153_s0 + $0x1b0] ss:$36 sps:$4 sm:$0xff]   ;;  %v3192_v39 = vld [vmem:[%s4153_s0 + $0x1b8] ss:$36 sps:$4 sm:$0xff]   ;;  %v3199_v42 = vld [vmem:[%s4153_s0 + $0x204] ss:$36 sps:$4 sm:$0xff]  }
  0x98   : > { %v3197_v40 = vld [vmem:[%s4153_s0 + $0x1fc] ss:$36 sps:$4 sm:$0xff]  }
  0x99   : > { %2746 = vmatpush3.bf16.msra.mxu0 %v3121_v44  ;;  %v3203_v41 = vld [vmem:[%s3714_s9 + $0x178] sm:$0xff]  }
  0x9a   : > { %2810 = vmatpush3.bf16.msra.mxu1 %v3122_v45  ;;  %2747 = vmatprep.subr.bf16.mxu0 %v3123_v46  ;;  %v3204_v43 = vld [vmem:[%s3714_s9 + $0x1f8] sm:$0xff]   ;;  %v3213_v46 = vld [vmem:[%s3714_s9 + $0x200] sm:$0xff]  }
  0x9b   : > { %2811 = vmatprep.subr.bf16.mxu1 %v3124_v47  ;;  %v3205_v44 = vld [vmem:[%s3714_s9 + $0x138] sm:$0xff]  }
  0x9c   : > { %v3206_v45 = vld [vmem:[%s3714_s9 + $0x1b8] sm:$0xff]  }
  0x9d   : > { %2748 = vmatpush3.bf16.msra.mxu0 %v3125_v49  ;;  %v3201_v47 = vld [vmem:[%s4153_s0 + $0x1f8] ss:$36 sps:$4 sm:$0xff]  }
  0x9e   : > { %2812 = vmatpush3.bf16.msra.mxu1 %v3126_v51  ;;  %2861 = vmatprep.subr.bf16.mxu0 %v3133_v53  ;;  %v3209_v49 = vld [vmem:[%s4153_s0 + $0x14] ss:$36 sps:$4 sm:$0xff]   ;;  %v3214_v53 = vld [vmem:[%s4153_s0 + $0x5c] ss:$36 sps:$4 sm:$0xff]  }
  0x9f   : > { %2925 = vmatprep.subr.bf16.mxu1 %v3134_v54  ;;  %v3207_v51 = vld [vmem:[%s4153_s0 + $0x10] ss:$36 sps:$4 sm:$0xff]   ;;  %v3216_v54 = vld [vmem:[%s4153_s0 + $0x64] ss:$36 sps:$4 sm:$0xff]  }
  0xa0   : > { %1897 = vmatmul.mubr.bf16.vlgmr.msra.gmra.mrb[0].mxu0 %v3127_v48  ;;  %v3202_v48 = vld [vmem:[%s4153_s0 + $0x200] ss:$36 sps:$4 sm:$0xff]  }
  0xa1   : > { %1994 = vmatmul.mubr.bf16.vlgmr.msra.gmra.mrb[0].mxu1 %v3130_v50  ;;  %2862 = vmatpush3.bf16.msra.mxu0 %v3135_v55  ;;  %v3212_v50 = vld [vmem:[%s4153_s0 + $0x1c] ss:$36 sps:$4 sm:$0xff]   ;;  %v3220_v55 = vld [vmem:[%s3714_s9 + $0x208] sm:$0xff]  }
  0xa2   : > { %2926 = vmatpush3.bf16.msra.mxu1 %v3136_v56  ;;  %1904 = vmatprep.mubr.bf16.mxu0 %v3137_v52  ;;  %v3210_v52 = vld [vmem:[%s4153_s0 + $0x18] ss:$36 sps:$4 sm:$0xff]   ;;  %v3227_v56 = vld [vmem:[%s3714_s9 + $0x210] sm:$0xff]  }
  0xa3   : > { %2001 = vmatprep.mubr.bf16.mxu1 %v3139_v57  ;;  %2863 = vmatprep.subr.bf16.mxu0 %v3143_v60  ;;  %v3218_v57 = vld [vmem:[%s4153_s0 + $0x58] ss:$36 sps:$4 sm:$0xff]   ;;  %v3223_v60 = vld [vmem:[%s4153_s0 + $0xac] ss:$36 sps:$4 sm:$0xff]  }
  0xa4   : > { %2927 = vmatprep.subr.bf16.mxu1 %v3144_v61  ;;  %v3234_v61 = vld [vmem:[%s3714_s9 + $0x218] sm:$0xff]  }
  0xa5   : > { %2864 = vmatpush3.bf16.msra.mxu0 %v3145_v62  ;;  %v3225_v62 = vld [vmem:[%s4153_s0 + $0xa0] ss:$36 sps:$4 sm:$0xff]  }
  0xa6   : > { %2928 = vmatpush3.bf16.msra.mxu1 %v3146_v63  ;;  %2865 = vmatprep.subr.bf16.mxu0 %v3153_v2  ;;  %v3241_v63 = vld [vmem:[%s3714_s9 + $0x220] sm:$0xff]   ;;  %v3230_v2 = vld [vmem:[%s4153_s0 + $0xf4] ss:$36 sps:$4 sm:$0xff]  }
  0xa7   : > { %2929 = vmatprep.subr.bf16.mxu1 %v3154_v4  ;;  %v3255_v4 = vld [vmem:[%s3714_s9 + $0x230] sm:$0xff]  }
  0xa8   : > { %1905 = vmatmul.mubr.bf16.gmra.mrb[4].mxu0 %v3141_v58  ;;  %v3219_v58 = vld [vmem:[%s4153_s0 + $0x60] ss:$36 sps:$4 sm:$0xff]  }
  0xa9   : > { %2002 = vmatmul.mubr.bf16.gmra.mrb[4].mxu1 %v3142_v59  ;;  %1912 = vmatprep.mubr.bf16.mxu0 %v3147_v0  ;;  %v3221_v59 = vld [vmem:[%s4153_s0 + $0xa4] ss:$36 sps:$4 sm:$0xff]  }
  0xaa   : > { %2009 = vmatprep.mubr.bf16.mxu1 %v3149_v1  ;;  %2866 = vmatpush3.bf16.msra.mxu0 %v3155_v6  ;;  %v3226_v0 = vld [vmem:[%s4153_s0 + $0xa8] ss:$36 sps:$4 sm:$0xff]   ;;  %v3233_v6 = vld [vmem:[%s4153_s0 + $0xf0] ss:$36 sps:$4 sm:$0xff]  }
  0xab   : > { %2930 = vmatpush3.bf16.msra.mxu1 %v3156_v7  ;;  %2867 = vmatprep.subr.bf16.mxu0 %v3163_v10  ;;  %v3228_v1 = vld [vmem:[%s4153_s0 + $0xec] ss:$36 sps:$4 sm:$0xff]   ;;  %v3235_v7 = vld [vmem:[%s4153_s0 + $0x134] ss:$36 sps:$4 sm:$0xff]  }
  0xac   : > { %2931 = vmatprep.subr.bf16.mxu1 %v3164_v11  ;;  %v3239_v10 = vld [vmem:[%s4153_s0 + $0x130] ss:$36 sps:$4 sm:$0xff]   ;;  %v3240_v11 = vld [vmem:[%s4153_s0 + $0x138] ss:$36 sps:$4 sm:$0xff]  }
  0xae   : > { %2868 = vmatpush3.bf16.msra.mxu0 %v3165_v12  ;;  %v3242_v12 = vld [vmem:[%s4153_s0 + $0x17c] ss:$36 sps:$4 sm:$0xff]  }
  0xaf   : > { %2932 = vmatpush3.bf16.msra.mxu1 %v3166_v13  ;;  %2869 = vmatprep.subr.bf16.mxu0 %v3173_v18  ;;  %v3244_v13 = vld [vmem:[%s4153_s0 + $0x184] ss:$36 sps:$4 sm:$0xff]  }
  0xb0   : > { %1913 = vmatmul.mubr.bf16.gmra.mrb[8].mxu0 %v3151_v3  ;;  %2933 = vmatprep.subr.bf16.mxu1 %v3174_v19  ;;  %v3248_v3 = vld [vmem:[%s3714_s9 + $0x228] sm:$0xff]   ;;  %v3253_v18 = vld [vmem:[%s4153_s0 + $0x1c0] ss:$36 sps:$4 sm:$0xff]  }
  0xb1   : > { %2010 = vmatmul.mubr.bf16.gmra.mrb[8].mxu1 %v3152_v5  ;;  %1920 = vmatprep.mubr.bf16.mxu0 %v3157_v8  ;;  %v3232_v5 = vld [vmem:[%s4153_s0 + $0xe8] ss:$36 sps:$4 sm:$0xff]   ;;  %v3237_v8 = vld [vmem:[%s4153_s0 + $0x13c] ss:$36 sps:$4 sm:$0xff]  }
  0xb2   : > { %2017 = vmatprep.mubr.bf16.mxu1 %v3159_v9  ;;  %2870 = vmatpush3.bf16.msra.mxu0 %v3175_v20  ;;  %v3262_v9 = vld [vmem:[%s3714_s9 + $0x238] sm:$0xff]   ;;  %v3254_v19 = vld [vmem:[%s4153_s0 + $0x1c8] ss:$36 sps:$4 sm:$0xff]  }
  0xb3   : > { %2934 = vmatpush3.bf16.msra.mxu1 %v3176_v21  ;;  %2871 = vmatprep.subr.bf16.mxu0 %v3183_v26  ;;  %v3256_v20 = vld [vmem:[%s4153_s0 + $0x20c] ss:$36 sps:$4 sm:$0xff]   ;;  %v3258_v21 = vld [vmem:[%s4153_s0 + $0x214] ss:$36 sps:$4 sm:$0xff]  }
  0xb4   : > { %2935 = vmatprep.subr.bf16.mxu1 %v3184_v27  ;;  %v3265_v26 = vld [vmem:[%s4153_s0 + $0x68] ss:$36 sps:$4 sm:$0xff]  }
  0xb5   : > { %v3266_v27 = vld [vmem:[%s4153_s0 + $0x188] ss:$36 sps:$4 sm:$0xff]  }
  0xb6   : > { %2872 = vmatpush3.bf16.msra.mxu0 %v3185_v28  ;;  %v3267_v28 = vld [vmem:[%s4153_s0 + $0xb0] ss:$36 sps:$4 sm:$0xff]  }
  0xb7   : > { %2936 = vmatpush3.bf16.msra.mxu1 %v3186_v29  ;;  %2873 = vmatprep.subr.bf16.mxu0 %v3193_v34  ;;  %v3268_v29 = vld [vmem:[%s4153_s0 + $0x1d0] ss:$36 sps:$4 sm:$0xff]   ;;  %v4003_v34 = vld [vmem:[%s830_s20] ss:$0 sm:$0xff] }
  0xb8   : > { %1921 = vmatmul.mubr.bf16.gmra.mrb[12].mxu0 %v3161_v14  ;;  %2937 = vmatprep.subr.bf16.mxu1 %v3194_v35  ;;  %v3246_v14 = vld [vmem:[%s4153_s0 + $0x178] ss:$36 sps:$4 sm:$0xff]  }
  0xb9   : > { %2018 = vmatmul.mubr.bf16.gmra.mrb[12].mxu1 %v3162_v15  ;;  %1928 = vmatprep.mubr.bf16.mxu0 %v3167_v16  ;;  %v3247_v15 = vld [vmem:[%s4153_s0 + $0x180] ss:$36 sps:$4 sm:$0xff]  }
  0xba   : > { %2025 = vmatprep.mubr.bf16.mxu1 %v3169_v17  ;;  %2874 = vmatpush3.bf16.msra.mxu0 %v3195_v36  ;;  %v3249_v16 = vld [vmem:[%s4153_s0 + $0x1c4] ss:$36 sps:$4 sm:$0xff]   ;;  %v3251_v17 = vld [vmem:[%s4153_s0 + $0x1cc] ss:$36 sps:$4 sm:$0xff]  }
  0xbb   : > { %2938 = vmatpush3.bf16.msra.mxu1 %v3196_v37  ;;  %2875 = vmatprep.subr.bf16.mxu0 %v3203_v41 }
  0xbc   : > { %2939 = vmatprep.subr.bf16.mxu1 %v3204_v43 }
  0xbe   : > { %2876 = vmatpush3.bf16.msra.mxu0 %v3205_v44 }
  0xbf   : > { %2940 = vmatpush3.bf16.msra.mxu1 %v3206_v45  ;;  %3005 = vmatprep.subr.bf16.mxu0 %v3213_v46 }
  0xc0   : > { %1929 = vmatmul.mubr.bf16.gmra.mrb[16].mxu0 %v3171_v22  ;;  %3037 = vmatprep.subr.bf16.mxu1 %v3213_v46  ;;  %v3260_v22 = vld [vmem:[%s4153_s0 + $0x208] ss:$36 sps:$4 sm:$0xff]  }
  0xc1   : > { %2026 = vmatmul.mubr.bf16.gmra.mrb[16].mxu1 %v3172_v23  ;;  %1936 = vmatprep.mubr.bf16.mxu0 %v3177_v24  ;;  %v3261_v23 = vld [vmem:[%s4153_s0 + $0x210] ss:$36 sps:$4 sm:$0xff]   ;;  %v3263_v24 = vld [vmem:[%s4153_s0 + $0x20] ss:$36 sps:$4 sm:$0xff]  }
  0xc2   : > { %2033 = vmatprep.mubr.bf16.mxu1 %v3179_v25  ;;  %v3264_v25 = vld [vmem:[%s4153_s0 + $0x140] ss:$36 sps:$4 sm:$0xff]  }
  0xc8   : > { %1937 = vmatmul.mubr.bf16.gmra.mrb[20].mxu0 %v3181_v30  ;;  %v3269_v30 = vld [vmem:[%s4153_s0 + $0xf8] ss:$36 sps:$4 sm:$0xff]  }
  0xc9   : > { %2034 = vmatmul.mubr.bf16.gmra.mrb[20].mxu1 %v3182_v31  ;;  %1944 = vmatprep.mubr.bf16.mxu0 %v3187_v32  ;;  %v3270_v31 = vld [vmem:[%s4153_s0 + $0x218] ss:$36 sps:$4 sm:$0xff]  }
  0xca   : > { %2041 = vmatprep.mubr.bf16.mxu1 %v3189_v33 }
  0xd0   : > { %1945 = vmatmul.mubr.bf16.gmra.mrb[24].mxu0 %v3191_v38 }
  0xd1   : > { %2042 = vmatmul.mubr.bf16.gmra.mrb[24].mxu1 %v3192_v39  ;;  %1952 = vmatprep.mubr.bf16.mxu0 %v3197_v40 }
  0xd2   : > { %2049 = vmatprep.mubr.bf16.mxu1 %v3199_v42 }
  0xd8   : > { %1953 = vmatmul.mubr.bf16.gmra.mrb[28].mxu0 %v3201_v47 }
  0xd9   : > { %2050 = vmatmul.mubr.bf16.gmra.mrb[28].mxu1 %v3202_v48  ;;  %2090 = vmatprep.mubr.bf16.mxu0 %v3209_v49 }
  0xda   : > { %2187 = vmatprep.mubr.bf16.mxu1 %v3212_v50 }
  0xe0   : > { %2091 = vmatmul.mubr.bf16.vlgmr.msra.gmra.mrb[32].mxu0 %v3207_v51 }
  0xe1   : > { %2188 = vmatmul.mubr.bf16.vlgmr.msra.gmra.mrb[32].mxu1 %v3210_v52  ;;  %3006 = vmatpush3.bf16.msra.mxu0 %v3213_v46 }
  0xe2   : > { %3045 = vmatpush3.bf16.msra.mxu1 %v3213_v46  ;;  %2098 = vmatprep.mubr.bf16.mxu0 %v3214_v53 }
  0xe3   : > { %2195 = vmatprep.mubr.bf16.mxu1 %v3216_v54  ;;  %3007 = vmatprep.subr.bf16.mxu0 %v3220_v55 }
  0xe4   : > { %3038 = vmatprep.subr.bf16.mxu1 %v3220_v55 }
  0xe5   : > { %3008 = vmatpush3.bf16.msra.mxu0 %v3220_v55 }
  0xe6   : > { %3046 = vmatpush3.bf16.msra.mxu1 %v3220_v55  ;;  %3009 = vmatprep.subr.bf16.mxu0 %v3227_v56 }
  0xe7   : > { %3039 = vmatprep.subr.bf16.mxu1 %v3227_v56 }
  0xe8   : > { %2099 = vmatmul.mubr.bf16.gmra.mrb[36].mxu0 %v3218_v57 }
  0xe9   : > { %2196 = vmatmul.mubr.bf16.gmra.mrb[36].mxu1 %v3219_v58  ;;  %2106 = vmatprep.mubr.bf16.mxu0 %v3221_v59 }
  0xea   : > { %2203 = vmatprep.mubr.bf16.mxu1 %v3223_v60  ;;  %3010 = vmatpush3.bf16.msra.mxu0 %v3227_v56 }
  0xeb   : > { %3047 = vmatpush3.bf16.msra.mxu1 %v3227_v56  ;;  %3011 = vmatprep.subr.bf16.mxu0 %v3234_v61 }
  0xec   : > { %3040 = vmatprep.subr.bf16.mxu1 %v3234_v61 }
  0xee   : > { %3012 = vmatpush3.bf16.msra.mxu0 %v3234_v61 }
  0xef   : > { %3048 = vmatpush3.bf16.msra.mxu1 %v3234_v61  ;;  %3013 = vmatprep.subr.bf16.mxu0 %v3241_v63 }
  0xf0   : > { %2107 = vmatmul.mubr.bf16.gmra.mrb[40].mxu0 %v3225_v62  ;;  %3041 = vmatprep.subr.bf16.mxu1 %v3241_v63 }
  0xf1   : > { %2204 = vmatmul.mubr.bf16.gmra.mrb[40].mxu1 %v3226_v0  ;;  %2114 = vmatprep.mubr.bf16.mxu0 %v3228_v1 }
  0xf2   : > { %2211 = vmatprep.mubr.bf16.mxu1 %v3230_v2  ;;  %3014 = vmatpush3.bf16.msra.mxu0 %v3241_v63 }
  0xf3   : > { %3049 = vmatpush3.bf16.msra.mxu1 %v3241_v63  ;;  %3015 = vmatprep.subr.bf16.mxu0 %v3248_v3 }
  0xf4   : > { %3042 = vmatprep.subr.bf16.mxu1 %v3248_v3 }
  0xf6   : > { %3016 = vmatpush3.bf16.msra.mxu0 %v3248_v3 }
  0xf7   : > { %3050 = vmatpush3.bf16.msra.mxu1 %v3248_v3  ;;  %3017 = vmatprep.subr.bf16.mxu0 %v3255_v4 }
  0xf8   : > { %2115 = vmatmul.mubr.bf16.gmra.mrb[44].mxu0 %v3232_v5  ;;  %3043 = vmatprep.subr.bf16.mxu1 %v3255_v4 }
  0xf9   : > { %2212 = vmatmul.mubr.bf16.gmra.mrb[44].mxu1 %v3233_v6  ;;  %2122 = vmatprep.mubr.bf16.mxu0 %v3235_v7 }
  0xfa   : > { %2219 = vmatprep.mubr.bf16.mxu1 %v3237_v8  ;;  %3018 = vmatpush3.bf16.msra.mxu0 %v3255_v4 }
  0xfb   : > { %3051 = vmatpush3.bf16.msra.mxu1 %v3255_v4  ;;  %3019 = vmatprep.subr.bf16.mxu0 %v3262_v9 }
  0xfc   : > { %3044 = vmatprep.subr.bf16.mxu1 %v3262_v9 }
  0xfe   : > { %3020 = vmatpush3.bf16.msra.mxu0 %v3262_v9 }
  0xff   : > { %3052 = vmatpush3.bf16.msra.mxu1 %v3262_v9 }
 0x100   : > { %2123 = vmatmul.mubr.bf16.gmra.mrb[48].mxu0 %v3239_v10 }
 0x101   : > { %2220 = vmatmul.mubr.bf16.gmra.mrb[48].mxu1 %v3240_v11  ;;  %2130 = vmatprep.mubr.bf16.mxu0 %v3242_v12 }
 0x102   : > { %2227 = vmatprep.mubr.bf16.mxu1 %v3244_v13 }
 0x108   : > { %2131 = vmatmul.mubr.bf16.gmra.mrb[52].mxu0 %v3246_v14 }
 0x109   : > { %2228 = vmatmul.mubr.bf16.gmra.mrb[52].mxu1 %v3247_v15  ;;  %2138 = vmatprep.mubr.bf16.mxu0 %v3249_v16 }
 0x10a   : > { %2235 = vmatprep.mubr.bf16.mxu1 %v3251_v17 }
 0x110   : > { %2139 = vmatmul.mubr.bf16.gmra.mrb[56].mxu0 %v3253_v18 }
 0x111   : > { %2236 = vmatmul.mubr.bf16.gmra.mrb[56].mxu1 %v3254_v19  ;;  %2146 = vmatprep.mubr.bf16.mxu0 %v3256_v20 }
 0x112   : > { %2243 = vmatprep.mubr.bf16.mxu1 %v3258_v21 }
 0x118   : > { %2147 = vmatmul.mubr.bf16.gmra.mrb[60].mxu0 %v3260_v22 }
 0x119   : > { %2244 = vmatmul.mubr.bf16.gmra.mrb[60].mxu1 %v3261_v23  ;;  %3021 = vmatprep.mubr.bf16.mxu0 %v3263_v24 }
 0x11a   : > { %3029 = vmatprep.mubr.bf16.mxu1 %v3264_v25 }
 0x120   : > { %3022 = vmatmul.mubr.bf16.vlgmr.msra.gmra.mrb[64].mxu0 %v3265_v26 }
 0x121   : > { %3030 = vmatmul.mubr.bf16.vlgmr.msra.gmra.mrb[64].mxu1 %v3266_v27  ;;  %3025 = vmatprep.mubr.bf16.mxu0 %v3267_v28 }
 0x122   : > { %3033 = vmatprep.mubr.bf16.mxu1 %v3268_v29 }
 0x128   : > { %3026 = vmatmul.mubr.bf16.gmra.mrb[68].mxu0 %v3269_v30 }
 0x129   : > { %3034 = vmatmul.mubr.bf16.gmra.mrb[68].mxu1 %v3270_v31 }
 0x173   : > { %v2749_v32 = vpop.f32.mrb[0].mxu0 }
 0x174   : > { %v2813_v33 = vpop.f32.mrb[0].mxu1  ;;  %v2750_v35 = vpop.f32.mrb[1].mxu0 }
 0x175   : > { %v2751_v36 = vadd.f32 %v2750_v35, %v2749_v32  ;;  %v2814_v37 = vpop.f32.mrb[1].mxu1  ;;  %v2752_v38 = vpop.f32.mrb[2].mxu0 }
 0x176   : > { %v2815_v39 = vadd.f32 %v2814_v37, %v2813_v33  ;;  %v2816_v40 = vpop.f32.mrb[2].mxu1  ;;  %v2753_v41 = vpop.f32.mrb[3].mxu0 }
 0x177   : > { %v1899_v42 = vadd.f32 %v2751_v36, %v4003_v34  ;;  %v2754_v43 = vadd.f32 %v2753_v41, %v2752_v38  ;;  %v2817_v44 = vpop.f32.mrb[3].mxu1 }
 0x178   : > { %v2818_v45 = vadd.f32 %v2817_v44, %v2816_v40 }
 0x179   : > { %v4006_v46 = vadd.f32 %v2815_v39, %v1899_v42  ;;  %v1902_v47 = vadd.f32 %v2754_v43, %v4003_v34 }
 0x17b   : > { %v4009_v48 = vadd.f32 %v2818_v45, %v1902_v47  ;;  %v2755_v49 = vpop.f32.mrb[4].mxu0 }
 0x17c   : > { %v2819_v50 = vpop.f32.mrb[4].mxu1  ;;  %v2756_v51 = vpop.f32.mrb[5].mxu0 }
 0x17d   : > { %v2757_v52 = vadd.f32 %v2756_v51, %v2755_v49  ;;  %v2820_v53 = vpop.f32.mrb[5].mxu1  ;;  %v2758_v54 = vpop.f32.mrb[6].mxu0 }
 0x17e   : > { %v2821_v55 = vadd.f32 %v2820_v53, %v2819_v50  ;;  %v2822_v56 = vpop.f32.mrb[6].mxu1  ;;  %v2759_v57 = vpop.f32.mrb[7].mxu0 }
 0x17f   : > { %v1907_v58 = vadd.f32 %v2757_v52, %v4003_v34  ;;  %v2760_v59 = vadd.f32 %v2759_v57, %v2758_v54  ;;  %v2823_v60 = vpop.f32.mrb[7].mxu1 }
 0x180   : > { %v2824_v61 = vadd.f32 %v2823_v60, %v2822_v56 }
 0x181   : > { %v4012_v62 = vadd.f32 %v2821_v55, %v1907_v58  ;;  %v1910_v63 = vadd.f32 %v2760_v59, %v4003_v34 }
 0x183   : > { %v4015_v0 = vadd.f32 %v2824_v61, %v1910_v63  ;;  %v2761_v1 = vpop.f32.mrb[8].mxu0 }
 0x184   : > { %v2825_v2 = vpop.f32.mrb[8].mxu1  ;;  %v2762_v3 = vpop.f32.mrb[9].mxu0 }
 0x185   : > { %v2763_v4 = vadd.f32 %v2762_v3, %v2761_v1  ;;  %v2826_v5 = vpop.f32.mrb[9].mxu1  ;;  %v2764_v6 = vpop.f32.mrb[10].mxu0 }
 0x186   : > { %v2827_v7 = vadd.f32 %v2826_v5, %v2825_v2  ;;  %v2828_v8 = vpop.f32.mrb[10].mxu1  ;;  %v2765_v9 = vpop.f32.mrb[11].mxu0 }
 0x187   : > { %v1915_v10 = vadd.f32 %v2763_v4, %v4003_v34  ;;  %v2766_v11 = vadd.f32 %v2765_v9, %v2764_v6  ;;  %v2829_v12 = vpop.f32.mrb[11].mxu1 }
 0x188   : > { %v2830_v13 = vadd.f32 %v2829_v12, %v2828_v8 }
 0x189   : > { %v4018_v14 = vadd.f32 %v2827_v7, %v1915_v10  ;;  %v1918_v15 = vadd.f32 %v2766_v11, %v4003_v34 }
 0x18b   : > { %v4021_v16 = vadd.f32 %v2830_v13, %v1918_v15  ;;  %v2767_v17 = vpop.f32.mrb[12].mxu0 }
 0x18c   : > { %v2831_v18 = vpop.f32.mrb[12].mxu1  ;;  %v2768_v19 = vpop.f32.mrb[13].mxu0 }
 0x18d   : > { %v2769_v20 = vadd.f32 %v2768_v19, %v2767_v17  ;;  %v2832_v21 = vpop.f32.mrb[13].mxu1  ;;  %v2770_v22 = vpop.f32.mrb[14].mxu0 }
 0x18e   : > { %v2833_v23 = vadd.f32 %v2832_v21, %v2831_v18  ;;  %v2834_v24 = vpop.f32.mrb[14].mxu1  ;;  %v2771_v25 = vpop.f32.mrb[15].mxu0 }
 0x18f   : > { %v1923_v26 = vadd.f32 %v2769_v20, %v4003_v34  ;;  %v2772_v27 = vadd.f32 %v2771_v25, %v2770_v22  ;;  %v2835_v28 = vpop.f32.mrb[15].mxu1 }
 0x190   : > { %v2836_v29 = vadd.f32 %v2835_v28, %v2834_v24 }
 0x191   : > { %v4024_v30 = vadd.f32 %v2833_v23, %v1923_v26  ;;  %v1926_v31 = vadd.f32 %v2772_v27, %v4003_v34 }
 0x193   : > { %v4027_v32 = vadd.f32 %v2836_v29, %v1926_v31  ;;  %v2773_v33 = vpop.f32.mrb[16].mxu0 }
 0x194   : > { %v2837_v35 = vpop.f32.mrb[16].mxu1  ;;  %v2774_v36 = vpop.f32.mrb[17].mxu0 }
 0x195   : > { %v2775_v37 = vadd.f32 %v2774_v36, %v2773_v33  ;;  %v2838_v38 = vpop.f32.mrb[17].mxu1  ;;  %v2776_v39 = vpop.f32.mrb[18].mxu0 }
 0x196   : > { %v2839_v40 = vadd.f32 %v2838_v38, %v2837_v35  ;;  %v2840_v41 = vpop.f32.mrb[18].mxu1  ;;  %v2777_v42 = vpop.f32.mrb[19].mxu0 }
 0x197   : > { %v1931_v43 = vadd.f32 %v2775_v37, %v4003_v34  ;;  %v2778_v44 = vadd.f32 %v2777_v42, %v2776_v39  ;;  %v2841_v45 = vpop.f32.mrb[19].mxu1 }
 0x198   : > { %v2842_v47 = vadd.f32 %v2841_v45, %v2840_v41 }
 0x199   : > { %v4030_v49 = vadd.f32 %v2839_v40, %v1931_v43  ;;  %v1934_v50 = vadd.f32 %v2778_v44, %v4003_v34 }
 0x19b   : > { %v4033_v51 = vadd.f32 %v2842_v47, %v1934_v50  ;;  %v2779_v52 = vpop.f32.mrb[20].mxu0 }
 0x19c   : > { %v2843_v53 = vpop.f32.mrb[20].mxu1  ;;  %v2780_v54 = vpop.f32.mrb[21].mxu0 }
 0x19d   : > { %v2781_v55 = vadd.f32 %v2780_v54, %v2779_v52  ;;  %v2844_v56 = vpop.f32.mrb[21].mxu1  ;;  %v2782_v57 = vpop.f32.mrb[22].mxu0 }
 0x19e   : > { %v2845_v58 = vadd.f32 %v2844_v56, %v2843_v53  ;;  %v2846_v59 = vpop.f32.mrb[22].mxu1  ;;  %v2783_v60 = vpop.f32.mrb[23].mxu0 }
 0x19f   : > { %v1939_v61 = vadd.f32 %v2781_v55, %v4003_v34  ;;  %v2784_v63 = vadd.f32 %v2783_v60, %v2782_v57  ;;  %v2847_v1 = vpop.f32.mrb[23].mxu1 }
 0x1a0   : > { %v2848_v2 = vadd.f32 %v2847_v1, %v2846_v59 }
 0x1a1   : > { %v4036_v3 = vadd.f32 %v2845_v58, %v1939_v61  ;;  %v1942_v4 = vadd.f32 %v2784_v63, %v4003_v34 }
 0x1a3   : > { %v4039_v5 = vadd.f32 %v2848_v2, %v1942_v4  ;;  %v2785_v6 = vpop.f32.mrb[24].mxu0 }
 0x1a4   : > { %v2849_v7 = vpop.f32.mrb[24].mxu1  ;;  %v2786_v8 = vpop.f32.mrb[25].mxu0 }
 0x1a5   : > { %v2787_v9 = vadd.f32 %v2786_v8, %v2785_v6  ;;  %v2850_v10 = vpop.f32.mrb[25].mxu1  ;;  %v2788_v11 = vpop.f32.mrb[26].mxu0 }
 0x1a6   : > { %v2851_v12 = vadd.f32 %v2850_v10, %v2849_v7  ;;  %v2852_v13 = vpop.f32.mrb[26].mxu1  ;;  %v2789_v15 = vpop.f32.mrb[27].mxu0 }
 0x1a7   : > { %v1947_v17 = vadd.f32 %v2787_v9, %v4003_v34  ;;  %v2790_v18 = vadd.f32 %v2789_v15, %v2788_v11  ;;  %v2853_v19 = vpop.f32.mrb[27].mxu1 }
 0x1a8   : > { %v2854_v20 = vadd.f32 %v2853_v19, %v2852_v13 }
 0x1a9   : > { %v4042_v21 = vadd.f32 %v2851_v12, %v1947_v17  ;;  %v1950_v22 = vadd.f32 %v2790_v18, %v4003_v34 }
 0x1ab   : > { %v4045_v23 = vadd.f32 %v2854_v20, %v1950_v22  ;;  %v2791_v24 = vpop.f32.mrb[28].mxu0 }
 0x1ac   : > { %v2855_v25 = vpop.f32.mrb[28].mxu1  ;;  %v2792_v26 = vpop.f32.mrb[29].mxu0 }
 0x1ad   : > { %v2793_v27 = vadd.f32 %v2792_v26, %v2791_v24  ;;  %v2856_v28 = vpop.f32.mrb[29].mxu1  ;;  %v2794_v29 = vpop.f32.mrb[30].mxu0 }
 0x1ae   : > { %v2857_v31 = vadd.f32 %v2856_v28, %v2855_v25  ;;  %v2858_v33 = vpop.f32.mrb[30].mxu1  ;;  %v2795_v35 = vpop.f32.mrb[31].mxu0 }
 0x1af   : > { %v1955_v36 = vadd.f32 %v2793_v27, %v4003_v34  ;;  %v2796_v37 = vadd.f32 %v2795_v35, %v2794_v29  ;;  %v2859_v38 = vpop.f32.mrb[31].mxu1 }
 0x1b0   : > { %v2860_v39 = vadd.f32 %v2859_v38, %v2858_v33 }
 0x1b1   : > { %v4048_v40 = vadd.f32 %v2857_v31, %v1955_v36  ;;  %v1958_v41 = vadd.f32 %v2796_v37, %v4003_v34 }
 0x1b3   : > { %v4051_v42 = vadd.f32 %v2860_v39, %v1958_v41  ;;  %v2877_v43 = vpop.f32.mrb[32].mxu0 }
 0x1b4   : > { %v2941_v44 = vpop.f32.mrb[32].mxu1  ;;  %v2878_v45 = vpop.f32.mrb[33].mxu0 }
 0x1b5   : > { %v2879_v47 = vadd.f32 %v2878_v45, %v2877_v43  ;;  %v2942_v50 = vpop.f32.mrb[33].mxu1  ;;  %v2880_v52 = vpop.f32.mrb[34].mxu0 }
 0x1b6   : > { %v2943_v53 = vadd.f32 %v2942_v50, %v2941_v44  ;;  %v2944_v54 = vpop.f32.mrb[34].mxu1  ;;  %v2881_v55 = vpop.f32.mrb[35].mxu0 }
 0x1b7   : > { %v2093_v56 = vadd.f32 %v2879_v47, %v4006_v46  ;;  %v2882_v57 = vadd.f32 %v2881_v55, %v2880_v52  ;;  %v2945_v58 = vpop.f32.mrb[35].mxu1 }
 0x1b8   : > { %v2946_v59 = vadd.f32 %v2945_v58, %v2944_v54 }
 0x1b9   : > { %v2096_v60 = vadd.f32 %v2882_v57, %v4009_v48  ;;  %v4055_v61 = vadd.f32 %v2943_v53, %v2093_v56 }
 0x1bb   : > { %v2883_v34 = vpop.f32.mrb[36].mxu0  ;;  %v4057_v63 = vadd.f32 %v2946_v59, %v2096_v60 }
 0x1bc   : > { %v2947_v1 = vpop.f32.mrb[36].mxu1  ;;  %v2884_v2 = vpop.f32.mrb[37].mxu0 }
 0x1bd   : > { %v2885_v4 = vadd.f32 %v2884_v2, %v2883_v34  ;;  %v2948_v6 = vpop.f32.mrb[37].mxu1  ;;  %v2886_v7 = vpop.f32.mrb[38].mxu0 }
 0x1be   : > { %v2949_v8 = vadd.f32 %v2948_v6, %v2947_v1  ;;  %v2950_v9 = vpop.f32.mrb[38].mxu1  ;;  %v2887_v10 = vpop.f32.mrb[39].mxu0 }
 0x1bf   : > { %v2101_v46 = vadd.f32 %v2885_v4, %v4012_v62  ;;  %v2888_v11 = vadd.f32 %v2887_v10, %v2886_v7  ;;  %v2951_v12 = vpop.f32.mrb[39].mxu1 }
 0x1c0   : > { %v2952_v13 = vadd.f32 %v2951_v12, %v2950_v9 }
 0x1c1   : > { %v2104_v48 = vadd.f32 %v2888_v11, %v4015_v0  ;;  %v4061_v15 = vadd.f32 %v2949_v8, %v2101_v46 }
 0x1c3   : > { %v2889_v17 = vpop.f32.mrb[40].mxu0  ;;  %v4063_v18 = vadd.f32 %v2952_v13, %v2104_v48 }
 0x1c4   : > { %v2953_v19 = vpop.f32.mrb[40].mxu1  ;;  %v2890_v20 = vpop.f32.mrb[41].mxu0 }
 0x1c5   : > { %v2891_v22 = vadd.f32 %v2890_v20, %v2889_v17  ;;  %v2954_v24 = vpop.f32.mrb[41].mxu1  ;;  %v2892_v25 = vpop.f32.mrb[42].mxu0 }
 0x1c6   : > { %v2955_v26 = vadd.f32 %v2954_v24, %v2953_v19  ;;  %v2956_v27 = vpop.f32.mrb[42].mxu1  ;;  %v2893_v28 = vpop.f32.mrb[43].mxu0 }
 0x1c7   : > { %v2109_v62 = vadd.f32 %v2891_v22, %v4018_v14  ;;  %v2894_v29 = vadd.f32 %v2893_v28, %v2892_v25  ;;  %v2957_v31 = vpop.f32.mrb[43].mxu1 }
 0x1c8   : > { %v2958_v33 = vadd.f32 %v2957_v31, %v2956_v27 }
 0x1c9   : > { %v2112_v0 = vadd.f32 %v2894_v29, %v4021_v16  ;;  %v4067_v35 = vadd.f32 %v2955_v26, %v2109_v62 }
 0x1cb   : > { %v2895_v36 = vpop.f32.mrb[44].mxu0  ;;  %v4069_v37 = vadd.f32 %v2958_v33, %v2112_v0 }
 0x1cc   : > { %v2959_v38 = vpop.f32.mrb[44].mxu1  ;;  %v2896_v39 = vpop.f32.mrb[45].mxu0 }
 0x1cd   : > { %v2897_v41 = vadd.f32 %v2896_v39, %v2895_v36  ;;  %v2960_v43 = vpop.f32.mrb[45].mxu1  ;;  %v2898_v44 = vpop.f32.mrb[46].mxu0 }
 0x1ce   : > { %v2961_v45 = vadd.f32 %v2960_v43, %v2959_v38  ;;  %v2962_v47 = vpop.f32.mrb[46].mxu1  ;;  %v2899_v50 = vpop.f32.mrb[47].mxu0 }
 0x1cf   : > { %v2117_v14 = vadd.f32 %v2897_v41, %v4024_v30  ;;  %v2900_v52 = vadd.f32 %v2899_v50, %v2898_v44  ;;  %v2963_v53 = vpop.f32.mrb[47].mxu1 }
 0x1d0   : > { %v2964_v54 = vadd.f32 %v2963_v53, %v2962_v47 }
 0x1d1   : > { %v2120_v16 = vadd.f32 %v2900_v52, %v4027_v32  ;;  %v4073_v55 = vadd.f32 %v2961_v45, %v2117_v14 }
 0x1d3   : > { %v2901_v56 = vpop.f32.mrb[48].mxu0  ;;  %v4075_v57 = vadd.f32 %v2964_v54, %v2120_v16 }
 0x1d4   : > { %v2965_v58 = vpop.f32.mrb[48].mxu1  ;;  %v2902_v59 = vpop.f32.mrb[49].mxu0 }
 0x1d5   : > { %v2903_v60 = vadd.f32 %v2902_v59, %v2901_v56  ;;  %v2966_v34 = vpop.f32.mrb[49].mxu1  ;;  %v2904_v1 = vpop.f32.mrb[50].mxu0 }
 0x1d6   : > { %v2967_v2 = vadd.f32 %v2966_v34, %v2965_v58  ;;  %v2968_v4 = vpop.f32.mrb[50].mxu1  ;;  %v2905_v6 = vpop.f32.mrb[51].mxu0 }
 0x1d7   : > { %v2125_v30 = vadd.f32 %v2903_v60, %v4030_v49  ;;  %v2906_v7 = vadd.f32 %v2905_v6, %v2904_v1  ;;  %v2969_v8 = vpop.f32.mrb[51].mxu1 }
 0x1d8   : > { %v2970_v9 = vadd.f32 %v2969_v8, %v2968_v4 }
 0x1d9   : > { %v2128_v32 = vadd.f32 %v2906_v7, %v4033_v51  ;;  %v2222_v10 = vadd.f32 %v2967_v2, %v2125_v30 }
 0x1db   : > { %v2907_v46 = vpop.f32.mrb[52].mxu0  ;;  %v4079_v11 = vadd.f32 %v2970_v9, %v2128_v32 }
 0x1dc   : > { %v2971_v12 = vpop.f32.mrb[52].mxu1  ;;  %v2908_v13 = vpop.f32.mrb[53].mxu0 }
 0x1dd   : > { %v2909_v48 = vadd.f32 %v2908_v13, %v2907_v46  ;;  %v2972_v17 = vpop.f32.mrb[53].mxu1  ;;  %v2910_v19 = vpop.f32.mrb[54].mxu0 }
 0x1de   : > { %v2973_v20 = vadd.f32 %v2972_v17, %v2971_v12  ;;  %v2974_v22 = vpop.f32.mrb[54].mxu1  ;;  %v2911_v24 = vpop.f32.mrb[55].mxu0 }
 0x1df   : > { %v2133_v25 = vadd.f32 %v2909_v48, %v4036_v3  ;;  %v2912_v49 = vadd.f32 %v2911_v24, %v2910_v19  ;;  %v2975_v26 = vpop.f32.mrb[55].mxu1 }
 0x1e0   : > { %v2976_v27 = vadd.f32 %v2975_v26, %v2974_v22 }
 0x1e1   : > { %v2136_v28 = vadd.f32 %v2912_v49, %v4039_v5  ;;  %v2230_v51 = vadd.f32 %v2973_v20, %v2133_v25 }
 0x1e3   : > { %v2913_v62 = vpop.f32.mrb[56].mxu0  ;;  %v2233_v29 = vadd.f32 %v2976_v27, %v2136_v28 }
 0x1e4   : > { %v2977_v31 = vpop.f32.mrb[56].mxu1  ;;  %v2914_v33 = vpop.f32.mrb[57].mxu0 }
 0x1e5   : > { %v2915_v0 = vadd.f32 %v2914_v33, %v2913_v62  ;;  %v2978_v36 = vpop.f32.mrb[57].mxu1  ;;  %v2916_v38 = vpop.f32.mrb[58].mxu0 }
 0x1e6   : > { %v2979_v39 = vadd.f32 %v2978_v36, %v2977_v31  ;;  %v2980_v41 = vpop.f32.mrb[58].mxu1  ;;  %v2917_v43 = vpop.f32.mrb[59].mxu0 }
 0x1e7   : > { %v2141_v44 = vadd.f32 %v2915_v0, %v4042_v21  ;;  %v2918_v45 = vadd.f32 %v2917_v43, %v2916_v38  ;;  %v2981_v3 = vpop.f32.mrb[59].mxu1 }
 0x1e8   : > { %v2982_v47 = vadd.f32 %v2981_v3, %v2980_v41 }
 0x1e9   : > { %v2144_v50 = vadd.f32 %v2918_v45, %v4045_v23  ;;  %v2238_v14 = vadd.f32 %v2979_v39, %v2141_v44 }
 0x1eb   : > { %v2919_v5 = vpop.f32.mrb[60].mxu0  ;;  %v2241_v52 = vadd.f32 %v2982_v47, %v2144_v50 }
 0x1ec   : > { %v2983_v53 = vpop.f32.mrb[60].mxu1  ;;  %v2920_v54 = vpop.f32.mrb[61].mxu0 }
 0x1ed   : > { %v2921_v16 = vadd.f32 %v2920_v54, %v2919_v5  ;;  %v2984_v56 = vpop.f32.mrb[61].mxu1  ;;  %v2922_v58 = vpop.f32.mrb[62].mxu0 }
 0x1ee   : > { %v2985_v59 = vadd.f32 %v2984_v56, %v2983_v53  ;;  %v2986_v60 = vpop.f32.mrb[62].mxu1  ;;  %v2923_v34 = vpop.f32.mrb[63].mxu0 }
 0x1ef   : > { %v2149_v1 = vadd.f32 %v2921_v16, %v4048_v40  ;;  %v2924_v2 = vadd.f32 %v2923_v34, %v2922_v58  ;;  %v2987_v21 = vpop.f32.mrb[63].mxu1 }
 0x1f0   : > { %v2988_v4 = vadd.f32 %v2987_v21, %v2986_v60 }
 0x1f1   : > { %v2152_v6 = vadd.f32 %v2924_v2, %v4051_v42  ;;  %v2246_v30 = vadd.f32 %v2985_v59, %v2149_v1 }
 0x1f3   : > { %v3023_v23 = vpop.f32.mrb[64].mxu0  ;;  %v2249_v7 = vadd.f32 %v2988_v4, %v2152_v6 }
 0x1f4   : > { %v2295_v8 = vadd.f32 %v3023_v23, %v4061_v15  ;;  %v3031_v9 = vpop.f32.mrb[64].mxu1  ;;  %v2286_v32 = vpop.f32.mrb[65].mxu0 }
 0x1f5   : > { %v2327_v46 = vadd.f32 %v3031_v9, %v2230_v51  ;;  %v2287_v12 = vadd.f32 %v2286_v32, %v4055_v61  ;;  %v2318_v13 = vpop.f32.mrb[65].mxu1  ;;  %v3024_v48 = vpop.f32.mrb[66].mxu0 }
 0x1f6   : > { %3271 = vtanh.f32 %v2295_v8  ;;  %v2319_v40 = vadd.f32 %v2318_v13, %v2222_v10  ;;  %v2298_v17 = vadd.f32 %v3024_v48, %v4063_v18  ;;  %v3032_v19 = vpop.f32.mrb[66].mxu1  ;;  %v2289_v20 = vpop.f32.mrb[67].mxu0 }
 0x1f7   : > { %3273 = vtanh.f32 %v2327_v46  ;;  %v2330_v42 = vadd.f32 %v3032_v19, %v2233_v29  ;;  %v2290_v22 = vadd.f32 %v2289_v20, %v4057_v63  ;;  %v2321_v24 = vpop.f32.mrb[67].mxu1 }
 0x1f8   : > { %3275 = vtanh.f32 %v2287_v12  ;;  %v2322_v15 = vadd.f32 %v2321_v24, %v4079_v11 }
 0x1f9   : > { %3277 = vtanh.f32 %v2319_v40 }
 0x1fa   : > { %3279 = vtanh.f32 %v2298_v17 }
 0x1fb   : > { %3281 = vtanh.f32 %v2330_v42  ;;  %v3027_v61 = vpop.f32.mrb[68].mxu0 }
 0x1fc   : > { %3283 = vtanh.f32 %v2290_v22  ;;  %v2311_v10 = vadd.f32 %v3027_v61, %v4073_v55  ;;  %v3035_v18 = vpop.f32.mrb[68].mxu1  ;;  %v2302_v25 = vpop.f32.mrb[69].mxu0 }
 0x1fd   : > { %3285 = vtanh.f32 %v2322_v15  ;;  %v2343_v49 = vadd.f32 %v3035_v18, %v2246_v30  ;;  %v2303_v26 = vadd.f32 %v2302_v25, %v4067_v35  ;;  %v2334_v63 = vpop.f32.mrb[69].mxu1  ;;  %v3028_v27 = vpop.f32.mrb[70].mxu0 }
 0x1fe   : > { %3287 = vtanh.f32 %v2311_v10  ;;  %v2335_v28 = vadd.f32 %v2334_v63, %v2238_v14  ;;  %v2314_v11 = vadd.f32 %v3028_v27, %v4075_v57  ;;  %v3036_v51 = vpop.f32.mrb[70].mxu1  ;;  %v2305_v62 = vpop.f32.mrb[71].mxu0 }
 0x1ff   : > { %3289 = vtanh.f32 %v2343_v49  ;;  %v2346_v29 = vadd.f32 %v3036_v51, %v2249_v7  ;;  %v2306_v31 = vadd.f32 %v2305_v62, %v4069_v37  ;;  %v2337_v33 = vpop.f32.mrb[71].mxu1 }
 0x200   : > { %v3272_v55 = vpop.eup %3271  ;;  %3291 = vtanh.f32 %v2303_v26  ;;  %v2338_v0 = vadd.f32 %v2337_v33, %v2241_v52 }
 0x201   : > { %v3274_v36 = vpop.eup %3273  ;;  %2367 = vst [vmem:[%s4098_s12 + $0x10] sm:$0xff] %v3272_v55  ;;  %3293 = vtanh.f32 %v2335_v28 }
 0x202   : > { %v3276_v35 = vpop.eup %3275  ;;  %2375 = vst [vmem:[%s4098_s12 + $0x50] sm:$0xff] %v3274_v36  ;;  %3295 = vtanh.f32 %v2314_v11 }
 0x203   : > { %v3278_v37 = vpop.eup %3277  ;;  %2365 = vst [vmem:[%s4098_s12] sm:$0xff] %v3276_v35  ;;  %3297 = vtanh.f32 %v2346_v29 }
 0x204   : > { %v3280_v57 = vpop.eup %3279  ;;  %2373 = vst [vmem:[%s4098_s12 + $0x40] sm:$0xff] %v3278_v37  ;;  %3299 = vtanh.f32 %v2306_v31 }
 0x205   : > { %v3282_v38 = vpop.eup %3281  ;;  %2368 = vst [vmem:[%s4098_s12 + $0x18] sm:$0xff] %v3280_v57  ;;  %3301 = vtanh.f32 %v2338_v0 }
 0x206   : > { %v3284_v39 = vpop.eup %3283  ;;  %2376 = vst [vmem:[%s4098_s12 + $0x58] sm:$0xff] %v3282_v38 }
 0x207   : > { %v3286_v41 = vpop.eup %3285  ;;  %2366 = vst [vmem:[%s4098_s12 + $0x8] sm:$0xff] %v3284_v39 }
 0x208   : > { %v3288_v43 = vpop.eup %3287  ;;  %2374 = vst [vmem:[%s4098_s12 + $0x48] sm:$0xff] %v3286_v41  ;;  %v2454_v54 = vld [vmem:[%s4098_s12 + $0x10] sm:$0xff] (%p3398_p6) }
 0x209   : > { %v3290_v44 = vpop.eup %3289  ;;  %2371 = vst [vmem:[%s4098_s12 + $0x30] sm:$0xff] %v3288_v43  ;;  %2455 = vst [vmem:[%s2392_s26 + $0x40] sm:$0xff] (%p3398_p6), %v2454_v54  ;;  %v2470_v2 = vld [vmem:[%s4098_s12 + $0x50] sm:$0xff] (%p3398_p6) }
 0x20a   : > { %v3292_v45 = vpop.eup %3291  ;;  %2379 = vst [vmem:[%s4098_s12 + $0x70] sm:$0xff] %v3290_v44  ;;  %2387 = sbr.rel (!%p3398_p6) target bundleno = 537 (0x219), region = 77  ;;  %v2450_v52 = vld [vmem:[%s4098_s12] sm:$0xff] (%p3398_p6)  ;;  %2471 = vst [vmem:[%s2392_s26 + $0x140] sm:$0xff] (%p3398_p6), %v2470_v2 }
 0x20b   : > { %v3294_v3 = vpop.eup %3293  ;;  %2369 = vst [vmem:[%s4098_s12 + $0x20] sm:$0xff] %v3292_v45  ;;  %2451 = vst [vmem:[%s2392_s26] sm:$0xff] (%p3398_p6), %v2450_v52  ;;  %v2466_v34 = vld [vmem:[%s4098_s12 + $0x40] sm:$0xff] (%p3398_p6) }
 0x20c   : > { %v3296_v47 = vpop.eup %3295  ;;  %2377 = vst [vmem:[%s4098_s12 + $0x60] sm:$0xff] %v3294_v3  ;;  %v2456_v16 = vld [vmem:[%s4098_s12 + $0x18] sm:$0xff] (%p3398_p6)  ;;  %2467 = vst [vmem:[%s2392_s26 + $0x100] sm:$0xff] (%p3398_p6), %v2466_v34 }
 0x20d   : > { %v3298_v50 = vpop.eup %3297  ;;  %2372 = vst [vmem:[%s4098_s12 + $0x38] sm:$0xff] %v3296_v47  ;;  %2457 = vst [vmem:[%s2392_s26 + $0x60] sm:$0xff] (%p3398_p6), %v2456_v16  ;;  %v2472_v21 = vld [vmem:[%s4098_s12 + $0x58] sm:$0xff] (%p3398_p6) }
 0x20e   : > { %v3300_v14 = vpop.eup %3299  ;;  %2380 = vst [vmem:[%s4098_s12 + $0x78] sm:$0xff] %v3298_v50  ;;  %v2452_v53 = vld [vmem:[%s4098_s12 + $0x8] sm:$0xff] (%p3398_p6)  ;;  %2473 = vst [vmem:[%s2392_s26 + $0x160] sm:$0xff] (%p3398_p6), %v2472_v21 }
 0x20f   : > { %v3302_v5 = vpop.eup %3301  ;;  %2370 = vst [vmem:[%s4098_s12 + $0x28] sm:$0xff] %v3300_v14  ;;  %2453 = vst [vmem:[%s2392_s26 + $0x20] sm:$0xff] (%p3398_p6), %v2452_v53  ;;  %v2468_v1 = vld [vmem:[%s4098_s12 + $0x48] sm:$0xff] (%p3398_p6) }
 0x210   : > { %2378 = vst [vmem:[%s4098_s12 + $0x68] sm:$0xff] %v3302_v5  ;;  %v2462_v59 = vld [vmem:[%s4098_s12 + $0x30] sm:$0xff] (%p3398_p6)  ;;  %2469 = vst [vmem:[%s2392_s26 + $0x120] sm:$0xff] (%p3398_p6), %v2468_v1 }
 0x211   : > { %2463 = vst [vmem:[%s2392_s26 + $0xc0] sm:$0xff] %v2462_v59  ;;  %v2478_v30 = vld [vmem:[%s4098_s12 + $0x70] sm:$0xff] }
 0x212   : > { %v2458_v56 = vld [vmem:[%s4098_s12 + $0x20] sm:$0xff]  ;;  %2479 = vst [vmem:[%s2392_s26 + $0x1c0] sm:$0xff] %v2478_v30 }
 0x213   : > { %2459 = vst [vmem:[%s2392_s26 + $0x80] sm:$0xff] %v2458_v56  ;;  %v2474_v4 = vld [vmem:[%s4098_s12 + $0x60] sm:$0xff] }
 0x214   : > { %v2464_v60 = vld [vmem:[%s4098_s12 + $0x38] sm:$0xff]  ;;  %2475 = vst [vmem:[%s2392_s26 + $0x180] sm:$0xff] %v2474_v4 }
 0x215   : > { %2465 = vst [vmem:[%s2392_s26 + $0xe0] sm:$0xff] %v2464_v60  ;;  %v2480_v23 = vld [vmem:[%s4098_s12 + $0x78] sm:$0xff] }
 0x216   : > { %v2460_v58 = vld [vmem:[%s4098_s12 + $0x28] sm:$0xff]  ;;  %2481 = vst [vmem:[%s2392_s26 + $0x1e0] sm:$0xff] %v2480_v23 }
 0x217   : > { %2461 = vst [vmem:[%s2392_s26 + $0xa0] sm:$0xff] %v2460_v58  ;;  %v2476_v6 = vld [vmem:[%s4098_s12 + $0x68] sm:$0xff] }
 0x218   : > { %2477 = vst [vmem:[%s2392_s26 + $0x1a0] sm:$0xff] %v2476_v6 }
 0x219 PF: > { %s13_s16 = sadd.s32 1, %s3341_s16   ;;  %s4158_s12 = smov %s3329_s13 }
 0x21a   : > { %p10_p12 = scmp.ge.s32.totalorder %s13_s16, 6   ;;  %s4159_s13 = smov %s3403_s22 }
 0x21b   : > { %s4160_s14 = smov %s3337_s15  ;;  %s4161_s15 = smov %s4163_s17 }
 0x21c   :  { %12 = sbr.rel (!%p10_p12) target bundleno = 3 (0x3), region = 152 }

</bundles_post_ra>
